<compile_context>
chip_gen: v7x
topology: tpu7x:2x2x1
jax: 0.10.0
libtpu: 0.0.40
codegen_flags: <defaults>
</compile_context>

<pallas_src>
import functools
import math

import jax
import jax.numpy as jnp
from jax import lax
from jax.experimental import pallas as pl
from jax.experimental.pallas import tpu as pltpu

context_len = 256
dropout = 0.2          # eval mode -> identity
n_embed = 64
n_heads = 8
head_size = n_embed // n_heads  # 8


def _mha_kernel(x_ref, wqkv_ref, bp_ref, o_ref, qkv_ref, *,
                num_heads, hs, compute_dtype):
    Bb, T, C = x_ref.shape
    cols = 2 * C + num_heads * C

    # One packed, lane-dense projection matmul for the whole block:
    #   columns [0:C)        -> Q heads (pre-scaled by 1/sqrt(n_embed))
    #   columns [C:2C)       -> K heads
    #   columns [2C:2C+H*C)  -> V' heads (output projection pre-folded)
    x2d = x_ref[...].reshape(Bb * T, C).astype(compute_dtype)
    qkv = jnp.dot(x2d, wqkv_ref[...], preferred_element_type=jnp.float32)
    qkv_ref[...] = qkv.reshape(Bb, T, cols).astype(compute_dtype)

    # Additive causal mask, hoisted out of the loops (one iota/select per step).
    row = lax.broadcasted_iota(jnp.int32, (T, T), 0)
    col = lax.broadcasted_iota(jnp.int32, (T, T), 1)
    mask_bias = jnp.where(row >= col, 0.0, -jnp.inf).astype(jnp.float32)

    bias = bp_ref[...].astype(jnp.float32)          # (1, C)

    @pl.loop(0, Bb)
    def _(b):                                       # one batch row live at a time
        acc = jnp.zeros((T, C), jnp.float32)        # lane-dense f32 accumulator
        for h in range(num_heads):                  # static unroll (8 heads)
            lo = h * hs
            q = qkv_ref[b, :, lo:lo + hs]                              # (T, hs)
            k = qkv_ref[b, :, C + lo:C + lo + hs]                      # (T, hs)
            vp = qkv_ref[b, :, 2 * C + h * C:2 * C + (h + 1) * C]      # (T, C)

            # Scores: contract over the head dim (scale already folded into Q).
            s = lax.dot_general(q, k, (((1,), (1,)), ((), ())),
                                preferred_element_type=jnp.float32)    # (T, T)
            s = s + mask_bias

            # Numerically stable softmax kept in f32 (no bf16 VPU/EUP on v5e).
            s = s - jnp.max(s, axis=-1, keepdims=True)
            p = jnp.exp(s)
            inv_l = pl.reciprocal(jnp.sum(p, axis=-1, keepdims=True), approx=True)
            # TODO(synk): training-mode dropout on attention weights omitted (eval).

            pv = jnp.dot(p.astype(compute_dtype), vp,
                         preferred_element_type=jnp.float32)           # (T, C)
            # Normalize the (T,C) PV result instead of the (T,T) probabilities.
            acc = acc + pv * inv_l

        # TODO(synk): training-mode dropout on the projected output omitted (eval).
        o_ref[b] = (acc + bias).astype(o_ref.dtype)


def _num_tensorcores_per_chip():
    """Best effort: how many TensorCores a 'parallel' grid axis shards over."""
    try:
        kind = jax.devices()[0].device_kind.lower()
    except Exception:
        return 1
    if "v5 lite" in kind or "v5e" in kind or "v6" in kind or "v2" in kind or "v3" in kind:
        return 1
    if "v7" in kind or "v4" in kind or "v5p" in kind or "v5" in kind:
        return 2   # v7x: 2 TCs / chip; v4 / v5p: megacore
    return 1


def _pick_block_b(B, n_cores):
    # Candidate batch-block sizes (largest first); cap at 8 so the per-step
    # VMEM footprint (x/out blocks + qkv scratch) stays small everywhere.
    cands = [bb for bb in (8, 4, 2, 1) if bb <= B and B % bb == 0]
    if n_cores > 1:
        # Dual-TC chips (v7x): keep the grid a multiple of the core count with
        # >= 2 pipelined steps per core so the x-block DMA overlaps compute.
        for bb in cands:
            g = B // bb
            if g % n_cores == 0 and g >= 2 * n_cores:
                return bb
        for bb in cands:
            if (B // bb) % n_cores == 0:
                return bb
        return 1
    # Single-TC chips (v5e/v6e): fewer, fatter steps (~0.35us fixed cost each);
    # only split once B is large enough that DMA hiding matters.
    if B <= 8:
        return B
    for bb in cands:
        if (B // bb) >= 3:
            return bb
    return 1


def multi_head_attention(x, wq, wk, wv, wp_t, bp, *, block_b=None,
                         compute_dtype=jnp.bfloat16):
    """x: (B,T,C); wq/wk/wv: (H,C,hs); wp_t: (C,C) (= proj.weight.T); bp: (1,C)."""
    B, T, C = x.shape
    H, _, hs = wq.shape
    # NOTE: the PyTorch module scales scores by 1/sqrt(n_embed) (C**0.5 with
    # C = x.shape[-1] = n_embed), NOT 1/sqrt(head_size).  Kept intentionally.
    scale = 1.0 / math.sqrt(C)

    def pack(w):                       # (H, C, hs) -> (C, H*hs)
        return jnp.transpose(w, (1, 0, 2)).reshape(C, H * hs)

    # Fold the output projection into the V weights (fused in f32, cast once):
    #   Wv'_h = Wv_h @ Wp[h*hs:(h+1)*hs, :]  -> (C, C) per head.
    wv_fused = jnp.einsum("hcd,hdj->hcj", wv.astype(jnp.float32),
                          wp_t.astype(jnp.float32).reshape(H, hs, C))   # (H, C, C)
    wv_packed = jnp.transpose(wv_fused, (1, 0, 2)).reshape(C, H * C)    # (C, H*C)

    # Packed [Q*scale | K | V'] matrix, lane-dense (C, 2C + H*C); cast once.
    wqkv = jnp.concatenate([pack(wq) * scale, pack(wk), wv_packed], axis=-1)
    wqkv = wqkv.astype(compute_dtype)
    cols = 2 * C + H * C

    if block_b is None:
        block_b = _pick_block_b(B, _num_tensorcores_per_chip())
    assert B % block_b == 0
    grid = (B // block_b,)

    flops = 2 * B * T * C * cols + 2 * B * H * (T * T * hs + T * T * C)
    bytes_accessed = (2 * B * T * C * x.dtype.itemsize
                      + C * cols * jnp.dtype(compute_dtype).itemsize
                      + bp.size * 4)
    cost = pl.CostEstimate(flops=flops, transcendentals=B * H * T * T,
                           bytes_accessed=bytes_accessed)

    kernel = functools.partial(_mha_kernel, num_heads=H, hs=hs,
                               compute_dtype=compute_dtype)

    return pl.pallas_call(
        kernel,
        out_shape=jax.ShapeDtypeStruct((B, T, C), x.dtype),
        grid_spec=pltpu.PrefetchScalarGridSpec(
            num_scalar_prefetch=0,
            grid=grid,
            in_specs=[
                pl.BlockSpec((block_b, T, C), lambda b: (b, 0, 0)),
                pl.BlockSpec((C, cols), lambda b: (0, 0)),
                pl.BlockSpec((1, C), lambda b: (0, 0)),
            ],
            out_specs=pl.BlockSpec((block_b, T, C), lambda b: (b, 0, 0)),
            scratch_shapes=[pltpu.VMEM((block_b, T, cols), compute_dtype)],
        ),
        compiler_params=pltpu.CompilerParams(
            dimension_semantics=("parallel",),
            # <= 32 MiB: fits v7x's 64 MiB physical VMEM with headroom; the
            # per-step footprint here is only a few MiB.
            vmem_limit_bytes=32 * 1024 * 1024,
        ),
        cost_estimate=cost,
    )(x, wqkv, bp)


def reference_mha(x, wq, wk, wv, wp_t, bp):
    """Pure-JAX reference mirroring the PyTorch forward (eval mode)."""
    B, T, C = x.shape
    scale = 1.0 / math.sqrt(C)
    mask = jnp.tril(jnp.ones((T, T), dtype=bool))
    outs = []
    for h in range(wq.shape[0]):
        q = x @ wq[h]
        k = x @ wk[h]
        v = x @ wv[h]
        s = (q @ jnp.swapaxes(k, -1, -2)) * scale
        s = jnp.where(mask[None], s, -jnp.inf)
        p = jax.nn.softmax(s, axis=-1)
        outs.append(p @ v)
    cat = jnp.concatenate(outs, axis=-1)
    return cat @ wp_t + bp[0]


if __name__ == "__main__":
    B, T = 4, 128
    key = jax.random.PRNGKey(0)
    kx, kq, kk, kv, kp, kb = jax.random.split(key, 6)

    # Deterministic synthetic parameters (PyTorch Linear-style init, pre-transposed).
    wstd = 1.0 / math.sqrt(n_embed)
    x = jax.random.normal(kx, (B, T, n_embed), dtype=jnp.float32)
    wq = jax.random.uniform(kq, (n_heads, n_embed, head_size), jnp.float32, -wstd, wstd)
    wk = jax.random.uniform(kk, (n_heads, n_embed, head_size), jnp.float32, -wstd, wstd)
    wv = jax.random.uniform(kv, (n_heads, n_embed, head_size), jnp.float32, -wstd, wstd)
    wp_t = jax.random.uniform(kp, (n_embed, n_embed), jnp.float32, -wstd, wstd)
    bp = jax.random.uniform(kb, (1, n_embed), jnp.float32, -wstd, wstd)

    ref = reference_mha(x, wq, wk, wv, wp_t, bp)

    # Default bf16-MXU-input path (recommended on v5e/v6e/v7x; f32 accumulate).
    out_bf16 = jax.block_until_ready(multi_head_attention(x, wq, wk, wv, wp_t, bp))
    assert out_bf16.shape == (B, T, n_embed)
    assert jnp.allclose(out_bf16, ref, atol=5e-2, rtol=5e-2), "bf16 mismatch vs JAX reference"

    # f32 MXU-input path -- tighter tolerance (approx reciprocal in softmax).
    out_f32 = jax.block_until_ready(
        multi_head_attention(x, wq, wk, wv, wp_t, bp, compute_dtype=jnp.float32))
    assert jnp.allclose(out_f32, ref, atol=1e-2, rtol=1e-2), "f32 mismatch vs JAX reference"

    print("KERNEL_OK")
</pallas_src>

<mosaic_0001>
module attributes {stable_mosaic.version = 11 : i64} {
  func.func @_mha_kernel(%arg0: i32, %arg1: memref<4x128x64xf32, #tpu.memory_space<vmem>>, %arg2: memref<64x640xbf16, #tpu.memory_space<vmem>>, %arg3: memref<1x64xf32, #tpu.memory_space<vmem>>, %arg4: memref<4x128x64xf32, #tpu.memory_space<vmem>>, %arg5: memref<4x128x640xbf16, #tpu.memory_space<vmem>>) attributes {dimension_semantics = [#tpu.dimension_semantics<parallel>], iteration_bounds = array<i64: 1>, scalar_prefetch = 0 : i64, scratch_operands = 1 : i64, tpu.core_type = #tpu.core_type<tc>, window_params = [{transform_indices = @transform_0, window_bounds = array<i64: 4, 128, 64>}, {pipeline_mode = #tpu.pipeline_mode<synchronous>, transform_indices = @transform_1, window_bounds = array<i64: 64, 640>}, {pipeline_mode = #tpu.pipeline_mode<synchronous>, transform_indices = @transform_2, window_bounds = array<i64: 1, 64>}, {transform_indices = @transform_3, window_bounds = array<i64: 4, 128, 64>}]} {
    %c0 = arith.constant 0 : index
    %c0_0 = arith.constant 0 : index
    %c0_1 = arith.constant 0 : index
    %0 = vector.load %arg1[%c0, %c0_0, %c0_1] : memref<4x128x64xf32, #tpu.memory_space<vmem>>, vector<4x128x64xf32>
    %1 = vector.shape_cast %0 : vector<4x128x64xf32> to vector<512x64xf32>
    %2 = arith.truncf %1 : vector<512x64xf32> to vector<512x64xbf16>
    %c0_2 = arith.constant 0 : index
    %c0_3 = arith.constant 0 : index
    %3 = vector.load %arg2[%c0_2, %c0_3] : memref<64x640xbf16, #tpu.memory_space<vmem>>, vector<64x640xbf16>
    %cst = arith.constant dense<0.000000e+00> : vector<512x640xf32>
    %4 = tpu.matmul %2, %3, %cst {dimension_numbers = #tpu.dot_dimension_numbers<[1], [0], [0], [1], [0, 0, 1, 1], [], []>} : vector<512x64xbf16>, vector<64x640xbf16>, vector<512x640xf32> -> vector<512x640xf32>
    %5 = vector.shape_cast %4 : vector<512x640xf32> to vector<4x128x640xf32>
    %6 = arith.truncf %5 : vector<4x128x640xf32> to vector<4x128x640xbf16>
    %c0_4 = arith.constant 0 : index
    %c0_5 = arith.constant 0 : index
    %c0_6 = arith.constant 0 : index
    %7 = vector.load %arg5[%c0_4, %c0_5, %c0_6] : memref<4x128x640xbf16, #tpu.memory_space<vmem>>, vector<4x128x640xbf16>
    tpu.vector_store %arg5[%c0_4, %c0_5, %c0_6], %6 {strides = array<i32>} : memref<4x128x640xbf16, #tpu.memory_space<vmem>>, vector<4x128x640xbf16>,
    %8 = tpu.iota {dimensions = array<i32: 0>} : vector<128x128xi32>
    %9 = tpu.iota {dimensions = array<i32: 1>} : vector<128x128xi32>
    %10 = arith.cmpi sge, %8, %9 : vector<128x128xi32>
    %cst_7 = arith.constant 0.000000e+00 : f32
    %cst_8 = arith.constant 0xFF800000 : f32
    %11 = vector.broadcast %cst_7 : f32 to vector<128x128xf32>
    %12 = vector.broadcast %cst_8 : f32 to vector<128x128xf32>
    %13 = arith.select %10, %11, %12 : vector<128x128xi1>, vector<128x128xf32>
    %c0_9 = arith.constant 0 : index
    %c0_10 = arith.constant 0 : index
    %14 = vector.load %arg3[%c0_9, %c0_10] : memref<1x64xf32, #tpu.memory_space<vmem>>, vector<1x64xf32>
    %c0_i32 = arith.constant 0 : i32
    %c4_i32 = arith.constant 4 : i32
    %15 = arith.addi %c0_i32, %c4_i32 : i32
    %c1_i32 = arith.constant 1 : i32
    scf.for %arg6 = %c0_i32 to %15 step %c1_i32  : i32 {
      %c1_i32_12 = arith.constant 1 : i32
      %16 = arith.muli %arg6, %c1_i32_12 : i32
      %c0_i32_13 = arith.constant 0 : i32
      %17 = arith.addi %c0_i32_13, %16 : i32
      %cst_14 = arith.constant 0.000000e+00 : f32
      %18 = vector.broadcast %cst_14 : f32 to vector<128x64xf32>
      %19 = arith.index_cast %17 : i32 to index
      %c0_15 = arith.constant 0 : index
      %c0_16 = arith.constant 0 : index
      %20 = vector.load %arg5[%19, %c0_15, %c0_16] : memref<4x128x640xbf16, #tpu.memory_space<vmem>>, vector<1x128x8xbf16>
      %21 = vector.shape_cast %20 : vector<1x128x8xbf16> to vector<128x8xbf16>
      %22 = arith.index_cast %17 : i32 to index
      %c0_17 = arith.constant 0 : index
      %c64 = arith.constant 64 : index
      %23 = vector.load %arg5[%22, %c0_17, %c64] : memref<4x128x640xbf16, #tpu.memory_space<vmem>>, vector<1x128x8xbf16>
      %24 = vector.shape_cast %23 : vector<1x128x8xbf16> to vector<128x8xbf16>
      %25 = arith.index_cast %17 : i32 to index
      %c0_18 = arith.constant 0 : index
      %c128 = arith.constant 128 : index
      %26 = vector.load %arg5[%25, %c0_18, %c128] : memref<4x128x640xbf16, #tpu.memory_space<vmem>>, vector<1x128x64xbf16>
      %27 = vector.shape_cast %26 : vector<1x128x64xbf16> to vector<128x64xbf16>
      %cst_19 = arith.constant dense<0.000000e+00> : vector<128x128xf32>
      %28 = tpu.matmul %21, %24, %cst_19 {dimension_numbers = #tpu.dot_dimension_numbers<[1], [1], [0], [0], [0, 0, 1, 0], [], []>} : vector<128x8xbf16>, vector<128x8xbf16>, vector<128x128xf32> -> vector<128x128xf32>
      %29 = arith.addf %28, %13 : vector<128x128xf32>
      %cst_20 = arith.constant dense<0xFF800000> : vector<128xf32>
      %30 = vector.multi_reduction <maximumf>, %29, %cst_20 [1] : vector<128x128xf32> to vector<128xf32>
      %31 = vector.shape_cast %30 : vector<128xf32> to vector<128x1xf32>
      %32 = vector.broadcast %31 : vector<128x1xf32> to vector<128x128xf32>
      %33 = arith.subf %29, %32 : vector<128x128xf32>
      %34 = math.exp %33 : vector<128x128xf32>
      %cst_21 = arith.constant dense<0.000000e+00> : vector<128xf32>
      %35 = vector.multi_reduction <add>, %34, %cst_21 [1] : vector<128x128xf32> to vector<128xf32>
      %36 = vector.shape_cast %35 : vector<128xf32> to vector<128x1xf32>
      %37 = tpu.reciprocal %36 {approx = true} : vector<128x1xf32> -> vector<128x1xf32>
      %38 = arith.truncf %34 : vector<128x128xf32> to vector<128x128xbf16>
      %cst_22 = arith.constant dense<0.000000e+00> : vector<128x64xf32>
      %39 = tpu.matmul %38, %27, %cst_22 {dimension_numbers = #tpu.dot_dimension_numbers<[1], [0], [0], [1], [0, 0, 1, 1], [], []>} : vector<128x128xbf16>, vector<128x64xbf16>, vector<128x64xf32> -> vector<128x64xf32>
      %40 = vector.broadcast %37 : vector<128x1xf32> to vector<128x64xf32>
      %41 = arith.mulf %39, %40 : vector<128x64xf32>
      %42 = arith.addf %18, %41 : vector<128x64xf32>
      %43 = arith.index_cast %17 : i32 to index
      %c0_23 = arith.constant 0 : index
      %c8 = arith.constant 8 : index
      %44 = vector.load %arg5[%43, %c0_23, %c8] : memref<4x128x640xbf16, #tpu.memory_space<vmem>>, vector<1x128x8xbf16>
      %45 = vector.shape_cast %44 : vector<1x128x8xbf16> to vector<128x8xbf16>
      %46 = arith.index_cast %17 : i32 to index
      %c0_24 = arith.constant 0 : index
      %c72 = arith.constant 72 : index
      %47 = vector.load %arg5[%46, %c0_24, %c72] : memref<4x128x640xbf16, #tpu.memory_space<vmem>>, vector<1x128x8xbf16>
      %48 = vector.shape_cast %47 : vector<1x128x8xbf16> to vector<128x8xbf16>
      %49 = arith.index_cast %17 : i32 to index
      %c0_25 = arith.constant 0 : index
      %c192 = arith.constant 192 : index
      %50 = vector.load %arg5[%49, %c0_25, %c192] : memref<4x128x640xbf16, #tpu.memory_space<vmem>>, vector<1x128x64xbf16>
      %51 = vector.shape_cast %50 : vector<1x128x64xbf16> to vector<128x64xbf16>
      %cst_26 = arith.constant dense<0.000000e+00> : vector<128x128xf32>
      %52 = tpu.matmul %45, %48, %cst_26 {dimension_numbers = #tpu.dot_dimension_numbers<[1], [1], [0], [0], [0, 0, 1, 0], [], []>} : vector<128x8xbf16>, vector<128x8xbf16>, vector<128x128xf32> -> vector<128x128xf32>
      %53 = arith.addf %52, %13 : vector<128x128xf32>
      %cst_27 = arith.constant dense<0xFF800000> : vector<128xf32>
      %54 = vector.multi_reduction <maximumf>, %53, %cst_27 [1] : vector<128x128xf32> to vector<128xf32>
      %55 = vector.shape_cast %54 : vector<128xf32> to vector<128x1xf32>
      %56 = vector.broadcast %55 : vector<128x1xf32> to vector<128x128xf32>
      %57 = arith.subf %53, %56 : vector<128x128xf32>
      %58 = math.exp %57 : vector<128x128xf32>
      %cst_28 = arith.constant dense<0.000000e+00> : vector<128xf32>
      %59 = vector.multi_reduction <add>, %58, %cst_28 [1] : vector<128x128xf32> to vector<128xf32>
      %60 = vector.shape_cast %59 : vector<128xf32> to vector<128x1xf32>
      %61 = tpu.reciprocal %60 {approx = true} : vector<128x1xf32> -> vector<128x1xf32>
      %62 = arith.truncf %58 : vector<128x128xf32> to vector<128x128xbf16>
      %cst_29 = arith.constant dense<0.000000e+00> : vector<128x64xf32>
      %63 = tpu.matmul %62, %51, %cst_29 {dimension_numbers = #tpu.dot_dimension_numbers<[1], [0], [0], [1], [0, 0, 1, 1], [], []>} : vector<128x128xbf16>, vector<128x64xbf16>, vector<128x64xf32> -> vector<128x64xf32>
      %64 = vector.broadcast %61 : vector<128x1xf32> to vector<128x64xf32>
      %65 = arith.mulf %63, %64 : vector<128x64xf32>
      %66 = arith.addf %42, %65 : vector<128x64xf32>
      %67 = arith.index_cast %17 : i32 to index
      %c0_30 = arith.constant 0 : index
      %c16 = arith.constant 16 : index
      %68 = vector.load %arg5[%67, %c0_30, %c16] : memref<4x128x640xbf16, #tpu.memory_space<vmem>>, vector<1x128x8xbf16>
      %69 = vector.shape_cast %68 : vector<1x128x8xbf16> to vector<128x8xbf16>
      %70 = arith.index_cast %17 : i32 to index
      %c0_31 = arith.constant 0 : index
      %c80 = arith.constant 80 : index
      %71 = vector.load %arg5[%70, %c0_31, %c80] : memref<4x128x640xbf16, #tpu.memory_space<vmem>>, vector<1x128x8xbf16>
      %72 = vector.shape_cast %71 : vector<1x128x8xbf16> to vector<128x8xbf16>
      %73 = arith.index_cast %17 : i32 to index
      %c0_32 = arith.constant 0 : index
      %c256 = arith.constant 256 : index
      %74 = vector.load %arg5[%73, %c0_32, %c256] : memref<4x128x640xbf16, #tpu.memory_space<vmem>>, vector<1x128x64xbf16>
      %75 = vector.shape_cast %74 : vector<1x128x64xbf16> to vector<128x64xbf16>
      %cst_33 = arith.constant dense<0.000000e+00> : vector<128x128xf32>
      %76 = tpu.matmul %69, %72, %cst_33 {dimension_numbers = #tpu.dot_dimension_numbers<[1], [1], [0], [0], [0, 0, 1, 0], [], []>} : vector<128x8xbf16>, vector<128x8xbf16>, vector<128x128xf32> -> vector<128x128xf32>
      %77 = arith.addf %76, %13 : vector<128x128xf32>
      %cst_34 = arith.constant dense<0xFF800000> : vector<128xf32>
      %78 = vector.multi_reduction <maximumf>, %77, %cst_34 [1] : vector<128x128xf32> to vector<128xf32>
      %79 = vector.shape_cast %78 : vector<128xf32> to vector<128x1xf32>
      %80 = vector.broadcast %79 : vector<128x1xf32> to vector<128x128xf32>
      %81 = arith.subf %77, %80 : vector<128x128xf32>
      %82 = math.exp %81 : vector<128x128xf32>
      %cst_35 = arith.constant dense<0.000000e+00> : vector<128xf32>
      %83 = vector.multi_reduction <add>, %82, %cst_35 [1] : vector<128x128xf32> to vector<128xf32>
      %84 = vector.shape_cast %83 : vector<128xf32> to vector<128x1xf32>
      %85 = tpu.reciprocal %84 {approx = true} : vector<128x1xf32> -> vector<128x1xf32>
      %86 = arith.truncf %82 : vector<128x128xf32> to vector<128x128xbf16>
      %cst_36 = arith.constant dense<0.000000e+00> : vector<128x64xf32>
      %87 = tpu.matmul %86, %75, %cst_36 {dimension_numbers = #tpu.dot_dimension_numbers<[1], [0], [0], [1], [0, 0, 1, 1], [], []>} : vector<128x128xbf16>, vector<128x64xbf16>, vector<128x64xf32> -> vector<128x64xf32>
      %88 = vector.broadcast %85 : vector<128x1xf32> to vector<128x64xf32>
      %89 = arith.mulf %87, %88 : vector<128x64xf32>
      %90 = arith.addf %66, %89 : vector<128x64xf32>
      %91 = arith.index_cast %17 : i32 to index
      %c0_37 = arith.constant 0 : index
      %c24 = arith.constant 24 : index
      %92 = vector.load %arg5[%91, %c0_37, %c24] : memref<4x128x640xbf16, #tpu.memory_space<vmem>>, vector<1x128x8xbf16>
      %93 = vector.shape_cast %92 : vector<1x128x8xbf16> to vector<128x8xbf16>
      %94 = arith.index_cast %17 : i32 to index
      %c0_38 = arith.constant 0 : index
      %c88 = arith.constant 88 : index
      %95 = vector.load %arg5[%94, %c0_38, %c88] : memref<4x128x640xbf16, #tpu.memory_space<vmem>>, vector<1x128x8xbf16>
      %96 = vector.shape_cast %95 : vector<1x128x8xbf16> to vector<128x8xbf16>
      %97 = arith.index_cast %17 : i32 to index
      %c0_39 = arith.constant 0 : index
      %c320 = arith.constant 320 : index
      %98 = vector.load %arg5[%97, %c0_39, %c320] : memref<4x128x640xbf16, #tpu.memory_space<vmem>>, vector<1x128x64xbf16>
      %99 = vector.shape_cast %98 : vector<1x128x64xbf16> to vector<128x64xbf16>
      %cst_40 = arith.constant dense<0.000000e+00> : vector<128x128xf32>
      %100 = tpu.matmul %93, %96, %cst_40 {dimension_numbers = #tpu.dot_dimension_numbers<[1], [1], [0], [0], [0, 0, 1, 0], [], []>} : vector<128x8xbf16>, vector<128x8xbf16>, vector<128x128xf32> -> vector<128x128xf32>
      %101 = arith.addf %100, %13 : vector<128x128xf32>
      %cst_41 = arith.constant dense<0xFF800000> : vector<128xf32>
      %102 = vector.multi_reduction <maximumf>, %101, %cst_41 [1] : vector<128x128xf32> to vector<128xf32>
      %103 = vector.shape_cast %102 : vector<128xf32> to vector<128x1xf32>
      %104 = vector.broadcast %103 : vector<128x1xf32> to vector<128x128xf32>
      %105 = arith.subf %101, %104 : vector<128x128xf32>
      %106 = math.exp %105 : vector<128x128xf32>
      %cst_42 = arith.constant dense<0.000000e+00> : vector<128xf32>
      %107 = vector.multi_reduction <add>, %106, %cst_42 [1] : vector<128x128xf32> to vector<128xf32>
      %108 = vector.shape_cast %107 : vector<128xf32> to vector<128x1xf32>
      %109 = tpu.reciprocal %108 {approx = true} : vector<128x1xf32> -> vector<128x1xf32>
      %110 = arith.truncf %106 : vector<128x128xf32> to vector<128x128xbf16>
      %cst_43 = arith.constant dense<0.000000e+00> : vector<128x64xf32>
      %111 = tpu.matmul %110, %99, %cst_43 {dimension_numbers = #tpu.dot_dimension_numbers<[1], [0], [0], [1], [0, 0, 1, 1], [], []>} : vector<128x128xbf16>, vector<128x64xbf16>, vector<128x64xf32> -> vector<128x64xf32>
      %112 = vector.broadcast %109 : vector<128x1xf32> to vector<128x64xf32>
      %113 = arith.mulf %111, %112 : vector<128x64xf32>
      %114 = arith.addf %90, %113 : vector<128x64xf32>
      %115 = arith.index_cast %17 : i32 to index
      %c0_44 = arith.constant 0 : index
      %c32 = arith.constant 32 : index
      %116 = vector.load %arg5[%115, %c0_44, %c32] : memref<4x128x640xbf16, #tpu.memory_space<vmem>>, vector<1x128x8xbf16>
      %117 = vector.shape_cast %116 : vector<1x128x8xbf16> to vector<128x8xbf16>
      %118 = arith.index_cast %17 : i32 to index
      %c0_45 = arith.constant 0 : index
      %c96 = arith.constant 96 : index
      %119 = vector.load %arg5[%118, %c0_45, %c96] : memref<4x128x640xbf16, #tpu.memory_space<vmem>>, vector<1x128x8xbf16>
      %120 = vector.shape_cast %119 : vector<1x128x8xbf16> to vector<128x8xbf16>
      %121 = arith.index_cast %17 : i32 to index
      %c0_46 = arith.constant 0 : index
      %c384 = arith.constant 384 : index
      %122 = vector.load %arg5[%121, %c0_46, %c384] : memref<4x128x640xbf16, #tpu.memory_space<vmem>>, vector<1x128x64xbf16>
      %123 = vector.shape_cast %122 : vector<1x128x64xbf16> to vector<128x64xbf16>
      %cst_47 = arith.constant dense<0.000000e+00> : vector<128x128xf32>
      %124 = tpu.matmul %117, %120, %cst_47 {dimension_numbers = #tpu.dot_dimension_numbers<[1], [1], [0], [0], [0, 0, 1, 0], [], []>} : vector<128x8xbf16>, vector<128x8xbf16>, vector<128x128xf32> -> vector<128x128xf32>
      %125 = arith.addf %124, %13 : vector<128x128xf32>
      %cst_48 = arith.constant dense<0xFF800000> : vector<128xf32>
      %126 = vector.multi_reduction <maximumf>, %125, %cst_48 [1] : vector<128x128xf32> to vector<128xf32>
      %127 = vector.shape_cast %126 : vector<128xf32> to vector<128x1xf32>
      %128 = vector.broadcast %127 : vector<128x1xf32> to vector<128x128xf32>
      %129 = arith.subf %125, %128 : vector<128x128xf32>
      %130 = math.exp %129 : vector<128x128xf32>
      %cst_49 = arith.constant dense<0.000000e+00> : vector<128xf32>
      %131 = vector.multi_reduction <add>, %130, %cst_49 [1] : vector<128x128xf32> to vector<128xf32>
      %132 = vector.shape_cast %131 : vector<128xf32> to vector<128x1xf32>
      %133 = tpu.reciprocal %132 {approx = true} : vector<128x1xf32> -> vector<128x1xf32>
      %134 = arith.truncf %130 : vector<128x128xf32> to vector<128x128xbf16>
      %cst_50 = arith.constant dense<0.000000e+00> : vector<128x64xf32>
      %135 = tpu.matmul %134, %123, %cst_50 {dimension_numbers = #tpu.dot_dimension_numbers<[1], [0], [0], [1], [0, 0, 1, 1], [], []>} : vector<128x128xbf16>, vector<128x64xbf16>, vector<128x64xf32> -> vector<128x64xf32>
      %136 = vector.broadcast %133 : vector<128x1xf32> to vector<128x64xf32>
      %137 = arith.mulf %135, %136 : vector<128x64xf32>
      %138 = arith.addf %114, %137 : vector<128x64xf32>
      %139 = arith.index_cast %17 : i32 to index
      %c0_51 = arith.constant 0 : index
      %c40 = arith.constant 40 : index
      %140 = vector.load %arg5[%139, %c0_51, %c40] : memref<4x128x640xbf16, #tpu.memory_space<vmem>>, vector<1x128x8xbf16>
      %141 = vector.shape_cast %140 : vector<1x128x8xbf16> to vector<128x8xbf16>
      %142 = arith.index_cast %17 : i32 to index
      %c0_52 = arith.constant 0 : index
      %c104 = arith.constant 104 : index
      %143 = vector.load %arg5[%142, %c0_52, %c104] : memref<4x128x640xbf16, #tpu.memory_space<vmem>>, vector<1x128x8xbf16>
      %144 = vector.shape_cast %143 : vector<1x128x8xbf16> to vector<128x8xbf16>
      %145 = arith.index_cast %17 : i32 to index
      %c0_53 = arith.constant 0 : index
      %c448 = arith.constant 448 : index
      %146 = vector.load %arg5[%145, %c0_53, %c448] : memref<4x128x640xbf16, #tpu.memory_space<vmem>>, vector<1x128x64xbf16>
      %147 = vector.shape_cast %146 : vector<1x128x64xbf16> to vector<128x64xbf16>
      %cst_54 = arith.constant dense<0.000000e+00> : vector<128x128xf32>
      %148 = tpu.matmul %141, %144, %cst_54 {dimension_numbers = #tpu.dot_dimension_numbers<[1], [1], [0], [0], [0, 0, 1, 0], [], []>} : vector<128x8xbf16>, vector<128x8xbf16>, vector<128x128xf32> -> vector<128x128xf32>
      %149 = arith.addf %148, %13 : vector<128x128xf32>
      %cst_55 = arith.constant dense<0xFF800000> : vector<128xf32>
      %150 = vector.multi_reduction <maximumf>, %149, %cst_55 [1] : vector<128x128xf32> to vector<128xf32>
      %151 = vector.shape_cast %150 : vector<128xf32> to vector<128x1xf32>
      %152 = vector.broadcast %151 : vector<128x1xf32> to vector<128x128xf32>
      %153 = arith.subf %149, %152 : vector<128x128xf32>
      %154 = math.exp %153 : vector<128x128xf32>
      %cst_56 = arith.constant dense<0.000000e+00> : vector<128xf32>
      %155 = vector.multi_reduction <add>, %154, %cst_56 [1] : vector<128x128xf32> to vector<128xf32>
      %156 = vector.shape_cast %155 : vector<128xf32> to vector<128x1xf32>
      %157 = tpu.reciprocal %156 {approx = true} : vector<128x1xf32> -> vector<128x1xf32>
      %158 = arith.truncf %154 : vector<128x128xf32> to vector<128x128xbf16>
      %cst_57 = arith.constant dense<0.000000e+00> : vector<128x64xf32>
      %159 = tpu.matmul %158, %147, %cst_57 {dimension_numbers = #tpu.dot_dimension_numbers<[1], [0], [0], [1], [0, 0, 1, 1], [], []>} : vector<128x128xbf16>, vector<128x64xbf16>, vector<128x64xf32> -> vector<128x64xf32>
      %160 = vector.broadcast %157 : vector<128x1xf32> to vector<128x64xf32>
      %161 = arith.mulf %159, %160 : vector<128x64xf32>
      %162 = arith.addf %138, %161 : vector<128x64xf32>
      %163 = arith.index_cast %17 : i32 to index
      %c0_58 = arith.constant 0 : index
      %c48 = arith.constant 48 : index
      %164 = vector.load %arg5[%163, %c0_58, %c48] : memref<4x128x640xbf16, #tpu.memory_space<vmem>>, vector<1x128x8xbf16>
      %165 = vector.shape_cast %164 : vector<1x128x8xbf16> to vector<128x8xbf16>
      %166 = arith.index_cast %17 : i32 to index
      %c0_59 = arith.constant 0 : index
      %c112 = arith.constant 112 : index
      %167 = vector.load %arg5[%166, %c0_59, %c112] : memref<4x128x640xbf16, #tpu.memory_space<vmem>>, vector<1x128x8xbf16>
      %168 = vector.shape_cast %167 : vector<1x128x8xbf16> to vector<128x8xbf16>
      %169 = arith.index_cast %17 : i32 to index
      %c0_60 = arith.constant 0 : index
      %c512 = arith.constant 512 : index
      %170 = vector.load %arg5[%169, %c0_60, %c512] : memref<4x128x640xbf16, #tpu.memory_space<vmem>>, vector<1x128x64xbf16>
      %171 = vector.shape_cast %170 : vector<1x128x64xbf16> to vector<128x64xbf16>
      %cst_61 = arith.constant dense<0.000000e+00> : vector<128x128xf32>
      %172 = tpu.matmul %165, %168, %cst_61 {dimension_numbers = #tpu.dot_dimension_numbers<[1], [1], [0], [0], [0, 0, 1, 0], [], []>} : vector<128x8xbf16>, vector<128x8xbf16>, vector<128x128xf32> -> vector<128x128xf32>
      %173 = arith.addf %172, %13 : vector<128x128xf32>
      %cst_62 = arith.constant dense<0xFF800000> : vector<128xf32>
      %174 = vector.multi_reduction <maximumf>, %173, %cst_62 [1] : vector<128x128xf32> to vector<128xf32>
      %175 = vector.shape_cast %174 : vector<128xf32> to vector<128x1xf32>
      %176 = vector.broadcast %175 : vector<128x1xf32> to vector<128x128xf32>
      %177 = arith.subf %173, %176 : vector<128x128xf32>
      %178 = math.exp %177 : vector<128x128xf32>
      %cst_63 = arith.constant dense<0.000000e+00> : vector<128xf32>
      %179 = vector.multi_reduction <add>, %178, %cst_63 [1] : vector<128x128xf32> to vector<128xf32>
      %180 = vector.shape_cast %179 : vector<128xf32> to vector<128x1xf32>
      %181 = tpu.reciprocal %180 {approx = true} : vector<128x1xf32> -> vector<128x1xf32>
      %182 = arith.truncf %178 : vector<128x128xf32> to vector<128x128xbf16>
      %cst_64 = arith.constant dense<0.000000e+00> : vector<128x64xf32>
      %183 = tpu.matmul %182, %171, %cst_64 {dimension_numbers = #tpu.dot_dimension_numbers<[1], [0], [0], [1], [0, 0, 1, 1], [], []>} : vector<128x128xbf16>, vector<128x64xbf16>, vector<128x64xf32> -> vector<128x64xf32>
      %184 = vector.broadcast %181 : vector<128x1xf32> to vector<128x64xf32>
      %185 = arith.mulf %183, %184 : vector<128x64xf32>
      %186 = arith.addf %162, %185 : vector<128x64xf32>
      %187 = arith.index_cast %17 : i32 to index
      %c0_65 = arith.constant 0 : index
      %c56 = arith.constant 56 : index
      %188 = vector.load %arg5[%187, %c0_65, %c56] : memref<4x128x640xbf16, #tpu.memory_space<vmem>>, vector<1x128x8xbf16>
      %189 = vector.shape_cast %188 : vector<1x128x8xbf16> to vector<128x8xbf16>
      %190 = arith.index_cast %17 : i32 to index
      %c0_66 = arith.constant 0 : index
      %c120 = arith.constant 120 : index
      %191 = vector.load %arg5[%190, %c0_66, %c120] : memref<4x128x640xbf16, #tpu.memory_space<vmem>>, vector<1x128x8xbf16>
      %192 = vector.shape_cast %191 : vector<1x128x8xbf16> to vector<128x8xbf16>
      %193 = arith.index_cast %17 : i32 to index
      %c0_67 = arith.constant 0 : index
      %c576 = arith.constant 576 : index
      %194 = vector.load %arg5[%193, %c0_67, %c576] : memref<4x128x640xbf16, #tpu.memory_space<vmem>>, vector<1x128x64xbf16>
      %195 = vector.shape_cast %194 : vector<1x128x64xbf16> to vector<128x64xbf16>
      %cst_68 = arith.constant dense<0.000000e+00> : vector<128x128xf32>
      %196 = tpu.matmul %189, %192, %cst_68 {dimension_numbers = #tpu.dot_dimension_numbers<[1], [1], [0], [0], [0, 0, 1, 0], [], []>} : vector<128x8xbf16>, vector<128x8xbf16>, vector<128x128xf32> -> vector<128x128xf32>
      %197 = arith.addf %196, %13 : vector<128x128xf32>
      %cst_69 = arith.constant dense<0xFF800000> : vector<128xf32>
      %198 = vector.multi_reduction <maximumf>, %197, %cst_69 [1] : vector<128x128xf32> to vector<128xf32>
      %199 = vector.shape_cast %198 : vector<128xf32> to vector<128x1xf32>
      %200 = vector.broadcast %199 : vector<128x1xf32> to vector<128x128xf32>
      %201 = arith.subf %197, %200 : vector<128x128xf32>
      %202 = math.exp %201 : vector<128x128xf32>
      %cst_70 = arith.constant dense<0.000000e+00> : vector<128xf32>
      %203 = vector.multi_reduction <add>, %202, %cst_70 [1] : vector<128x128xf32> to vector<128xf32>
      %204 = vector.shape_cast %203 : vector<128xf32> to vector<128x1xf32>
      %205 = tpu.reciprocal %204 {approx = true} : vector<128x1xf32> -> vector<128x1xf32>
      %206 = arith.truncf %202 : vector<128x128xf32> to vector<128x128xbf16>
      %cst_71 = arith.constant dense<0.000000e+00> : vector<128x64xf32>
      %207 = tpu.matmul %206, %195, %cst_71 {dimension_numbers = #tpu.dot_dimension_numbers<[1], [0], [0], [1], [0, 0, 1, 1], [], []>} : vector<128x128xbf16>, vector<128x64xbf16>, vector<128x64xf32> -> vector<128x64xf32>
      %208 = vector.broadcast %205 : vector<128x1xf32> to vector<128x64xf32>
      %209 = arith.mulf %207, %208 : vector<128x64xf32>
      %210 = arith.addf %186, %209 : vector<128x64xf32>
      %211 = vector.broadcast %14 : vector<1x64xf32> to vector<128x64xf32>
      %212 = arith.addf %210, %211 : vector<128x64xf32>
      %213 = arith.index_cast %17 : i32 to index
      %c0_72 = arith.constant 0 : index
      %c0_73 = arith.constant 0 : index
      %214 = vector.load %arg4[%213, %c0_72, %c0_73] : memref<4x128x64xf32, #tpu.memory_space<vmem>>, vector<1x128x64xf32>
      %215 = vector.shape_cast %214 : vector<1x128x64xf32> to vector<128x64xf32>
      %216 = vector.shape_cast %212 : vector<128x64xf32> to vector<1x128x64xf32>
      tpu.vector_store %arg4[%213, %c0_72, %c0_73], %216 {strides = array<i32>} : memref<4x128x64xf32, #tpu.memory_space<vmem>>, vector<1x128x64xf32>,
    }
    %c4_i32_11 = arith.constant 4 : i32
    return
  }
  func.func @transform_0(%arg0: i32) -> (i32, i32, i32) {
    %c0_i32 = arith.constant 0 : i32
    %c0_i32_0 = arith.constant 0 : i32
    %c0_i32_1 = arith.constant 0 : i32
    return %arg0, %c0_i32, %c0_i32_0 : i32, i32, i32
  }
  func.func @transform_1(%arg0: i32) -> (i32, i32) {
    %c0_i32 = arith.constant 0 : i32
    %c0_i32_0 = arith.constant 0 : i32
    %c0_i32_1 = arith.constant 0 : i32
    return %c0_i32, %c0_i32_0 : i32, i32
  }
  func.func @transform_2(%arg0: i32) -> (i32, i32) {
    %c0_i32 = arith.constant 0 : i32
    %c0_i32_0 = arith.constant 0 : i32
    %c0_i32_1 = arith.constant 0 : i32
    return %c0_i32, %c0_i32_0 : i32, i32
  }
  func.func @transform_3(%arg0: i32) -> (i32, i32, i32) {
    %c0_i32 = arith.constant 0 : i32
    %c0_i32_0 = arith.constant 0 : i32
    %c0_i32_1 = arith.constant 0 : i32
    return %arg0, %c0_i32, %c0_i32_0 : i32, i32, i32
  }
}

</mosaic_0001>

<bundles_post_ra>
// kernel: tpu_custom_call.1
= control target key start
LH: loop header
LB: loop body
LE: loop exit
PB: predicated region body
PF: predicated region fallthrough
CT: control target
= control target key end

     0   :  { %v7183_v1 = vmov 0   ;;  %vm10491_vm0 = vcmask 523264   ;;  %s10487_s1 = inlined_call_operand.vmem [shape: bf16[64,640], index: 1, kind: input, shape index: {}]   ;;  %s10488_s3 = inlined_call_operand.vmem [shape: f32[4,128,64], index: 3, kind: output, shape index: {}]   ;;  %s10489_s0 = inlined_call_operand.vmem [shape: f32[4,128,64], index: 0, kind: input, shape index: {}]   ;;  %s10490_s2 = inlined_call_operand.vmem [shape: f32[1,64], index: 2, kind: input, shape index: {}]  }
   0x1   :  { %v6619_v0 = vld [vmem:[%s10487_s1 + $0x4] ss:$20 sps:$4 sm:$0xff]   ;;  %368 = vmatprep.mubr.bf16.mxu0 %v7183_v1  ;;  %608 = vmatprep.mubr.bf16.mxu1 %v7183_v1  ;;  %v6621_v2 = vld [vmem:[%s10487_s1] ss:$20 sps:$4 sm:$0xff]   ;;  %v6624_v4 = vld [vmem:[%s10487_s1 + $0x28] ss:$20 sps:$4 sm:$0xff]  }
   0x2   :  { %336 = vmatprep.subr.bf16.mxu0 %v6619_v0  ;;  %6522 = vmatprep.subr.bf16.mxu1 %v6619_v0  ;;  %v6622_v3 = vld [vmem:[%s10487_s1 + $0x2c] ss:$20 sps:$4 sm:$0xff]   ;;  %v6625_v5 = vld [vmem:[%s10487_s1 + $0x54] ss:$20 sps:$4 sm:$0xff]   ;;  %v6627_v6 = vld [vmem:[%s10487_s1 + $0x50] ss:$20 sps:$4 sm:$0xff]  }
   0x3   :  { %337 = vmatpush1.bf16.msra.mxu0 %v6621_v2  ;;  %6526 = vmatpush1.bf16.msra.mxu1 %v6621_v2  ;;  %v6628_v7 = vld [vmem:[%s10487_s1 + $0x7c] ss:$20 sps:$4 sm:$0xff]   ;;  %v6630_v8 = vld [vmem:[%s10487_s1 + $0x78] ss:$20 sps:$4 sm:$0xff]   ;;  %v15_v9 = vld [vmem:[%s10489_s0] sm:$0xff] }
   0x4   :  { %338 = vmatprep.subr.bf16.mxu0 %v6622_v3  ;;  %6523 = vmatprep.subr.bf16.mxu1 %v6622_v3  ;;  %v16_v10 = vld [vmem:[%s10489_s0 + $0x8] sm:$0xff]  ;;  %v63_v11 = vld [vmem:[%s10489_s0 + $0x180] sm:$0xff]  ;;  %v17_v19 = vld [vmem:[%s10489_s0 + $0x10] sm:$0xff] }
   0x5   :  { %v64_v12 = vld [vmem:[%s10489_s0 + $0x188] sm:$0xff]  ;;  %v6634_v14 = vld [vmem:[%s10487_s1 + $0x10] ss:$20 sps:$4 sm:$0xff]   ;;  %v7264_v15 = vpack.c.bf16 %v16_v10, %v15_v9  ;;  %v18_v20 = vld [vmem:[%s10489_s0 + $0x18] sm:$0xff] }
   0x6   :  { %v6633_v13 = vld [vmem:[%s10487_s1 + $0xc] ss:$20 sps:$4 sm:$0xff]   ;;  %v7266_v16 = vpack.c.bf16 %v64_v12, %v63_v11  ;;  %v6631_v17 = vld [vmem:[%s10487_s1 + $0x8] ss:$20 sps:$4 sm:$0xff]   ;;  %v65_v21 = vld [vmem:[%s10489_s0 + $0x190] sm:$0xff]  ;;  %v7301_v26 = vpack.c.bf16 %v18_v20, %v17_v19 }
   0x7   :  { %339 = vmatpush1.bf16.msra.mxu0 %v6624_v4  ;;  %6527 = vmatpush1.bf16.msra.mxu1 %v6624_v4  ;;  %v6637_v18 = vld [vmem:[%s10487_s1 + $0x34] ss:$20 sps:$4 sm:$0xff]   ;;  %v66_v22 = vld [vmem:[%s10489_s0 + $0x198] sm:$0xff]  ;;  %v6635_v23 = vld [vmem:[%s10487_s1 + $0x30] ss:$20 sps:$4 sm:$0xff]  }
   0x8   :  { %340 = vmatprep.subr.bf16.mxu0 %v6625_v5  ;;  %6524 = vmatprep.subr.bf16.mxu1 %v6625_v5  ;;  %v6640_v24 = vld [vmem:[%s10487_s1 + $0x5c] ss:$20 sps:$4 sm:$0xff]   ;;  %v6644_v25 = vld [vmem:[%s10487_s1 + $0x38] ss:$20 sps:$4 sm:$0xff]   ;;  %v7303_v27 = vpack.c.bf16 %v66_v22, %v65_v21  ;;  %v19_v29 = vld [vmem:[%s10489_s0 + $0x20] sm:$0xff] }
   0x9   :  { %v6638_v28 = vld [vmem:[%s10487_s1 + $0x58] ss:$20 sps:$4 sm:$0xff]   ;;  %v67_v32 = vld [vmem:[%s10489_s0 + $0x1a0] sm:$0xff]  ;;  %v21_v38 = vld [vmem:[%s10489_s0 + $0x30] sm:$0xff] }
   0xa   :  { %v6643_v30 = vld [vmem:[%s10487_s1 + $0x84] ss:$20 sps:$4 sm:$0xff]   ;;  %v20_v31 = vld [vmem:[%s10489_s0 + $0x28] sm:$0xff]  ;;  %v6645_v34 = vld [vmem:[%s10487_s1 + $0x60] ss:$20 sps:$4 sm:$0xff]  }
   0xb   :  { %341 = vmatpush1.bf16.msra.mxu0 %v6627_v6  ;;  %6528 = vmatpush1.bf16.msra.mxu1 %v6627_v6  ;;  %v68_v33 = vld [vmem:[%s10489_s0 + $0x1a8] sm:$0xff]  ;;  %v6641_v35 = vld [vmem:[%s10487_s1 + $0x80] ss:$20 sps:$4 sm:$0xff]   ;;  %v7335_v36 = vpack.c.bf16 %v20_v31, %v19_v29  ;;  %v22_v40 = vld [vmem:[%s10489_s0 + $0x38] sm:$0xff] }
   0xc   :  { %342 = vmatprep.subr.bf16.mxu0 %v6628_v7  ;;  %6525 = vmatprep.subr.bf16.mxu1 %v6628_v7  ;;  %v7337_v37 = vpack.c.bf16 %v68_v33, %v67_v32  ;;  %v6646_v39 = vld [vmem:[%s10487_s1 + $0x88] ss:$20 sps:$4 sm:$0xff]   ;;  %v69_v41 = vld [vmem:[%s10489_s0 + $0x1b0] sm:$0xff]  ;;  %v7360_v43 = vpack.c.bf16 %v22_v40, %v21_v38  ;;  %v23_v45 = vld [vmem:[%s10489_s0 + $0x40] sm:$0xff] }
   0xd   :  { %v70_v42 = vld [vmem:[%s10489_s0 + $0x1b8] sm:$0xff]  ;;  %v24_v46 = vld [vmem:[%s10489_s0 + $0x48] sm:$0xff]  ;;  %v71_v47 = vld [vmem:[%s10489_s0 + $0x1c0] sm:$0xff] }
   0xe   :  { %v7362_v44 = vpack.c.bf16 %v70_v42, %v69_v41  ;;  %v72_v48 = vld [vmem:[%s10489_s0 + $0x1c8] sm:$0xff]  ;;  %v7382_v49 = vpack.c.bf16 %v24_v46, %v23_v45  ;;  %v25_v51 = vld [vmem:[%s10489_s0 + $0x50] sm:$0xff]  ;;  %v26_v52 = vld [vmem:[%s10489_s0 + $0x58] sm:$0xff] }
   0xf   :  { %343 = vmatpush1.bf16.msra.mxu0 %v6630_v8  ;;  %6529 = vmatpush1.bf16.msra.mxu1 %v6630_v8  ;;  %v7384_v50 = vpack.c.bf16 %v72_v48, %v71_v47  ;;  %v73_v53 = vld [vmem:[%s10489_s0 + $0x1d0] sm:$0xff]  ;;  %v74_v54 = vld [vmem:[%s10489_s0 + $0x1d8] sm:$0xff]  ;;  %v7404_v55 = vpack.c.bf16 %v26_v52, %v25_v51  ;;  %v27_v57 = vld [vmem:[%s10489_s0 + $0x60] sm:$0xff] }
  0x10   :  { %689 = vmatprep.subr.bf16.mxu1 %v6633_v13  ;;  %5938 = vmatprep.subr.bf16.mxu0 %v6634_v14  ;;  %v7406_v56 = vpack.c.bf16 %v74_v54, %v73_v53  ;;  %v28_v58 = vld [vmem:[%s10489_s0 + $0x68] sm:$0xff]  ;;  %v75_v59 = vld [vmem:[%s10489_s0 + $0x1e0] sm:$0xff]  ;;  %v29_v63 = vld [vmem:[%s10489_s0 + $0x70] sm:$0xff] }
  0x11   :  { %v76_v60 = vld [vmem:[%s10489_s0 + $0x1e8] sm:$0xff]  ;;  %v7426_v61 = vpack.c.bf16 %v28_v58, %v27_v57  ;;  %v30_v0 = vld [vmem:[%s10489_s0 + $0x78] sm:$0xff]  ;;  %v77_v2 = vld [vmem:[%s10489_s0 + $0x1f0] sm:$0xff] }
  0x12   :  { %5482 = vmatmul.mubr.msk.bf16.vlgmr.msra.gmra.mrb[0].mxu0 %vm10491_vm0, %v7264_v15  ;;  %5506 = vmatmul.mubr.msk.bf16.vlgmr.msra.gmra.mrb[0].mxu1 %vm10491_vm0, %v7266_v16  ;;  %v7428_v62 = vpack.c.bf16 %v76_v60, %v75_v59  ;;  %v78_v3 = vld [vmem:[%s10489_s0 + $0x1f8] sm:$0xff]  ;;  %v7448_v4 = vpack.c.bf16 %v30_v0, %v29_v63  ;;  %v31_v6 = vld [vmem:[%s10489_s0 + $0x80] sm:$0xff]  ;;  %v32_v7 = vld [vmem:[%s10489_s0 + $0x88] sm:$0xff] }
  0x13   :  { %690 = vmatpush1.bf16.msra.mxu1 %v6631_v17  ;;  %5939 = vmatpush3.bf16.msra.mxu0 %v6634_v14  ;;  %v7450_v5 = vpack.c.bf16 %v78_v3, %v77_v2  ;;  %v7464_v8 = vpack.c.bf16 %v32_v7, %v31_v6  ;;  %v33_v9 = vld [vmem:[%s10489_s0 + $0x90] sm:$0xff]  ;;  %v34_v10 = vld [vmem:[%s10489_s0 + $0x98] sm:$0xff]  ;;  %v35_v12 = vld [vmem:[%s10489_s0 + $0xa0] sm:$0xff] }
  0x14   :  { %378 = vmatprep.mubr.bf16.mxu0 %v7183_v1  ;;  %618 = vmatprep.mubr.bf16.mxu1 %v7183_v1  ;;  %v7478_v11 = vpack.c.bf16 %v34_v10, %v33_v9  ;;  %v36_v13 = vld [vmem:[%s10489_s0 + $0xa8] sm:$0xff]  ;;  %v37_v17 = vld [vmem:[%s10489_s0 + $0xb0] sm:$0xff]  ;;  %v39_v20 = vld [vmem:[%s10489_s0 + $0xc0] sm:$0xff] }
  0x15   :  { %691 = vmatprep.subr.bf16.mxu1 %v6637_v18  ;;  %5940 = vmatprep.subr.bf16.mxu0 %v6644_v25  ;;  %v7492_v14 = vpack.c.bf16 %v36_v13, %v35_v12  ;;  %v38_v18 = vld [vmem:[%s10489_s0 + $0xb8] sm:$0xff]  ;;  %v40_v21 = vld [vmem:[%s10489_s0 + $0xc8] sm:$0xff]  ;;  %v45_v31 = vld [vmem:[%s10489_s0 + $0xf0] sm:$0xff] }
  0x16   :  { %v7506_v19 = vpack.c.bf16 %v38_v18, %v37_v17  ;;  %v7520_v22 = vpack.c.bf16 %v40_v21, %v39_v20  ;;  %v44_v29 = vld [vmem:[%s10489_s0 + $0xe8] sm:$0xff]  ;;  %v46_v32 = vld [vmem:[%s10489_s0 + $0xf8] sm:$0xff]  ;;  %v51_v42 = vld [vmem:[%s10489_s0 + $0x120] sm:$0xff] }
  0x17   :  { %692 = vmatpush1.bf16.msra.mxu1 %v6635_v23  ;;  %5941 = vmatpush3.bf16.msra.mxu0 %v6644_v25  ;;  %v41_v23 = vld [vmem:[%s10489_s0 + $0xd0] sm:$0xff]  ;;  %v7562_v33 = vpack.c.bf16 %v46_v32, %v45_v31  ;;  %v50_v40 = vld [vmem:[%s10489_s0 + $0x118] sm:$0xff]  ;;  %v52_v45 = vld [vmem:[%s10489_s0 + $0x128] sm:$0xff] }
  0x18   :  { %693 = vmatprep.subr.bf16.mxu1 %v6640_v24  ;;  %5942 = vmatprep.subr.bf16.mxu0 %v6645_v34  ;;  %v42_v24 = vld [vmem:[%s10489_s0 + $0xd8] sm:$0xff]  ;;  %v7604_v46 = vpack.c.bf16 %v52_v45, %v51_v42  ;;  %v53_v47 = vld [vmem:[%s10489_s0 + $0x130] sm:$0xff]  ;;  %v55_v52 = vld [vmem:[%s10489_s0 + $0x140] sm:$0xff] }
  0x19   :  { %v7534_v25 = vpack.c.bf16 %v42_v24, %v41_v23  ;;  %v54_v48 = vld [vmem:[%s10489_s0 + $0x138] sm:$0xff]  ;;  %v56_v53 = vld [vmem:[%s10489_s0 + $0x148] sm:$0xff]  ;;  %v57_v57 = vld [vmem:[%s10489_s0 + $0x150] sm:$0xff] }
  0x1a   :  { %5483 = vmatmul.mubr.msk.bf16.gmra.mrb[4].mxu0 %vm10491_vm0, %v7301_v26  ;;  %5507 = vmatmul.mubr.msk.bf16.gmra.mrb[4].mxu1 %vm10491_vm0, %v7303_v27  ;;  %v7618_v51 = vpack.c.bf16 %v54_v48, %v53_v47  ;;  %v7632_v54 = vpack.c.bf16 %v56_v53, %v55_v52  ;;  %v58_v58 = vld [vmem:[%s10489_s0 + $0x158] sm:$0xff]  ;;  %v59_v60 = vld [vmem:[%s10489_s0 + $0x160] sm:$0xff]  ;;  %v60_v63 = vld [vmem:[%s10489_s0 + $0x168] sm:$0xff] }
  0x1b   :  { %388 = vmatprep.mubr.bf16.mxu0 %v7183_v1  ;;  %628 = vmatprep.mubr.bf16.mxu1 %v7183_v1  ;;  %v7646_v59 = vpack.c.bf16 %v58_v58, %v57_v57  ;;  %v7660_v0 = vpack.c.bf16 %v60_v63, %v59_v60  ;;  %v61_v2 = vld [vmem:[%s10489_s0 + $0x170] sm:$0xff]  ;;  %v62_v3 = vld [vmem:[%s10489_s0 + $0x178] sm:$0xff] }
  0x1c   :  { %694 = vmatpush1.bf16.msra.mxu1 %v6638_v28  ;;  %5943 = vmatpush3.bf16.msra.mxu0 %v6645_v34  ;;  %v43_v28 = vld [vmem:[%s10489_s0 + $0xe0] sm:$0xff]  ;;  %v7674_v6 = vpack.c.bf16 %v62_v3, %v61_v2 }
  0x1d   :  { %695 = vmatprep.subr.bf16.mxu1 %v6643_v30  ;;  %5944 = vmatprep.subr.bf16.mxu0 %v6646_v39  ;;  %v7548_v30 = vpack.c.bf16 %v44_v29, %v43_v28  ;;  %v47_v34 = vld [vmem:[%s10489_s0 + $0x100] sm:$0xff] }
  0x20   :  { %696 = vmatpush1.bf16.msra.mxu1 %v6641_v35  ;;  %5945 = vmatpush3.bf16.msra.mxu0 %v6646_v39  ;;  %v48_v35 = vld [vmem:[%s10489_s0 + $0x108] sm:$0xff]  ;;  %v49_v39 = vld [vmem:[%s10489_s0 + $0x110] sm:$0xff] }
  0x21   :  { %v7576_v38 = vpack.c.bf16 %v48_v35, %v47_v34  ;;  %v7590_v41 = vpack.c.bf16 %v50_v40, %v49_v39 }
  0x22   :  { %5484 = vmatmul.mubr.msk.bf16.gmra.mrb[8].mxu0 %vm10491_vm0, %v7335_v36  ;;  %5508 = vmatmul.mubr.msk.bf16.gmra.mrb[8].mxu1 %vm10491_vm0, %v7337_v37 }
  0x23   :  { %398 = vmatprep.mubr.bf16.mxu0 %v7183_v1  ;;  %638 = vmatprep.mubr.bf16.mxu1 %v7183_v1 }
  0x2a   :  { %5485 = vmatmul.mubr.msk.bf16.gmra.mrb[12].mxu0 %vm10491_vm0, %v7360_v43  ;;  %5509 = vmatmul.mubr.msk.bf16.gmra.mrb[12].mxu1 %vm10491_vm0, %v7362_v44 }
  0x2b   :  { %408 = vmatprep.mubr.bf16.mxu0 %v7183_v1  ;;  %648 = vmatprep.mubr.bf16.mxu1 %v7183_v1 }
  0x32   :  { %5486 = vmatmul.mubr.msk.bf16.gmra.mrb[16].mxu0 %vm10491_vm0, %v7382_v49  ;;  %5510 = vmatmul.mubr.msk.bf16.gmra.mrb[16].mxu1 %vm10491_vm0, %v7384_v50 }
  0x33   :  { %418 = vmatprep.mubr.bf16.mxu0 %v7183_v1  ;;  %658 = vmatprep.mubr.bf16.mxu1 %v7183_v1 }
  0x3a   :  { %5487 = vmatmul.mubr.msk.bf16.gmra.mrb[20].mxu0 %vm10491_vm0, %v7404_v55  ;;  %5511 = vmatmul.mubr.msk.bf16.gmra.mrb[20].mxu1 %vm10491_vm0, %v7406_v56 }
  0x3b   :  { %428 = vmatprep.mubr.bf16.mxu0 %v7183_v1  ;;  %668 = vmatprep.mubr.bf16.mxu1 %v7183_v1 }
  0x42   :  { %5488 = vmatmul.mubr.msk.bf16.gmra.mrb[24].mxu0 %vm10491_vm0, %v7426_v61  ;;  %5512 = vmatmul.mubr.msk.bf16.gmra.mrb[24].mxu1 %vm10491_vm0, %v7428_v62 }
  0x43   :  { %438 = vmatprep.mubr.bf16.mxu0 %v7183_v1  ;;  %678 = vmatprep.mubr.bf16.mxu1 %v7183_v1 }
  0x4a   :  { %5489 = vmatmul.mubr.msk.bf16.gmra.mrb[28].mxu0 %vm10491_vm0, %v7448_v4  ;;  %5513 = vmatmul.mubr.msk.bf16.gmra.mrb[28].mxu1 %vm10491_vm0, %v7450_v5 }
  0x4b   :  { %448 = vmatprep.mubr.bf16.mxu0 %v7183_v1  ;;  %721 = vmatprep.mubr.bf16.mxu1 %v7183_v1 }
  0x52   :  { %5490 = vmatmul.mubr.msk.bf16.gmra.mrb[32].mxu0 %vm10491_vm0, %v7464_v8  ;;  %5514 = vmatmul.mubr.msk.bf16.vlgmr.msra.gmra.mrb[32].mxu1 %vm10491_vm0, %v7264_v15 }
  0x53   :  { %458 = vmatprep.mubr.bf16.mxu0 %v7183_v1  ;;  %731 = vmatprep.mubr.bf16.mxu1 %v7183_v1 }
  0x5a   :  { %5491 = vmatmul.mubr.msk.bf16.gmra.mrb[36].mxu0 %vm10491_vm0, %v7478_v11  ;;  %5515 = vmatmul.mubr.msk.bf16.gmra.mrb[36].mxu1 %vm10491_vm0, %v7301_v26 }
  0x5b   :  { %468 = vmatprep.mubr.bf16.mxu0 %v7183_v1  ;;  %741 = vmatprep.mubr.bf16.mxu1 %v7183_v1 }
  0x62   :  { %5492 = vmatmul.mubr.msk.bf16.gmra.mrb[40].mxu0 %vm10491_vm0, %v7492_v14  ;;  %5516 = vmatmul.mubr.msk.bf16.gmra.mrb[40].mxu1 %vm10491_vm0, %v7335_v36 }
  0x63   :  { %478 = vmatprep.mubr.bf16.mxu0 %v7183_v1  ;;  %751 = vmatprep.mubr.bf16.mxu1 %v7183_v1 }
  0x6a   :  { %5493 = vmatmul.mubr.msk.bf16.gmra.mrb[44].mxu0 %vm10491_vm0, %v7506_v19  ;;  %5517 = vmatmul.mubr.msk.bf16.gmra.mrb[44].mxu1 %vm10491_vm0, %v7360_v43 }
  0x6b   :  { %488 = vmatprep.mubr.bf16.mxu0 %v7183_v1  ;;  %761 = vmatprep.mubr.bf16.mxu1 %v7183_v1 }
  0x72   :  { %5494 = vmatmul.mubr.msk.bf16.gmra.mrb[48].mxu0 %vm10491_vm0, %v7520_v22  ;;  %5518 = vmatmul.mubr.msk.bf16.gmra.mrb[48].mxu1 %vm10491_vm0, %v7382_v49 }
  0x73   :  { %498 = vmatprep.mubr.bf16.mxu0 %v7183_v1  ;;  %771 = vmatprep.mubr.bf16.mxu1 %v7183_v1 }
  0x7a   :  { %5495 = vmatmul.mubr.msk.bf16.gmra.mrb[52].mxu0 %vm10491_vm0, %v7534_v25  ;;  %5519 = vmatmul.mubr.msk.bf16.gmra.mrb[52].mxu1 %vm10491_vm0, %v7404_v55 }
  0x7b   :  { %508 = vmatprep.mubr.bf16.mxu0 %v7183_v1  ;;  %781 = vmatprep.mubr.bf16.mxu1 %v7183_v1 }
  0x82   :  { %5496 = vmatmul.mubr.msk.bf16.gmra.mrb[56].mxu0 %vm10491_vm0, %v7548_v30  ;;  %5520 = vmatmul.mubr.msk.bf16.gmra.mrb[56].mxu1 %vm10491_vm0, %v7426_v61 }
  0x83   :  { %518 = vmatprep.mubr.bf16.mxu0 %v7183_v1  ;;  %791 = vmatprep.mubr.bf16.mxu1 %v7183_v1 }
  0x8a   :  { %5497 = vmatmul.mubr.msk.bf16.gmra.mrb[60].mxu0 %vm10491_vm0, %v7562_v33  ;;  %5521 = vmatmul.mubr.msk.bf16.gmra.mrb[60].mxu1 %vm10491_vm0, %v7448_v4 }
  0x8b   :  { %528 = vmatprep.mubr.bf16.mxu0 %v7183_v1  ;;  %801 = vmatprep.mubr.bf16.mxu1 %v7183_v1 }
  0x92   :  { %5498 = vmatmul.mubr.msk.bf16.gmra.mrb[64].mxu0 %vm10491_vm0, %v7576_v38  ;;  %5522 = vmatmul.mubr.msk.bf16.gmra.mrb[64].mxu1 %vm10491_vm0, %v7464_v8 }
  0x93   :  { %538 = vmatprep.mubr.bf16.mxu0 %v7183_v1  ;;  %811 = vmatprep.mubr.bf16.mxu1 %v7183_v1 }
  0x9a   :  { %5499 = vmatmul.mubr.msk.bf16.gmra.mrb[68].mxu0 %vm10491_vm0, %v7590_v41  ;;  %5523 = vmatmul.mubr.msk.bf16.gmra.mrb[68].mxu1 %vm10491_vm0, %v7478_v11 }
  0x9b   :  { %548 = vmatprep.mubr.bf16.mxu0 %v7183_v1  ;;  %821 = vmatprep.mubr.bf16.mxu1 %v7183_v1 }
  0xa2   :  { %5500 = vmatmul.mubr.msk.bf16.gmra.mrb[72].mxu0 %vm10491_vm0, %v7604_v46  ;;  %5524 = vmatmul.mubr.msk.bf16.gmra.mrb[72].mxu1 %vm10491_vm0, %v7492_v14 }
  0xa3   :  { %558 = vmatprep.mubr.bf16.mxu0 %v7183_v1  ;;  %831 = vmatprep.mubr.bf16.mxu1 %v7183_v1 }
  0xaa   :  { %5501 = vmatmul.mubr.msk.bf16.gmra.mrb[76].mxu0 %vm10491_vm0, %v7618_v51  ;;  %5525 = vmatmul.mubr.msk.bf16.gmra.mrb[76].mxu1 %vm10491_vm0, %v7506_v19 }
  0xab   :  { %568 = vmatprep.mubr.bf16.mxu0 %v7183_v1  ;;  %841 = vmatprep.mubr.bf16.mxu1 %v7183_v1 }
  0xb2   :  { %5502 = vmatmul.mubr.msk.bf16.gmra.mrb[80].mxu0 %vm10491_vm0, %v7632_v54  ;;  %5526 = vmatmul.mubr.msk.bf16.gmra.mrb[80].mxu1 %vm10491_vm0, %v7520_v22 }
  0xb3   :  { %578 = vmatprep.mubr.bf16.mxu0 %v7183_v1  ;;  %851 = vmatprep.mubr.bf16.mxu1 %v7183_v1 }
  0xba   :  { %5503 = vmatmul.mubr.msk.bf16.gmra.mrb[84].mxu0 %vm10491_vm0, %v7646_v59  ;;  %5527 = vmatmul.mubr.msk.bf16.gmra.mrb[84].mxu1 %vm10491_vm0, %v7534_v25 }
  0xbb   :  { %588 = vmatprep.mubr.bf16.mxu0 %v7183_v1  ;;  %861 = vmatprep.mubr.bf16.mxu1 %v7183_v1 }
  0xc2   :  { %5504 = vmatmul.mubr.msk.bf16.gmra.mrb[88].mxu0 %vm10491_vm0, %v7660_v0  ;;  %5528 = vmatmul.mubr.msk.bf16.gmra.mrb[88].mxu1 %vm10491_vm0, %v7548_v30 }
  0xc3   :  { %598 = vmatprep.mubr.bf16.mxu0 %v7183_v1  ;;  %871 = vmatprep.mubr.bf16.mxu1 %v7183_v1 }
  0xca   :  { %5505 = vmatmul.mubr.msk.bf16.gmra.mrb[92].mxu0 %vm10491_vm0, %v7674_v6  ;;  %5529 = vmatmul.mubr.msk.bf16.gmra.mrb[92].mxu1 %vm10491_vm0, %v7562_v33 }
  0xcb   :  { %881 = vmatprep.mubr.bf16.mxu1 %v7183_v1  ;;  %5946 = vmatprep.mubr.msk.bf16.mxu0 %vm10491_vm0, %v7264_v15 }
  0xd2   :  { %5530 = vmatmul.mubr.msk.bf16.gmra.mrb[96].mxu1 %vm10491_vm0, %v7576_v38  ;;  %5947 = vmatmul.mubr.msk.bf16.vlgmr.msra.gmra.mrb[96].mxu0 %vm10491_vm0, %v7301_v26 }
  0xd3   :  { %891 = vmatprep.mubr.bf16.mxu1 %v7183_v1  ;;  %5950 = vmatprep.mubr.msk.bf16.mxu0 %vm10491_vm0, %v7335_v36 }
  0xda   :  { %5531 = vmatmul.mubr.msk.bf16.gmra.mrb[100].mxu1 %vm10491_vm0, %v7590_v41  ;;  %5951 = vmatmul.mubr.msk.bf16.gmra.mrb[100].mxu0 %vm10491_vm0, %v7360_v43 }
  0xdb   :  { %901 = vmatprep.mubr.bf16.mxu1 %v7183_v1  ;;  %5954 = vmatprep.mubr.msk.bf16.mxu0 %vm10491_vm0, %v7382_v49 }
  0xe2   :  { %5532 = vmatmul.mubr.msk.bf16.gmra.mrb[104].mxu1 %vm10491_vm0, %v7604_v46  ;;  %5955 = vmatmul.mubr.msk.bf16.gmra.mrb[104].mxu0 %vm10491_vm0, %v7404_v55 }
  0xe3   :  { %911 = vmatprep.mubr.bf16.mxu1 %v7183_v1  ;;  %5958 = vmatprep.mubr.msk.bf16.mxu0 %vm10491_vm0, %v7426_v61 }
  0xe5   :  { %v370_v15 = vpop.f32.mrb[0].mxu0  ;;  %v610_v26 = vpop.f32.mrb[0].mxu1 }
  0xe6   :  { %v372_v36 = vpop.f32.mrb[1].mxu0  ;;  %v612_v43 = vpop.f32.mrb[1].mxu1 }
  0xe7   :  { %v374_v7 = vpop.f32.mrb[2].mxu0  ;;  %v614_v9 = vpop.f32.mrb[2].mxu1 }
  0xe8   :  { %v1331_v10 = vpack.c.bf16 %v374_v7, %v370_v15  ;;  %v1451_v12 = vpack.c.bf16 %v614_v9, %v610_v26  ;;  %v376_v49 = vpop.f32.mrb[3].mxu0  ;;  %v616_v13 = vpop.f32.mrb[3].mxu1 }
  0xe9   :  { %v1332_v17 = vpack.c.bf16 %v376_v49, %v372_v36  ;;  %v1452_v18 = vpack.c.bf16 %v616_v13, %v612_v43 }
  0xea   :  { %1491 = vst [vmem:[#allocation2] sm:$0xff] %v1331_v10  ;;  %1611 = vst [vmem:[#allocation2 + $0x3c0] sm:$0xff] %v1451_v12  ;;  %5533 = vmatmul.mubr.msk.bf16.gmra.mrb[108].mxu1 %vm10491_vm0, %v7618_v51  ;;  %5959 = vmatmul.mubr.msk.bf16.gmra.mrb[108].mxu0 %vm10491_vm0, %v7448_v4 }
  0xeb   :  { %1492 = vst [vmem:[#allocation2 + $0x8] sm:$0xff] %v1332_v17  ;;  %1612 = vst [vmem:[#allocation2 + $0x3c8] sm:$0xff] %v1452_v18  ;;  %921 = vmatprep.mubr.bf16.mxu1 %v7183_v1  ;;  %5962 = vmatprep.mubr.msk.bf16.mxu0 %vm10491_vm0, %v7464_v8 }
  0xed   :  { %v380_v55 = vpop.f32.mrb[4].mxu0  ;;  %v620_v61 = vpop.f32.mrb[4].mxu1 }
  0xee   :  { %v382_v20 = vpop.f32.mrb[5].mxu0  ;;  %v622_v21 = vpop.f32.mrb[5].mxu1 }
  0xef   :  { %v384_v23 = vpop.f32.mrb[6].mxu0  ;;  %v624_v24 = vpop.f32.mrb[6].mxu1 }
  0xf0   :  { %v1336_v28 = vpack.c.bf16 %v384_v23, %v380_v55  ;;  %v1456_v29 = vpack.c.bf16 %v624_v24, %v620_v61  ;;  %v386_v31 = vpop.f32.mrb[7].mxu0  ;;  %v626_v32 = vpop.f32.mrb[7].mxu1 }
  0xf1   :  { %v1337_v34 = vpack.c.bf16 %v386_v31, %v382_v20  ;;  %v1457_v35 = vpack.c.bf16 %v626_v32, %v622_v21 }
  0xf2   :  { %1496 = vst [vmem:[#allocation2 + $0x28] sm:$0xff] %v1336_v28  ;;  %1616 = vst [vmem:[#allocation2 + $0x3e8] sm:$0xff] %v1456_v29  ;;  %5534 = vmatmul.mubr.msk.bf16.gmra.mrb[112].mxu1 %vm10491_vm0, %v7632_v54  ;;  %5963 = vmatmul.mubr.msk.bf16.gmra.mrb[112].mxu0 %vm10491_vm0, %v7478_v11 }
  0xf3   :  { %1497 = vst [vmem:[#allocation2 + $0x30] sm:$0xff] %v1337_v34  ;;  %1617 = vst [vmem:[#allocation2 + $0x3f0] sm:$0xff] %v1457_v35  ;;  %931 = vmatprep.mubr.bf16.mxu1 %v7183_v1  ;;  %5966 = vmatprep.mubr.msk.bf16.mxu0 %vm10491_vm0, %v7492_v14 }
  0xf5   :  { %v390_v4 = vpop.f32.mrb[8].mxu0  ;;  %v630_v8 = vpop.f32.mrb[8].mxu1 }
  0xf6   :  { %v392_v39 = vpop.f32.mrb[9].mxu0  ;;  %v632_v40 = vpop.f32.mrb[9].mxu1 }
  0xf7   :  { %v394_v42 = vpop.f32.mrb[10].mxu0  ;;  %v634_v45 = vpop.f32.mrb[10].mxu1 }
  0xf8   :  { %v1341_v47 = vpack.c.bf16 %v394_v42, %v390_v4  ;;  %v1461_v48 = vpack.c.bf16 %v634_v45, %v630_v8  ;;  %v396_v52 = vpop.f32.mrb[11].mxu0  ;;  %v636_v53 = vpop.f32.mrb[11].mxu1 }
  0xf9   :  { %v1342_v57 = vpack.c.bf16 %v396_v52, %v392_v39  ;;  %v1462_v58 = vpack.c.bf16 %v636_v53, %v632_v40 }
  0xfa   :  { %1501 = vst [vmem:[#allocation2 + $0x50] sm:$0xff] %v1341_v47  ;;  %1621 = vst [vmem:[#allocation2 + $0x410] sm:$0xff] %v1461_v48  ;;  %5535 = vmatmul.mubr.msk.bf16.gmra.mrb[116].mxu1 %vm10491_vm0, %v7646_v59  ;;  %5967 = vmatmul.mubr.msk.bf16.gmra.mrb[116].mxu0 %vm10491_vm0, %v7506_v19 }
  0xfb   :  { %1502 = vst [vmem:[#allocation2 + $0x58] sm:$0xff] %v1342_v57  ;;  %1622 = vst [vmem:[#allocation2 + $0x418] sm:$0xff] %v1462_v58  ;;  %941 = vmatprep.mubr.bf16.mxu1 %v7183_v1  ;;  %5970 = vmatprep.mubr.msk.bf16.mxu0 %vm10491_vm0, %v7520_v22 }
  0xfd   :  { %v400_v11 = vpop.f32.mrb[12].mxu0  ;;  %v640_v14 = vpop.f32.mrb[12].mxu1 }
  0xfe   :  { %v402_v60 = vpop.f32.mrb[13].mxu0  ;;  %v642_v63 = vpop.f32.mrb[13].mxu1 }
  0xff   :  { %v404_v2 = vpop.f32.mrb[14].mxu0  ;;  %v644_v3 = vpop.f32.mrb[14].mxu1 }
 0x100   :  { %v1346_v15 = vpack.c.bf16 %v404_v2, %v400_v11  ;;  %v1466_v26 = vpack.c.bf16 %v644_v3, %v640_v14  ;;  %v406_v36 = vpop.f32.mrb[15].mxu0  ;;  %v646_v43 = vpop.f32.mrb[15].mxu1 }
 0x101   :  { %v1347_v7 = vpack.c.bf16 %v406_v36, %v402_v60  ;;  %v1467_v9 = vpack.c.bf16 %v646_v43, %v642_v63 }
 0x102   :  { %1506 = vst [vmem:[#allocation2 + $0x78] sm:$0xff] %v1346_v15  ;;  %1626 = vst [vmem:[#allocation2 + $0x438] sm:$0xff] %v1466_v26  ;;  %5536 = vmatmul.mubr.msk.bf16.gmra.mrb[120].mxu1 %vm10491_vm0, %v7660_v0  ;;  %5971 = vmatmul.mubr.msk.bf16.gmra.mrb[120].mxu0 %vm10491_vm0, %v7534_v25 }
 0x103   :  { %1507 = vst [vmem:[#allocation2 + $0x80] sm:$0xff] %v1347_v7  ;;  %1627 = vst [vmem:[#allocation2 + $0x440] sm:$0xff] %v1467_v9  ;;  %951 = vmatprep.mubr.bf16.mxu1 %v7183_v1  ;;  %5974 = vmatprep.mubr.msk.bf16.mxu0 %vm10491_vm0, %v7548_v30 }
 0x105   :  { %v410_v19 = vpop.f32.mrb[16].mxu0  ;;  %v650_v22 = vpop.f32.mrb[16].mxu1 }
 0x106   :  { %v412_v10 = vpop.f32.mrb[17].mxu0  ;;  %v652_v12 = vpop.f32.mrb[17].mxu1 }
 0x107   :  { %v414_v49 = vpop.f32.mrb[18].mxu0  ;;  %v654_v13 = vpop.f32.mrb[18].mxu1 }
 0x108   :  { %v1351_v17 = vpack.c.bf16 %v414_v49, %v410_v19  ;;  %v1471_v18 = vpack.c.bf16 %v654_v13, %v650_v22  ;;  %v416_v55 = vpop.f32.mrb[19].mxu0  ;;  %v656_v61 = vpop.f32.mrb[19].mxu1 }
 0x109   :  { %v1352_v20 = vpack.c.bf16 %v416_v55, %v412_v10  ;;  %v1472_v21 = vpack.c.bf16 %v656_v61, %v652_v12 }
 0x10a   :  { %1511 = vst [vmem:[#allocation2 + $0xa0] sm:$0xff] %v1351_v17  ;;  %1631 = vst [vmem:[#allocation2 + $0x460] sm:$0xff] %v1471_v18  ;;  %5537 = vmatmul.mubr.msk.bf16.gmra.mrb[124].mxu1 %vm10491_vm0, %v7674_v6  ;;  %5975 = vmatmul.mubr.msk.bf16.gmra.mrb[124].mxu0 %vm10491_vm0, %v7562_v33 }
 0x10b   :  { %1512 = vst [vmem:[#allocation2 + $0xa8] sm:$0xff] %v1352_v20  ;;  %1632 = vst [vmem:[#allocation2 + $0x468] sm:$0xff] %v1472_v21  ;;  %961 = vmatprep.mubr.bf16.mxu1 %v7183_v1  ;;  %5978 = vmatprep.mubr.msk.bf16.mxu0 %vm10491_vm0, %v7576_v38 }
 0x10d   :  { %v420_v25 = vpop.f32.mrb[20].mxu0  ;;  %v660_v30 = vpop.f32.mrb[20].mxu1 }
 0x10e   :  { %v422_v23 = vpop.f32.mrb[21].mxu0  ;;  %v662_v24 = vpop.f32.mrb[21].mxu1 }
 0x10f   :  { %v424_v28 = vpop.f32.mrb[22].mxu0  ;;  %v664_v29 = vpop.f32.mrb[22].mxu1 }
 0x110   :  { %v1356_v31 = vpack.c.bf16 %v424_v28, %v420_v25  ;;  %v1476_v32 = vpack.c.bf16 %v664_v29, %v660_v30  ;;  %v426_v34 = vpop.f32.mrb[23].mxu0  ;;  %v666_v35 = vpop.f32.mrb[23].mxu1 }
 0x111   :  { %v1357_v4 = vpack.c.bf16 %v426_v34, %v422_v23  ;;  %v1477_v8 = vpack.c.bf16 %v666_v35, %v662_v24 }
 0x112   :  { %1516 = vst [vmem:[#allocation2 + $0xc8] sm:$0xff] %v1356_v31  ;;  %1636 = vst [vmem:[#allocation2 + $0x488] sm:$0xff] %v1476_v32  ;;  %5538 = vmatmul.mubr.msk.bf16.gmra.mrb[128].mxu1 %vm10491_vm0, %v7266_v16  ;;  %5979 = vmatmul.mubr.msk.bf16.gmra.mrb[128].mxu0 %vm10491_vm0, %v7590_v41 }
 0x113   :  { %1517 = vst [vmem:[#allocation2 + $0xd0] sm:$0xff] %v1357_v4  ;;  %1637 = vst [vmem:[#allocation2 + $0x490] sm:$0xff] %v1477_v8  ;;  %971 = vmatprep.mubr.bf16.mxu1 %v7183_v1  ;;  %5982 = vmatprep.mubr.msk.bf16.mxu0 %vm10491_vm0, %v7604_v46 }
 0x115   :  { %v430_v33 = vpop.f32.mrb[24].mxu0  ;;  %v670_v38 = vpop.f32.mrb[24].mxu1 }
 0x116   :  { %v432_v39 = vpop.f32.mrb[25].mxu0  ;;  %v672_v40 = vpop.f32.mrb[25].mxu1 }
 0x117   :  { %v434_v42 = vpop.f32.mrb[26].mxu0  ;;  %v674_v45 = vpop.f32.mrb[26].mxu1 }
 0x118   :  { %v1361_v47 = vpack.c.bf16 %v434_v42, %v430_v33  ;;  %v1481_v48 = vpack.c.bf16 %v674_v45, %v670_v38  ;;  %v436_v52 = vpop.f32.mrb[27].mxu0  ;;  %v676_v53 = vpop.f32.mrb[27].mxu1 }
 0x119   :  { %v1362_v57 = vpack.c.bf16 %v436_v52, %v432_v39  ;;  %v1482_v58 = vpack.c.bf16 %v676_v53, %v672_v40 }
 0x11a   :  { %1521 = vst [vmem:[#allocation2 + $0xf0] sm:$0xff] %v1361_v47  ;;  %1641 = vst [vmem:[#allocation2 + $0x4b0] sm:$0xff] %v1481_v48  ;;  %5539 = vmatmul.mubr.msk.bf16.gmra.mrb[132].mxu1 %vm10491_vm0, %v7303_v27  ;;  %5983 = vmatmul.mubr.msk.bf16.gmra.mrb[132].mxu0 %vm10491_vm0, %v7618_v51 }
 0x11b   :  { %1522 = vst [vmem:[#allocation2 + $0xf8] sm:$0xff] %v1362_v57  ;;  %1642 = vst [vmem:[#allocation2 + $0x4b8] sm:$0xff] %v1482_v58  ;;  %981 = vmatprep.mubr.bf16.mxu1 %v7183_v1  ;;  %5986 = vmatprep.mubr.msk.bf16.mxu0 %vm10491_vm0, %v7632_v54 }
 0x11d   :  { %v440_v41 = vpop.f32.mrb[28].mxu0  ;;  %v680_v46 = vpop.f32.mrb[28].mxu1 }
 0x11e   :  { %v442_v11 = vpop.f32.mrb[29].mxu0  ;;  %v682_v14 = vpop.f32.mrb[29].mxu1 }
 0x11f   :  { %v444_v60 = vpop.f32.mrb[30].mxu0  ;;  %v684_v63 = vpop.f32.mrb[30].mxu1 }
 0x120   :  { %v1366_v2 = vpack.c.bf16 %v444_v60, %v440_v41  ;;  %v1486_v3 = vpack.c.bf16 %v684_v63, %v680_v46  ;;  %v446_v15 = vpop.f32.mrb[31].mxu0  ;;  %v686_v26 = vpop.f32.mrb[31].mxu1 }
 0x121   :  { %v1367_v36 = vpack.c.bf16 %v446_v15, %v442_v11  ;;  %v1487_v43 = vpack.c.bf16 %v686_v26, %v682_v14 }
 0x122   :  { %1526 = vst [vmem:[#allocation2 + $0x118] sm:$0xff] %v1366_v2  ;;  %1646 = vst [vmem:[#allocation2 + $0x4d8] sm:$0xff] %v1486_v3  ;;  %5540 = vmatmul.mubr.msk.bf16.gmra.mrb[136].mxu1 %vm10491_vm0, %v7337_v37  ;;  %5987 = vmatmul.mubr.msk.bf16.gmra.mrb[136].mxu0 %vm10491_vm0, %v7646_v59 }
 0x123   :  { %1527 = vst [vmem:[#allocation2 + $0x120] sm:$0xff] %v1367_v36  ;;  %1647 = vst [vmem:[#allocation2 + $0x4e0] sm:$0xff] %v1487_v43  ;;  %991 = vmatprep.mubr.bf16.mxu1 %v7183_v1  ;;  %5990 = vmatprep.mubr.msk.bf16.mxu0 %vm10491_vm0, %v7660_v0 }
 0x125   :  { %v450_v51 = vpop.f32.mrb[32].mxu0  ;;  %v723_v54 = vpop.f32.mrb[32].mxu1 }
 0x126   :  { %v452_v7 = vpop.f32.mrb[33].mxu0  ;;  %v725_v9 = vpop.f32.mrb[33].mxu1 }
 0x127   :  { %v454_v19 = vpop.f32.mrb[34].mxu0  ;;  %v727_v22 = vpop.f32.mrb[34].mxu1 }
 0x128   :  { %v1371_v10 = vpack.c.bf16 %v454_v19, %v450_v51  ;;  %v1333_v12 = vpack.c.bf16 %v727_v22, %v723_v54  ;;  %v456_v49 = vpop.f32.mrb[35].mxu0  ;;  %v729_v13 = vpop.f32.mrb[35].mxu1 }
 0x129   :  { %v1372_v17 = vpack.c.bf16 %v456_v49, %v452_v7  ;;  %v1334_v18 = vpack.c.bf16 %v729_v13, %v725_v9 }
 0x12a   :  { %1531 = vst [vmem:[#allocation2 + $0x140] sm:$0xff] %v1371_v10  ;;  %1493 = vst [vmem:[#allocation2 + $0x10] sm:$0xff] %v1333_v12  ;;  %5541 = vmatmul.mubr.msk.bf16.gmra.mrb[140].mxu1 %vm10491_vm0, %v7362_v44  ;;  %5991 = vmatmul.mubr.msk.bf16.gmra.mrb[140].mxu0 %vm10491_vm0, %v7674_v6 }
 0x12b   :  { %1532 = vst [vmem:[#allocation2 + $0x148] sm:$0xff] %v1372_v17  ;;  %1494 = vst [vmem:[#allocation2 + $0x18] sm:$0xff] %v1334_v18  ;;  %1001 = vmatprep.mubr.bf16.mxu1 %v7183_v1  ;;  %5994 = vmatprep.mubr.msk.bf16.mxu0 %vm10491_vm0, %v7266_v16 }
 0x12d   :  { %v460_v59 = vpop.f32.mrb[36].mxu0  ;;  %v733_v0 = vpop.f32.mrb[36].mxu1 }
 0x12e   :  { %v462_v55 = vpop.f32.mrb[37].mxu0  ;;  %v735_v61 = vpop.f32.mrb[37].mxu1 }
 0x12f   :  { %v464_v20 = vpop.f32.mrb[38].mxu0  ;;  %v737_v21 = vpop.f32.mrb[38].mxu1 }
 0x130   :  { %v1376_v25 = vpack.c.bf16 %v464_v20, %v460_v59  ;;  %v1338_v30 = vpack.c.bf16 %v737_v21, %v733_v0  ;;  %v466_v23 = vpop.f32.mrb[39].mxu0  ;;  %v739_v24 = vpop.f32.mrb[39].mxu1 }
 0x131   :  { %v1377_v28 = vpack.c.bf16 %v466_v23, %v462_v55  ;;  %v1339_v29 = vpack.c.bf16 %v739_v24, %v735_v61 }
 0x132   :  { %1536 = vst [vmem:[#allocation2 + $0x168] sm:$0xff] %v1376_v25  ;;  %1498 = vst [vmem:[#allocation2 + $0x38] sm:$0xff] %v1338_v30  ;;  %5542 = vmatmul.mubr.msk.bf16.gmra.mrb[144].mxu1 %vm10491_vm0, %v7384_v50  ;;  %5995 = vmatmul.mubr.msk.bf16.gmra.mrb[144].mxu0 %vm10491_vm0, %v7303_v27 }
 0x133   :  { %1537 = vst [vmem:[#allocation2 + $0x170] sm:$0xff] %v1377_v28  ;;  %1499 = vst [vmem:[#allocation2 + $0x40] sm:$0xff] %v1339_v29  ;;  %1011 = vmatprep.mubr.bf16.mxu1 %v7183_v1  ;;  %5998 = vmatprep.mubr.msk.bf16.mxu0 %vm10491_vm0, %v7337_v37 }
 0x135   :  { %v470_v16 = vpop.f32.mrb[40].mxu0  ;;  %v743_v6 = vpop.f32.mrb[40].mxu1 }
 0x136   :  { %v472_v31 = vpop.f32.mrb[41].mxu0  ;;  %v745_v32 = vpop.f32.mrb[41].mxu1 }
 0x137   :  { %v474_v34 = vpop.f32.mrb[42].mxu0  ;;  %v747_v35 = vpop.f32.mrb[42].mxu1 }
 0x138   :  { %v1381_v4 = vpack.c.bf16 %v474_v34, %v470_v16  ;;  %v1343_v8 = vpack.c.bf16 %v747_v35, %v743_v6  ;;  %v476_v33 = vpop.f32.mrb[43].mxu0  ;;  %v749_v38 = vpop.f32.mrb[43].mxu1 }
 0x139   :  { %v1382_v39 = vpack.c.bf16 %v476_v33, %v472_v31  ;;  %v1344_v40 = vpack.c.bf16 %v749_v38, %v745_v32 }
 0x13a   :  { %1541 = vst [vmem:[#allocation2 + $0x190] sm:$0xff] %v1381_v4  ;;  %1503 = vst [vmem:[#allocation2 + $0x60] sm:$0xff] %v1343_v8  ;;  %5543 = vmatmul.mubr.msk.bf16.gmra.mrb[148].mxu1 %vm10491_vm0, %v7406_v56  ;;  %5999 = vmatmul.mubr.msk.bf16.gmra.mrb[148].mxu0 %vm10491_vm0, %v7362_v44 }
 0x13b   :  { %1542 = vst [vmem:[#allocation2 + $0x198] sm:$0xff] %v1382_v39  ;;  %1504 = vst [vmem:[#allocation2 + $0x68] sm:$0xff] %v1344_v40  ;;  %1021 = vmatprep.mubr.bf16.mxu1 %v7183_v1  ;;  %6002 = vmatprep.mubr.msk.bf16.mxu0 %vm10491_vm0, %v7384_v50 }
 0x13d   :  { %v480_v27 = vpop.f32.mrb[44].mxu0  ;;  %v753_v37 = vpop.f32.mrb[44].mxu1 }
 0x13e   :  { %v482_v42 = vpop.f32.mrb[45].mxu0  ;;  %v755_v45 = vpop.f32.mrb[45].mxu1 }
 0x13f   :  { %v484_v47 = vpop.f32.mrb[46].mxu0  ;;  %v757_v48 = vpop.f32.mrb[46].mxu1 }
 0x140   :  { %v1386_v52 = vpack.c.bf16 %v484_v47, %v480_v27  ;;  %v1348_v53 = vpack.c.bf16 %v757_v48, %v753_v37  ;;  %v486_v57 = vpop.f32.mrb[47].mxu0  ;;  %v759_v58 = vpop.f32.mrb[47].mxu1 }
 0x141   :  { %v1387_v41 = vpack.c.bf16 %v486_v57, %v482_v42  ;;  %v1349_v46 = vpack.c.bf16 %v759_v58, %v755_v45 }
 0x142   :  { %1546 = vst [vmem:[#allocation2 + $0x1b8] sm:$0xff] %v1386_v52  ;;  %1508 = vst [vmem:[#allocation2 + $0x88] sm:$0xff] %v1348_v53  ;;  %5544 = vmatmul.mubr.msk.bf16.gmra.mrb[152].mxu1 %vm10491_vm0, %v7428_v62  ;;  %6003 = vmatmul.mubr.msk.bf16.gmra.mrb[152].mxu0 %vm10491_vm0, %v7406_v56 }
 0x143   :  { %1547 = vst [vmem:[#allocation2 + $0x1c0] sm:$0xff] %v1387_v41  ;;  %1509 = vst [vmem:[#allocation2 + $0x90] sm:$0xff] %v1349_v46  ;;  %1031 = vmatprep.mubr.bf16.mxu1 %v7183_v1  ;;  %6006 = vmatprep.mubr.msk.bf16.mxu0 %vm10491_vm0, %v7428_v62 }
 0x145   :  { %v490_v44 = vpop.f32.mrb[48].mxu0  ;;  %v763_v50 = vpop.f32.mrb[48].mxu1 }
 0x146   :  { %v492_v11 = vpop.f32.mrb[49].mxu0  ;;  %v765_v14 = vpop.f32.mrb[49].mxu1 }
 0x147   :  { %v494_v60 = vpop.f32.mrb[50].mxu0  ;;  %v767_v63 = vpop.f32.mrb[50].mxu1 }
 0x148   :  { %v1391_v2 = vpack.c.bf16 %v494_v60, %v490_v44  ;;  %v1353_v3 = vpack.c.bf16 %v767_v63, %v763_v50  ;;  %v496_v15 = vpop.f32.mrb[51].mxu0  ;;  %v769_v26 = vpop.f32.mrb[51].mxu1 }
 0x149   :  { %v1392_v36 = vpack.c.bf16 %v496_v15, %v492_v11  ;;  %v1354_v43 = vpack.c.bf16 %v769_v26, %v765_v14 }
 0x14a   :  { %1551 = vst [vmem:[#allocation2 + $0x1e0] sm:$0xff] %v1391_v2  ;;  %1513 = vst [vmem:[#allocation2 + $0xb0] sm:$0xff] %v1353_v3  ;;  %5545 = vmatmul.mubr.msk.bf16.gmra.mrb[156].mxu1 %vm10491_vm0, %v7450_v5  ;;  %6007 = vmatmul.mubr.msk.bf16.gmra.mrb[156].mxu0 %vm10491_vm0, %v7450_v5 }
 0x14b   :  { %1552 = vst [vmem:[#allocation2 + $0x1e8] sm:$0xff] %v1392_v36  ;;  %1514 = vst [vmem:[#allocation2 + $0xb8] sm:$0xff] %v1354_v43 }
 0x14d   :  { %v500_v1 = vpop.f32.mrb[52].mxu0  ;;  %v773_v56 = vpop.f32.mrb[52].mxu1 }
 0x14e   :  { %v502_v62 = vpop.f32.mrb[53].mxu0  ;;  %v775_v51 = vpop.f32.mrb[53].mxu1 }
 0x14f   :  { %v504_v54 = vpop.f32.mrb[54].mxu0  ;;  %v777_v7 = vpop.f32.mrb[54].mxu1 }
 0x150   :  { %v1396_v9 = vpack.c.bf16 %v504_v54, %v500_v1  ;;  %v1358_v19 = vpack.c.bf16 %v777_v7, %v773_v56  ;;  %v506_v22 = vpop.f32.mrb[55].mxu0  ;;  %v779_v10 = vpop.f32.mrb[55].mxu1 }
 0x151   :  { %v1397_v12 = vpack.c.bf16 %v506_v22, %v502_v62  ;;  %v1359_v49 = vpack.c.bf16 %v779_v10, %v775_v51 }
 0x152   :  { %1556 = vst [vmem:[#allocation2 + $0x208] sm:$0xff] %v1396_v9  ;;  %1518 = vst [vmem:[#allocation2 + $0xd8] sm:$0xff] %v1358_v19 }
 0x153   :  { %1557 = vst [vmem:[#allocation2 + $0x210] sm:$0xff] %v1397_v12  ;;  %1519 = vst [vmem:[#allocation2 + $0xe0] sm:$0xff] %v1359_v49 }
 0x155   :  { %v510_v13 = vpop.f32.mrb[56].mxu0  ;;  %v783_v5 = vpop.f32.mrb[56].mxu1 }
 0x156   :  { %v512_v17 = vpop.f32.mrb[57].mxu0  ;;  %v785_v18 = vpop.f32.mrb[57].mxu1 }
 0x157   :  { %v514_v59 = vpop.f32.mrb[58].mxu0  ;;  %v787_v0 = vpop.f32.mrb[58].mxu1 }
 0x158   :  { %v1401_v55 = vpack.c.bf16 %v514_v59, %v510_v13  ;;  %v1363_v61 = vpack.c.bf16 %v787_v0, %v783_v5  ;;  %v516_v20 = vpop.f32.mrb[59].mxu0  ;;  %v789_v21 = vpop.f32.mrb[59].mxu1 }
 0x159   :  { %v1402_v25 = vpack.c.bf16 %v516_v20, %v512_v17  ;;  %v1364_v30 = vpack.c.bf16 %v789_v21, %v785_v18 }
 0x15a   :  { %1561 = vst [vmem:[#allocation2 + $0x230] sm:$0xff] %v1401_v55  ;;  %1523 = vst [vmem:[#allocation2 + $0x100] sm:$0xff] %v1363_v61 }
 0x15b   :  { %1562 = vst [vmem:[#allocation2 + $0x238] sm:$0xff] %v1402_v25  ;;  %1524 = vst [vmem:[#allocation2 + $0x108] sm:$0xff] %v1364_v30 }
 0x15d   :  { %v520_v23 = vpop.f32.mrb[60].mxu0  ;;  %v793_v24 = vpop.f32.mrb[60].mxu1 }
 0x15e   :  { %v522_v28 = vpop.f32.mrb[61].mxu0  ;;  %v795_v29 = vpop.f32.mrb[61].mxu1 }
 0x15f   :  { %v524_v16 = vpop.f32.mrb[62].mxu0  ;;  %v797_v6 = vpop.f32.mrb[62].mxu1 }
 0x160   :  { %v1406_v31 = vpack.c.bf16 %v524_v16, %v520_v23  ;;  %v1368_v32 = vpack.c.bf16 %v797_v6, %v793_v24  ;;  %v526_v34 = vpop.f32.mrb[63].mxu0  ;;  %v799_v35 = vpop.f32.mrb[63].mxu1 }
 0x161   :  { %v1407_v4 = vpack.c.bf16 %v526_v34, %v522_v28  ;;  %v1369_v8 = vpack.c.bf16 %v799_v35, %v795_v29 }
 0x162   :  { %1566 = vst [vmem:[#allocation2 + $0x258] sm:$0xff] %v1406_v31  ;;  %1528 = vst [vmem:[#allocation2 + $0x128] sm:$0xff] %v1368_v32 }
 0x163   :  { %1567 = vst [vmem:[#allocation2 + $0x260] sm:$0xff] %v1407_v4  ;;  %1529 = vst [vmem:[#allocation2 + $0x130] sm:$0xff] %v1369_v8 }
 0x165   :  { %v530_v33 = vpop.f32.mrb[64].mxu0  ;;  %v803_v38 = vpop.f32.mrb[64].mxu1 }
 0x166   :  { %v532_v39 = vpop.f32.mrb[65].mxu0  ;;  %v805_v40 = vpop.f32.mrb[65].mxu1 }
 0x167   :  { %v534_v27 = vpop.f32.mrb[66].mxu0  ;;  %v807_v37 = vpop.f32.mrb[66].mxu1 }
 0x168   :  { %v1411_v42 = vpack.c.bf16 %v534_v27, %v530_v33  ;;  %v1373_v45 = vpack.c.bf16 %v807_v37, %v803_v38  ;;  %v536_v47 = vpop.f32.mrb[67].mxu0  ;;  %v809_v48 = vpop.f32.mrb[67].mxu1 }
 0x169   :  { %v1412_v52 = vpack.c.bf16 %v536_v47, %v532_v39  ;;  %v1374_v53 = vpack.c.bf16 %v809_v48, %v805_v40 }
 0x16a   :  { %1571 = vst [vmem:[#allocation2 + $0x280] sm:$0xff] %v1411_v42  ;;  %1533 = vst [vmem:[#allocation2 + $0x150] sm:$0xff] %v1373_v45 }
 0x16b   :  { %1572 = vst [vmem:[#allocation2 + $0x288] sm:$0xff] %v1412_v52  ;;  %1534 = vst [vmem:[#allocation2 + $0x158] sm:$0xff] %v1374_v53 }
 0x16d   :  { %v540_v57 = vpop.f32.mrb[68].mxu0  ;;  %v813_v58 = vpop.f32.mrb[68].mxu1 }
 0x16e   :  { %v542_v41 = vpop.f32.mrb[69].mxu0  ;;  %v815_v46 = vpop.f32.mrb[69].mxu1 }
 0x16f   :  { %v544_v44 = vpop.f32.mrb[70].mxu0  ;;  %v817_v50 = vpop.f32.mrb[70].mxu1 }
 0x170   :  { %v1416_v11 = vpack.c.bf16 %v544_v44, %v540_v57  ;;  %v1378_v14 = vpack.c.bf16 %v817_v50, %v813_v58  ;;  %v546_v60 = vpop.f32.mrb[71].mxu0  ;;  %v819_v63 = vpop.f32.mrb[71].mxu1 }
 0x171   :  { %v1417_v2 = vpack.c.bf16 %v546_v60, %v542_v41  ;;  %v1379_v3 = vpack.c.bf16 %v819_v63, %v815_v46  ;;  %v1651_v60 = vlaneseq }
 0x172   :  { %1576 = vst [vmem:[#allocation2 + $0x2a8] sm:$0xff] %v1416_v11  ;;  %1538 = vst [vmem:[#allocation2 + $0x178] sm:$0xff] %v1378_v14 }
 0x173   :  { %1577 = vst [vmem:[#allocation2 + $0x2b0] sm:$0xff] %v1417_v2  ;;  %1539 = vst [vmem:[#allocation2 + $0x180] sm:$0xff] %v1379_v3 }
 0x175   :  { %v550_v15 = vpop.f32.mrb[72].mxu0  ;;  %v823_v26 = vpop.f32.mrb[72].mxu1 }
 0x176   :  { %v552_v36 = vpop.f32.mrb[73].mxu0  ;;  %v825_v43 = vpop.f32.mrb[73].mxu1 }
 0x177   :  { %v554_v1 = vpop.f32.mrb[74].mxu0  ;;  %v827_v56 = vpop.f32.mrb[74].mxu1 }
 0x178   :  { %v1421_v62 = vpack.c.bf16 %v554_v1, %v550_v15  ;;  %v1383_v51 = vpack.c.bf16 %v827_v56, %v823_v26  ;;  %v556_v54 = vpop.f32.mrb[75].mxu0  ;;  %v829_v7 = vpop.f32.mrb[75].mxu1  ;;  %v7792_v26 = vshrl.u32 %v1651_v60, 7 }
 0x179   :  { %v1422_v9 = vpack.c.bf16 %v556_v54, %v552_v36  ;;  %v1384_v19 = vpack.c.bf16 %v829_v7, %v825_v43 }
 0x17a   :  { %1581 = vst [vmem:[#allocation2 + $0x2d0] sm:$0xff] %v1421_v62  ;;  %1543 = vst [vmem:[#allocation2 + $0x1a0] sm:$0xff] %v1383_v51 }
 0x17b   :  { %1582 = vst [vmem:[#allocation2 + $0x2d8] sm:$0xff] %v1422_v9  ;;  %1544 = vst [vmem:[#allocation2 + $0x1a8] sm:$0xff] %v1384_v19  ;;  %v1653_v9 = vadd.s32 8, %v7792_v26  ;;  %v1654_v19 = vadd.s32 16, %v7792_v26 }
 0x17d   :  { %v560_v22 = vpop.f32.mrb[76].mxu0  ;;  %v833_v10 = vpop.f32.mrb[76].mxu1 }
 0x17e   :  { %v562_v12 = vpop.f32.mrb[77].mxu0  ;;  %v835_v49 = vpop.f32.mrb[77].mxu1 }
 0x17f   :  { %v564_v13 = vpop.f32.mrb[78].mxu0  ;;  %v837_v5 = vpop.f32.mrb[78].mxu1 }
 0x180   :  { %v1426_v17 = vpack.c.bf16 %v564_v13, %v560_v22  ;;  %v1388_v18 = vpack.c.bf16 %v837_v5, %v833_v10  ;;  %v566_v59 = vpop.f32.mrb[79].mxu0  ;;  %v839_v0 = vpop.f32.mrb[79].mxu1  ;;  %v1655_v22 = vadd.s32 24, %v7792_v26  ;;  %v1656_v10 = vadd.s32 32, %v7792_v26 }
 0x181   :  { %v1427_v55 = vpack.c.bf16 %v566_v59, %v562_v12  ;;  %v1389_v61 = vpack.c.bf16 %v839_v0, %v835_v49  ;;  %v1657_v12 = vadd.s32 40, %v7792_v26  ;;  %v1658_v49 = vadd.s32 48, %v7792_v26 }
 0x182   :  { %1586 = vst [vmem:[#allocation2 + $0x2f8] sm:$0xff] %v1426_v17  ;;  %1548 = vst [vmem:[#allocation2 + $0x1c8] sm:$0xff] %v1388_v18  ;;  %v1659_v13 = vadd.s32 56, %v7792_v26  ;;  %v1660_v5 = vadd.s32 64, %v7792_v26  ;;  %v1661_v17 = vadd.s32 72, %v7792_v26  ;;  %v1662_v59 = vadd.s32 80, %v7792_v26 }
 0x183   :  { %1587 = vst [vmem:[#allocation2 + $0x300] sm:$0xff] %v1427_v55  ;;  %1549 = vst [vmem:[#allocation2 + $0x1d0] sm:$0xff] %v1389_v61  ;;  %v7806_v18 = vld [vmem:[%s10490_s2] ss:$0 sm:$0xff]  ;;  %v1663_v0 = vadd.s32 88, %v7792_v26  ;;  %v1664_v55 = vadd.s32 96, %v7792_v26 }
 0x184   :  { %10597 = vst [vmem:[#allocation3_spill] sm:$0xff] %v7806_v18  ;;  %v1669_v61 = vand.u32 127, %v1651_v60  ;;  %s7864_s2 = smov 0  }
 0x185   :  { %v570_v20 = vpop.f32.mrb[80].mxu0  ;;  %v843_v21 = vpop.f32.mrb[80].mxu1 }
 0x186   :  { %v572_v25 = vpop.f32.mrb[81].mxu0  ;;  %v845_v30 = vpop.f32.mrb[81].mxu1  ;;  %vm1670_vm1 = vcmp.ge.s32.totalorder %v7792_v26, %v1669_v61  ;;  %vm1671_vm2 = vcmp.ge.s32.totalorder %v1653_v9, %v1669_v61  ;;  %vm1672_vm3 = vcmp.ge.s32.totalorder %v1654_v19, %v1669_v61  ;;  %vm1673_vm4 = vcmp.ge.s32.totalorder %v1655_v22, %v1669_v61 }
 0x187   :  { %v574_v23 = vpop.f32.mrb[82].mxu0  ;;  %v847_v24 = vpop.f32.mrb[82].mxu1  ;;  %vm1674_vm5 = vcmp.ge.s32.totalorder %v1656_v10, %v1669_v61  ;;  %vm1675_vm6 = vcmp.ge.s32.totalorder %v1657_v12, %v1669_v61  ;;  %vm1676_vm7 = vcmp.ge.s32.totalorder %v1658_v49, %v1669_v61  ;;  %vm1677_vm8 = vcmp.ge.s32.totalorder %v1659_v13, %v1669_v61 }
 0x188   :  { %v1431_v28 = vpack.c.bf16 %v574_v23, %v570_v20  ;;  %v1393_v29 = vpack.c.bf16 %v847_v24, %v843_v21  ;;  %v576_v16 = vpop.f32.mrb[83].mxu0  ;;  %v849_v6 = vpop.f32.mrb[83].mxu1  ;;  %v1667_v23 = vadd.s32 120, %v7792_v26  ;;  %vm1678_vm9 = vcmp.ge.s32.totalorder %v1660_v5, %v1669_v61 }
 0x189   :  { %v1432_v31 = vpack.c.bf16 %v576_v16, %v572_v25  ;;  %v1394_v32 = vpack.c.bf16 %v849_v6, %v845_v30  ;;  %v1665_v25 = vadd.s32 104, %v7792_v26  ;;  %v1666_v30 = vadd.s32 112, %v7792_v26 }
 0x18a   :  { %1591 = vst [vmem:[#allocation2 + $0x320] sm:$0xff] %v1431_v28  ;;  %1553 = vst [vmem:[#allocation2 + $0x1f0] sm:$0xff] %v1393_v29  ;;  %vm1679_vm10 = vcmp.ge.s32.totalorder %v1661_v17, %v1669_v61  ;;  %vm1680_vm11 = vcmp.ge.s32.totalorder %v1662_v59, %v1669_v61  ;;  %vm1681_vm12 = vcmp.ge.s32.totalorder %v1663_v0, %v1669_v61 }
 0x18b   :  { %1592 = vst [vmem:[#allocation2 + $0x328] sm:$0xff] %v1432_v31  ;;  %1554 = vst [vmem:[#allocation2 + $0x1f8] sm:$0xff] %v1394_v32  ;;  %vm1682_vm13 = vcmp.ge.s32.totalorder %v1664_v55, %v1669_v61  ;;  %vm1683_vm14 = vcmp.ge.s32.totalorder %v1665_v25, %v1669_v61  ;;  %vm1684_vm15 = vcmp.ge.s32.totalorder %v1666_v30, %v1669_v61 }
 0x18c   :  { %vm1685_vm0 = vcmp.ge.s32.totalorder %v1667_v23, %v1669_v61 }
 0x18d   :  { %v580_v34 = vpop.f32.mrb[84].mxu0  ;;  %v853_v35 = vpop.f32.mrb[84].mxu1 }
 0x18e   :  { %v582_v4 = vpop.f32.mrb[85].mxu0  ;;  %v855_v8 = vpop.f32.mrb[85].mxu1 }
 0x18f   :  { %v584_v33 = vpop.f32.mrb[86].mxu0  ;;  %v857_v38 = vpop.f32.mrb[86].mxu1 }
 0x190   :  { %v1436_v39 = vpack.c.bf16 %v584_v33, %v580_v34  ;;  %v1398_v40 = vpack.c.bf16 %v857_v38, %v853_v35  ;;  %v586_v27 = vpop.f32.mrb[87].mxu0  ;;  %v859_v37 = vpop.f32.mrb[87].mxu1 }
 0x191   :  { %v1437_v42 = vpack.c.bf16 %v586_v27, %v582_v4  ;;  %v1399_v45 = vpack.c.bf16 %v859_v37, %v855_v8  ;;  %v7184_v8 = vmov -inf  }
 0x192   :  { %1596 = vst [vmem:[#allocation2 + $0x348] sm:$0xff] %v1436_v39  ;;  %1558 = vst [vmem:[#allocation2 + $0x218] sm:$0xff] %v1398_v40  ;;  %v7817_v33 = vsel %vm1670_vm1, 0.0, %v7184_v8  ;;  %v7820_v38 = vsel %vm1671_vm2, 0.0, %v7184_v8  ;;  %v7823_v39 = vsel %vm1672_vm3, 0.0, %v7184_v8  ;;  %v7826_v40 = vsel %vm1673_vm4, 0.0, %v7184_v8 }
 0x193   :  { %1597 = vst [vmem:[#allocation2 + $0x350] sm:$0xff] %v1437_v42  ;;  %1559 = vst [vmem:[#allocation2 + $0x220] sm:$0xff] %v1399_v45  ;;  %v7829_v27 = vsel %vm1674_vm5, 0.0, %v7184_v8  ;;  %v7832_v37 = vsel %vm1675_vm6, 0.0, %v7184_v8  ;;  %v7835_v42 = vsel %vm1676_vm7, 0.0, %v7184_v8  ;;  %v7838_v45 = vsel %vm1677_vm8, 0.0, %v7184_v8 }
 0x194   :  { %10598 = vst [vmem:[#allocation4_spill] sm:$0xff] %v7817_v33  ;;  %10599 = vst [vmem:[#allocation5_spill] sm:$0xff] %v7820_v38 }
 0x195   :  { %v590_v47 = vpop.f32.mrb[88].mxu0  ;;  %v863_v48 = vpop.f32.mrb[88].mxu1  ;;  %10600 = vst [vmem:[#allocation6_spill] sm:$0xff] %v7823_v39  ;;  %10601 = vst [vmem:[#allocation7_spill] sm:$0xff] %v7826_v40 }
 0x196   :  { %v592_v52 = vpop.f32.mrb[89].mxu0  ;;  %v865_v53 = vpop.f32.mrb[89].mxu1  ;;  %10602 = vst [vmem:[#allocation8_spill] sm:$0xff] %v7829_v27  ;;  %10603 = vst [vmem:[#allocation9_spill] sm:$0xff] %v7832_v37 }
 0x197   :  { %v594_v57 = vpop.f32.mrb[90].mxu0  ;;  %v867_v58 = vpop.f32.mrb[90].mxu1  ;;  %10604 = vst [vmem:[#allocation10_spill] sm:$0xff] %v7835_v42  ;;  %10605 = vst [vmem:[#allocation11_spill] sm:$0xff] %v7838_v45 }
 0x198   :  { %v1441_v41 = vpack.c.bf16 %v594_v57, %v590_v47  ;;  %v1403_v46 = vpack.c.bf16 %v867_v58, %v863_v48  ;;  %v596_v44 = vpop.f32.mrb[91].mxu0  ;;  %v869_v50 = vpop.f32.mrb[91].mxu1  ;;  %v7847_v57 = vsel %vm1680_vm11, 0.0, %v7184_v8  ;;  %v7850_v58 = vsel %vm1681_vm12, 0.0, %v7184_v8 }
 0x199   :  { %v1442_v11 = vpack.c.bf16 %v596_v44, %v592_v52  ;;  %v1404_v14 = vpack.c.bf16 %v869_v50, %v865_v53  ;;  %v7841_v52 = vsel %vm1678_vm9, 0.0, %v7184_v8  ;;  %v7844_v53 = vsel %vm1679_vm10, 0.0, %v7184_v8  ;;  %10608 = vst [vmem:[#allocation14_spill] sm:$0xff] %v7847_v57  ;;  %10609 = vst [vmem:[#allocation15_spill] sm:$0xff] %v7850_v58 }
 0x19a   :  { %1601 = vst [vmem:[#allocation2 + $0x370] sm:$0xff] %v1441_v41  ;;  %1563 = vst [vmem:[#allocation2 + $0x240] sm:$0xff] %v1403_v46  ;;  %v7853_v44 = vsel %vm1682_vm13, 0.0, %v7184_v8  ;;  %v7856_v50 = vsel %vm1683_vm14, 0.0, %v7184_v8 }
 0x19b   :  { %1602 = vst [vmem:[#allocation2 + $0x378] sm:$0xff] %v1442_v11  ;;  %1564 = vst [vmem:[#allocation2 + $0x248] sm:$0xff] %v1404_v14  ;;  %v7859_v11 = vsel %vm1684_vm15, 0.0, %v7184_v8  ;;  %v7862_v14 = vsel %vm1685_vm0, 0.0, %v7184_v8 }
 0x19c   :  { %10606 = vst [vmem:[#allocation12_spill] sm:$0xff] %v7841_v52  ;;  %10607 = vst [vmem:[#allocation13_spill] sm:$0xff] %v7844_v53 }
 0x19d   :  { %v600_v63 = vpop.f32.mrb[92].mxu0  ;;  %v873_v2 = vpop.f32.mrb[92].mxu1  ;;  %10610 = vst [vmem:[#allocation16_spill] sm:$0xff] %v7853_v44  ;;  %10611 = vst [vmem:[#allocation17_spill] sm:$0xff] %v7856_v50 }
 0x19e   :  { %v602_v3 = vpop.f32.mrb[93].mxu0  ;;  %v875_v15 = vpop.f32.mrb[93].mxu1  ;;  %10612 = vst [vmem:[#allocation18_spill] sm:$0xff] %v7859_v11  ;;  %10613 = vst [vmem:[#allocation19_spill] sm:$0xff] %v7862_v14 }
 0x19f   :  { %v604_v36 = vpop.f32.mrb[94].mxu0  ;;  %v877_v43 = vpop.f32.mrb[94].mxu1 }
 0x1a0   :  { %v1446_v1 = vpack.c.bf16 %v604_v36, %v600_v63  ;;  %v1408_v56 = vpack.c.bf16 %v877_v43, %v873_v2  ;;  %v606_v62 = vpop.f32.mrb[95].mxu0  ;;  %v879_v51 = vpop.f32.mrb[95].mxu1 }
 0x1a1   :  { %v1447_v54 = vpack.c.bf16 %v606_v62, %v602_v3  ;;  %v1409_v7 = vpack.c.bf16 %v879_v51, %v875_v15 }
 0x1a2   :  { %1606 = vst [vmem:[#allocation2 + $0x398] sm:$0xff] %v1446_v1  ;;  %1568 = vst [vmem:[#allocation2 + $0x268] sm:$0xff] %v1408_v56 }
 0x1a3   :  { %1607 = vst [vmem:[#allocation2 + $0x3a0] sm:$0xff] %v1447_v54  ;;  %1569 = vst [vmem:[#allocation2 + $0x270] sm:$0xff] %v1409_v7 }
 0x1a5   :  { %v883_v20 = vpop.f32.mrb[96].mxu1  ;;  %v5948_v21 = vpop.f32.mrb[96].mxu0 }
 0x1a6   :  { %v885_v24 = vpop.f32.mrb[97].mxu1  ;;  %v1076_v28 = vpop.f32.mrb[97].mxu0 }
 0x1a7   :  { %v887_v29 = vpop.f32.mrb[98].mxu1  ;;  %v5949_v16 = vpop.f32.mrb[98].mxu0 }
 0x1a8   :  { %v1413_v6 = vpack.c.bf16 %v887_v29, %v883_v20  ;;  %v1340_v31 = vpack.c.bf16 %v5949_v16, %v5948_v21  ;;  %v889_v32 = vpop.f32.mrb[99].mxu1  ;;  %v1079_v34 = vpop.f32.mrb[99].mxu0 }
 0x1a9   :  { %v1414_v35 = vpack.c.bf16 %v889_v32, %v885_v24  ;;  %v1335_v4 = vpack.c.bf16 %v1079_v34, %v1076_v28 }
 0x1aa   :  { %1573 = vst [vmem:[#allocation2 + $0x290] sm:$0xff] %v1413_v6  ;;  %1500 = vst [vmem:[#allocation2 + $0x48] sm:$0xff] %v1340_v31 }
 0x1ab   :  { %1574 = vst [vmem:[#allocation2 + $0x298] sm:$0xff] %v1414_v35  ;;  %1495 = vst [vmem:[#allocation2 + $0x20] sm:$0xff] %v1335_v4 }
 0x1ad   :  { %v893_v47 = vpop.f32.mrb[100].mxu1  ;;  %v5952_v48 = vpop.f32.mrb[100].mxu0 }
 0x1ae   :  { %v895_v41 = vpop.f32.mrb[101].mxu1  ;;  %v1092_v46 = vpop.f32.mrb[101].mxu0 }
 0x1af   :  { %v897_v60 = vpop.f32.mrb[102].mxu1  ;;  %v5953_v63 = vpop.f32.mrb[102].mxu0 }
 0x1b0   :  { %v1418_v2 = vpack.c.bf16 %v897_v60, %v893_v47  ;;  %v1350_v3 = vpack.c.bf16 %v5953_v63, %v5952_v48  ;;  %v899_v15 = vpop.f32.mrb[103].mxu1  ;;  %v1095_v26 = vpop.f32.mrb[103].mxu0 }
 0x1b1   :  { %v1419_v36 = vpack.c.bf16 %v899_v15, %v895_v41  ;;  %v1345_v43 = vpack.c.bf16 %v1095_v26, %v1092_v46 }
 0x1b2   :  { %1578 = vst [vmem:[#allocation2 + $0x2b8] sm:$0xff] %v1418_v2  ;;  %1510 = vst [vmem:[#allocation2 + $0x98] sm:$0xff] %v1350_v3 }
 0x1b3   :  { %1579 = vst [vmem:[#allocation2 + $0x2c0] sm:$0xff] %v1419_v36  ;;  %1505 = vst [vmem:[#allocation2 + $0x70] sm:$0xff] %v1345_v43 }
 0x1b5   :  { %v903_v1 = vpop.f32.mrb[104].mxu1  ;;  %v5956_v56 = vpop.f32.mrb[104].mxu0 }
 0x1b6   :  { %v905_v62 = vpop.f32.mrb[105].mxu1  ;;  %v1108_v51 = vpop.f32.mrb[105].mxu0 }
 0x1b7   :  { %v907_v54 = vpop.f32.mrb[106].mxu1  ;;  %v5957_v7 = vpop.f32.mrb[106].mxu0 }
 0x1b8   :  { %v1423_v9 = vpack.c.bf16 %v907_v54, %v903_v1  ;;  %v1360_v19 = vpack.c.bf16 %v5957_v7, %v5956_v56  ;;  %v909_v22 = vpop.f32.mrb[107].mxu1  ;;  %v1111_v10 = vpop.f32.mrb[107].mxu0 }
 0x1b9   :  { %v1424_v12 = vpack.c.bf16 %v909_v22, %v905_v62  ;;  %v1355_v49 = vpack.c.bf16 %v1111_v10, %v1108_v51 }
 0x1ba   :  { %1583 = vst [vmem:[#allocation2 + $0x2e0] sm:$0xff] %v1423_v9  ;;  %1520 = vst [vmem:[#allocation2 + $0xe8] sm:$0xff] %v1360_v19 }
 0x1bb   :  { %1584 = vst [vmem:[#allocation2 + $0x2e8] sm:$0xff] %v1424_v12  ;;  %1515 = vst [vmem:[#allocation2 + $0xc0] sm:$0xff] %v1355_v49 }
 0x1bd   :  { %v913_v13 = vpop.f32.mrb[108].mxu1  ;;  %v5960_v5 = vpop.f32.mrb[108].mxu0 }
 0x1be   :  { %v915_v17 = vpop.f32.mrb[109].mxu1  ;;  %v1124_v59 = vpop.f32.mrb[109].mxu0 }
 0x1bf   :  { %v917_v0 = vpop.f32.mrb[110].mxu1  ;;  %v5961_v55 = vpop.f32.mrb[110].mxu0 }
 0x1c0   :  { %v1428_v61 = vpack.c.bf16 %v917_v0, %v913_v13  ;;  %v1370_v20 = vpack.c.bf16 %v5961_v55, %v5960_v5  ;;  %v919_v21 = vpop.f32.mrb[111].mxu1  ;;  %v1127_v25 = vpop.f32.mrb[111].mxu0 }
 0x1c1   :  { %v1429_v30 = vpack.c.bf16 %v919_v21, %v915_v17  ;;  %v1365_v23 = vpack.c.bf16 %v1127_v25, %v1124_v59 }
 0x1c2   :  { %1588 = vst [vmem:[#allocation2 + $0x308] sm:$0xff] %v1428_v61  ;;  %1530 = vst [vmem:[#allocation2 + $0x138] sm:$0xff] %v1370_v20 }
 0x1c3   :  { %1589 = vst [vmem:[#allocation2 + $0x310] sm:$0xff] %v1429_v30  ;;  %1525 = vst [vmem:[#allocation2 + $0x110] sm:$0xff] %v1365_v23 }
 0x1c5   :  { %v923_v24 = vpop.f32.mrb[112].mxu1  ;;  %v5964_v28 = vpop.f32.mrb[112].mxu0 }
 0x1c6   :  { %v925_v29 = vpop.f32.mrb[113].mxu1  ;;  %v1140_v16 = vpop.f32.mrb[113].mxu0 }
 0x1c7   :  { %v927_v6 = vpop.f32.mrb[114].mxu1  ;;  %v5965_v31 = vpop.f32.mrb[114].mxu0 }
 0x1c8   :  { %v1433_v32 = vpack.c.bf16 %v927_v6, %v923_v24  ;;  %v1380_v34 = vpack.c.bf16 %v5965_v31, %v5964_v28  ;;  %v929_v35 = vpop.f32.mrb[115].mxu1  ;;  %v1143_v4 = vpop.f32.mrb[115].mxu0 }
 0x1c9   :  { %v1434_v8 = vpack.c.bf16 %v929_v35, %v925_v29  ;;  %v1375_v47 = vpack.c.bf16 %v1143_v4, %v1140_v16 }
 0x1ca   :  { %1593 = vst [vmem:[#allocation2 + $0x330] sm:$0xff] %v1433_v32  ;;  %1540 = vst [vmem:[#allocation2 + $0x188] sm:$0xff] %v1380_v34 }
 0x1cb   :  { %1594 = vst [vmem:[#allocation2 + $0x338] sm:$0xff] %v1434_v8  ;;  %1535 = vst [vmem:[#allocation2 + $0x160] sm:$0xff] %v1375_v47 }
 0x1cd   :  { %v933_v48 = vpop.f32.mrb[116].mxu1  ;;  %v5968_v41 = vpop.f32.mrb[116].mxu0 }
 0x1ce   :  { %v935_v46 = vpop.f32.mrb[117].mxu1  ;;  %v1156_v60 = vpop.f32.mrb[117].mxu0 }
 0x1cf   :  { %v937_v63 = vpop.f32.mrb[118].mxu1  ;;  %v5969_v2 = vpop.f32.mrb[118].mxu0 }
 0x1d0   :  { %v1438_v3 = vpack.c.bf16 %v937_v63, %v933_v48  ;;  %v1390_v15 = vpack.c.bf16 %v5969_v2, %v5968_v41  ;;  %v939_v26 = vpop.f32.mrb[119].mxu1  ;;  %v1159_v36 = vpop.f32.mrb[119].mxu0 }
 0x1d1   :  { %v1439_v43 = vpack.c.bf16 %v939_v26, %v935_v46  ;;  %v1385_v1 = vpack.c.bf16 %v1159_v36, %v1156_v60 }
 0x1d2   :  { %1598 = vst [vmem:[#allocation2 + $0x358] sm:$0xff] %v1438_v3  ;;  %1550 = vst [vmem:[#allocation2 + $0x1d8] sm:$0xff] %v1390_v15 }
 0x1d3   :  { %1599 = vst [vmem:[#allocation2 + $0x360] sm:$0xff] %v1439_v43  ;;  %1545 = vst [vmem:[#allocation2 + $0x1b0] sm:$0xff] %v1385_v1 }
 0x1d5   :  { %v943_v56 = vpop.f32.mrb[120].mxu1  ;;  %v5972_v62 = vpop.f32.mrb[120].mxu0 }
 0x1d6   :  { %v945_v51 = vpop.f32.mrb[121].mxu1  ;;  %v1172_v54 = vpop.f32.mrb[121].mxu0 }
 0x1d7   :  { %v947_v7 = vpop.f32.mrb[122].mxu1  ;;  %v5973_v9 = vpop.f32.mrb[122].mxu0 }
 0x1d8   :  { %v1443_v19 = vpack.c.bf16 %v947_v7, %v943_v56  ;;  %v1400_v22 = vpack.c.bf16 %v5973_v9, %v5972_v62  ;;  %v949_v10 = vpop.f32.mrb[123].mxu1  ;;  %v1175_v12 = vpop.f32.mrb[123].mxu0 }
 0x1d9   :  { %v1444_v49 = vpack.c.bf16 %v949_v10, %v945_v51  ;;  %v1395_v13 = vpack.c.bf16 %v1175_v12, %v1172_v54 }
 0x1da   :  { %1603 = vst [vmem:[#allocation2 + $0x380] sm:$0xff] %v1443_v19  ;;  %1560 = vst [vmem:[#allocation2 + $0x228] sm:$0xff] %v1400_v22 }
 0x1db   :  { %1604 = vst [vmem:[#allocation2 + $0x388] sm:$0xff] %v1444_v49  ;;  %1555 = vst [vmem:[#allocation2 + $0x200] sm:$0xff] %v1395_v13 }
 0x1dd   :  { %v953_v5 = vpop.f32.mrb[124].mxu1  ;;  %v5976_v17 = vpop.f32.mrb[124].mxu0 }
 0x1de   :  { %v955_v59 = vpop.f32.mrb[125].mxu1  ;;  %v1188_v0 = vpop.f32.mrb[125].mxu0 }
 0x1df   :  { %v957_v55 = vpop.f32.mrb[126].mxu1  ;;  %v5977_v61 = vpop.f32.mrb[126].mxu0 }
 0x1e0   :  { %v1448_v20 = vpack.c.bf16 %v957_v55, %v953_v5  ;;  %v1410_v21 = vpack.c.bf16 %v5977_v61, %v5976_v17  ;;  %v959_v25 = vpop.f32.mrb[127].mxu1  ;;  %v1191_v30 = vpop.f32.mrb[127].mxu0 }
 0x1e1   :  { %v1449_v23 = vpack.c.bf16 %v959_v25, %v955_v59  ;;  %v1405_v24 = vpack.c.bf16 %v1191_v30, %v1188_v0 }
 0x1e2   :  { %1608 = vst [vmem:[#allocation2 + $0x3a8] sm:$0xff] %v1448_v20  ;;  %1570 = vst [vmem:[#allocation2 + $0x278] sm:$0xff] %v1410_v21 }
 0x1e3   :  { %1609 = vst [vmem:[#allocation2 + $0x3b0] sm:$0xff] %v1449_v23  ;;  %1565 = vst [vmem:[#allocation2 + $0x250] sm:$0xff] %v1405_v24 }
 0x1e5   :  { %v963_v28 = vpop.f32.mrb[128].mxu1  ;;  %v5980_v29 = vpop.f32.mrb[128].mxu0 }
 0x1e6   :  { %v965_v16 = vpop.f32.mrb[129].mxu1  ;;  %v1204_v6 = vpop.f32.mrb[129].mxu0 }
 0x1e7   :  { %v967_v31 = vpop.f32.mrb[130].mxu1  ;;  %v5981_v32 = vpop.f32.mrb[130].mxu0 }
 0x1e8   :  { %v1453_v34 = vpack.c.bf16 %v967_v31, %v963_v28  ;;  %v1420_v35 = vpack.c.bf16 %v5981_v32, %v5980_v29  ;;  %v969_v4 = vpop.f32.mrb[131].mxu1  ;;  %v1207_v8 = vpop.f32.mrb[131].mxu0 }
 0x1e9   :  { %v1454_v47 = vpack.c.bf16 %v969_v4, %v965_v16  ;;  %v1415_v48 = vpack.c.bf16 %v1207_v8, %v1204_v6 }
 0x1ea   :  { %1613 = vst [vmem:[#allocation2 + $0x3d0] sm:$0xff] %v1453_v34  ;;  %1580 = vst [vmem:[#allocation2 + $0x2c8] sm:$0xff] %v1420_v35 }
 0x1eb   :  { %1614 = vst [vmem:[#allocation2 + $0x3d8] sm:$0xff] %v1454_v47  ;;  %1575 = vst [vmem:[#allocation2 + $0x2a0] sm:$0xff] %v1415_v48 }
 0x1ed   :  { %v973_v41 = vpop.f32.mrb[132].mxu1  ;;  %v5984_v46 = vpop.f32.mrb[132].mxu0 }
 0x1ee   :  { %v975_v60 = vpop.f32.mrb[133].mxu1  ;;  %v1220_v63 = vpop.f32.mrb[133].mxu0 }
 0x1ef   :  { %v977_v2 = vpop.f32.mrb[134].mxu1  ;;  %v5985_v3 = vpop.f32.mrb[134].mxu0 }
 0x1f0   :  { %v1458_v15 = vpack.c.bf16 %v977_v2, %v973_v41  ;;  %v1430_v26 = vpack.c.bf16 %v5985_v3, %v5984_v46  ;;  %v979_v36 = vpop.f32.mrb[135].mxu1  ;;  %v1223_v43 = vpop.f32.mrb[135].mxu0 }
 0x1f1   :  { %v1459_v1 = vpack.c.bf16 %v979_v36, %v975_v60  ;;  %v1425_v56 = vpack.c.bf16 %v1223_v43, %v1220_v63 }
 0x1f2   :  { %1618 = vst [vmem:[#allocation2 + $0x3f8] sm:$0xff] %v1458_v15  ;;  %1590 = vst [vmem:[#allocation2 + $0x318] sm:$0xff] %v1430_v26 }
 0x1f3   :  { %1619 = vst [vmem:[#allocation2 + $0x400] sm:$0xff] %v1459_v1  ;;  %1585 = vst [vmem:[#allocation2 + $0x2f0] sm:$0xff] %v1425_v56 }
 0x1f5   :  { %v983_v62 = vpop.f32.mrb[136].mxu1  ;;  %v5988_v51 = vpop.f32.mrb[136].mxu0 }
 0x1f6   :  { %v985_v54 = vpop.f32.mrb[137].mxu1  ;;  %v1236_v7 = vpop.f32.mrb[137].mxu0 }
 0x1f7   :  { %v987_v9 = vpop.f32.mrb[138].mxu1  ;;  %v5989_v19 = vpop.f32.mrb[138].mxu0 }
 0x1f8   :  { %v1463_v22 = vpack.c.bf16 %v987_v9, %v983_v62  ;;  %v1440_v10 = vpack.c.bf16 %v5989_v19, %v5988_v51  ;;  %v989_v12 = vpop.f32.mrb[139].mxu1  ;;  %v1239_v49 = vpop.f32.mrb[139].mxu0 }
 0x1f9   :  { %v1464_v13 = vpack.c.bf16 %v989_v12, %v985_v54  ;;  %v1435_v5 = vpack.c.bf16 %v1239_v49, %v1236_v7 }
 0x1fa   :  { %1623 = vst [vmem:[#allocation2 + $0x420] sm:$0xff] %v1463_v22  ;;  %1600 = vst [vmem:[#allocation2 + $0x368] sm:$0xff] %v1440_v10 }
 0x1fb   :  { %1624 = vst [vmem:[#allocation2 + $0x428] sm:$0xff] %v1464_v13  ;;  %1595 = vst [vmem:[#allocation2 + $0x340] sm:$0xff] %v1435_v5 }
 0x1fd   :  { %v993_v17 = vpop.f32.mrb[140].mxu1  ;;  %v5992_v59 = vpop.f32.mrb[140].mxu0 }
 0x1fe   :  { %v995_v0 = vpop.f32.mrb[141].mxu1  ;;  %v1252_v55 = vpop.f32.mrb[141].mxu0 }
 0x1ff   :  { %v997_v61 = vpop.f32.mrb[142].mxu1  ;;  %v5993_v20 = vpop.f32.mrb[142].mxu0 }
 0x200   :  { %v1468_v21 = vpack.c.bf16 %v997_v61, %v993_v17  ;;  %v1450_v25 = vpack.c.bf16 %v5993_v20, %v5992_v59  ;;  %v999_v30 = vpop.f32.mrb[143].mxu1  ;;  %v1255_v23 = vpop.f32.mrb[143].mxu0 }
 0x201   :  { %v1469_v24 = vpack.c.bf16 %v999_v30, %v995_v0  ;;  %v1445_v28 = vpack.c.bf16 %v1255_v23, %v1252_v55 }
 0x202   :  { %1628 = vst [vmem:[#allocation2 + $0x448] sm:$0xff] %v1468_v21  ;;  %1610 = vst [vmem:[#allocation2 + $0x3b8] sm:$0xff] %v1450_v25 }
 0x203   :  { %1629 = vst [vmem:[#allocation2 + $0x450] sm:$0xff] %v1469_v24  ;;  %1605 = vst [vmem:[#allocation2 + $0x390] sm:$0xff] %v1445_v28 }
 0x205   :  { %v1003_v29 = vpop.f32.mrb[144].mxu1  ;;  %v5996_v16 = vpop.f32.mrb[144].mxu0 }
 0x206   :  { %v1005_v6 = vpop.f32.mrb[145].mxu1  ;;  %v1268_v31 = vpop.f32.mrb[145].mxu0 }
 0x207   :  { %v1007_v32 = vpop.f32.mrb[146].mxu1  ;;  %v5997_v34 = vpop.f32.mrb[146].mxu0 }
 0x208   :  { %v1473_v35 = vpack.c.bf16 %v1007_v32, %v1003_v29  ;;  %v1460_v4 = vpack.c.bf16 %v5997_v34, %v5996_v16  ;;  %v1009_v8 = vpop.f32.mrb[147].mxu1  ;;  %v1271_v47 = vpop.f32.mrb[147].mxu0 }
 0x209   :  { %v1474_v48 = vpack.c.bf16 %v1009_v8, %v1005_v6  ;;  %v1455_v41 = vpack.c.bf16 %v1271_v47, %v1268_v31 }
 0x20a   :  { %1633 = vst [vmem:[#allocation2 + $0x470] sm:$0xff] %v1473_v35  ;;  %1620 = vst [vmem:[#allocation2 + $0x408] sm:$0xff] %v1460_v4 }
 0x20b   :  { %1634 = vst [vmem:[#allocation2 + $0x478] sm:$0xff] %v1474_v48  ;;  %1615 = vst [vmem:[#allocation2 + $0x3e0] sm:$0xff] %v1455_v41 }
 0x20d   :  { %v1013_v46 = vpop.f32.mrb[148].mxu1  ;;  %v6000_v60 = vpop.f32.mrb[148].mxu0 }
 0x20e   :  { %v1015_v63 = vpop.f32.mrb[149].mxu1  ;;  %v1284_v2 = vpop.f32.mrb[149].mxu0 }
 0x20f   :  { %v1017_v3 = vpop.f32.mrb[150].mxu1  ;;  %v6001_v15 = vpop.f32.mrb[150].mxu0 }
 0x210   :  { %v1478_v26 = vpack.c.bf16 %v1017_v3, %v1013_v46  ;;  %v1470_v36 = vpack.c.bf16 %v6001_v15, %v6000_v60  ;;  %v1019_v43 = vpop.f32.mrb[151].mxu1  ;;  %v1287_v1 = vpop.f32.mrb[151].mxu0 }
 0x211   :  { %v1479_v56 = vpack.c.bf16 %v1019_v43, %v1015_v63  ;;  %v1465_v62 = vpack.c.bf16 %v1287_v1, %v1284_v2 }
 0x212   :  { %1638 = vst [vmem:[#allocation2 + $0x498] sm:$0xff] %v1478_v26  ;;  %1630 = vst [vmem:[#allocation2 + $0x458] sm:$0xff] %v1470_v36 }
 0x213   :  { %1639 = vst [vmem:[#allocation2 + $0x4a0] sm:$0xff] %v1479_v56  ;;  %1625 = vst [vmem:[#allocation2 + $0x430] sm:$0xff] %v1465_v62 }
 0x215   :  { %v1023_v51 = vpop.f32.mrb[152].mxu1  ;;  %v6004_v54 = vpop.f32.mrb[152].mxu0 }
 0x216   :  { %v1025_v7 = vpop.f32.mrb[153].mxu1  ;;  %v1300_v9 = vpop.f32.mrb[153].mxu0 }
 0x217   :  { %v1027_v19 = vpop.f32.mrb[154].mxu1  ;;  %v6005_v22 = vpop.f32.mrb[154].mxu0 }
 0x218   :  { %v1483_v10 = vpack.c.bf16 %v1027_v19, %v1023_v51  ;;  %v1480_v12 = vpack.c.bf16 %v6005_v22, %v6004_v54  ;;  %v1029_v49 = vpop.f32.mrb[155].mxu1  ;;  %v1303_v13 = vpop.f32.mrb[155].mxu0 }
 0x219   :  { %v1484_v5 = vpack.c.bf16 %v1029_v49, %v1025_v7  ;;  %v1475_v17 = vpack.c.bf16 %v1303_v13, %v1300_v9 }
 0x21a   :  { %1643 = vst [vmem:[#allocation2 + $0x4c0] sm:$0xff] %v1483_v10  ;;  %1640 = vst [vmem:[#allocation2 + $0x4a8] sm:$0xff] %v1480_v12 }
 0x21b   :  { %1644 = vst [vmem:[#allocation2 + $0x4c8] sm:$0xff] %v1484_v5  ;;  %1635 = vst [vmem:[#allocation2 + $0x480] sm:$0xff] %v1475_v17 }
 0x21d   :  { %v1033_v59 = vpop.f32.mrb[156].mxu1  ;;  %v6008_v0 = vpop.f32.mrb[156].mxu0 }
 0x21e   :  { %v1035_v55 = vpop.f32.mrb[157].mxu1  ;;  %v1316_v61 = vpop.f32.mrb[157].mxu0 }
 0x21f   :  { %v1037_v20 = vpop.f32.mrb[158].mxu1  ;;  %v6009_v21 = vpop.f32.mrb[158].mxu0 }
 0x220   :  { %v1488_v25 = vpack.c.bf16 %v1037_v20, %v1033_v59  ;;  %v1490_v30 = vpack.c.bf16 %v6009_v21, %v6008_v0  ;;  %v1039_v23 = vpop.f32.mrb[159].mxu1  ;;  %v1319_v24 = vpop.f32.mrb[159].mxu0 }
 0x221   :  { %v1489_v28 = vpack.c.bf16 %v1039_v23, %v1035_v55  ;;  %v1485_v29 = vpack.c.bf16 %v1319_v24, %v1316_v61 }
 0x222   :  { %1648 = vst [vmem:[#allocation2 + $0x4e8] sm:$0xff] %v1488_v25  ;;  %1650 = vst [vmem:[#allocation2 + $0x4f8] sm:$0xff] %v1490_v30 }
 0x223   :  { %1649 = vst [vmem:[#allocation2 + $0x4f0] sm:$0xff] %v1489_v28  ;;  %1645 = vst [vmem:[#allocation2 + $0x4d0] sm:$0xff] %v1485_v29 }
 0x224 LB: > { %v10614_v57 = vld [vmem:[#allocation14_spill] sm:$0xff]  ;;  %v10615_v53 = vld [vmem:[#allocation13_spill] sm:$0xff]  ;;  %v10616_v44 = vld [vmem:[#allocation16_spill] sm:$0xff]  ;;  %s5645_s15 = smul.u32 320, %s7181_s2  ;;  %s7185_s17 = smov 64   ;;  %vm1752_vm0 = vcmask 64512   ;;  %s7181_s2 = sphi %s7864_s2, %s1708_s2  }
 0x225   : > { %v10617_v11 = vld [vmem:[#allocation18_spill] sm:$0xff]  ;;  %v10618_v50 = vld [vmem:[#allocation17_spill] sm:$0xff]  ;;  %v10619_v45 = vld [vmem:[#allocation11_spill] sm:$0xff]  ;;  %s7186_s18 = smov 56   ;;  %s7187_s19 = smov 120   ;;  %vm11030_vm1 = vcmask 523264  }
 0x226   : > { %v10620_v37 = vld [vmem:[#allocation9_spill] sm:$0xff]  ;;  %v10621_v14 = vld [vmem:[#allocation19_spill] sm:$0xff]  ;;  %v10623_v52 = vld [vmem:[#allocation12_spill] sm:$0xff]  ;;  %s7870_s16 = scalar_lea.vmem [#allocation2], %s5645_s15  ;;  %s7188_s20 = smov 48  }
 0x227   : > { %v10622_v58 = vld [vmem:[#allocation15_spill] sm:$0xff]  ;;  %v10624_v42 = vld [vmem:[#allocation10_spill] sm:$0xff]  ;;  %v10625_v27 = vld [vmem:[#allocation8_spill] sm:$0xff]  ;;  %s7189_s21 = smov 112   ;;  %s7190_s22 = smov 40  }
 0x228   : > { %v10626_v40 = vld [vmem:[#allocation7_spill] sm:$0xff]  ;;  %v10627_v38 = vld [vmem:[#allocation5_spill] sm:$0xff]  ;;  %v10628_v33 = vld [vmem:[#allocation4_spill] sm:$0xff]  ;;  %s7191_s23 = smov 104   ;;  %s7192_s24 = smov 32  }
 0x229   : > { %v10629_v39 = vld [vmem:[#allocation6_spill] sm:$0xff]  ;;  %s7193_s25 = smov 96   ;;  %s7194_s26 = smov 24   ;;  %vm11032_vm2 = vmmov %vm11030_vm1 }
 0x22a   : > { %v7873_v16 = vld [vmem:[%s7870_s16] sm:$0xff]  ;;  %v7876_v6 = vld [vmem:[%s7870_s16 + $0x50] sm:$0xff]  ;;  %v7883_v31 = vld [vmem:[%s7870_s16 + $0x28] sm:$0xff]  ;;  %s7195_s27 = smov 88   ;;  %s7196_s28 = smov 16  }
 0x22b   : > { %1736 = vrot.lane.b32.xlu0 %v7873_v16, %s7185_s17  ;;  %1740 = vrot.lane.b32.xlu1 %v7876_v6, %s7185_s17  ;;  %v7886_v32 = vld [vmem:[%s7870_s16 + $0x78] sm:$0xff]  ;;  %v7895_v34 = vld [vmem:[%s7870_s16 + $0xa0] sm:$0xff]  ;;  %s7197_s29 = smov 80   ;;  %s7198_s1 = smov 8   ;;  %vm11033_vm3 = vmmov %vm11030_vm1 }
 0x22c   : > { %6026 = vmatprep.mubr.msk.bf16.mxu0 %vm1752_vm0, %v7873_v16  ;;  %v7898_v35 = vld [vmem:[%s7870_s16 + $0xc8] sm:$0xff]  ;;  %v7905_v4 = vld [vmem:[%s7870_s16 + $0xf0] sm:$0xff]  ;;  %v7908_v8 = vld [vmem:[%s7870_s16 + $0x118] sm:$0xff]  ;;  %s7199_s30 = smov 72   ;;  %s5644_s4 = sshll.u32 %s7181_s2, 7 }
 0x22d   : > { %v7951_v54 = vld [vmem:[%s7870_s16 + $0x8] sm:$0xff]  ;;  %v7956_v7 = vld [vmem:[%s7870_s16 + $0x30] sm:$0xff]  ;;  %v7959_v9 = vld [vmem:[%s7870_s16 + $0x58] sm:$0xff]  ;;  %s10412_s7 = scalar_lea.vmem %s10488_s3, %s5644_s4  ;;  %s1708_s2 = sadd.s32 1, %s7181_s2  }
 0x22e   : > { %6042 = vmatprep.subr.bf16.mxu1 %v7951_v54  ;;  %v7965_v19 = vld [vmem:[%s7870_s16 + $0x80] sm:$0xff]  ;;  %v7970_v22 = vld [vmem:[%s7870_s16 + $0xa8] sm:$0xff]  ;;  %v7976_v10 = vld [vmem:[%s7870_s16 + $0xd0] sm:$0xff]  ;;  %p1705_p0 = scmp.ge.s32.totalorder %s1708_s2, 4  }
 0x22f   : > { %1738 = vrot.lane.b32.xlu0 %v7883_v31, %s7185_s17  ;;  %1742 = vrot.lane.b32.xlu1 %v7886_v32, %s7185_s17  ;;  %v7979_v12 = vld [vmem:[%s7870_s16 + $0xf8] sm:$0xff]  ;;  %v7985_v49 = vld [vmem:[%s7870_s16 + $0x120] sm:$0xff]  ;;  %vm11034_vm4 = vmmov %vm11030_vm1 }
 0x230   : > { %6043 = vmatpush3.bf16.msra.mxu1 %v7951_v54  ;;  %vm11035_vm5 = vmmov %vm11030_vm1 }
 0x231   : > { %6044 = vmatprep.subr.bf16.mxu1 %v7956_v7  ;;  %vm11036_vm6 = vmmov %vm11030_vm1 }
 0x232   : > { %vm11037_vm7 = vmmov %vm11030_vm1 }
 0x233   : > { %1744 = vrot.lane.b32.xlu0 %v7895_v34, %s7185_s17  ;;  %1746 = vrot.lane.b32.xlu1 %v7898_v35, %s7185_s17  ;;  %vm11038_vm8 = vmmov %vm11030_vm1 }
 0x234   : > { %6045 = vmatpush3.bf16.msra.mxu1 %v7956_v7  ;;  %vm11039_vm9 = vmmov %vm11030_vm1 }
 0x235   : > { %6046 = vmatprep.subr.bf16.mxu1 %v7959_v9  ;;  %vm11040_vm10 = vmmov %vm11030_vm1 }
 0x236   : > { %vm11041_vm11 = vmmov %vm11030_vm1 }
 0x237   : > { %1748 = vrot.lane.b32.xlu0 %v7905_v4, %s7185_s17  ;;  %1750 = vrot.lane.b32.xlu1 %v7908_v8, %s7185_s17  ;;  %vm11042_vm12 = vmmov %vm11030_vm1 }
 0x238   : > { %6047 = vmatpush3.bf16.msra.mxu1 %v7959_v9  ;;  %vm11043_vm13 = vmmov %vm11030_vm1 }
 0x239   : > { %6048 = vmatprep.subr.bf16.mxu1 %v7965_v19  ;;  %vm11044_vm14 = vmmov %vm11030_vm1 }
 0x23a   : > { %vm11045_vm15 = vmmov %vm11030_vm1 }
 0x23b   : > { %2179 = vrot.lane.b32.xlu1 %v7873_v16, %s7186_s18  ;;  %2181 = vrot.lane.b32.xlu0 %v7883_v31, %s7186_s18 }
 0x23c   : > { %6049 = vmatpush3.bf16.msra.mxu1 %v7965_v19 }
 0x23d   : > { %6050 = vmatprep.subr.bf16.mxu1 %v7970_v22 }
 0x23f   : > { %2183 = vrot.lane.b32.xlu1 %v7876_v6, %s7186_s18 }
 0x240   : > { %6051 = vmatpush3.bf16.msra.mxu1 %v7970_v22 }
 0x241   : > { %6052 = vmatprep.subr.bf16.mxu1 %v7976_v10 }
 0x244   : > { %6053 = vmatpush3.bf16.msra.mxu1 %v7976_v10 }
 0x245   : > { %6054 = vmatprep.subr.bf16.mxu1 %v7979_v12 }
 0x248   : > { %6055 = vmatpush3.bf16.msra.mxu1 %v7979_v12 }
 0x249   : > { %6056 = vmatprep.subr.bf16.mxu1 %v7985_v49 }
 0x24c   : > { %6057 = vmatpush3.bf16.msra.mxu1 %v7985_v49 }
 0x29d   : > { %v1737_v47 = vpop.permute.xlu0 %1736  ;;  %v1741_v60 = vpop.permute.xlu1 %1740 }
 0x29e   : > { %6530 = vmatprep.subr.msk.bf16.mxu0 %vm1752_vm0, %v1737_v47  ;;  %v1778_v48 = vsel %vm1752_vm0, %v1737_v47, 0  ;;  %v1784_v63 = vsel %vm1752_vm0, %v1741_v60, 0 }
 0x29f   : > { %6011 = vmatpush3.bf16.xpose.msra.mxu0 %v1778_v48 }
 0x2a1   : > { %v1739_v41 = vpop.permute.xlu0 %1738  ;;  %v1743_v2 = vpop.permute.xlu1 %1742 }
 0x2a2   : > { %6531 = vmatprep.subr.msk.bf16.mxu0 %vm1752_vm0, %v1739_v41  ;;  %v1781_v46 = vsel %vm1752_vm0, %v1739_v41, 0  ;;  %v1787_v3 = vsel %vm1752_vm0, %v1743_v2, 0 }
 0x2a5   : > { %v1745_v15 = vpop.permute.xlu0 %1744  ;;  %v1747_v36 = vpop.permute.xlu1 %1746 }
 0x2a6   : > { %v1790_v26 = vsel %vm1752_vm0, %v1745_v15, 0  ;;  %v1793_v43 = vsel %vm1752_vm0, %v1747_v36, 0 }
 0x2a7   : > { %6013 = vmatpush3.bf16.xpose.msra.mxu0 %v1781_v46 }
 0x2a8   : > { %6532 = vmatprep.subr.msk.bf16.mxu0 %vm1752_vm0, %v1741_v60 }
 0x2a9   : > { %v1749_v1 = vpop.permute.xlu0 %1748  ;;  %v1751_v62 = vpop.permute.xlu1 %1750 }
 0x2aa   : > { %v1796_v56 = vsel %vm1752_vm0, %v1749_v1, 0  ;;  %v1799_v51 = vsel %vm1752_vm0, %v1751_v62, 0 }
 0x2ad   : > { %v7989_v13 = vpop.permute.xlu1 %2179 }
 0x2ae   : > { %6538 = vmatprep.subr.msk.bf16.mxu1 %vm1752_vm0, %v7989_v13 }
 0x2af   : > { %6015 = vmatpush3.bf16.xpose.msra.mxu0 %v1784_v63 }
 0x2b0   : > { %6533 = vmatprep.subr.msk.bf16.mxu0 %vm1752_vm0, %v1743_v2 }
 0x2b7   : > { %6017 = vmatpush3.bf16.xpose.msra.mxu0 %v1787_v3 }
 0x2b8   : > { %6534 = vmatprep.subr.msk.bf16.mxu0 %vm1752_vm0, %v1745_v15 }
 0x2bf   : > { %6019 = vmatpush3.bf16.xpose.msra.mxu0 %v1790_v26 }
 0x2c0   : > { %6535 = vmatprep.subr.msk.bf16.mxu0 %vm1752_vm0, %v1747_v36 }
 0x2c7   : > { %6021 = vmatpush3.bf16.xpose.msra.mxu0 %v1793_v43 }
 0x2c8   : > { %6536 = vmatprep.subr.msk.bf16.mxu0 %vm1752_vm0, %v1749_v1 }
 0x2cf   : > { %6023 = vmatpush3.bf16.xpose.msra.mxu0 %v1796_v56 }
 0x2d0   : > { %6537 = vmatprep.subr.msk.bf16.mxu0 %vm1752_vm0, %v1751_v62 }
 0x2d7   : > { %6025 = vmatpush3.bf16.xpose.msra.mxu0 %v1799_v51 }
 0x2de   : > { %6027 = vmatmul.mubr.msk.bf16.vlgmr.msra.gmra.mrb[0].mxu0 %vm1752_vm0, %v7883_v31 }
 0x2df   : > { %6030 = vmatprep.mubr.msk.bf16.mxu0 %vm1752_vm0, %v7876_v6 }
 0x2e6   : > { %6031 = vmatmul.mubr.msk.bf16.gmra.mrb[4].mxu0 %vm1752_vm0, %v7886_v32 }
 0x2e7   : > { %6034 = vmatprep.mubr.msk.bf16.mxu0 %vm1752_vm0, %v7895_v34 }
 0x2ee   : > { %6035 = vmatmul.mubr.msk.bf16.gmra.mrb[8].mxu0 %vm1752_vm0, %v7898_v35 }
 0x2ef   : > { %6038 = vmatprep.mubr.msk.bf16.mxu0 %vm1752_vm0, %v7905_v4 }
 0x2f6   : > { %6039 = vmatmul.mubr.msk.bf16.gmra.mrb[12].mxu0 %vm1752_vm0, %v7908_v8 }
 0x3b1   : > { %v6028_v5 = vpop.f32.mrb[0].mxu0 }
 0x3b2   : > { %v7995_v17 = vadd.f32 %v6028_v5, %v10629_v39  ;;  %v1835_v59 = vpop.f32.mrb[1].mxu0 }
 0x3b3   : > { %v6029_v0 = vpop.f32.mrb[2].mxu0  ;;  %v8002_v20 = vadd.f32 %v1835_v59, %v10628_v33 }
 0x3b4   : > { %1902 = vmax.xlane.f32.xlu0 %v7995_v17  ;;  %v1838_v55 = vpop.f32.mrb[3].mxu0  ;;  %v8007_v25 = vadd.f32 %v6029_v0, %v10626_v40 }
 0x3b5   : > { %v7999_v61 = vadd.f32 %v1838_v55, %v10627_v38 }
 0x3b7   : > { %1900 = vmax.xlane.f32.xlu1 %v7999_v61 }
 0x3b8   : > { %1898 = vmax.xlane.f32.xlu0 %v8002_v20 }
 0x3b9   : > { %v6032_v21 = vpop.f32.mrb[4].mxu0 }
 0x3ba   : > { %v8010_v30 = vadd.f32 %v6032_v21, %v10624_v42  ;;  %v1851_v23 = vpop.f32.mrb[5].mxu0 }
 0x3bb   : > { %v6033_v24 = vpop.f32.mrb[6].mxu0  ;;  %v8013_v28 = vadd.f32 %v1851_v23, %v10625_v27 }
 0x3bc   : > { %v1854_v29 = vpop.f32.mrb[7].mxu0  ;;  %1910 = vmax.xlane.f32.xlu1 %v8010_v30  ;;  %1904 = vmax.xlane.f32.xlu0 %v8007_v25  ;;  %v8019_v48 = vadd.f32 %v6033_v24, %v10619_v45 }
 0x3bd   : > { %v8030_v3 = vadd.f32 %v1854_v29, %v10620_v37 }
 0x3c0   : > { %1906 = vmax.xlane.f32.xlu0 %v8013_v28 }
 0x3c1   : > { %v6036_v47 = vpop.f32.mrb[8].mxu0 }
 0x3c2   : > { %v1867_v41 = vpop.f32.mrb[9].mxu0  ;;  %v8033_v15 = vadd.f32 %v6036_v47, %v10614_v57 }
 0x3c3   : > { %v8022_v46 = vadd.f32 %v1867_v41, %v10623_v52  ;;  %v6037_v60 = vpop.f32.mrb[10].mxu0 }
 0x3c4   : > { %1912 = vmax.xlane.f32.xlu0 %v8019_v48  ;;  %v1870_v63 = vpop.f32.mrb[11].mxu0  ;;  %v8039_v56 = vadd.f32 %v6037_v60, %v10622_v58 }
 0x3c5   : > { %1914 = vmax.xlane.f32.xlu1 %v8022_v46  ;;  %v8027_v2 = vadd.f32 %v1870_v63, %v10615_v53 }
 0x3c8   : > { %1908 = vmax.xlane.f32.xlu0 %v8030_v3 }
 0x3c9   : > { %1916 = vmax.xlane.f32.xlu1 %v8027_v2  ;;  %v6040_v26 = vpop.f32.mrb[12].mxu0 }
 0x3ca   : > { %v1883_v36 = vpop.f32.mrb[13].mxu0  ;;  %v8042_v62 = vadd.f32 %v6040_v26, %v10617_v11 }
 0x3cb   : > { %v6041_v43 = vpop.f32.mrb[14].mxu0  ;;  %v8047_v51 = vadd.f32 %v1883_v36, %v10616_v44 }
 0x3cc   : > { %1918 = vmax.xlane.f32.xlu0 %v8033_v15  ;;  %v1886_v1 = vpop.f32.mrb[15].mxu0  ;;  %v8057_v5 = vadd.f32 %v6041_v43, %v10621_v14 }
 0x3cd   : > { %v8061_v59 = vadd.f32 %v1886_v1, %v10618_v50 }
 0x3d0   : > { %1920 = vmax.xlane.f32.xlu0 %v8039_v56 }
 0x3d4   : > { %1926 = vmax.xlane.f32.xlu0 %v8042_v62 }
 0x3d8   : > { %1922 = vmax.xlane.f32.xlu0 %v8047_v51 }
 0x3da   : > { %2185 = vrot.lane.b32.xlu1 %v7886_v32, %s7186_s18 }
 0x3ee   : > { %2187 = vrot.lane.b32.xlu0 %v7895_v34, %s7186_s18 }
 0x3f2   : > { %2189 = vrot.lane.b32.xlu0 %v7898_v35, %s7186_s18 }
 0x3fe   : > { %1928 = vmax.xlane.f32.xlu1 %v8057_v5 }
 0x40f   : > { %2165 = vrot.lane.b32.xlu1 %v7883_v31, %s7187_s19 }
 0x411   : > { %1924 = vmax.xlane.f32.xlu0 %v8061_v59 }
 0x413   : > { %2175 = vrot.lane.b32.xlu1 %v7905_v4, %s7187_s19 }
 0x417   : > { %2484 = vrot.lane.b32.xlu1 %v7951_v54, %s7185_s17  ;;  %v8082_v54 = vpop.permute.xlu0 %2181 }
 0x41b   : > { %2490 = vrot.lane.b32.xlu1 %v7965_v19, %s7185_s17  ;;  %v8085_v19 = vpop.permute.xlu1 %2183 }
 0x41f   : > { %2492 = vrot.lane.b32.xlu1 %v7970_v22, %s7185_s17 }
 0x423   : > { %2496 = vrot.lane.b32.xlu1 %v7979_v12, %s7185_s17 }
 0x427   : > { %2191 = vrot.lane.b32.xlu0 %v7905_v4, %s7186_s18  ;;  %2661 = vrot.lane.b32.xlu1 %v7873_v16, %s7188_s20 }
 0x42b   : > { %2193 = vrot.lane.b32.xlu0 %v7908_v8, %s7186_s18 }
 0x42f   : > { %2163 = vrot.lane.b32.xlu0 %v7873_v16, %s7187_s19 }
 0x433   : > { %2167 = vrot.lane.b32.xlu0 %v7876_v6, %s7187_s19 }
 0x437   : > { %2169 = vrot.lane.b32.xlu0 %v7886_v32, %s7187_s19 }
 0x43b   : > { %2171 = vrot.lane.b32.xlu0 %v7895_v34, %s7187_s19 }
 0x43f   : > { %2173 = vrot.lane.b32.xlu0 %v7898_v35, %s7187_s19 }
 0x441   : > { %v1903_v22 = vpop.xlane.xlu0 %1902 }
 0x442   : > { %v1932_v21 = vsub.f32 %v7995_v17, %v1903_v22 }
 0x443   : > { %2177 = vrot.lane.b32.xlu0 %v7908_v8, %s7187_s19 }
 0x444   : > { %v1901_v12 = vpop.xlane.xlu1 %1900  ;;  %v1950_v41 = vmul.f32 1.442695, %v1932_v21 }
 0x445   : > { %v1931_v0 = vsub.f32 %v7999_v61, %v1901_v12  ;;  %v1899_v55 = vpop.xlane.xlu0 %1898 }
 0x446   : > { %v1930_v23 = vsub.f32 %v8002_v20, %v1899_v55 }
 0x447   : > { %v1948_v24 = vmul.f32 1.442695, %v1931_v0  ;;  %2486 = vrot.lane.b32.xlu0 %v7956_v7, %s7185_s17 }
 0x448   : > { %v1946_v29 = vmul.f32 1.442695, %v1930_v23 }
 0x449   : > { %6647 = vpow2.f32 %v1948_v24  ;;  %v1905_v47 = vpop.xlane.xlu0 %1904  ;;  %v1911_v63 = vpop.xlane.xlu1 %1910 }
 0x44a   : > { %6649 = vpow2.f32 %v1946_v29  ;;  %v1933_v60 = vsub.f32 %v8007_v25, %v1905_v47  ;;  %v1936_v17 = vsub.f32 %v8010_v30, %v1911_v63 }
 0x44b   : > { %2488 = vrot.lane.b32.xlu0 %v7959_v9, %s7185_s17  ;;  %6651 = vpow2.f32 %v1950_v41 }
 0x44c   : > { %v1952_v61 = vmul.f32 1.442695, %v1933_v60  ;;  %v1958_v36 = vmul.f32 1.442695, %v1936_v17 }
 0x44d   : > { %v1907_v26 = vpop.xlane.xlu0 %1906 }
 0x44e   : > { %6653 = vpow2.f32 %v1952_v61  ;;  %v1934_v20 = vsub.f32 %v8013_v28, %v1907_v26 }
 0x44f   : > { %2494 = vrot.lane.b32.xlu0 %v7976_v10, %s7185_s17  ;;  %6655 = vpow2.f32 %v1958_v36 }
 0x450   : > { %v1954_v22 = vmul.f32 1.442695, %v1934_v20 }
 0x451   : > { %v1913_v7 = vpop.xlane.xlu0 %1912 }
 0x452   : > { %v1937_v43 = vsub.f32 %v8019_v48, %v1913_v7  ;;  %v1915_v25 = vpop.xlane.xlu1 %1914  ;;  %6657 = vpow2.f32 %v1954_v22  ;;  %v2223_v7 = vsel %vm1752_vm0, %v8082_v54, 0 }
 0x453   : > { %v8101_v1 = vpop.eup %6647  ;;  %v1938_v9 = vsub.f32 %v8022_v46, %v1915_v25  ;;  %2498 = vrot.lane.b32.xlu0 %v7985_v49, %s7185_s17 }
 0x454   : > { %v8106_v30 = vpop.eup %6649  ;;  %v1960_v12 = vmul.f32 1.442695, %v1937_v43 }
 0x455   : > { %v1962_v28 = vmul.f32 1.442695, %v1938_v9  ;;  %v1909_v0 = vpop.xlane.xlu0 %1908  ;;  %v2026_v10 = vpack.c.bf16 %v8101_v1, %v8106_v30  ;;  %v8112_v46 = vpop.eup %6651 }
 0x456   : > { %v1935_v48 = vsub.f32 %v8030_v3, %v1909_v0  ;;  %v1917_v55 = vpop.xlane.xlu1 %1916  ;;  %6659 = vpow2.f32 %v1960_v12  ;;  %v2226_v12 = vsel %vm1752_vm0, %v8085_v19, 0 }
 0x457   : > { %v1939_v21 = vsub.f32 %v8027_v2, %v1917_v55  ;;  %6058 = vmatprep.mubr.bf16.mxu1 %v2026_v10  ;;  %6661 = vpow2.f32 %v1962_v28  ;;  %v2220_v2 = vsel %vm1752_vm0, %v7989_v13, 0  ;;  %2663 = vrot.lane.b32.xlu0 %v7883_v31, %s7188_s20 }
 0x458   : > { %v1956_v49 = vmul.f32 1.442695, %v1935_v48  ;;  %v8114_v23 = vpop.eup %6653 }
 0x459   : > { %v1964_v24 = vmul.f32 1.442695, %v1939_v21  ;;  %v1919_v29 = vpop.xlane.xlu0 %1918  ;;  %v2027_v3 = vpack.c.bf16 %v8114_v23, %v8112_v46  ;;  %v8124_v61 = vpop.eup %6655 }
 0x45a   : > { %6663 = vpow2.f32 %v1956_v49  ;;  %v1940_v47 = vsub.f32 %v8033_v15, %v1919_v29  ;;  %10630 = vst [vmem:[#allocation20_spill] sm:$0xff] %v8124_v61  ;;  %v2186_v28 = vpop.permute.xlu1 %2185 }
 0x45b   : > { %6665 = vpow2.f32 %v1964_v24  ;;  %6059 = vmatmul.mubr.bf16.vlgmr.msra.gmra.mrb[0].mxu1 %v2027_v3  ;;  %v2229_v48 = vsel %vm1752_vm0, %v2186_v28, 0  ;;  %2665 = vrot.lane.b32.xlu0 %v7876_v6, %s7188_s20 }
 0x45c   : > { %v1966_v41 = vmul.f32 1.442695, %v1940_v47  ;;  %6075 = vmatpush3.bf16.xpose.msra.mxu1 %v2220_v2  ;;  %v8126_v15 = vpop.eup %6657 }
 0x45d   : > { %v1921_v60 = vpop.xlane.xlu0 %1920  ;;  %6539 = vmatprep.subr.msk.bf16.mxu1 %vm1752_vm0, %v8082_v54  ;;  %10631 = vst [vmem:[#allocation21_spill] sm:$0xff] %v8126_v15 }
 0x45e   : > { %v1941_v63 = vsub.f32 %v8039_v56, %v1921_v60  ;;  %6667 = vpow2.f32 %v1966_v41 }
 0x460   : > { %v1968_v26 = vmul.f32 1.442695, %v1941_v63  ;;  %v8128_v17 = vpop.eup %6659 }
 0x461   : > { %v8130_v20 = vpop.eup %6661  ;;  %v2029_v43 = vpack.c.bf16 %v8128_v17, %v8124_v61  ;;  %v1927_v22 = vpop.xlane.xlu0 %1926 }
 0x462   : > { %6669 = vpow2.f32 %v1968_v26  ;;  %10632 = vst [vmem:[#allocation22_spill] sm:$0xff] %v8130_v20  ;;  %v1944_v3 = vsub.f32 %v8042_v62, %v1927_v22 }
 0x464   : > { %v8132_v13 = vpop.eup %6663  ;;  %6077 = vmatpush3.bf16.xpose.msra.mxu1 %v2223_v7  ;;  %v1974_v26 = vmul.f32 1.442695, %v1944_v3 }
 0x465   : > { %10633 = vst [vmem:[#allocation23_spill] sm:$0xff] %v8132_v13  ;;  %v8136_v36 = vpop.eup %6665  ;;  %v2028_v56 = vpack.c.bf16 %v8132_v13, %v8126_v15  ;;  %6540 = vmatprep.subr.msk.bf16.mxu1 %vm1752_vm0, %v8085_v19  ;;  %v1923_v10 = vpop.xlane.xlu0 %1922 }
 0x466   : > { %10634 = vst [vmem:[#allocation24_spill] sm:$0xff] %v8136_v36  ;;  %v2030_v25 = vpack.c.bf16 %v8136_v36, %v8130_v20  ;;  %v1942_v29 = vsub.f32 %v8047_v51, %v1923_v10 }
 0x467   : > { %6062 = vmatprep.mubr.bf16.mxu1 %v2028_v56 }
 0x468   : > { %6063 = vmatmul.mubr.bf16.gmra.mrb[4].mxu1 %v2029_v43  ;;  %v8146_v54 = vpop.eup %6667  ;;  %v1970_v2 = vmul.f32 1.442695, %v1942_v29 }
 0x469   : > { %6066 = vmatprep.mubr.bf16.mxu1 %v2030_v25  ;;  %10635 = vst [vmem:[#allocation25_spill] sm:$0xff] %v8146_v54  ;;  %v2188_v55 = vpop.permute.xlu0 %2187 }
 0x46a   : > { %v2232_v21 = vsel %vm1752_vm0, %v2188_v55, 0  ;;  %6671 = vpow2.f32 %v1970_v2 }
 0x46c   : > { %v8148_v9 = vpop.eup %6669  ;;  %6079 = vmatpush3.bf16.xpose.msra.mxu1 %v2226_v12 }
 0x46d   : > { %10636 = vst [vmem:[#allocation26_spill] sm:$0xff] %v8148_v9  ;;  %v2031_v0 = vpack.c.bf16 %v8148_v9, %v8146_v54  ;;  %6541 = vmatprep.subr.msk.bf16.mxu1 %vm1752_vm0, %v2186_v28  ;;  %v2190_v49 = vpop.permute.xlu0 %2189 }
 0x46e   : > { %v2235_v19 = vsel %vm1752_vm0, %v2190_v49, 0 }
 0x470   : > { %6067 = vmatmul.mubr.bf16.gmra.mrb[8].mxu1 %v2031_v0 }
 0x474   : > { %6081 = vmatpush3.bf16.xpose.msra.mxu1 %v2229_v48 }
 0x475   : > { %6542 = vmatprep.subr.msk.bf16.mxu1 %vm1752_vm0, %v2188_v55 }
 0x47c   : > { %6083 = vmatpush3.bf16.xpose.msra.mxu1 %v2232_v21 }
 0x47d   : > { %6543 = vmatprep.subr.msk.bf16.mxu1 %vm1752_vm0, %v2190_v49 }
 0x484   : > { %6085 = vmatpush3.bf16.xpose.msra.mxu1 %v2235_v19 }
 0x48b   : > { %v1929_v24 = vpop.xlane.xlu1 %1928 }
 0x48c   : > { %v1945_v47 = vsub.f32 %v8057_v5, %v1929_v24  ;;  %v8168_v5 = vpop.eup %6671 }
 0x48d   : > { %10637 = vst [vmem:[#allocation27_spill] sm:$0xff] %v8168_v5 }
 0x48e   : > { %v1976_v41 = vmul.f32 1.442695, %v1945_v47 }
 0x48f   : > { %v2166_v10 = vpop.permute.xlu1 %2165 }
 0x490   : > { %6673 = vpow2.f32 %v1976_v41 }
 0x493   : > { %v2176_v19 = vpop.permute.xlu1 %2175 }
 0x497   : > { %v2485_v29 = vpop.permute.xlu1 %2484 }
 0x498   : > { %6106 = vmatprep.subr.bf16.mxu0 %v2485_v29 }
 0x499   : > { %6107 = vmatpush3.bf16.msra.mxu0 %v2485_v29 }
 0x49e   : > { %v1925_v60 = vpop.xlane.xlu0 %1924 }
 0x49f   : > { %v1943_v63 = vsub.f32 %v8061_v59, %v1925_v60  ;;  %v8170_v59 = vpop.eup %6673 }
 0x4a0   : > { %10638 = vst [vmem:[#allocation28_spill] sm:$0xff] %v8170_v59 }
 0x4a1   : > { %v1972_v7 = vmul.f32 1.442695, %v1943_v63 }
 0x4a2   : > { %v2192_v56 = vpop.permute.xlu0 %2191 }
 0x4a3   : > { %6675 = vpow2.f32 %v1972_v7  ;;  %6544 = vmatprep.subr.msk.bf16.mxu1 %vm1752_vm0, %v2192_v56  ;;  %v2238_v43 = vsel %vm1752_vm0, %v2192_v56, 0 }
 0x4a4   : > { %6677 = vpow2.f32 %v1974_v26  ;;  %6087 = vmatpush3.bf16.xpose.msra.mxu1 %v2238_v43 }
 0x4a6   : > { %v2194_v51 = vpop.permute.xlu0 %2193 }
 0x4a7   : > { %6545 = vmatprep.subr.msk.bf16.mxu1 %vm1752_vm0, %v2194_v51  ;;  %v2241_v62 = vsel %vm1752_vm0, %v2194_v51, 0 }
 0x4aa   : > { %v2164_v0 = vpop.permute.xlu0 %2163 }
 0x4ac   : > { %6089 = vmatpush3.bf16.xpose.msra.mxu1 %v2241_v62 }
 0x4ad   : > { %v8172_v25 = vpop.eup %6675 }
 0x4ae   : > { %10639 = vst [vmem:[#allocation29_spill] sm:$0xff] %v8172_v25  ;;  %v8174_v22 = vpop.eup %6677  ;;  %v2032_v12 = vpack.c.bf16 %v8172_v25, %v8168_v5  ;;  %v2168_v48 = vpop.permute.xlu0 %2167 }
 0x4af   : > { %10640 = vst [vmem:[#allocation30_spill] sm:$0xff] %v8174_v22  ;;  %v2033_v28 = vpack.c.bf16 %v8170_v59, %v8174_v22 }
 0x4b0   : > { %6070 = vmatprep.mubr.bf16.mxu1 %v2032_v12 }
 0x4b1   : > { %6071 = vmatmul.mubr.bf16.gmra.mrb[12].mxu1 %v2033_v28 }
 0x4b2   : > { %6090 = vmatprep.mubr.msk.bf16.mxu1 %vm1752_vm0, %v2164_v0  ;;  %v2170_v55 = vpop.permute.xlu0 %2169  ;;  %v2491_v0 = vpop.permute.xlu1 %2490 }
 0x4b6   : > { %v2172_v21 = vpop.permute.xlu0 %2171 }
 0x4b9   : > { %6091 = vmatmul.mubr.msk.bf16.vlgmr.msra.gmra.mrb[16].mxu1 %vm1752_vm0, %v2166_v10  ;;  %v2493_v10 = vpop.permute.xlu1 %2492 }
 0x4ba   : > { %6094 = vmatprep.mubr.msk.bf16.mxu1 %vm1752_vm0, %v2168_v48  ;;  %v2174_v49 = vpop.permute.xlu0 %2173 }
 0x4be   : > { %v2178_v24 = vpop.permute.xlu0 %2177 }
 0x4c1   : > { %6095 = vmatmul.mubr.msk.bf16.gmra.mrb[20].mxu1 %vm1752_vm0, %v2170_v55  ;;  %v2497_v55 = vpop.permute.xlu1 %2496 }
 0x4c2   : > { %6098 = vmatprep.mubr.msk.bf16.mxu1 %vm1752_vm0, %v2172_v21  ;;  %v2487_v47 = vpop.permute.xlu0 %2486 }
 0x4c3   : > { %6108 = vmatprep.subr.bf16.mxu0 %v2487_v47 }
 0x4c4   : > { %6109 = vmatpush3.bf16.msra.mxu0 %v2487_v47 }
 0x4c6   : > { %v2489_v62 = vpop.permute.xlu0 %2488 }
 0x4c7   : > { %6110 = vmatprep.subr.bf16.mxu0 %v2489_v62 }
 0x4c8   : > { %6111 = vmatpush3.bf16.msra.mxu0 %v2489_v62 }
 0x4c9   : > { %6099 = vmatmul.mubr.msk.bf16.gmra.mrb[24].mxu1 %vm1752_vm0, %v2174_v49  ;;  %6112 = vmatprep.subr.bf16.mxu0 %v2491_v0  ;;  %v8218_v49 = vpop.permute.xlu1 %2661 }
 0x4ca   : > { %6102 = vmatprep.mubr.msk.bf16.mxu1 %vm1752_vm0, %v2176_v19  ;;  %v2495_v48 = vpop.permute.xlu0 %2494 }
 0x4cc   : > { %6113 = vmatpush3.bf16.msra.mxu0 %v2491_v0 }
 0x4cd   : > { %6114 = vmatprep.subr.bf16.mxu0 %v2493_v10 }
 0x4ce   : > { %v2499_v21 = vpop.permute.xlu0 %2498 }
 0x4d0   : > { %6115 = vmatpush3.bf16.msra.mxu0 %v2493_v10 }
 0x4d1   : > { %6103 = vmatmul.mubr.msk.bf16.gmra.mrb[28].mxu1 %vm1752_vm0, %v2178_v24  ;;  %6116 = vmatprep.subr.bf16.mxu0 %v2495_v48 }
 0x4d4   : > { %6117 = vmatpush3.bf16.msra.mxu0 %v2495_v48 }
 0x4d5   : > { %6118 = vmatprep.subr.bf16.mxu0 %v2497_v55 }
 0x4d8   : > { %6119 = vmatpush3.bf16.msra.mxu0 %v2497_v55 }
 0x4d9   : > { %6120 = vmatprep.subr.bf16.mxu0 %v2499_v21 }
 0x4dc   : > { %6121 = vmatpush3.bf16.msra.mxu0 %v2499_v21 }
 0x4dd   : > { %6546 = vmatprep.subr.msk.bf16.mxu0 %vm1752_vm0, %v8218_v49 }
 0x52e   : > { %v8194_v3 = vpop.f32.mrb[0].mxu1 }
 0x52f   : > { %10641 = vst [vmem:[#allocation31_spill] sm:$0xff] %v8194_v3  ;;  %v8196_v2 = vpop.f32.mrb[1].mxu1 }
 0x530   : > { %10642 = vst [vmem:[#allocation32_spill] sm:$0xff] %v8196_v2  ;;  %v8198_v41 = vpop.f32.mrb[2].mxu1 }
 0x531   : > { %10643 = vst [vmem:[#allocation33_spill] sm:$0xff] %v8198_v41  ;;  %v8200_v60 = vpop.f32.mrb[3].mxu1 }
 0x532   : > { %10644 = vst [vmem:[#allocation34_spill] sm:$0xff] %v8200_v60 }
 0x53b   : > { %v8202_v63 = vpop.f32.mrb[4].mxu1 }
 0x53c   : > { %10645 = vst [vmem:[#allocation35_spill] sm:$0xff] %v8202_v63  ;;  %v8204_v26 = vpop.f32.mrb[5].mxu1 }
 0x53d   : > { %10646 = vst [vmem:[#allocation36_spill] sm:$0xff] %v8204_v26  ;;  %v8206_v7 = vpop.f32.mrb[6].mxu1 }
 0x53e   : > { %10647 = vst [vmem:[#allocation37_spill] sm:$0xff] %v8206_v7  ;;  %v8208_v56 = vpop.f32.mrb[7].mxu1 }
 0x53f   : > { %10648 = vst [vmem:[#allocation38_spill] sm:$0xff] %v8208_v56 }
 0x543   : > { %v8210_v43 = vpop.f32.mrb[8].mxu1 }
 0x544   : > { %10649 = vst [vmem:[#allocation39_spill] sm:$0xff] %v8210_v43  ;;  %v8212_v51 = vpop.f32.mrb[9].mxu1 }
 0x545   : > { %10650 = vst [vmem:[#allocation40_spill] sm:$0xff] %v8212_v51  ;;  %v8214_v12 = vpop.f32.mrb[10].mxu1 }
 0x546   : > { %10651 = vst [vmem:[#allocation41_spill] sm:$0xff] %v8214_v12  ;;  %v8216_v28 = vpop.f32.mrb[11].mxu1 }
 0x547   : > { %10652 = vst [vmem:[#allocation42_spill] sm:$0xff] %v8216_v28 }
 0x584   : > { %v8222_v19 = vpop.f32.mrb[12].mxu1 }
 0x585   : > { %10653 = vst [vmem:[#allocation43_spill] sm:$0xff] %v8222_v19  ;;  %v8224_v24 = vpop.f32.mrb[13].mxu1 }
 0x586   : > { %10654 = vst [vmem:[#allocation44_spill] sm:$0xff] %v8224_v24  ;;  %v8226_v29 = vpop.f32.mrb[14].mxu1 }
 0x587   : > { %10655 = vst [vmem:[#allocation45_spill] sm:$0xff] %v8226_v29  ;;  %v8228_v47 = vpop.f32.mrb[15].mxu1 }
 0x588   : > { %10656 = vst [vmem:[#allocation46_spill] sm:$0xff] %v8228_v47 }
 0x58c   : > { %v6092_v62 = vpop.f32.mrb[16].mxu1 }
 0x58d   : > { %v8231_v0 = vadd.f32 %v6092_v62, %v10629_v39  ;;  %v2277_v10 = vpop.f32.mrb[17].mxu1 }
 0x58e   : > { %v8234_v48 = vadd.f32 %v2277_v10, %v10628_v33  ;;  %v6093_v55 = vpop.f32.mrb[18].mxu1 }
 0x58f   : > { %2344 = vmax.xlane.f32.xlu0 %v8231_v0  ;;  %v2280_v21 = vpop.f32.mrb[19].mxu1  ;;  %v8239_v18 = vadd.f32 %v6093_v55, %v10626_v40 }
 0x590   : > { %2340 = vmax.xlane.f32.xlu1 %v8234_v48  ;;  %v2281_v63 = vadd.f32 %v2280_v21, %v10627_v38 }
 0x594   : > { %2346 = vmax.xlane.f32.xlu1 %v8239_v18  ;;  %v6096_v47 = vpop.f32.mrb[20].mxu1 }
 0x595   : > { %v2293_v12 = vpop.f32.mrb[21].mxu1  ;;  %v8251_v26 = vadd.f32 %v6096_v47, %v10624_v42 }
 0x596   : > { %v6097_v28 = vpop.f32.mrb[22].mxu1  ;;  %v8248_v60 = vadd.f32 %v2293_v12, %v10625_v27 }
 0x597   : > { %v2296_v62 = vpop.f32.mrb[23].mxu1  ;;  %v2305_v3 = vadd.f32 %v6097_v28, %v10619_v45 }
 0x598   : > { %v8257_v2 = vadd.f32 %v2296_v62, %v10620_v37 }
 0x59c   : > { %v6100_v24 = vpop.f32.mrb[24].mxu1 }
 0x59d   : > { %v2309_v7 = vpop.f32.mrb[25].mxu1  ;;  %v8261_v21 = vadd.f32 %v6100_v24, %v10614_v57 }
 0x59e   : > { %v6101_v43 = vpop.f32.mrb[26].mxu1  ;;  %v8265_v12 = vadd.f32 %v2309_v7, %v10623_v52 }
 0x59f   : > { %v2312_v10 = vpop.f32.mrb[27].mxu1 }
 0x5a0   : > { %v8269_v47 = vadd.f32 %v2312_v10, %v10615_v53 }
 0x5a4   : > { %v6104_v56 = vpop.f32.mrb[28].mxu1 }
 0x5a5   : > { %2669 = vrot.lane.b32.xlu0 %v7895_v34, %s7188_s20  ;;  %2667 = vrot.lane.b32.xlu1 %v7886_v32, %s7188_s20  ;;  %v2325_v51 = vpop.f32.mrb[29].mxu1  ;;  %v8273_v28 = vadd.f32 %v6104_v56, %v10617_v11  ;;  %v8289_v56 = vadd.f32 %v6101_v43, %v10622_v58 }
 0x5a6   : > { %v6105_v55 = vpop.f32.mrb[30].mxu1  ;;  %v8279_v24 = vadd.f32 %v2325_v51, %v10616_v44 }
 0x5a7   : > { %v2328_v41 = vpop.f32.mrb[31].mxu1  ;;  %v8294_v51 = vadd.f32 %v6105_v55, %v10621_v14 }
 0x5a8   : > { %v8283_v7 = vadd.f32 %v2328_v41, %v10618_v50 }
 0x5c4   : > { %2342 = vmax.xlane.f32.xlu0 %v2281_v63 }
 0x5c8   : > { %2348 = vmax.xlane.f32.xlu0 %v8248_v60 }
 0x5c9   : > { %2352 = vmax.xlane.f32.xlu1 %v8251_v26 }
 0x5cd   : > { %2354 = vmax.xlane.f32.xlu1 %v2305_v3 }
 0x5d1   : > { %2350 = vmax.xlane.f32.xlu1 %v8257_v2 }
 0x5d5   : > { %2360 = vmax.xlane.f32.xlu1 %v8261_v21 }
 0x5d9   : > { %2356 = vmax.xlane.f32.xlu1 %v8265_v12 }
 0x5dd   : > { %2358 = vmax.xlane.f32.xlu1 %v8269_v47 }
 0x5de   : > { %2671 = vrot.lane.b32.xlu0 %v7898_v35, %s7188_s20 }
 0x5e1   : > { %2368 = vmax.xlane.f32.xlu1 %v8273_v28 }
 0x5e5   : > { %2364 = vmax.xlane.f32.xlu1 %v8279_v24 }
 0x5e9   : > { %2366 = vmax.xlane.f32.xlu1 %v8283_v7 }
 0x5fa   : > { %2675 = vrot.lane.b32.xlu1 %v7908_v8, %s7188_s20 }
 0x5fd   : > { %2362 = vmax.xlane.f32.xlu0 %v8289_v56 }
 0x5fe   : > { %2653 = vrot.lane.b32.xlu1 %v7895_v34, %s7189_s21  ;;  %v2664_v34 = vpop.permute.xlu0 %2663 }
 0x601   : > { %2370 = vmax.xlane.f32.xlu0 %v8294_v51 }
 0x602   : > { %2657 = vrot.lane.b32.xlu1 %v7905_v4, %s7189_s21  ;;  %v8306_v41 = vpop.permute.xlu0 %2665 }
 0x617   : > { %2673 = vrot.lane.b32.xlu0 %v7905_v4, %s7188_s20 }
 0x61b   : > { %2645 = vrot.lane.b32.xlu0 %v7873_v16, %s7189_s21 }
 0x61c   : > { %v2345_v62 = vpop.xlane.xlu0 %2344 }
 0x61d   : > { %v2341_v43 = vpop.xlane.xlu1 %2340 }
 0x61e   : > { %v2372_v4 = vsub.f32 %v8234_v48, %v2341_v43 }
 0x61f   : > { %2647 = vrot.lane.b32.xlu0 %v7883_v31, %s7189_s21 }
 0x620   : > { %v8309_v55 = vpop.permute.xlu0 %2669  ;;  %v2388_v31 = vmul.f32 1.442695, %v2372_v4 }
 0x621   : > { %v2347_v10 = vpop.xlane.xlu1 %2346 }
 0x622   : > { %v2375_v16 = vsub.f32 %v8239_v18, %v2347_v10  ;;  %6679 = vpow2.f32 %v2388_v31 }
 0x623   : > { %2649 = vrot.lane.b32.xlu0 %v7876_v6, %s7189_s21  ;;  %v2374_v6 = vsub.f32 %v8231_v0, %v2345_v62 }
 0x625   : > { %v2392_v19 = vmul.f32 1.442695, %v2374_v6 }
 0x627   : > { %2651 = vrot.lane.b32.xlu0 %v7886_v32, %s7189_s21  ;;  %v2394_v32 = vmul.f32 1.442695, %v2375_v16 }
 0x629   : > { %6681 = vpow2.f32 %v2394_v32 }
 0x62b   : > { %2655 = vrot.lane.b32.xlu0 %v7898_v35, %s7189_s21  ;;  %v8313_v35 = vpop.permute.xlu1 %2667 }
 0x62c   : > { %v8317_v10 = vpop.eup %6679 }
 0x62d   : > { %10657 = vst [vmem:[#allocation47_spill] sm:$0xff] %v8317_v10 }
 0x62f   : > { %2659 = vrot.lane.b32.xlu0 %v7908_v8, %s7189_s21 }
 0x651   : > { %v2343_v29 = vpop.xlane.xlu0 %2342 }
 0x652   : > { %v2373_v8 = vsub.f32 %v2281_v63, %v2343_v29  ;;  %v8319_v63 = vpop.eup %6681 }
 0x653   : > { %10658 = vst [vmem:[#allocation48_spill] sm:$0xff] %v8319_v63 }
 0x654   : > { %v2390_v59 = vmul.f32 1.442695, %v2373_v8 }
 0x655   : > { %v2349_v22 = vpop.xlane.xlu0 %2348 }
 0x656   : > { %6683 = vpow2.f32 %v2390_v59  ;;  %v2353_v5 = vpop.xlane.xlu1 %2352  ;;  %v2376_v48 = vsub.f32 %v8248_v60, %v2349_v22 }
 0x657   : > { %6685 = vpow2.f32 %v2392_v19  ;;  %v2378_v0 = vsub.f32 %v8251_v26, %v2353_v5 }
 0x658   : > { %v2396_v62 = vmul.f32 1.442695, %v2376_v48 }
 0x659   : > { %v2400_v59 = vmul.f32 1.442695, %v2378_v0  ;;  %v2705_v0 = vsel %vm1752_vm0, %v2664_v34, 0 }
 0x65a   : > { %v2355_v43 = vpop.xlane.xlu1 %2354  ;;  %6687 = vpow2.f32 %v2396_v62 }
 0x65b   : > { %v2379_v18 = vsub.f32 %v2305_v3, %v2355_v43 }
 0x65d   : > { %v2402_v4 = vmul.f32 1.442695, %v2379_v18 }
 0x65e   : > { %v2351_v16 = vpop.xlane.xlu1 %2350 }
 0x65f   : > { %v2377_v29 = vsub.f32 %v8257_v2, %v2351_v16  ;;  %6689 = vpow2.f32 %v2402_v4  ;;  %v2702_v2 = vsel %vm1752_vm0, %v8218_v49, 0 }
 0x660   : > { %v8322_v6 = vpop.eup %6683 }
 0x661   : > { %10659 = vst [vmem:[#allocation49_spill] sm:$0xff] %v8322_v6  ;;  %v8324_v31 = vpop.eup %6685  ;;  %v2398_v22 = vmul.f32 1.442695, %v2377_v29  ;;  %v2468_v3 = vpack.c.bf16 %v8322_v6, %v8317_v10 }
 0x662   : > { %10660 = vst [vmem:[#allocation50_spill] sm:$0xff] %v8324_v31  ;;  %v2361_v5 = vpop.xlane.xlu1 %2360  ;;  %v2469_v60 = vpack.c.bf16 %v8319_v63, %v8324_v31  ;;  %v8517_v63 = vld [vmem:[%s7870_s16 + $0xa0] sm:$0xff] }
 0x663   : > { %6691 = vpow2.f32 %v2398_v22  ;;  %6122 = vmatprep.mubr.bf16.mxu0 %v2468_v3  ;;  %v2711_v3 = vsel %vm1752_vm0, %v8313_v35, 0 }
 0x664   : > { %6693 = vpow2.f32 %v2400_v59  ;;  %6123 = vmatmul.mubr.bf16.vlgmr.msra.gmra.mrb[16].mxu0 %v2469_v60  ;;  %v8334_v48 = vpop.eup %6687 }
 0x665   : > { %6139 = vmatpush3.bf16.xpose.msra.mxu0 %v2702_v2  ;;  %10661 = vst [vmem:[#allocation51_spill] sm:$0xff] %v8334_v48  ;;  %v2714_v2 = vsel %vm1752_vm0, %v8309_v55, 0 }
 0x666   : > { %6547 = vmatprep.subr.msk.bf16.mxu0 %vm1752_vm0, %v2664_v34  ;;  %v2357_v26 = vpop.xlane.xlu1 %2356  ;;  %v2708_v34 = vsel %vm1752_vm0, %v8306_v41, 0 }
 0x667   : > { %v2380_v19 = vsub.f32 %v8265_v12, %v2357_v26  ;;  %v2672_v26 = vpop.permute.xlu0 %2671 }
 0x669   : > { %v2404_v32 = vmul.f32 1.442695, %v2380_v19  ;;  %v8337_v18 = vpop.eup %6689  ;;  %v2382_v19 = vsub.f32 %v8261_v21, %v2361_v5 }
 0x66a   : > { %v2359_v8 = vpop.xlane.xlu1 %2358  ;;  %10662 = vst [vmem:[#allocation52_spill] sm:$0xff] %v8337_v18 }
 0x66b   : > { %v2381_v43 = vsub.f32 %v8269_v47, %v2359_v8  ;;  %6695 = vpow2.f32 %v2404_v32 }
 0x66d   : > { %v8340_v62 = vpop.eup %6691  ;;  %v2406_v4 = vmul.f32 1.442695, %v2381_v43  ;;  %6141 = vmatpush3.bf16.xpose.msra.mxu0 %v2705_v0 }
 0x66e   : > { %10663 = vst [vmem:[#allocation53_spill] sm:$0xff] %v8340_v62  ;;  %v8342_v49 = vpop.eup %6693  ;;  %6548 = vmatprep.subr.msk.bf16.mxu0 %vm1752_vm0, %v8306_v41  ;;  %v2470_v12 = vpack.c.bf16 %v8340_v62, %v8334_v48  ;;  %v2369_v16 = vpop.xlane.xlu1 %2368 }
 0x66f   : > { %10664 = vst [vmem:[#allocation54_spill] sm:$0xff] %v8342_v49  ;;  %6697 = vpow2.f32 %v2406_v4  ;;  %v2471_v47 = vpack.c.bf16 %v8337_v18, %v8342_v49  ;;  %v2386_v5 = vsub.f32 %v8273_v28, %v2369_v16 }
 0x670   : > { %6126 = vmatprep.mubr.bf16.mxu0 %v2470_v12 }
 0x671   : > { %6127 = vmatmul.mubr.bf16.gmra.mrb[20].mxu0 %v2471_v47  ;;  %v2717_v47 = vsel %vm1752_vm0, %v2672_v26, 0 }
 0x672   : > { %v2365_v60 = vpop.xlane.xlu1 %2364 }
 0x673   : > { %v2384_v8 = vsub.f32 %v8279_v24, %v2365_v60 }
 0x675   : > { %6143 = vmatpush3.bf16.xpose.msra.mxu0 %v2708_v34  ;;  %v8354_v29 = vpop.eup %6695  ;;  %v2412_v12 = vmul.f32 1.442695, %v2384_v8 }
 0x676   : > { %6549 = vmatprep.subr.msk.bf16.mxu0 %vm1752_vm0, %v8313_v35  ;;  %10665 = vst [vmem:[#allocation55_spill] sm:$0xff] %v8354_v29  ;;  %v2367_v41 = vpop.xlane.xlu1 %2366  ;;  %v2408_v35 = vmul.f32 1.442695, %v2382_v19 }
 0x677   : > { %v2385_v32 = vsub.f32 %v8283_v7, %v2367_v41 }
 0x678   : > { %6699 = vpow2.f32 %v2408_v35 }
 0x679   : > { %v8356_v59 = vpop.eup %6697  ;;  %v2414_v43 = vmul.f32 1.442695, %v2385_v32 }
 0x67a   : > { %10666 = vst [vmem:[#allocation56_spill] sm:$0xff] %v8356_v59  ;;  %v2472_v22 = vpack.c.bf16 %v8356_v59, %v8354_v29 }
 0x67b   : > { %6701 = vpow2.f32 %v2414_v43 }
 0x67c   : > { %6130 = vmatprep.mubr.bf16.mxu0 %v2472_v22  ;;  %v2416_v22 = vmul.f32 1.442695, %v2386_v5  ;;  %v8405_v5 = vld [vmem:[%s7870_s16] sm:$0xff] }
 0x67d   : > { %6145 = vmatpush3.bf16.xpose.msra.mxu0 %v2711_v3  ;;  %v2676_v3 = vpop.permute.xlu1 %2675  ;;  %3103 = vrot.lane.b32.xlu0 %v8405_v5, %s7190_s22 }
 0x67e   : > { %6550 = vmatprep.subr.msk.bf16.mxu0 %vm1752_vm0, %v8309_v55 }
 0x682   : > { %v8377_v60 = vpop.eup %6699 }
 0x683   : > { %10667 = vst [vmem:[#allocation57_spill] sm:$0xff] %v8377_v60 }
 0x685   : > { %6147 = vmatpush3.bf16.xpose.msra.mxu0 %v2714_v2  ;;  %v8379_v28 = vpop.eup %6701  ;;  %v2723_v2 = vsel %vm1752_vm0, %v2676_v3, 0 }
 0x686   : > { %6551 = vmatprep.subr.msk.bf16.mxu0 %vm1752_vm0, %v2672_v26  ;;  %10668 = vst [vmem:[#allocation58_spill] sm:$0xff] %v8379_v28 }
 0x68a   : > { %v2363_v0 = vpop.xlane.xlu0 %2362 }
 0x68b   : > { %v2383_v4 = vsub.f32 %v8289_v56, %v2363_v0 }
 0x68d   : > { %v2410_v55 = vmul.f32 1.442695, %v2383_v4  ;;  %6149 = vmatpush3.bf16.xpose.msra.mxu0 %v2717_v47 }
 0x68e   : > { %v2371_v21 = vpop.xlane.xlu0 %2370 }
 0x68f   : > { %6703 = vpow2.f32 %v2410_v55  ;;  %v2387_v7 = vsub.f32 %v8294_v51, %v2371_v21 }
 0x690   : > { %6705 = vpow2.f32 %v2412_v12  ;;  %v2654_v12 = vpop.permute.xlu1 %2653 }
 0x691   : > { %v2418_v24 = vmul.f32 1.442695, %v2387_v7  ;;  %v8410_v7 = vld [vmem:[%s7870_s16 + $0x28] sm:$0xff] }
 0x692   : > { %v2674_v34 = vpop.permute.xlu0 %2673  ;;  %3105 = vrot.lane.b32.xlu1 %v8410_v7, %s7190_s22 }
 0x693   : > { %6552 = vmatprep.subr.msk.bf16.mxu0 %vm1752_vm0, %v2674_v34  ;;  %v2720_v56 = vsel %vm1752_vm0, %v2674_v34, 0  ;;  %6707 = vpow2.f32 %v2418_v24  ;;  %v8415_v24 = vld [vmem:[%s7870_s16 + $0x50] sm:$0xff] }
 0x694   : > { %6709 = vpow2.f32 %v2416_v22  ;;  %v2658_v55 = vpop.permute.xlu1 %2657  ;;  %3107 = vrot.lane.b32.xlu0 %v8415_v24, %s7190_s22 }
 0x695   : > { %6151 = vmatpush3.bf16.xpose.msra.mxu0 %v2720_v56 }
 0x696   : > { %6553 = vmatprep.subr.msk.bf16.mxu0 %vm1752_vm0, %v2676_v3  ;;  %v2646_v8 = vpop.permute.xlu0 %2645 }
 0x699   : > { %v8381_v16 = vpop.eup %6703 }
 0x69a   : > { %10669 = vst [vmem:[#allocation59_spill] sm:$0xff] %v8381_v16  ;;  %v8383_v51 = vpop.eup %6705  ;;  %v2473_v41 = vpack.c.bf16 %v8381_v16, %v8377_v60  ;;  %v2648_v43 = vpop.permute.xlu0 %2647  ;;  %v8512_v60 = vld [vmem:[%s7870_s16 + $0x78] sm:$0xff] }
 0x69b   : > { %10670 = vst [vmem:[#allocation60_spill] sm:$0xff] %v8383_v51  ;;  %v2474_v26 = vpack.c.bf16 %v8379_v28, %v8383_v51 }
 0x69c   : > { %6131 = vmatmul.mubr.bf16.gmra.mrb[24].mxu0 %v2473_v41  ;;  %v8428_v41 = vld [vmem:[%s7870_s16 + $0x10] sm:$0xff] }
 0x69d   : > { %6134 = vmatprep.mubr.bf16.mxu0 %v2474_v26  ;;  %6153 = vmatpush3.bf16.xpose.msra.mxu0 %v2723_v2  ;;  %v8390_v19 = vpop.eup %6707  ;;  %v8435_v26 = vld [vmem:[%s7870_s16 + $0x38] sm:$0xff] }
 0x69e   : > { %10671 = vst [vmem:[#allocation61_spill] sm:$0xff] %v8390_v19  ;;  %v8392_v32 = vpop.eup %6709  ;;  %v2650_v0 = vpop.permute.xlu0 %2649  ;;  %6170 = vmatprep.subr.bf16.mxu1 %v8428_v41 }
 0x69f   : > { %10672 = vst [vmem:[#allocation62_spill] sm:$0xff] %v8392_v32  ;;  %v2475_v35 = vpack.c.bf16 %v8390_v19, %v8392_v32  ;;  %6171 = vmatpush3.bf16.msra.mxu1 %v8428_v41 }
 0x6a0   : > { %6172 = vmatprep.subr.bf16.mxu1 %v8435_v26 }
 0x6a2   : > { %v2652_v4 = vpop.permute.xlu0 %2651 }
 0x6a3   : > { %6173 = vmatpush3.bf16.msra.mxu1 %v8435_v26 }
 0x6a4   : > { %6135 = vmatmul.mubr.bf16.gmra.mrb[28].mxu0 %v2475_v35 }
 0x6a5   : > { %6154 = vmatprep.mubr.msk.bf16.mxu0 %vm1752_vm0, %v2646_v8 }
 0x6a6   : > { %v2656_v47 = vpop.permute.xlu0 %2655 }
 0x6aa   : > { %v2660_v21 = vpop.permute.xlu0 %2659 }
 0x6ac   : > { %6155 = vmatmul.mubr.msk.bf16.vlgmr.msra.gmra.mrb[32].mxu0 %vm1752_vm0, %v2648_v43 }
 0x6ad   : > { %6158 = vmatprep.mubr.msk.bf16.mxu0 %vm1752_vm0, %v2650_v0  ;;  %v8446_v0 = vld [vmem:[%s7870_s16 + $0x60] sm:$0xff] }
 0x6ae   : > { %6174 = vmatprep.subr.bf16.mxu1 %v8446_v0 }
 0x6af   : > { %6175 = vmatpush3.bf16.msra.mxu1 %v8446_v0 }
 0x6b4   : > { %6159 = vmatmul.mubr.msk.bf16.gmra.mrb[36].mxu0 %vm1752_vm0, %v2652_v4  ;;  %v8451_v4 = vld [vmem:[%s7870_s16 + $0x88] sm:$0xff] }
 0x6b5   : > { %6162 = vmatprep.mubr.msk.bf16.mxu0 %vm1752_vm0, %v2654_v12  ;;  %6176 = vmatprep.subr.bf16.mxu1 %v8451_v4  ;;  %v8456_v12 = vld [vmem:[%s7870_s16 + $0xb0] sm:$0xff] }
 0x6b6   : > { %6177 = vmatpush3.bf16.msra.mxu1 %v8451_v4 }
 0x6b7   : > { %6178 = vmatprep.subr.bf16.mxu1 %v8456_v12 }
 0x6ba   : > { %6179 = vmatpush3.bf16.msra.mxu1 %v8456_v12 }
 0x6bc   : > { %6163 = vmatmul.mubr.msk.bf16.gmra.mrb[40].mxu0 %vm1752_vm0, %v2656_v47  ;;  %v8461_v47 = vld [vmem:[%s7870_s16 + $0xd8] sm:$0xff] }
 0x6bd   : > { %6166 = vmatprep.mubr.msk.bf16.mxu0 %vm1752_vm0, %v2658_v55  ;;  %6180 = vmatprep.subr.bf16.mxu1 %v8461_v47  ;;  %v8466_v55 = vld [vmem:[%s7870_s16 + $0x100] sm:$0xff] }
 0x6be   : > { %6181 = vmatpush3.bf16.msra.mxu1 %v8461_v47 }
 0x6bf   : > { %6182 = vmatprep.subr.bf16.mxu1 %v8466_v55 }
 0x6c2   : > { %6183 = vmatpush3.bf16.msra.mxu1 %v8466_v55 }
 0x6c4   : > { %6167 = vmatmul.mubr.msk.bf16.gmra.mrb[44].mxu0 %vm1752_vm0, %v2660_v21  ;;  %v8469_v21 = vld [vmem:[%s7870_s16 + $0x128] sm:$0xff] }
 0x6c5   : > { %6184 = vmatprep.subr.bf16.mxu1 %v8469_v21 }
 0x6c6   : > { %6185 = vmatpush3.bf16.msra.mxu1 %v8469_v21 }
 0x737   : > { %v8419_v34 = vpop.f32.mrb[16].mxu0 }
 0x738   : > { %10673 = vst [vmem:[#allocation63_spill] sm:$0xff] %v8419_v34  ;;  %v8421_v22 = vpop.f32.mrb[17].mxu0 }
 0x739   : > { %10674 = vst [vmem:[#allocation64_spill] sm:$0xff] %v8421_v22  ;;  %v8423_v56 = vpop.f32.mrb[18].mxu0 }
 0x73a   : > { %10675 = vst [vmem:[#allocation65_spill] sm:$0xff] %v8423_v56  ;;  %v8425_v3 = vpop.f32.mrb[19].mxu0 }
 0x73b   : > { %10676 = vst [vmem:[#allocation66_spill] sm:$0xff] %v8425_v3 }
 0x744   : > { %v8432_v2 = vpop.f32.mrb[20].mxu0 }
 0x745   : > { %10677 = vst [vmem:[#allocation67_spill] sm:$0xff] %v8432_v2  ;;  %v8437_v8 = vpop.f32.mrb[21].mxu0 }
 0x746   : > { %10678 = vst [vmem:[#allocation68_spill] sm:$0xff] %v8437_v8  ;;  %v8440_v35 = vpop.f32.mrb[22].mxu0 }
 0x747   : > { %10679 = vst [vmem:[#allocation69_spill] sm:$0xff] %v8440_v35  ;;  %v8443_v43 = vpop.f32.mrb[23].mxu0  ;;  %v8474_v35 = vpop.permute.xlu0 %3103 }
 0x748   : > { %10680 = vst [vmem:[#allocation70_spill] sm:$0xff] %v8443_v43  ;;  %6554 = vmatprep.subr.msk.bf16.mxu1 %vm1752_vm0, %v8474_v35 }
 0x76f   : > { %v8479_v43 = vpop.f32.mrb[24].mxu0 }
 0x770   : > { %10681 = vst [vmem:[#allocation71_spill] sm:$0xff] %v8479_v43  ;;  %v8481_v56 = vpop.f32.mrb[25].mxu0 }
 0x771   : > { %10682 = vst [vmem:[#allocation72_spill] sm:$0xff] %v8481_v56  ;;  %v8483_v2 = vpop.f32.mrb[26].mxu0 }
 0x772   : > { %10683 = vst [vmem:[#allocation73_spill] sm:$0xff] %v8483_v2  ;;  %v8485_v3 = vpop.f32.mrb[27].mxu0 }
 0x773   : > { %10684 = vst [vmem:[#allocation74_spill] sm:$0xff] %v8485_v3 }
 0x777   : > { %v8487_v8 = vpop.f32.mrb[28].mxu0 }
 0x778   : > { %10685 = vst [vmem:[#allocation75_spill] sm:$0xff] %v8487_v8  ;;  %v8489_v34 = vpop.f32.mrb[29].mxu0 }
 0x779   : > { %10686 = vst [vmem:[#allocation76_spill] sm:$0xff] %v8489_v34  ;;  %v8491_v22 = vpop.f32.mrb[30].mxu0 }
 0x77a   : > { %10687 = vst [vmem:[#allocation77_spill] sm:$0xff] %v8491_v22  ;;  %v8493_v19 = vpop.f32.mrb[31].mxu0 }
 0x77b   : > { %10688 = vst [vmem:[#allocation78_spill] sm:$0xff] %v8493_v19 }
 0x77f   : > { %v6156_v28 = vpop.f32.mrb[32].mxu0 }
 0x780   : > { %v8496_v16 = vadd.f32 %v6156_v28, %v10629_v39  ;;  %v2759_v32 = vpop.f32.mrb[33].mxu0 }
 0x781   : > { %v8499_v43 = vadd.f32 %v2759_v32, %v10628_v33  ;;  %v6157_v56 = vpop.f32.mrb[34].mxu0 }
 0x782   : > { %2826 = vmax.xlane.f32.xlu0 %v8496_v16  ;;  %v2762_v2 = vpop.f32.mrb[35].mxu0  ;;  %v8507_v22 = vadd.f32 %v6157_v56, %v10626_v40 }
 0x783   : > { %v8503_v8 = vadd.f32 %v2762_v2, %v10627_v38  ;;  %2822 = vmax.xlane.f32.xlu1 %v8499_v43 }
 0x786   : > { %2824 = vmax.xlane.f32.xlu0 %v8503_v8 }
 0x787   : > { %2828 = vmax.xlane.f32.xlu1 %v8507_v22  ;;  %v6160_v28 = vpop.f32.mrb[36].mxu0 }
 0x788   : > { %v2775_v32 = vpop.f32.mrb[37].mxu0  ;;  %v8522_v49 = vadd.f32 %v6160_v28, %v10624_v42 }
 0x789   : > { %v6161_v19 = vpop.f32.mrb[38].mxu0  ;;  %v8525_v6 = vadd.f32 %v2775_v32, %v10625_v27 }
 0x78a   : > { %v2778_v3 = vpop.f32.mrb[39].mxu0  ;;  %v8533_v31 = vadd.f32 %v6161_v19, %v10619_v45 }
 0x78b   : > { %v8541_v28 = vadd.f32 %v2778_v3, %v10620_v37 }
 0x78f   : > { %v6164_v34 = vpop.f32.mrb[40].mxu0 }
 0x790   : > { %v2791_v59 = vpop.f32.mrb[41].mxu0  ;;  %v8548_v19 = vadd.f32 %v6164_v34, %v10614_v57 }
 0x791   : > { %v6165_v51 = vpop.f32.mrb[42].mxu0  ;;  %v8529_v48 = vadd.f32 %v2791_v59, %v10623_v52 }
 0x792   : > { %v2794_v18 = vpop.f32.mrb[43].mxu0 }
 0x793   : > { %v8537_v10 = vadd.f32 %v2794_v18, %v10615_v53  ;;  %v8554_v18 = vadd.f32 %v6165_v51, %v10622_v58  ;;  %v8575_v51 = vld [vmem:[%s7870_s16 + $0x118] sm:$0xff] }
 0x797   : > { %v6168_v2 = vpop.f32.mrb[44].mxu0 }
 0x798   : > { %3109 = vrot.lane.b32.xlu1 %v8512_v60, %s7190_s22  ;;  %v2807_v56 = vpop.f32.mrb[45].mxu0  ;;  %v8545_v59 = vadd.f32 %v6168_v2, %v10617_v11  ;;  %v8570_v2 = vld [vmem:[%s7870_s16 + $0xf0] sm:$0xff] }
 0x799   : > { %v6169_v62 = vpop.f32.mrb[46].mxu0  ;;  %v8557_v3 = vadd.f32 %v2807_v56, %v10616_v44 }
 0x79a   : > { %v2810_v29 = vpop.f32.mrb[47].mxu0  ;;  %v8562_v34 = vadd.f32 %v6169_v62, %v10621_v14  ;;  %v8581_v62 = vld [vmem:[%s7870_s16 + $0xc8] sm:$0xff] }
 0x79b   : > { %v8566_v32 = vadd.f32 %v2810_v29, %v10618_v50  ;;  %v3108_v29 = vpop.permute.xlu0 %3107 }
 0x79c   : > { %3111 = vrot.lane.b32.xlu0 %v8517_v63, %s7190_s22 }
 0x7bb   : > { %2834 = vmax.xlane.f32.xlu0 %v8522_v49 }
 0x7bc   : > { %2830 = vmax.xlane.f32.xlu1 %v8525_v6 }
 0x7bf   : > { %2838 = vmax.xlane.f32.xlu0 %v8529_v48 }
 0x7c0   : > { %2836 = vmax.xlane.f32.xlu1 %v8533_v31 }
 0x7c3   : > { %2840 = vmax.xlane.f32.xlu0 %v8537_v10 }
 0x7c4   : > { %2832 = vmax.xlane.f32.xlu1 %v8541_v28 }
 0x7c7   : > { %2850 = vmax.xlane.f32.xlu0 %v8545_v59 }
 0x7c8   : > { %2842 = vmax.xlane.f32.xlu1 %v8548_v19 }
 0x7cc   : > { %2844 = vmax.xlane.f32.xlu1 %v8554_v18 }
 0x7d0   : > { %2846 = vmax.xlane.f32.xlu1 %v8557_v3 }
 0x7d4   : > { %2852 = vmax.xlane.f32.xlu1 %v8562_v34 }
 0x7d8   : > { %2848 = vmax.xlane.f32.xlu1 %v8566_v32 }
 0x7dd   : > { %3115 = vrot.lane.b32.xlu0 %v8570_v2, %s7190_s22 }
 0x7e1   : > { %3117 = vrot.lane.b32.xlu0 %v8575_v51, %s7190_s22 }
 0x7e5   : > { %3087 = vrot.lane.b32.xlu0 %v8405_v5, %s7191_s23 }
 0x7e9   : > { %3113 = vrot.lane.b32.xlu1 %v8581_v62, %s7190_s22  ;;  %3089 = vrot.lane.b32.xlu0 %v8410_v7, %s7191_s23 }
 0x7ed   : > { %3091 = vrot.lane.b32.xlu1 %v8415_v24, %s7191_s23  ;;  %3093 = vrot.lane.b32.xlu0 %v8512_v60, %s7191_s23 }
 0x7f1   : > { %3095 = vrot.lane.b32.xlu1 %v8517_v63, %s7191_s23  ;;  %3097 = vrot.lane.b32.xlu0 %v8581_v62, %s7191_s23 }
 0x7f5   : > { %3099 = vrot.lane.b32.xlu1 %v8570_v2, %s7191_s23  ;;  %3101 = vrot.lane.b32.xlu0 %v8575_v51, %s7191_s23 }
 0x7f9   : > { %3408 = vrot.lane.b32.xlu1 %v8428_v41, %s7185_s17  ;;  %3410 = vrot.lane.b32.xlu0 %v8435_v26, %s7185_s17  ;;  %v3106_v41 = vpop.permute.xlu1 %3105 }
 0x7fd   : > { %3412 = vrot.lane.b32.xlu0 %v8446_v0, %s7185_s17  ;;  %3414 = vrot.lane.b32.xlu1 %v8451_v4, %s7185_s17 }
 0x801   : > { %3416 = vrot.lane.b32.xlu1 %v8456_v12, %s7185_s17  ;;  %3418 = vrot.lane.b32.xlu0 %v8461_v47, %s7185_s17 }
 0x805   : > { %3420 = vrot.lane.b32.xlu1 %v8466_v55, %s7185_s17  ;;  %3422 = vrot.lane.b32.xlu0 %v8469_v21, %s7185_s17 }
 0x809   : > { %3587 = vrot.lane.b32.xlu0 %v8410_v7, %s7192_s24  ;;  %3585 = vrot.lane.b32.xlu1 %v8405_v5, %s7192_s24 }
 0x80d   : > { %3589 = vrot.lane.b32.xlu0 %v8415_v24, %s7192_s24 }
 0x80f   : > { %v2827_v26 = vpop.xlane.xlu0 %2826 }
 0x810   : > { %v2856_v0 = vsub.f32 %v8496_v16, %v2827_v26  ;;  %v2823_v56 = vpop.xlane.xlu1 %2822 }
 0x811   : > { %v2854_v4 = vsub.f32 %v8499_v43, %v2823_v56 }
 0x812   : > { %v2874_v54 = vmul.f32 1.442695, %v2856_v0 }
 0x813   : > { %v2870_v20 = vmul.f32 1.442695, %v2854_v4  ;;  %v2825_v12 = vpop.xlane.xlu0 %2824 }
 0x814   : > { %v2855_v25 = vsub.f32 %v8503_v8, %v2825_v12  ;;  %v2829_v47 = vpop.xlane.xlu1 %2828  ;;  %6711 = vpow2.f32 %v2874_v54  ;;  %v3150_v54 = vsel %vm1752_vm0, %v3108_v29, 0 }
 0x815   : > { %v2857_v61 = vsub.f32 %v8507_v22, %v2829_v47  ;;  %6713 = vpow2.f32 %v2870_v20  ;;  %v3147_v20 = vsel %vm1752_vm0, %v3106_v41, 0 }
 0x816   : > { %v2872_v55 = vmul.f32 1.442695, %v2855_v25 }
 0x817   : > { %v2876_v21 = vmul.f32 1.442695, %v2857_v61  ;;  %v3144_v61 = vsel %vm1752_vm0, %v8474_v35, 0  ;;  %v3112_v56 = vpop.permute.xlu0 %3111 }
 0x818   : > { %6715 = vpow2.f32 %v2872_v55  ;;  %v3110_v25 = vpop.permute.xlu1 %3109  ;;  %v3156_v35 = vsel %vm1752_vm0, %v3112_v56, 0 }
 0x819   : > { %6717 = vpow2.f32 %v2876_v21  ;;  %v3153_v0 = vsel %vm1752_vm0, %v3110_v25, 0 }
 0x81e   : > { %v8612_v9 = vpop.eup %6711 }
 0x81f   : > { %10689 = vst [vmem:[#allocation79_spill] sm:$0xff] %v8612_v9  ;;  %v8614_v16 = vpop.eup %6713 }
 0x820   : > { %10690 = vst [vmem:[#allocation80_spill] sm:$0xff] %v8614_v16 }
 0x822   : > { %v8616_v26 = vpop.eup %6715 }
 0x823   : > { %10691 = vst [vmem:[#allocation81_spill] sm:$0xff] %v8616_v26  ;;  %v8618_v43 = vpop.eup %6717  ;;  %v2950_v8 = vpack.c.bf16 %v8616_v26, %v8614_v16 }
 0x824   : > { %10692 = vst [vmem:[#allocation82_spill] sm:$0xff] %v8618_v43  ;;  %v2951_v22 = vpack.c.bf16 %v8618_v43, %v8612_v9 }
 0x825   : > { %6186 = vmatprep.mubr.bf16.mxu1 %v2950_v8 }
 0x826   : > { %6187 = vmatmul.mubr.bf16.vlgmr.msra.gmra.mrb[32].mxu1 %v2951_v22 }
 0x827   : > { %6203 = vmatpush3.bf16.xpose.msra.mxu1 %v3144_v61 }
 0x828   : > { %6555 = vmatprep.subr.msk.bf16.mxu1 %vm1752_vm0, %v3106_v41 }
 0x82f   : > { %6205 = vmatpush3.bf16.xpose.msra.mxu1 %v3147_v20 }
 0x830   : > { %6556 = vmatprep.subr.msk.bf16.mxu1 %vm1752_vm0, %v3108_v29 }
 0x837   : > { %6207 = vmatpush3.bf16.xpose.msra.mxu1 %v3150_v54 }
 0x838   : > { %6557 = vmatprep.subr.msk.bf16.mxu1 %vm1752_vm0, %v3110_v25 }
 0x83f   : > { %6209 = vmatpush3.bf16.xpose.msra.mxu1 %v3153_v0 }
 0x840   : > { %6558 = vmatprep.subr.msk.bf16.mxu1 %vm1752_vm0, %v3112_v56 }
 0x847   : > { %6211 = vmatpush3.bf16.xpose.msra.mxu1 %v3156_v35 }
 0x848   : > { %v2835_v4 = vpop.xlane.xlu0 %2834 }
 0x849   : > { %v2831_v41 = vpop.xlane.xlu1 %2830  ;;  %v2860_v21 = vsub.f32 %v8522_v49, %v2835_v4 }
 0x84a   : > { %v2858_v12 = vsub.f32 %v8525_v6, %v2831_v41 }
 0x84b   : > { %v2882_v56 = vmul.f32 1.442695, %v2860_v21 }
 0x84c   : > { %v2839_v47 = vpop.xlane.xlu0 %2838  ;;  %v2878_v8 = vmul.f32 1.442695, %v2858_v12 }
 0x84d   : > { %v2837_v55 = vpop.xlane.xlu1 %2836  ;;  %v2862_v22 = vsub.f32 %v8529_v48, %v2839_v47 }
 0x84e   : > { %v2861_v29 = vsub.f32 %v8533_v31, %v2837_v55  ;;  %6719 = vpow2.f32 %v2878_v8 }
 0x84f   : > { %v2886_v6 = vmul.f32 1.442695, %v2862_v22 }
 0x850   : > { %v2884_v61 = vmul.f32 1.442695, %v2861_v29  ;;  %v2841_v20 = vpop.xlane.xlu0 %2840 }
 0x851   : > { %v2863_v54 = vsub.f32 %v8537_v10, %v2841_v20  ;;  %v2833_v25 = vpop.xlane.xlu1 %2832 }
 0x852   : > { %v2859_v0 = vsub.f32 %v8541_v28, %v2833_v25  ;;  %6721 = vpow2.f32 %v2884_v61 }
 0x853   : > { %v2888_v35 = vmul.f32 1.442695, %v2863_v54 }
 0x854   : > { %v2880_v41 = vmul.f32 1.442695, %v2859_v0  ;;  %v2851_v8 = vpop.xlane.xlu0 %2850 }
 0x855   : > { %6723 = vpow2.f32 %v2888_v35  ;;  %v2843_v31 = vpop.xlane.xlu1 %2842  ;;  %v2868_v0 = vsub.f32 %v8545_v59, %v2851_v8 }
 0x856   : > { %6725 = vpow2.f32 %v2880_v41  ;;  %v2864_v49 = vsub.f32 %v8548_v19, %v2843_v31 }
 0x857   : > { %6727 = vpow2.f32 %v2882_v56 }
 0x858   : > { %6729 = vpow2.f32 %v2886_v6  ;;  %v2890_v48 = vmul.f32 1.442695, %v2864_v49  ;;  %v8642_v47 = vpop.eup %6719  ;;  %v2898_v49 = vmul.f32 1.442695, %v2868_v0 }
 0x859   : > { %v2845_v4 = vpop.xlane.xlu1 %2844  ;;  %10693 = vst [vmem:[#allocation83_spill] sm:$0xff] %v8642_v47 }
 0x85a   : > { %v2865_v10 = vsub.f32 %v8554_v18, %v2845_v4  ;;  %6731 = vpow2.f32 %v2890_v48 }
 0x85c   : > { %v2892_v12 = vmul.f32 1.442695, %v2865_v10  ;;  %v8644_v55 = vpop.eup %6721  ;;  %v3116_v10 = vpop.permute.xlu0 %3115 }
 0x85d   : > { %v2847_v28 = vpop.xlane.xlu1 %2846  ;;  %10694 = vst [vmem:[#allocation84_spill] sm:$0xff] %v8644_v55 }
 0x85e   : > { %6733 = vpow2.f32 %v2892_v12  ;;  %v2866_v19 = vsub.f32 %v8557_v3, %v2847_v28 }
 0x85f   : > { %v8646_v29 = vpop.eup %6723 }
 0x860   : > { %10695 = vst [vmem:[#allocation85_spill] sm:$0xff] %v8646_v29  ;;  %v8648_v21 = vpop.eup %6725  ;;  %v2894_v3 = vmul.f32 1.442695, %v2866_v19  ;;  %v3118_v28 = vpop.permute.xlu0 %3117 }
 0x861   : > { %10696 = vst [vmem:[#allocation86_spill] sm:$0xff] %v8648_v21  ;;  %v8651_v22 = vpop.eup %6727  ;;  %v2853_v61 = vpop.xlane.xlu1 %2852  ;;  %v2952_v18 = vpack.c.bf16 %v8648_v21, %v8642_v47 }
 0x862   : > { %10697 = vst [vmem:[#allocation87_spill] sm:$0xff] %v8651_v22  ;;  %v8655_v20 = vpop.eup %6729  ;;  %v2869_v54 = vsub.f32 %v8562_v34, %v2853_v61  ;;  %v2953_v25 = vpack.c.bf16 %v8644_v55, %v8651_v22  ;;  %6735 = vpow2.f32 %v2894_v3 }
 0x863   : > { %10698 = vst [vmem:[#allocation88_spill] sm:$0xff] %v8655_v20  ;;  %6190 = vmatprep.mubr.bf16.mxu1 %v2952_v18  ;;  %v2954_v56 = vpack.c.bf16 %v8646_v29, %v8655_v20 }
 0x864   : > { %6191 = vmatmul.mubr.bf16.gmra.mrb[36].mxu1 %v2953_v25  ;;  %v2900_v35 = vmul.f32 1.442695, %v2869_v54  ;;  %v8664_v31 = vpop.eup %6731  ;;  %v3088_v0 = vpop.permute.xlu0 %3087 }
 0x865   : > { %v2849_v6 = vpop.xlane.xlu1 %2848  ;;  %6194 = vmatprep.mubr.bf16.mxu1 %v2954_v56  ;;  %10699 = vst [vmem:[#allocation89_spill] sm:$0xff] %v8664_v31  ;;  %v3165_v56 = vsel %vm1752_vm0, %v3118_v28, 0 }
 0x866   : > { %v2867_v41 = vsub.f32 %v8566_v32, %v2849_v6  ;;  %6737 = vpow2.f32 %v2900_v35  ;;  %v3162_v32 = vsel %vm1752_vm0, %v3116_v10, 0 }
 0x868   : > { %v8666_v34 = vpop.eup %6733  ;;  %v2896_v48 = vmul.f32 1.442695, %v2867_v41  ;;  %v3090_v3 = vpop.permute.xlu0 %3089 }
 0x869   : > { %10700 = vst [vmem:[#allocation90_spill] sm:$0xff] %v8666_v34  ;;  %v3114_v59 = vpop.permute.xlu1 %3113  ;;  %v2955_v4 = vpack.c.bf16 %v8666_v34, %v8664_v31 }
 0x86a   : > { %6739 = vpow2.f32 %v2896_v48  ;;  %6559 = vmatprep.subr.msk.bf16.mxu1 %vm1752_vm0, %v3114_v59  ;;  %v3159_v12 = vsel %vm1752_vm0, %v3114_v59, 0 }
 0x86b   : > { %6741 = vpow2.f32 %v2898_v49  ;;  %6213 = vmatpush3.bf16.xpose.msra.mxu1 %v3159_v12 }
 0x86c   : > { %6195 = vmatmul.mubr.bf16.gmra.mrb[40].mxu1 %v2955_v4  ;;  %6560 = vmatprep.subr.msk.bf16.mxu1 %vm1752_vm0, %v3116_v10  ;;  %v8674_v8 = vpop.eup %6735  ;;  %v3094_v6 = vpop.permute.xlu0 %3093 }
 0x86d   : > { %10701 = vst [vmem:[#allocation91_spill] sm:$0xff] %v8674_v8  ;;  %v3092_v35 = vpop.permute.xlu1 %3091 }
 0x870   : > { %v8676_v19 = vpop.eup %6737  ;;  %v3098_v49 = vpop.permute.xlu0 %3097 }
 0x871   : > { %10702 = vst [vmem:[#allocation92_spill] sm:$0xff] %v8676_v19  ;;  %v3096_v41 = vpop.permute.xlu1 %3095 }
 0x873   : > { %6215 = vmatpush3.bf16.xpose.msra.mxu1 %v3162_v32 }
 0x874   : > { %v8678_v61 = vpop.eup %6739  ;;  %6561 = vmatprep.subr.msk.bf16.mxu1 %vm1752_vm0, %v3118_v28  ;;  %v3102_v59 = vpop.permute.xlu0 %3101 }
 0x875   : > { %10703 = vst [vmem:[#allocation93_spill] sm:$0xff] %v8678_v61  ;;  %v8681_v18 = vpop.eup %6741  ;;  %v2956_v54 = vpack.c.bf16 %v8678_v61, %v8674_v8  ;;  %v3100_v48 = vpop.permute.xlu1 %3099 }
 0x876   : > { %10704 = vst [vmem:[#allocation94_spill] sm:$0xff] %v8681_v18  ;;  %v2957_v25 = vpack.c.bf16 %v8676_v19, %v8681_v18 }
 0x877   : > { %6198 = vmatprep.mubr.bf16.mxu1 %v2956_v54 }
 0x878   : > { %6199 = vmatmul.mubr.bf16.gmra.mrb[44].mxu1 %v2957_v25  ;;  %v3411_v10 = vpop.permute.xlu0 %3410 }
 0x879   : > { %6218 = vmatprep.mubr.msk.bf16.mxu1 %vm1752_vm0, %v3088_v0  ;;  %v3409_v4 = vpop.permute.xlu1 %3408 }
 0x87a   : > { %6234 = vmatprep.subr.bf16.mxu0 %v3409_v4 }
 0x87b   : > { %6217 = vmatpush3.bf16.xpose.msra.mxu1 %v3165_v56  ;;  %6235 = vmatpush3.bf16.msra.mxu0 %v3409_v4 }
 0x87c   : > { %6236 = vmatprep.subr.bf16.mxu0 %v3411_v10  ;;  %v3413_v25 = vpop.permute.xlu0 %3412 }
 0x87d   : > { %v3415_v0 = vpop.permute.xlu1 %3414 }
 0x87f   : > { %6237 = vmatpush3.bf16.msra.mxu0 %v3411_v10 }
 0x880   : > { %6238 = vmatprep.subr.bf16.mxu0 %v3413_v25 }
 0x881   : > { %v3417_v56 = vpop.permute.xlu1 %3416 }
 0x882   : > { %6219 = vmatmul.mubr.msk.bf16.vlgmr.msra.gmra.mrb[48].mxu1 %vm1752_vm0, %v3090_v3  ;;  %v3419_v3 = vpop.permute.xlu0 %3418 }
 0x883   : > { %6222 = vmatprep.mubr.msk.bf16.mxu1 %vm1752_vm0, %v3092_v35  ;;  %6239 = vmatpush3.bf16.msra.mxu0 %v3413_v25 }
 0x884   : > { %6240 = vmatprep.subr.bf16.mxu0 %v3415_v0 }
 0x885   : > { %v3421_v35 = vpop.permute.xlu1 %3420 }
 0x887   : > { %6241 = vmatpush3.bf16.msra.mxu0 %v3415_v0 }
 0x888   : > { %6242 = vmatprep.subr.bf16.mxu0 %v3417_v56 }
 0x88a   : > { %6223 = vmatmul.mubr.msk.bf16.gmra.mrb[52].mxu1 %vm1752_vm0, %v3094_v6  ;;  %v3423_v6 = vpop.permute.xlu0 %3422 }
 0x88b   : > { %6226 = vmatprep.mubr.msk.bf16.mxu1 %vm1752_vm0, %v3096_v41  ;;  %6243 = vmatpush3.bf16.msra.mxu0 %v3417_v56  ;;  %v8710_v41 = vpop.permute.xlu1 %3585 }
 0x88c   : > { %6244 = vmatprep.subr.bf16.mxu0 %v3419_v3 }
 0x88f   : > { %6245 = vmatpush3.bf16.msra.mxu0 %v3419_v3 }
 0x890   : > { %6246 = vmatprep.subr.bf16.mxu0 %v3421_v35 }
 0x892   : > { %6227 = vmatmul.mubr.msk.bf16.gmra.mrb[56].mxu1 %vm1752_vm0, %v3098_v49 }
 0x893   : > { %6230 = vmatprep.mubr.msk.bf16.mxu1 %vm1752_vm0, %v3100_v48  ;;  %6247 = vmatpush3.bf16.msra.mxu0 %v3421_v35 }
 0x894   : > { %6248 = vmatprep.subr.bf16.mxu0 %v3423_v6 }
 0x897   : > { %6249 = vmatpush3.bf16.msra.mxu0 %v3423_v6 }
 0x898   : > { %6562 = vmatprep.subr.msk.bf16.mxu0 %vm1752_vm0, %v8710_v41 }
 0x89a   : > { %6231 = vmatmul.mubr.msk.bf16.gmra.mrb[60].mxu1 %vm1752_vm0, %v3102_v59 }
 0x8f9   : > { %v8702_v12 = vpop.f32.mrb[32].mxu1 }
 0x8fa   : > { %10705 = vst [vmem:[#allocation95_spill] sm:$0xff] %v8702_v12  ;;  %v8704_v32 = vpop.f32.mrb[33].mxu1 }
 0x8fb   : > { %10706 = vst [vmem:[#allocation96_spill] sm:$0xff] %v8704_v32  ;;  %v8706_v28 = vpop.f32.mrb[34].mxu1 }
 0x8fc   : > { %10707 = vst [vmem:[#allocation97_spill] sm:$0xff] %v8706_v28  ;;  %v8708_v54 = vpop.f32.mrb[35].mxu1 }
 0x8fd   : > { %10708 = vst [vmem:[#allocation98_spill] sm:$0xff] %v8708_v54 }
 0x937   : > { %v8714_v49 = vpop.f32.mrb[36].mxu1 }
 0x938   : > { %10709 = vst [vmem:[#allocation99_spill] sm:$0xff] %v8714_v49  ;;  %v8716_v48 = vpop.f32.mrb[37].mxu1 }
 0x939   : > { %10710 = vst [vmem:[#allocation100_spill] sm:$0xff] %v8716_v48  ;;  %v8718_v59 = vpop.f32.mrb[38].mxu1 }
 0x93a   : > { %10711 = vst [vmem:[#allocation101_spill] sm:$0xff] %v8718_v59  ;;  %v8720_v4 = vpop.f32.mrb[39].mxu1 }
 0x93b   : > { %10712 = vst [vmem:[#allocation102_spill] sm:$0xff] %v8720_v4 }
 0x93f   : > { %v8722_v10 = vpop.f32.mrb[40].mxu1 }
 0x940   : > { %10713 = vst [vmem:[#allocation103_spill] sm:$0xff] %v8722_v10  ;;  %v8724_v25 = vpop.f32.mrb[41].mxu1 }
 0x941   : > { %10714 = vst [vmem:[#allocation104_spill] sm:$0xff] %v8724_v25  ;;  %v8726_v0 = vpop.f32.mrb[42].mxu1 }
 0x942   : > { %10715 = vst [vmem:[#allocation105_spill] sm:$0xff] %v8726_v0  ;;  %v8728_v56 = vpop.f32.mrb[43].mxu1 }
 0x943   : > { %10716 = vst [vmem:[#allocation106_spill] sm:$0xff] %v8728_v56 }
 0x94b   : > { %v8730_v3 = vpop.f32.mrb[44].mxu1 }
 0x94c   : > { %10717 = vst [vmem:[#allocation107_spill] sm:$0xff] %v8730_v3  ;;  %v8732_v35 = vpop.f32.mrb[45].mxu1 }
 0x94d   : > { %10718 = vst [vmem:[#allocation108_spill] sm:$0xff] %v8732_v35  ;;  %v8734_v6 = vpop.f32.mrb[46].mxu1 }
 0x94e   : > { %10719 = vst [vmem:[#allocation109_spill] sm:$0xff] %v8734_v6  ;;  %v8736_v28 = vpop.f32.mrb[47].mxu1 }
 0x94f   : > { %10720 = vst [vmem:[#allocation110_spill] sm:$0xff] %v8736_v28 }
 0x955   : > { %v6220_v49 = vpop.f32.mrb[48].mxu1 }
 0x956   : > { %v8739_v59 = vadd.f32 %v6220_v49, %v10629_v39  ;;  %v3201_v4 = vpop.f32.mrb[49].mxu1 }
 0x957   : > { %v8742_v10 = vadd.f32 %v3201_v4, %v10628_v33  ;;  %v6221_v25 = vpop.f32.mrb[50].mxu1 }
 0x958   : > { %3268 = vmax.xlane.f32.xlu0 %v8739_v59  ;;  %v3204_v0 = vpop.f32.mrb[51].mxu1  ;;  %v8747_v3 = vadd.f32 %v6221_v25, %v10626_v40 }
 0x959   : > { %3264 = vmax.xlane.f32.xlu1 %v8742_v10  ;;  %v3205_v61 = vadd.f32 %v3204_v0, %v10627_v38 }
 0x95d   : > { %3270 = vmax.xlane.f32.xlu1 %v8747_v3  ;;  %v6224_v6 = vpop.f32.mrb[52].mxu1 }
 0x95e   : > { %v3217_v28 = vpop.f32.mrb[53].mxu1  ;;  %v8759_v18 = vadd.f32 %v6224_v6, %v10624_v42 }
 0x95f   : > { %v6225_v56 = vpop.f32.mrb[54].mxu1  ;;  %v8756_v34 = vadd.f32 %v3217_v28, %v10625_v27 }
 0x960   : > { %v3220_v49 = vpop.f32.mrb[55].mxu1  ;;  %v3229_v29 = vadd.f32 %v6225_v56, %v10619_v45 }
 0x961   : > { %v8765_v8 = vadd.f32 %v3220_v49, %v10620_v37 }
 0x965   : > { %v6228_v35 = vpop.f32.mrb[56].mxu1 }
 0x966   : > { %v3233_v54 = vpop.f32.mrb[57].mxu1  ;;  %v8769_v0 = vadd.f32 %v6228_v35, %v10614_v57 }
 0x967   : > { %v6229_v48 = vpop.f32.mrb[58].mxu1  ;;  %v8773_v28 = vadd.f32 %v3233_v54, %v10623_v52 }
 0x968   : > { %v3236_v4 = vpop.f32.mrb[59].mxu1 }
 0x969   : > { %v8777_v6 = vadd.f32 %v3236_v4, %v10615_v53 }
 0x96d   : > { %v6232_v12 = vpop.f32.mrb[60].mxu1 }
 0x96e   : > { %3593 = vrot.lane.b32.xlu0 %v8517_v63, %s7192_s24  ;;  %3591 = vrot.lane.b32.xlu1 %v8512_v60, %s7192_s24  ;;  %v3249_v32 = vpop.f32.mrb[61].mxu1  ;;  %v8781_v56 = vadd.f32 %v6232_v12, %v10617_v11  ;;  %v8797_v12 = vadd.f32 %v6229_v48, %v10622_v58 }
 0x96f   : > { %v6233_v25 = vpop.f32.mrb[62].mxu1  ;;  %v8787_v35 = vadd.f32 %v3249_v32, %v10616_v44 }
 0x970   : > { %v3252_v19 = vpop.f32.mrb[63].mxu1  ;;  %v8802_v32 = vadd.f32 %v6233_v25, %v10621_v14 }
 0x971   : > { %v8791_v54 = vadd.f32 %v3252_v19, %v10618_v50  ;;  %v3588_v19 = vpop.permute.xlu0 %3587 }
 0x975   : > { %v8814_v48 = vpop.permute.xlu0 %3589 }
 0x98d   : > { %3266 = vmax.xlane.f32.xlu0 %v3205_v61 }
 0x991   : > { %3272 = vmax.xlane.f32.xlu0 %v8756_v34 }
 0x992   : > { %3276 = vmax.xlane.f32.xlu1 %v8759_v18 }
 0x996   : > { %3278 = vmax.xlane.f32.xlu1 %v3229_v29 }
 0x99a   : > { %3274 = vmax.xlane.f32.xlu1 %v8765_v8 }
 0x99e   : > { %3284 = vmax.xlane.f32.xlu1 %v8769_v0 }
 0x9a2   : > { %3280 = vmax.xlane.f32.xlu1 %v8773_v28 }
 0x9a6   : > { %3282 = vmax.xlane.f32.xlu1 %v8777_v6 }
 0x9a7   : > { %3595 = vrot.lane.b32.xlu0 %v8581_v62, %s7192_s24 }
 0x9aa   : > { %3292 = vmax.xlane.f32.xlu1 %v8781_v56 }
 0x9ae   : > { %3288 = vmax.xlane.f32.xlu1 %v8787_v35 }
 0x9b2   : > { %3290 = vmax.xlane.f32.xlu1 %v8791_v54 }
 0x9c3   : > { %3599 = vrot.lane.b32.xlu1 %v8575_v51, %s7192_s24 }
 0x9c6   : > { %3286 = vmax.xlane.f32.xlu0 %v8797_v12 }
 0x9c7   : > { %3577 = vrot.lane.b32.xlu1 %v8517_v63, %s7193_s25 }
 0x9ca   : > { %3294 = vmax.xlane.f32.xlu0 %v8802_v32 }
 0x9cb   : > { %3581 = vrot.lane.b32.xlu1 %v8570_v2, %s7193_s25 }
 0x9cf   : > { %4029 = vrot.lane.b32.xlu1 %v8410_v7, %s7194_s26 }
 0x9e0   : > { %3597 = vrot.lane.b32.xlu0 %v8570_v2, %s7192_s24 }
 0x9e4   : > { %3569 = vrot.lane.b32.xlu0 %v8405_v5, %s7193_s25 }
 0x9e5   : > { %v3269_v4 = vpop.xlane.xlu0 %3268 }
 0x9e6   : > { %v3265_v49 = vpop.xlane.xlu1 %3264  ;;  %v3298_v20 = vsub.f32 %v8739_v59, %v3269_v4 }
 0x9e7   : > { %v3296_v55 = vsub.f32 %v8742_v10, %v3265_v49 }
 0x9e8   : > { %3571 = vrot.lane.b32.xlu0 %v8410_v7, %s7193_s25  ;;  %v3316_v16 = vmul.f32 1.442695, %v3298_v20  ;;  %v3626_v20 = vsel %vm1752_vm0, %v8710_v41, 0  ;;  %v8934_v7 = vld [vmem:[%s7870_s16 + $0x40] sm:$0xff] }
 0x9e9   : > { %v8817_v31 = vpop.permute.xlu0 %3593  ;;  %v3312_v43 = vmul.f32 1.442695, %v3296_v55 }
 0x9ea   : > { %v3271_v25 = vpop.xlane.xlu1 %3270 }
 0x9eb   : > { %v3299_v21 = vsub.f32 %v8747_v3, %v3271_v25  ;;  %6743 = vpow2.f32 %v3312_v43 }
 0x9ec   : > { %3573 = vrot.lane.b32.xlu0 %v8415_v24, %s7193_s25 }
 0x9ed   : > { %v3318_v22 = vmul.f32 1.442695, %v3299_v21 }
 0x9ee   : > { %v8821_v47 = vpop.permute.xlu1 %3591 }
 0x9ef   : > { %6745 = vpow2.f32 %v3318_v22 }
 0x9f0   : > { %3575 = vrot.lane.b32.xlu0 %v8512_v60, %s7193_s25 }
 0x9f4   : > { %3579 = vrot.lane.b32.xlu0 %v8581_v62, %s7193_s25 }
 0x9f5   : > { %v8825_v21 = vpop.eup %6743 }
 0x9f6   : > { %10721 = vst [vmem:[#allocation111_spill] sm:$0xff] %v8825_v21 }
 0x9f8   : > { %3583 = vrot.lane.b32.xlu0 %v8575_v51, %s7193_s25 }
 0x9fc   : > { %4027 = vrot.lane.b32.xlu0 %v8405_v5, %s7194_s26 }
 0xa00   : > { %4031 = vrot.lane.b32.xlu0 %v8415_v24, %s7194_s26 }
 0xa1a   : > { %v3267_v26 = vpop.xlane.xlu0 %3266 }
 0xa1b   : > { %v3297_v9 = vsub.f32 %v3205_v61, %v3267_v26  ;;  %v8827_v26 = vpop.eup %6745 }
 0xa1c   : > { %10722 = vst [vmem:[#allocation112_spill] sm:$0xff] %v8827_v26 }
 0xa1d   : > { %v3314_v13 = vmul.f32 1.442695, %v3297_v9 }
 0xa1e   : > { %v3273_v36 = vpop.xlane.xlu0 %3272 }
 0xa1f   : > { %6747 = vpow2.f32 %v3314_v13  ;;  %v3277_v15 = vpop.xlane.xlu1 %3276  ;;  %v3300_v10 = vsub.f32 %v8756_v34, %v3273_v36 }
 0xa20   : > { %6749 = vpow2.f32 %v3316_v16  ;;  %v3302_v59 = vsub.f32 %v8759_v18, %v3277_v15 }
 0xa21   : > { %v3320_v55 = vmul.f32 1.442695, %v3300_v10 }
 0xa22   : > { %v3324_v13 = vmul.f32 1.442695, %v3302_v59  ;;  %v3629_v59 = vsel %vm1752_vm0, %v3588_v19, 0 }
 0xa23   : > { %v3279_v49 = vpop.xlane.xlu1 %3278  ;;  %6751 = vpow2.f32 %v3320_v55 }
 0xa24   : > { %v3303_v3 = vsub.f32 %v3229_v29, %v3279_v49 }
 0xa26   : > { %v3326_v4 = vmul.f32 1.442695, %v3303_v3 }
 0xa27   : > { %v3275_v25 = vpop.xlane.xlu1 %3274 }
 0xa28   : > { %v3301_v9 = vsub.f32 %v8765_v8, %v3275_v25  ;;  %6753 = vpow2.f32 %v3326_v4 }
 0xa29   : > { %v8830_v43 = vpop.eup %6747 }
 0xa2a   : > { %10723 = vst [vmem:[#allocation113_spill] sm:$0xff] %v8830_v43  ;;  %v8832_v22 = vpop.eup %6749  ;;  %v3322_v36 = vmul.f32 1.442695, %v3301_v9  ;;  %v3392_v16 = vpack.c.bf16 %v8830_v43, %v8825_v21 }
 0xa2b   : > { %10724 = vst [vmem:[#allocation114_spill] sm:$0xff] %v8832_v22  ;;  %v3285_v15 = vpop.xlane.xlu1 %3284  ;;  %v3393_v29 = vpack.c.bf16 %v8827_v26, %v8832_v22 }
 0xa2c   : > { %6755 = vpow2.f32 %v3322_v36  ;;  %6250 = vmatprep.mubr.bf16.mxu0 %v3392_v16  ;;  %v3635_v16 = vsel %vm1752_vm0, %v8821_v47, 0 }
 0xa2d   : > { %6757 = vpow2.f32 %v3324_v13  ;;  %6251 = vmatmul.mubr.bf16.vlgmr.msra.gmra.mrb[48].mxu0 %v3393_v29  ;;  %v8842_v10 = vpop.eup %6751 }
 0xa2e   : > { %6267 = vmatpush3.bf16.xpose.msra.mxu0 %v3626_v20  ;;  %10725 = vst [vmem:[#allocation115_spill] sm:$0xff] %v8842_v10  ;;  %v3638_v20 = vsel %vm1752_vm0, %v8817_v31, 0 }
 0xa2f   : > { %6563 = vmatprep.subr.msk.bf16.mxu0 %vm1752_vm0, %v3588_v19  ;;  %v3281_v34 = vpop.xlane.xlu1 %3280  ;;  %v3632_v19 = vsel %vm1752_vm0, %v8814_v48, 0 }
 0xa30   : > { %v3304_v8 = vsub.f32 %v8773_v28, %v3281_v34  ;;  %v3596_v34 = vpop.permute.xlu0 %3595 }
 0xa32   : > { %v3328_v61 = vmul.f32 1.442695, %v3304_v8  ;;  %v8845_v3 = vpop.eup %6753  ;;  %v3306_v8 = vsub.f32 %v8769_v0, %v3285_v15 }
 0xa33   : > { %v3283_v18 = vpop.xlane.xlu1 %3282  ;;  %10726 = vst [vmem:[#allocation116_spill] sm:$0xff] %v8845_v3 }
 0xa34   : > { %v3305_v49 = vsub.f32 %v8777_v6, %v3283_v18  ;;  %6759 = vpow2.f32 %v3328_v61 }
 0xa36   : > { %v8848_v55 = vpop.eup %6755  ;;  %v3330_v4 = vmul.f32 1.442695, %v3305_v49  ;;  %6269 = vmatpush3.bf16.xpose.msra.mxu0 %v3629_v59 }
 0xa37   : > { %10727 = vst [vmem:[#allocation117_spill] sm:$0xff] %v8848_v55  ;;  %v8850_v41 = vpop.eup %6757  ;;  %6564 = vmatprep.subr.msk.bf16.mxu0 %vm1752_vm0, %v8814_v48  ;;  %v3394_v28 = vpack.c.bf16 %v8848_v55, %v8842_v10  ;;  %v3293_v25 = vpop.xlane.xlu1 %3292 }
 0xa38   : > { %10728 = vst [vmem:[#allocation118_spill] sm:$0xff] %v8850_v41  ;;  %6761 = vpow2.f32 %v3330_v4  ;;  %v3395_v6 = vpack.c.bf16 %v8845_v3, %v8850_v41  ;;  %v3310_v15 = vsub.f32 %v8781_v56, %v3293_v25 }
 0xa39   : > { %6254 = vmatprep.mubr.bf16.mxu0 %v3394_v28 }
 0xa3a   : > { %6255 = vmatmul.mubr.bf16.gmra.mrb[52].mxu0 %v3395_v6  ;;  %v3641_v6 = vsel %vm1752_vm0, %v3596_v34, 0 }
 0xa3b   : > { %v3289_v29 = vpop.xlane.xlu1 %3288 }
 0xa3c   : > { %v3308_v18 = vsub.f32 %v8787_v35, %v3289_v29 }
 0xa3e   : > { %6271 = vmatpush3.bf16.xpose.msra.mxu0 %v3632_v19  ;;  %v8862_v9 = vpop.eup %6759  ;;  %v3336_v28 = vmul.f32 1.442695, %v3308_v18 }
 0xa3f   : > { %6565 = vmatprep.subr.msk.bf16.mxu0 %vm1752_vm0, %v8821_v47  ;;  %10729 = vst [vmem:[#allocation119_spill] sm:$0xff] %v8862_v9  ;;  %v3291_v48 = vpop.xlane.xlu1 %3290  ;;  %v3332_v47 = vmul.f32 1.442695, %v3306_v8 }
 0xa40   : > { %v3309_v61 = vsub.f32 %v8791_v54, %v3291_v48 }
 0xa41   : > { %6763 = vpow2.f32 %v3332_v47 }
 0xa42   : > { %v8864_v13 = vpop.eup %6761  ;;  %v3338_v49 = vmul.f32 1.442695, %v3309_v61 }
 0xa43   : > { %10730 = vst [vmem:[#allocation120_spill] sm:$0xff] %v8864_v13  ;;  %v3396_v36 = vpack.c.bf16 %v8864_v13, %v8862_v9 }
 0xa44   : > { %6765 = vpow2.f32 %v3338_v49 }
 0xa45   : > { %6258 = vmatprep.mubr.bf16.mxu0 %v3396_v36  ;;  %v3340_v36 = vmul.f32 1.442695, %v3310_v15 }
 0xa46   : > { %6273 = vmatpush3.bf16.xpose.msra.mxu0 %v3635_v16  ;;  %v3600_v16 = vpop.permute.xlu1 %3599 }
 0xa47   : > { %6566 = vmatprep.subr.msk.bf16.mxu0 %vm1752_vm0, %v8817_v31 }
 0xa4b   : > { %v8885_v29 = vpop.eup %6763 }
 0xa4c   : > { %10731 = vst [vmem:[#allocation121_spill] sm:$0xff] %v8885_v29 }
 0xa4e   : > { %6275 = vmatpush3.bf16.xpose.msra.mxu0 %v3638_v20  ;;  %v8887_v56 = vpop.eup %6765  ;;  %v3647_v20 = vsel %vm1752_vm0, %v3600_v16, 0 }
 0xa4f   : > { %6567 = vmatprep.subr.msk.bf16.mxu0 %vm1752_vm0, %v3596_v34  ;;  %10732 = vst [vmem:[#allocation122_spill] sm:$0xff] %v8887_v56 }
 0xa53   : > { %v3287_v59 = vpop.xlane.xlu0 %3286 }
 0xa54   : > { %v3307_v4 = vsub.f32 %v8797_v12, %v3287_v59 }
 0xa56   : > { %v3334_v31 = vmul.f32 1.442695, %v3307_v4  ;;  %6277 = vmatpush3.bf16.xpose.msra.mxu0 %v3641_v6 }
 0xa57   : > { %v3295_v0 = vpop.xlane.xlu0 %3294 }
 0xa58   : > { %6767 = vpow2.f32 %v3334_v31  ;;  %v3311_v54 = vsub.f32 %v8802_v32, %v3295_v0 }
 0xa59   : > { %6769 = vpow2.f32 %v3336_v28  ;;  %v3578_v28 = vpop.permute.xlu1 %3577 }
 0xa5a   : > { %v3342_v35 = vmul.f32 1.442695, %v3311_v54 }
 0xa5b   : > { %v3598_v19 = vpop.permute.xlu0 %3597 }
 0xa5c   : > { %6568 = vmatprep.subr.msk.bf16.mxu0 %vm1752_vm0, %v3598_v19  ;;  %v3644_v12 = vsel %vm1752_vm0, %v3598_v19, 0  ;;  %6771 = vpow2.f32 %v3342_v35 }
 0xa5d   : > { %6773 = vpow2.f32 %v3340_v36  ;;  %v3582_v31 = vpop.permute.xlu1 %3581  ;;  %v8927_v36 = vld [vmem:[%s7870_s16 + $0x18] sm:$0xff] }
 0xa5e   : > { %6279 = vmatpush3.bf16.xpose.msra.mxu0 %v3644_v12  ;;  %6298 = vmatprep.subr.bf16.mxu1 %v8927_v36 }
 0xa5f   : > { %6569 = vmatprep.subr.msk.bf16.mxu0 %vm1752_vm0, %v3600_v16  ;;  %v3570_v18 = vpop.permute.xlu0 %3569  ;;  %6299 = vmatpush3.bf16.msra.mxu1 %v8927_v36 }
 0xa60   : > { %6300 = vmatprep.subr.bf16.mxu1 %v8934_v7 }
 0xa62   : > { %v8889_v25 = vpop.eup %6767 }
 0xa63   : > { %10733 = vst [vmem:[#allocation123_spill] sm:$0xff] %v8889_v25  ;;  %v8891_v32 = vpop.eup %6769  ;;  %v3397_v48 = vpack.c.bf16 %v8889_v25, %v8885_v29  ;;  %v3572_v49 = vpop.permute.xlu0 %3571  ;;  %6301 = vmatpush3.bf16.msra.mxu1 %v8934_v7 }
 0xa64   : > { %10734 = vst [vmem:[#allocation124_spill] sm:$0xff] %v8891_v32  ;;  %v3398_v34 = vpack.c.bf16 %v8887_v56, %v8891_v32 }
 0xa65   : > { %6259 = vmatmul.mubr.bf16.gmra.mrb[56].mxu0 %v3397_v48  ;;  %v8945_v48 = vld [vmem:[%s7870_s16 + $0x68] sm:$0xff] }
 0xa66   : > { %6262 = vmatprep.mubr.bf16.mxu0 %v3398_v34  ;;  %6281 = vmatpush3.bf16.xpose.msra.mxu0 %v3647_v20  ;;  %v8898_v8 = vpop.eup %6771  ;;  %v8950_v20 = vld [vmem:[%s7870_s16 + $0x90] sm:$0xff]  ;;  %v8955_v34 = vld [vmem:[%s7870_s16 + $0xb8] sm:$0xff] }
 0xa67   : > { %10735 = vst [vmem:[#allocation125_spill] sm:$0xff] %v8898_v8  ;;  %v8900_v61 = vpop.eup %6773  ;;  %v3574_v59 = vpop.permute.xlu0 %3573  ;;  %6302 = vmatprep.subr.bf16.mxu1 %v8945_v48 }
 0xa68   : > { %10736 = vst [vmem:[#allocation126_spill] sm:$0xff] %v8900_v61  ;;  %v3399_v47 = vpack.c.bf16 %v8898_v8, %v8900_v61  ;;  %6303 = vmatpush3.bf16.msra.mxu1 %v8945_v48 }
 0xa69   : > { %6304 = vmatprep.subr.bf16.mxu1 %v8950_v20 }
 0xa6b   : > { %v3576_v4 = vpop.permute.xlu0 %3575 }
 0xa6c   : > { %6305 = vmatpush3.bf16.msra.mxu1 %v8950_v20 }
 0xa6d   : > { %6263 = vmatmul.mubr.bf16.gmra.mrb[60].mxu0 %v3399_v47  ;;  %6306 = vmatprep.subr.bf16.mxu1 %v8955_v34  ;;  %v8965_v47 = vld [vmem:[%s7870_s16 + $0x108] sm:$0xff] }
 0xa6e   : > { %6282 = vmatprep.mubr.msk.bf16.mxu0 %vm1752_vm0, %v3570_v18  ;;  %v8960_v18 = vld [vmem:[%s7870_s16 + $0xe0] sm:$0xff] }
 0xa6f   : > { %v3580_v6 = vpop.permute.xlu0 %3579 }
 0xa70   : > { %6307 = vmatpush3.bf16.msra.mxu1 %v8955_v34 }
 0xa71   : > { %6308 = vmatprep.subr.bf16.mxu1 %v8960_v18 }
 0xa73   : > { %v3584_v0 = vpop.permute.xlu0 %3583 }
 0xa74   : > { %6309 = vmatpush3.bf16.msra.mxu1 %v8960_v18 }
 0xa75   : > { %6283 = vmatmul.mubr.msk.bf16.vlgmr.msra.gmra.mrb[64].mxu0 %vm1752_vm0, %v3572_v49  ;;  %v8968_v49 = vld [vmem:[%s7870_s16 + $0x130] sm:$0xff]  ;;  %6310 = vmatprep.subr.bf16.mxu1 %v8965_v47 }
 0xa76   : > { %6286 = vmatprep.mubr.msk.bf16.mxu0 %vm1752_vm0, %v3574_v59 }
 0xa77   : > { %v8973_v59 = vpop.permute.xlu0 %4027 }
 0xa78   : > { %6311 = vmatpush3.bf16.msra.mxu1 %v8965_v47 }
 0xa79   : > { %6312 = vmatprep.subr.bf16.mxu1 %v8968_v49 }
 0xa7c   : > { %6313 = vmatpush3.bf16.msra.mxu1 %v8968_v49 }
 0xa7d   : > { %6287 = vmatmul.mubr.msk.bf16.gmra.mrb[68].mxu0 %vm1752_vm0, %v3576_v4  ;;  %6570 = vmatprep.subr.msk.bf16.mxu1 %vm1752_vm0, %v8973_v59 }
 0xa7e   : > { %6290 = vmatprep.mubr.msk.bf16.mxu0 %vm1752_vm0, %v3578_v28 }
 0xa85   : > { %6291 = vmatmul.mubr.msk.bf16.gmra.mrb[72].mxu0 %vm1752_vm0, %v3580_v6 }
 0xa86   : > { %6294 = vmatprep.mubr.msk.bf16.mxu0 %vm1752_vm0, %v3582_v31 }
 0xa8d   : > { %6295 = vmatmul.mubr.msk.bf16.gmra.mrb[76].mxu0 %vm1752_vm0, %v3584_v0 }
 0xb00   : > { %v8918_v15 = vpop.f32.mrb[48].mxu0 }
 0xb01   : > { %10737 = vst [vmem:[#allocation127_spill] sm:$0xff] %v8918_v15  ;;  %v8920_v54 = vpop.f32.mrb[49].mxu0 }
 0xb02   : > { %10738 = vst [vmem:[#allocation128_spill] sm:$0xff] %v8920_v54  ;;  %v8922_v35 = vpop.f32.mrb[50].mxu0 }
 0xb03   : > { %10739 = vst [vmem:[#allocation129_spill] sm:$0xff] %v8922_v35  ;;  %v8924_v19 = vpop.f32.mrb[51].mxu0 }
 0xb04   : > { %10740 = vst [vmem:[#allocation130_spill] sm:$0xff] %v8924_v19 }
 0xb0d   : > { %v8931_v5 = vpop.f32.mrb[52].mxu0 }
 0xb0e   : > { %10741 = vst [vmem:[#allocation131_spill] sm:$0xff] %v8931_v5  ;;  %v8936_v24 = vpop.f32.mrb[53].mxu0 }
 0xb0f   : > { %10742 = vst [vmem:[#allocation132_spill] sm:$0xff] %v8936_v24  ;;  %v8939_v12 = vpop.f32.mrb[54].mxu0 }
 0xb10   : > { %10743 = vst [vmem:[#allocation133_spill] sm:$0xff] %v8939_v12  ;;  %v8942_v16 = vpop.f32.mrb[55].mxu0 }
 0xb11   : > { %10744 = vst [vmem:[#allocation134_spill] sm:$0xff] %v8942_v16 }
 0xb38   : > { %v8978_v4 = vpop.f32.mrb[56].mxu0 }
 0xb39   : > { %10745 = vst [vmem:[#allocation135_spill] sm:$0xff] %v8978_v4  ;;  %v8980_v28 = vpop.f32.mrb[57].mxu0 }
 0xb3a   : > { %10746 = vst [vmem:[#allocation136_spill] sm:$0xff] %v8980_v28  ;;  %v8982_v6 = vpop.f32.mrb[58].mxu0 }
 0xb3b   : > { %10747 = vst [vmem:[#allocation137_spill] sm:$0xff] %v8982_v6  ;;  %v8984_v31 = vpop.f32.mrb[59].mxu0 }
 0xb3c   : > { %10748 = vst [vmem:[#allocation138_spill] sm:$0xff] %v8984_v31 }
 0xb40   : > { %v8986_v0 = vpop.f32.mrb[60].mxu0 }
 0xb41   : > { %10749 = vst [vmem:[#allocation139_spill] sm:$0xff] %v8986_v0  ;;  %v8988_v12 = vpop.f32.mrb[61].mxu0 }
 0xb42   : > { %10750 = vst [vmem:[#allocation140_spill] sm:$0xff] %v8988_v12  ;;  %v8990_v16 = vpop.f32.mrb[62].mxu0 }
 0xb43   : > { %10751 = vst [vmem:[#allocation141_spill] sm:$0xff] %v8990_v16  ;;  %v8992_v35 = vpop.f32.mrb[63].mxu0 }
 0xb44   : > { %10752 = vst [vmem:[#allocation142_spill] sm:$0xff] %v8992_v35 }
 0xb48   : > { %v6284_v5 = vpop.f32.mrb[64].mxu0 }
 0xb49   : > { %v8995_v19 = vadd.f32 %v6284_v5, %v10629_v39  ;;  %v3683_v24 = vpop.f32.mrb[65].mxu0 }
 0xb4a   : > { %v8998_v4 = vadd.f32 %v3683_v24, %v10628_v33  ;;  %v6285_v28 = vpop.f32.mrb[66].mxu0 }
 0xb4b   : > { %3750 = vmax.xlane.f32.xlu0 %v8995_v19  ;;  %v3686_v6 = vpop.f32.mrb[67].mxu0  ;;  %v9006_v16 = vadd.f32 %v6285_v28, %v10626_v40 }
 0xb4c   : > { %v9002_v0 = vadd.f32 %v3686_v6, %v10627_v38  ;;  %3746 = vmax.xlane.f32.xlu1 %v8998_v4 }
 0xb4f   : > { %3748 = vmax.xlane.f32.xlu0 %v9002_v0 }
 0xb50   : > { %3752 = vmax.xlane.f32.xlu1 %v9006_v16  ;;  %v6288_v5 = vpop.f32.mrb[68].mxu0 }
 0xb51   : > { %v3699_v35 = vpop.f32.mrb[69].mxu0  ;;  %v9015_v61 = vadd.f32 %v6288_v5, %v10624_v42 }
 0xb52   : > { %v6289_v24 = vpop.f32.mrb[70].mxu0  ;;  %v9018_v13 = vadd.f32 %v3699_v35, %v10625_v27 }
 0xb53   : > { %v3702_v31 = vpop.f32.mrb[71].mxu0 }
 0xb54   : > { %v9034_v35 = vadd.f32 %v3702_v31, %v10620_v37 }
 0xb58   : > { %v6292_v12 = vpop.f32.mrb[72].mxu0 }
 0xb59   : > { %v3715_v15 = vpop.f32.mrb[73].mxu0  ;;  %v9041_v5 = vadd.f32 %v6292_v12, %v10614_v57 }
 0xb5a   : > { %v6293_v54 = vpop.f32.mrb[74].mxu0  ;;  %v9022_v32 = vadd.f32 %v3715_v15, %v10623_v52 }
 0xb5b   : > { %v3718_v8 = vpop.f32.mrb[75].mxu0 }
 0xb60   : > { %v6296_v56 = vpop.f32.mrb[76].mxu0 }
 0xb61   : > { %4033 = vrot.lane.b32.xlu1 %v8512_v60, %s7194_s26  ;;  %v3731_v6 = vpop.f32.mrb[77].mxu0  ;;  %v9026_v60 = vadd.f32 %v6289_v24, %v10619_v45  ;;  %v9038_v15 = vadd.f32 %v6296_v56, %v10617_v11  ;;  %v9077_v24 = vld [vmem:[%s7870_s16 + $0x50] sm:$0xff] }
 0xb62   : > { %v6297_v25 = vpop.f32.mrb[78].mxu0  ;;  %v9050_v31 = vadd.f32 %v3731_v6, %v10616_v44  ;;  %v9089_v6 = vld [vmem:[%s7870_s16 + $0xc8] sm:$0xff] }
 0xb63   : > { %v3734_v28 = vpop.f32.mrb[79].mxu0  ;;  %v9055_v56 = vadd.f32 %v6297_v25, %v10621_v14  ;;  %v9073_v25 = vld [vmem:[%s7870_s16 + $0x28] sm:$0xff] }
 0xb64   : > { %v9059_v12 = vadd.f32 %v3734_v28, %v10618_v50  ;;  %v9097_v28 = vld [vmem:[%s7870_s16 + $0x118] sm:$0xff] }
 0xb65   : > { %4035 = vrot.lane.b32.xlu0 %v8517_v63, %s7194_s26  ;;  %v9030_v63 = vadd.f32 %v3718_v8, %v10615_v53  ;;  %v9047_v8 = vadd.f32 %v6293_v54, %v10622_v58  ;;  %v9067_v54 = vld [vmem:[%s7870_s16] sm:$0xff] }
 0xb84   : > { %3758 = vmax.xlane.f32.xlu0 %v9015_v61 }
 0xb85   : > { %3754 = vmax.xlane.f32.xlu1 %v9018_v13 }
 0xb88   : > { %3762 = vmax.xlane.f32.xlu0 %v9022_v32 }
 0xb89   : > { %3760 = vmax.xlane.f32.xlu1 %v9026_v60 }
 0xb8c   : > { %3764 = vmax.xlane.f32.xlu0 %v9030_v63 }
 0xb8d   : > { %3756 = vmax.xlane.f32.xlu1 %v9034_v35 }
 0xb90   : > { %3774 = vmax.xlane.f32.xlu0 %v9038_v15 }
 0xb91   : > { %3766 = vmax.xlane.f32.xlu1 %v9041_v5 }
 0xb95   : > { %3768 = vmax.xlane.f32.xlu1 %v9047_v8 }
 0xb99   : > { %3770 = vmax.xlane.f32.xlu1 %v9050_v31 }
 0xb9d   : > { %3776 = vmax.xlane.f32.xlu1 %v9055_v56 }
 0xba1   : > { %3772 = vmax.xlane.f32.xlu1 %v9059_v12 }
 0xba6   : > { %4039 = vrot.lane.b32.xlu0 %v8570_v2, %s7194_s26  ;;  %v9081_v2 = vld [vmem:[%s7870_s16 + $0x78] sm:$0xff] }
 0xbaa   : > { %4041 = vrot.lane.b32.xlu0 %v8575_v51, %s7194_s26  ;;  %v9085_v51 = vld [vmem:[%s7870_s16 + $0xa0] sm:$0xff] }
 0xbae   : > { %4011 = vrot.lane.b32.xlu0 %v9067_v54, %s7195_s27 }
 0xbb2   : > { %4037 = vrot.lane.b32.xlu1 %v8581_v62, %s7194_s26  ;;  %4013 = vrot.lane.b32.xlu0 %v9073_v25, %s7195_s27  ;;  %v9093_v62 = vld [vmem:[%s7870_s16 + $0xf0] sm:$0xff] }
 0xbb6   : > { %4015 = vrot.lane.b32.xlu1 %v9077_v24, %s7195_s27  ;;  %4017 = vrot.lane.b32.xlu0 %v9081_v2, %s7195_s27 }
 0xbba   : > { %4019 = vrot.lane.b32.xlu1 %v9085_v51, %s7195_s27  ;;  %4021 = vrot.lane.b32.xlu0 %v9089_v6, %s7195_s27 }
 0xbbe   : > { %4023 = vrot.lane.b32.xlu1 %v9093_v62, %s7195_s27  ;;  %4025 = vrot.lane.b32.xlu0 %v9097_v28, %s7195_s27 }
 0xbc2   : > { %4332 = vrot.lane.b32.xlu1 %v8927_v36, %s7185_s17  ;;  %4334 = vrot.lane.b32.xlu0 %v8934_v7, %s7185_s17  ;;  %v4032_v36 = vpop.permute.xlu0 %4031  ;;  %v4030_v7 = vpop.permute.xlu1 %4029 }
 0xbc6   : > { %4336 = vrot.lane.b32.xlu0 %v8945_v48, %s7185_s17  ;;  %4338 = vrot.lane.b32.xlu1 %v8950_v20, %s7185_s17 }
 0xbca   : > { %4340 = vrot.lane.b32.xlu1 %v8955_v34, %s7185_s17  ;;  %4342 = vrot.lane.b32.xlu0 %v8960_v18, %s7185_s17 }
 0xbce   : > { %4344 = vrot.lane.b32.xlu1 %v8965_v47, %s7185_s17  ;;  %4346 = vrot.lane.b32.xlu0 %v8968_v49, %s7185_s17 }
 0xbd2   : > { %4511 = vrot.lane.b32.xlu0 %v9073_v25, %s7196_s28  ;;  %4509 = vrot.lane.b32.xlu1 %v9067_v54, %s7196_s28 }
 0xbd6   : > { %4513 = vrot.lane.b32.xlu0 %v9077_v24, %s7196_s28 }
 0xbd8   : > { %v3751_v3 = vpop.xlane.xlu0 %3750 }
 0xbd9   : > { %v3780_v48 = vsub.f32 %v8995_v19, %v3751_v3  ;;  %v3747_v29 = vpop.xlane.xlu1 %3746 }
 0xbda   : > { %v3778_v20 = vsub.f32 %v8998_v4, %v3747_v29 }
 0xbdb   : > { %v3798_v55 = vmul.f32 1.442695, %v3780_v48 }
 0xbdc   : > { %v3794_v9 = vmul.f32 1.442695, %v3778_v20  ;;  %v3749_v34 = vpop.xlane.xlu0 %3748 }
 0xbdd   : > { %v3779_v26 = vsub.f32 %v9002_v0, %v3749_v34  ;;  %v3753_v18 = vpop.xlane.xlu1 %3752  ;;  %6775 = vpow2.f32 %v3798_v55  ;;  %v4071_v55 = vsel %vm1752_vm0, %v4030_v7, 0 }
 0xbde   : > { %v3781_v41 = vsub.f32 %v9006_v16, %v3753_v18  ;;  %6777 = vpow2.f32 %v3794_v9 }
 0xbdf   : > { %v3796_v47 = vmul.f32 1.442695, %v3779_v26  ;;  %v4068_v26 = vsel %vm1752_vm0, %v8973_v59, 0 }
 0xbe0   : > { %v3800_v49 = vmul.f32 1.442695, %v3781_v41  ;;  %v4074_v41 = vsel %vm1752_vm0, %v4032_v36, 0  ;;  %v4036_v48 = vpop.permute.xlu0 %4035 }
 0xbe1   : > { %6779 = vpow2.f32 %v3796_v47  ;;  %v4034_v9 = vpop.permute.xlu1 %4033  ;;  %v4080_v59 = vsel %vm1752_vm0, %v4036_v48, 0 }
 0xbe2   : > { %6781 = vpow2.f32 %v3800_v49  ;;  %v4077_v0 = vsel %vm1752_vm0, %v4034_v9, 0 }
 0xbe7   : > { %v9120_v43 = vpop.eup %6775 }
 0xbe8   : > { %10753 = vst [vmem:[#allocation143_spill] sm:$0xff] %v9120_v43  ;;  %v9122_v3 = vpop.eup %6777 }
 0xbe9   : > { %10754 = vst [vmem:[#allocation144_spill] sm:$0xff] %v9122_v3 }
 0xbeb   : > { %v9124_v19 = vpop.eup %6779 }
 0xbec   : > { %10755 = vst [vmem:[#allocation145_spill] sm:$0xff] %v9124_v19  ;;  %v9126_v29 = vpop.eup %6781  ;;  %v3874_v4 = vpack.c.bf16 %v9124_v19, %v9122_v3 }
 0xbed   : > { %10756 = vst [vmem:[#allocation146_spill] sm:$0xff] %v9126_v29  ;;  %v3875_v16 = vpack.c.bf16 %v9126_v29, %v9120_v43 }
 0xbee   : > { %6314 = vmatprep.mubr.bf16.mxu1 %v3874_v4 }
 0xbef   : > { %6315 = vmatmul.mubr.bf16.vlgmr.msra.gmra.mrb[64].mxu1 %v3875_v16 }
 0xbf0   : > { %6331 = vmatpush3.bf16.xpose.msra.mxu1 %v4068_v26 }
 0xbf1   : > { %6571 = vmatprep.subr.msk.bf16.mxu1 %vm1752_vm0, %v4030_v7 }
 0xbf8   : > { %6333 = vmatpush3.bf16.xpose.msra.mxu1 %v4071_v55 }
 0xbf9   : > { %6572 = vmatprep.subr.msk.bf16.mxu1 %vm1752_vm0, %v4032_v36 }
 0xc00   : > { %6335 = vmatpush3.bf16.xpose.msra.mxu1 %v4074_v41 }
 0xc01   : > { %6573 = vmatprep.subr.msk.bf16.mxu1 %vm1752_vm0, %v4034_v9 }
 0xc08   : > { %6337 = vmatpush3.bf16.xpose.msra.mxu1 %v4077_v0 }
 0xc09   : > { %6574 = vmatprep.subr.msk.bf16.mxu1 %vm1752_vm0, %v4036_v48 }
 0xc10   : > { %6339 = vmatpush3.bf16.xpose.msra.mxu1 %v4080_v59 }
 0xc11   : > { %v3759_v20 = vpop.xlane.xlu0 %3758 }
 0xc12   : > { %v3755_v7 = vpop.xlane.xlu1 %3754  ;;  %v3784_v49 = vsub.f32 %v9015_v61, %v3759_v20 }
 0xc13   : > { %v3782_v34 = vsub.f32 %v9018_v13, %v3755_v7 }
 0xc14   : > { %v3806_v48 = vmul.f32 1.442695, %v3784_v49 }
 0xc15   : > { %v3763_v18 = vpop.xlane.xlu0 %3762  ;;  %v3802_v4 = vmul.f32 1.442695, %v3782_v34 }
 0xc16   : > { %v3761_v47 = vpop.xlane.xlu1 %3760  ;;  %v3786_v16 = vsub.f32 %v9022_v32, %v3763_v18 }
 0xc17   : > { %v3785_v36 = vsub.f32 %v9026_v60, %v3761_v47  ;;  %6783 = vpow2.f32 %v3802_v4 }
 0xc18   : > { %v3810_v13 = vmul.f32 1.442695, %v3786_v16 }
 0xc19   : > { %v3808_v26 = vmul.f32 1.442695, %v3785_v36  ;;  %v3765_v55 = vpop.xlane.xlu0 %3764 }
 0xc1a   : > { %v3787_v41 = vsub.f32 %v9030_v63, %v3765_v55  ;;  %v3757_v9 = vpop.xlane.xlu1 %3756 }
 0xc1b   : > { %v3783_v0 = vsub.f32 %v9034_v35, %v3757_v9  ;;  %6785 = vpow2.f32 %v3808_v26 }
 0xc1c   : > { %v3812_v59 = vmul.f32 1.442695, %v3787_v41 }
 0xc1d   : > { %v3804_v7 = vmul.f32 1.442695, %v3783_v0  ;;  %v3775_v4 = vpop.xlane.xlu0 %3774 }
 0xc1e   : > { %6787 = vpow2.f32 %v3812_v59  ;;  %v3767_v60 = vpop.xlane.xlu1 %3766  ;;  %v3792_v0 = vsub.f32 %v9038_v15, %v3775_v4 }
 0xc1f   : > { %6789 = vpow2.f32 %v3804_v7  ;;  %v3788_v61 = vsub.f32 %v9041_v5, %v3767_v60 }
 0xc20   : > { %6791 = vpow2.f32 %v3806_v48 }
 0xc21   : > { %6793 = vpow2.f32 %v3810_v13  ;;  %v3814_v32 = vmul.f32 1.442695, %v3788_v61  ;;  %v9150_v18 = vpop.eup %6783  ;;  %v3822_v61 = vmul.f32 1.442695, %v3792_v0 }
 0xc22   : > { %v3769_v20 = vpop.xlane.xlu1 %3768  ;;  %10757 = vst [vmem:[#allocation147_spill] sm:$0xff] %v9150_v18 }
 0xc23   : > { %v3789_v63 = vsub.f32 %v9047_v8, %v3769_v20  ;;  %6795 = vpow2.f32 %v3814_v32 }
 0xc25   : > { %v3816_v34 = vmul.f32 1.442695, %v3789_v63  ;;  %v9152_v47 = vpop.eup %6785  ;;  %v4040_v63 = vpop.permute.xlu0 %4039 }
 0xc26   : > { %v3771_v35 = vpop.xlane.xlu1 %3770  ;;  %10758 = vst [vmem:[#allocation148_spill] sm:$0xff] %v9152_v47 }
 0xc27   : > { %6797 = vpow2.f32 %v3816_v34  ;;  %v3790_v5 = vsub.f32 %v9050_v31, %v3771_v35 }
 0xc28   : > { %v9154_v36 = vpop.eup %6787 }
 0xc29   : > { %10759 = vst [vmem:[#allocation149_spill] sm:$0xff] %v9154_v36  ;;  %v9156_v49 = vpop.eup %6789  ;;  %v3818_v31 = vmul.f32 1.442695, %v3790_v5  ;;  %v4042_v35 = vpop.permute.xlu0 %4041 }
 0xc2a   : > { %10760 = vst [vmem:[#allocation150_spill] sm:$0xff] %v9156_v49  ;;  %v9159_v16 = vpop.eup %6791  ;;  %v3777_v26 = vpop.xlane.xlu1 %3776  ;;  %v3876_v8 = vpack.c.bf16 %v9156_v49, %v9150_v18 }
 0xc2b   : > { %10761 = vst [vmem:[#allocation151_spill] sm:$0xff] %v9159_v16  ;;  %v9163_v55 = vpop.eup %6793  ;;  %v3793_v41 = vsub.f32 %v9055_v56, %v3777_v26  ;;  %v3877_v9 = vpack.c.bf16 %v9152_v47, %v9159_v16  ;;  %6799 = vpow2.f32 %v3818_v31 }
 0xc2c   : > { %10762 = vst [vmem:[#allocation152_spill] sm:$0xff] %v9163_v55  ;;  %6318 = vmatprep.mubr.bf16.mxu1 %v3876_v8  ;;  %v3878_v48 = vpack.c.bf16 %v9154_v36, %v9163_v55 }
 0xc2d   : > { %6319 = vmatmul.mubr.bf16.gmra.mrb[68].mxu1 %v3877_v9  ;;  %v3824_v59 = vmul.f32 1.442695, %v3793_v41  ;;  %v9172_v60 = vpop.eup %6795  ;;  %v4012_v0 = vpop.permute.xlu0 %4011 }
 0xc2e   : > { %v3773_v13 = vpop.xlane.xlu1 %3772  ;;  %6322 = vmatprep.mubr.bf16.mxu1 %v3878_v48  ;;  %10763 = vst [vmem:[#allocation153_spill] sm:$0xff] %v9172_v60  ;;  %v4089_v48 = vsel %vm1752_vm0, %v4042_v35, 0 }
 0xc2f   : > { %v3791_v7 = vsub.f32 %v9059_v12, %v3773_v13  ;;  %6801 = vpow2.f32 %v3824_v59  ;;  %v4086_v12 = vsel %vm1752_vm0, %v4040_v63, 0 }
 0xc31   : > { %v9174_v56 = vpop.eup %6797  ;;  %v3820_v32 = vmul.f32 1.442695, %v3791_v7  ;;  %v4014_v31 = vpop.permute.xlu0 %4013 }
 0xc32   : > { %10764 = vst [vmem:[#allocation154_spill] sm:$0xff] %v9174_v56  ;;  %v4038_v15 = vpop.permute.xlu1 %4037  ;;  %v3879_v20 = vpack.c.bf16 %v9174_v56, %v9172_v60 }
 0xc33   : > { %6803 = vpow2.f32 %v3820_v32  ;;  %6575 = vmatprep.subr.msk.bf16.mxu1 %vm1752_vm0, %v4038_v15  ;;  %v4083_v34 = vsel %vm1752_vm0, %v4038_v15, 0 }
 0xc34   : > { %6805 = vpow2.f32 %v3822_v61  ;;  %6341 = vmatpush3.bf16.xpose.msra.mxu1 %v4083_v34 }
 0xc35   : > { %6323 = vmatmul.mubr.bf16.gmra.mrb[72].mxu1 %v3879_v20  ;;  %6576 = vmatprep.subr.msk.bf16.mxu1 %vm1752_vm0, %v4040_v63  ;;  %v9182_v4 = vpop.eup %6799  ;;  %v4018_v13 = vpop.permute.xlu0 %4017 }
 0xc36   : > { %10765 = vst [vmem:[#allocation155_spill] sm:$0xff] %v9182_v4  ;;  %v4016_v59 = vpop.permute.xlu1 %4015 }
 0xc39   : > { %v9184_v5 = vpop.eup %6801  ;;  %v4022_v61 = vpop.permute.xlu0 %4021 }
 0xc3a   : > { %10766 = vst [vmem:[#allocation156_spill] sm:$0xff] %v9184_v5  ;;  %v4020_v7 = vpop.permute.xlu1 %4019 }
 0xc3c   : > { %6343 = vmatpush3.bf16.xpose.msra.mxu1 %v4086_v12 }
 0xc3d   : > { %v9186_v26 = vpop.eup %6803  ;;  %6577 = vmatprep.subr.msk.bf16.mxu1 %vm1752_vm0, %v4042_v35  ;;  %v4026_v15 = vpop.permute.xlu0 %4025 }
 0xc3e   : > { %10767 = vst [vmem:[#allocation157_spill] sm:$0xff] %v9186_v26  ;;  %v9189_v8 = vpop.eup %6805  ;;  %v3880_v41 = vpack.c.bf16 %v9186_v26, %v9182_v4  ;;  %v4024_v32 = vpop.permute.xlu1 %4023 }
 0xc3f   : > { %10768 = vst [vmem:[#allocation158_spill] sm:$0xff] %v9189_v8  ;;  %v3881_v9 = vpack.c.bf16 %v9184_v5, %v9189_v8 }
 0xc40   : > { %6326 = vmatprep.mubr.bf16.mxu1 %v3880_v41 }
 0xc41   : > { %6327 = vmatmul.mubr.bf16.gmra.mrb[76].mxu1 %v3881_v9  ;;  %v4335_v63 = vpop.permute.xlu0 %4334 }
 0xc42   : > { %6346 = vmatprep.mubr.msk.bf16.mxu1 %vm1752_vm0, %v4012_v0  ;;  %v4333_v20 = vpop.permute.xlu1 %4332 }
 0xc43   : > { %6362 = vmatprep.subr.bf16.mxu0 %v4333_v20 }
 0xc44   : > { %6345 = vmatpush3.bf16.xpose.msra.mxu1 %v4089_v48  ;;  %6363 = vmatpush3.bf16.msra.mxu0 %v4333_v20 }
 0xc45   : > { %6364 = vmatprep.subr.bf16.mxu0 %v4335_v63  ;;  %v4337_v9 = vpop.permute.xlu0 %4336 }
 0xc46   : > { %v4339_v0 = vpop.permute.xlu1 %4338 }
 0xc48   : > { %6365 = vmatpush3.bf16.msra.mxu0 %v4335_v63 }
 0xc49   : > { %6366 = vmatprep.subr.bf16.mxu0 %v4337_v9 }
 0xc4a   : > { %v4341_v48 = vpop.permute.xlu1 %4340 }
 0xc4b   : > { %6347 = vmatmul.mubr.msk.bf16.vlgmr.msra.gmra.mrb[80].mxu1 %vm1752_vm0, %v4014_v31  ;;  %v4343_v31 = vpop.permute.xlu0 %4342 }
 0xc4c   : > { %6350 = vmatprep.mubr.msk.bf16.mxu1 %vm1752_vm0, %v4016_v59  ;;  %6367 = vmatpush3.bf16.msra.mxu0 %v4337_v9 }
 0xc4d   : > { %6368 = vmatprep.subr.bf16.mxu0 %v4339_v0 }
 0xc4e   : > { %v4345_v59 = vpop.permute.xlu1 %4344 }
 0xc50   : > { %6369 = vmatpush3.bf16.msra.mxu0 %v4339_v0 }
 0xc51   : > { %6370 = vmatprep.subr.bf16.mxu0 %v4341_v48 }
 0xc53   : > { %6351 = vmatmul.mubr.msk.bf16.gmra.mrb[84].mxu1 %vm1752_vm0, %v4018_v13  ;;  %v4347_v13 = vpop.permute.xlu0 %4346 }
 0xc54   : > { %6354 = vmatprep.mubr.msk.bf16.mxu1 %vm1752_vm0, %v4020_v7  ;;  %6371 = vmatpush3.bf16.msra.mxu0 %v4341_v48  ;;  %v9218_v7 = vpop.permute.xlu1 %4509 }
 0xc55   : > { %6372 = vmatprep.subr.bf16.mxu0 %v4343_v31 }
 0xc58   : > { %6373 = vmatpush3.bf16.msra.mxu0 %v4343_v31 }
 0xc59   : > { %6374 = vmatprep.subr.bf16.mxu0 %v4345_v59 }
 0xc5b   : > { %6355 = vmatmul.mubr.msk.bf16.gmra.mrb[88].mxu1 %vm1752_vm0, %v4022_v61 }
 0xc5c   : > { %6358 = vmatprep.mubr.msk.bf16.mxu1 %vm1752_vm0, %v4024_v32  ;;  %6375 = vmatpush3.bf16.msra.mxu0 %v4345_v59 }
 0xc5d   : > { %6376 = vmatprep.subr.bf16.mxu0 %v4347_v13 }
 0xc60   : > { %6377 = vmatpush3.bf16.msra.mxu0 %v4347_v13 }
 0xc61   : > { %6578 = vmatprep.subr.msk.bf16.mxu0 %vm1752_vm0, %v9218_v7 }
 0xc63   : > { %6359 = vmatmul.mubr.msk.bf16.gmra.mrb[92].mxu1 %vm1752_vm0, %v4026_v15 }
 0xcc2   : > { %v9210_v34 = vpop.f32.mrb[64].mxu1 }
 0xcc3   : > { %10769 = vst [vmem:[#allocation159_spill] sm:$0xff] %v9210_v34  ;;  %v9212_v12 = vpop.f32.mrb[65].mxu1 }
 0xcc4   : > { %10770 = vst [vmem:[#allocation160_spill] sm:$0xff] %v9212_v12  ;;  %v9214_v35 = vpop.f32.mrb[66].mxu1 }
 0xcc5   : > { %10771 = vst [vmem:[#allocation161_spill] sm:$0xff] %v9214_v35  ;;  %v9216_v41 = vpop.f32.mrb[67].mxu1 }
 0xcc6   : > { %10772 = vst [vmem:[#allocation162_spill] sm:$0xff] %v9216_v41 }
 0xd00   : > { %v9222_v61 = vpop.f32.mrb[68].mxu1 }
 0xd01   : > { %10773 = vst [vmem:[#allocation163_spill] sm:$0xff] %v9222_v61  ;;  %v9224_v32 = vpop.f32.mrb[69].mxu1 }
 0xd02   : > { %10774 = vst [vmem:[#allocation164_spill] sm:$0xff] %v9224_v32  ;;  %v9226_v15 = vpop.f32.mrb[70].mxu1 }
 0xd03   : > { %10775 = vst [vmem:[#allocation165_spill] sm:$0xff] %v9226_v15  ;;  %v9228_v20 = vpop.f32.mrb[71].mxu1 }
 0xd04   : > { %10776 = vst [vmem:[#allocation166_spill] sm:$0xff] %v9228_v20 }
 0xd08   : > { %v9230_v63 = vpop.f32.mrb[72].mxu1 }
 0xd09   : > { %10777 = vst [vmem:[#allocation167_spill] sm:$0xff] %v9230_v63  ;;  %v9232_v9 = vpop.f32.mrb[73].mxu1 }
 0xd0a   : > { %10778 = vst [vmem:[#allocation168_spill] sm:$0xff] %v9232_v9  ;;  %v9234_v0 = vpop.f32.mrb[74].mxu1 }
 0xd0b   : > { %10779 = vst [vmem:[#allocation169_spill] sm:$0xff] %v9234_v0  ;;  %v9236_v48 = vpop.f32.mrb[75].mxu1 }
 0xd0c   : > { %10780 = vst [vmem:[#allocation170_spill] sm:$0xff] %v9236_v48 }
 0xd14   : > { %v9238_v31 = vpop.f32.mrb[76].mxu1 }
 0xd15   : > { %10781 = vst [vmem:[#allocation171_spill] sm:$0xff] %v9238_v31  ;;  %v9240_v59 = vpop.f32.mrb[77].mxu1 }
 0xd16   : > { %10782 = vst [vmem:[#allocation172_spill] sm:$0xff] %v9240_v59  ;;  %v9242_v13 = vpop.f32.mrb[78].mxu1 }
 0xd17   : > { %10783 = vst [vmem:[#allocation173_spill] sm:$0xff] %v9242_v13  ;;  %v9244_v35 = vpop.f32.mrb[79].mxu1 }
 0xd18   : > { %10784 = vst [vmem:[#allocation174_spill] sm:$0xff] %v9244_v35 }
 0xd1e   : > { %v6348_v61 = vpop.f32.mrb[80].mxu1 }
 0xd1f   : > { %v9247_v15 = vadd.f32 %v6348_v61, %v10629_v39  ;;  %v4125_v20 = vpop.f32.mrb[81].mxu1 }
 0xd20   : > { %v9250_v63 = vadd.f32 %v4125_v20, %v10628_v33  ;;  %v6349_v9 = vpop.f32.mrb[82].mxu1 }
 0xd21   : > { %4192 = vmax.xlane.f32.xlu0 %v9247_v15  ;;  %v4128_v0 = vpop.f32.mrb[83].mxu1  ;;  %v9255_v31 = vadd.f32 %v6349_v9, %v10626_v40 }
 0xd22   : > { %4188 = vmax.xlane.f32.xlu1 %v9250_v63  ;;  %v4129_v26 = vadd.f32 %v4128_v0, %v10627_v38 }
 0xd26   : > { %4194 = vmax.xlane.f32.xlu1 %v9255_v31  ;;  %v6352_v13 = vpop.f32.mrb[84].mxu1 }
 0xd27   : > { %v4141_v35 = vpop.f32.mrb[85].mxu1  ;;  %v9267_v8 = vadd.f32 %v6352_v13, %v10624_v42 }
 0xd28   : > { %v6353_v48 = vpop.f32.mrb[86].mxu1  ;;  %v9264_v56 = vadd.f32 %v4141_v35, %v10625_v27 }
 0xd29   : > { %v4144_v61 = vpop.f32.mrb[87].mxu1  ;;  %v4153_v36 = vadd.f32 %v6353_v48, %v10619_v45 }
 0xd2a   : > { %v9273_v4 = vadd.f32 %v4144_v61, %v10620_v37 }
 0xd2e   : > { %v6356_v59 = vpop.f32.mrb[88].mxu1 }
 0xd2f   : > { %v4157_v41 = vpop.f32.mrb[89].mxu1  ;;  %v9277_v0 = vadd.f32 %v6356_v59, %v10614_v57 }
 0xd30   : > { %v6357_v32 = vpop.f32.mrb[90].mxu1  ;;  %v9281_v35 = vadd.f32 %v4157_v41, %v10623_v52 }
 0xd31   : > { %v4160_v20 = vpop.f32.mrb[91].mxu1 }
 0xd32   : > { %v9285_v13 = vadd.f32 %v4160_v20, %v10615_v53 }
 0xd36   : > { %v6360_v34 = vpop.f32.mrb[92].mxu1 }
 0xd37   : > { %4517 = vrot.lane.b32.xlu0 %v9085_v51, %s7196_s28  ;;  %4515 = vrot.lane.b32.xlu1 %v9081_v2, %s7196_s28  ;;  %v4173_v12 = vpop.f32.mrb[93].mxu1  ;;  %v9289_v48 = vadd.f32 %v6360_v34, %v10617_v11  ;;  %v9305_v34 = vadd.f32 %v6357_v32, %v10622_v58 }
 0xd38   : > { %v6361_v9 = vpop.f32.mrb[94].mxu1  ;;  %v9295_v59 = vadd.f32 %v4173_v12, %v10616_v44 }
 0xd39   : > { %v4176_v5 = vpop.f32.mrb[95].mxu1  ;;  %v9310_v12 = vadd.f32 %v6361_v9, %v10621_v14 }
 0xd3a   : > { %v9299_v41 = vadd.f32 %v4176_v5, %v10618_v50  ;;  %v4512_v5 = vpop.permute.xlu0 %4511 }
 0xd3e   : > { %v9322_v32 = vpop.permute.xlu0 %4513 }
 0xd56   : > { %4190 = vmax.xlane.f32.xlu0 %v4129_v26 }
 0xd5a   : > { %4196 = vmax.xlane.f32.xlu0 %v9264_v56 }
 0xd5b   : > { %4200 = vmax.xlane.f32.xlu1 %v9267_v8 }
 0xd5f   : > { %4202 = vmax.xlane.f32.xlu1 %v4153_v36 }
 0xd63   : > { %4198 = vmax.xlane.f32.xlu1 %v9273_v4 }
 0xd67   : > { %4208 = vmax.xlane.f32.xlu1 %v9277_v0 }
 0xd6b   : > { %4204 = vmax.xlane.f32.xlu1 %v9281_v35 }
 0xd6f   : > { %4206 = vmax.xlane.f32.xlu1 %v9285_v13 }
 0xd70   : > { %4519 = vrot.lane.b32.xlu0 %v9089_v6, %s7196_s28 }
 0xd73   : > { %4216 = vmax.xlane.f32.xlu1 %v9289_v48 }
 0xd77   : > { %4212 = vmax.xlane.f32.xlu1 %v9295_v59 }
 0xd7b   : > { %4214 = vmax.xlane.f32.xlu1 %v9299_v41 }
 0xd8c   : > { %4523 = vrot.lane.b32.xlu1 %v9097_v28, %s7196_s28 }
 0xd8f   : > { %4210 = vmax.xlane.f32.xlu0 %v9305_v34 }
 0xd90   : > { %4501 = vrot.lane.b32.xlu1 %v9085_v51, %s7197_s29 }
 0xd93   : > { %4218 = vmax.xlane.f32.xlu0 %v9310_v12 }
 0xd94   : > { %4505 = vrot.lane.b32.xlu1 %v9093_v62, %s7197_s29 }
 0xd98   : > { %4953 = vrot.lane.b32.xlu1 %v9073_v25, %s7198_s1 }
 0xda9   : > { %4521 = vrot.lane.b32.xlu0 %v9093_v62, %s7196_s28 }
 0xdad   : > { %4493 = vrot.lane.b32.xlu0 %v9067_v54, %s7197_s29 }
 0xdae   : > { %v4193_v20 = vpop.xlane.xlu0 %4192 }
 0xdaf   : > { %v4189_v61 = vpop.xlane.xlu1 %4188  ;;  %v4222_v55 = vsub.f32 %v9247_v15, %v4193_v20 }
 0xdb0   : > { %v4220_v47 = vsub.f32 %v9250_v63, %v4189_v61 }
 0xdb1   : > { %4495 = vrot.lane.b32.xlu0 %v9073_v25, %s7197_s29  ;;  %v4240_v3 = vmul.f32 1.442695, %v4222_v55  ;;  %v4550_v55 = vsel %vm1752_vm0, %v9218_v7, 0 }
 0xdb2   : > { %v9325_v60 = vpop.permute.xlu0 %4517  ;;  %v4236_v29 = vmul.f32 1.442695, %v4220_v47 }
 0xdb3   : > { %v4195_v9 = vpop.xlane.xlu1 %4194 }
 0xdb4   : > { %v4223_v49 = vsub.f32 %v9255_v31, %v4195_v9  ;;  %6807 = vpow2.f32 %v4236_v29 }
 0xdb5   : > { %4497 = vrot.lane.b32.xlu0 %v9077_v24, %s7197_s29 }
 0xdb6   : > { %v4242_v16 = vmul.f32 1.442695, %v4223_v49 }
 0xdb7   : > { %v9329_v18 = vpop.permute.xlu1 %4515 }
 0xdb8   : > { %6809 = vpow2.f32 %v4242_v16 }
 0xdb9   : > { %4499 = vrot.lane.b32.xlu0 %v9081_v2, %s7197_s29 }
 0xdbd   : > { %4503 = vrot.lane.b32.xlu0 %v9089_v6, %s7197_s29 }
 0xdbe   : > { %v9333_v49 = vpop.eup %6807 }
 0xdc1   : > { %4507 = vrot.lane.b32.xlu0 %v9097_v28, %s7197_s29 }
 0xdc5   : > { %4951 = vrot.lane.b32.xlu0 %v9067_v54, %s7198_s1 }
 0xdc9   : > { %4955 = vrot.lane.b32.xlu0 %v9077_v24, %s7198_s1 }
 0xde3   : > { %v4191_v19 = vpop.xlane.xlu0 %4190 }
 0xde4   : > { %v4221_v43 = vsub.f32 %v4129_v26, %v4191_v19  ;;  %v9335_v19 = vpop.eup %6809 }
 0xde5   : > { %10785 = vst [vmem:[#allocation175_spill] sm:$0xff] %v9335_v19 }
 0xde6   : > { %v4238_v10 = vmul.f32 1.442695, %v4221_v43 }
 0xde7   : > { %v4197_v22 = vpop.xlane.xlu0 %4196 }
 0xde8   : > { %6811 = vpow2.f32 %v4238_v10  ;;  %v4201_v21 = vpop.xlane.xlu1 %4200  ;;  %v4224_v63 = vsub.f32 %v9264_v56, %v4197_v22 }
 0xde9   : > { %6813 = vpow2.f32 %v4240_v3  ;;  %v4226_v15 = vsub.f32 %v9267_v8, %v4201_v21 }
 0xdea   : > { %v4244_v47 = vmul.f32 1.442695, %v4224_v63 }
 0xdeb   : > { %v4248_v10 = vmul.f32 1.442695, %v4226_v15  ;;  %v4553_v15 = vsel %vm1752_vm0, %v4512_v5, 0 }
 0xdec   : > { %v4203_v61 = vpop.xlane.xlu1 %4202  ;;  %6815 = vpow2.f32 %v4244_v47 }
 0xded   : > { %v4227_v31 = vsub.f32 %v4153_v36, %v4203_v61 }
 0xdef   : > { %v4250_v20 = vmul.f32 1.442695, %v4227_v31 }
 0xdf0   : > { %v4199_v9 = vpop.xlane.xlu1 %4198 }
 0xdf1   : > { %v4225_v43 = vsub.f32 %v9273_v4, %v4199_v9  ;;  %6817 = vpow2.f32 %v4250_v20 }
 0xdf2   : > { %v9338_v29 = vpop.eup %6811 }
 0xdf3   : > { %v9340_v16 = vpop.eup %6813  ;;  %v4246_v22 = vmul.f32 1.442695, %v4225_v43  ;;  %v4316_v3 = vpack.c.bf16 %v9338_v29, %v9333_v49 }
 0xdf4   : > { %v4209_v21 = vpop.xlane.xlu1 %4208  ;;  %v4317_v36 = vpack.c.bf16 %v9335_v19, %v9340_v16 }
 0xdf5   : > { %6819 = vpow2.f32 %v4246_v22  ;;  %6378 = vmatprep.mubr.bf16.mxu0 %v4316_v3  ;;  %v4559_v3 = vsel %vm1752_vm0, %v9329_v18, 0 }
 0xdf6   : > { %6821 = vpow2.f32 %v4248_v10  ;;  %6379 = vmatmul.mubr.bf16.vlgmr.msra.gmra.mrb[80].mxu0 %v4317_v36  ;;  %v9350_v63 = vpop.eup %6815 }
 0xdf7   : > { %6395 = vmatpush3.bf16.xpose.msra.mxu0 %v4550_v55  ;;  %v4562_v55 = vsel %vm1752_vm0, %v9325_v60, 0 }
 0xdf8   : > { %6579 = vmatprep.subr.msk.bf16.mxu0 %vm1752_vm0, %v4512_v5  ;;  %v4205_v56 = vpop.xlane.xlu1 %4204  ;;  %v4556_v5 = vsel %vm1752_vm0, %v9322_v32, 0 }
 0xdf9   : > { %v4228_v4 = vsub.f32 %v9281_v35, %v4205_v56  ;;  %v4520_v56 = vpop.permute.xlu0 %4519 }
 0xdfb   : > { %v4252_v26 = vmul.f32 1.442695, %v4228_v4  ;;  %v9353_v31 = vpop.eup %6817  ;;  %v4230_v4 = vsub.f32 %v9277_v0, %v4209_v21 }
 0xdfc   : > { %v4207_v8 = vpop.xlane.xlu1 %4206  ;;  %10786 = vst [vmem:[#allocation176_spill] sm:$0xff] %v9353_v31 }
 0xdfd   : > { %v4229_v61 = vsub.f32 %v9285_v13, %v4207_v8  ;;  %6823 = vpow2.f32 %v4252_v26 }
 0xdff   : > { %v9356_v47 = vpop.eup %6819  ;;  %v4254_v20 = vmul.f32 1.442695, %v4229_v61  ;;  %6397 = vmatpush3.bf16.xpose.msra.mxu0 %v4553_v15 }
 0xe00   : > { %10787 = vst [vmem:[#allocation177_spill] sm:$0xff] %v9356_v47  ;;  %v9358_v7 = vpop.eup %6821  ;;  %6580 = vmatprep.subr.msk.bf16.mxu0 %vm1752_vm0, %v9322_v32  ;;  %v4318_v35 = vpack.c.bf16 %v9356_v47, %v9350_v63  ;;  %v4217_v9 = vpop.xlane.xlu1 %4216 }
 0xe01   : > { %6825 = vpow2.f32 %v4254_v20  ;;  %v4319_v13 = vpack.c.bf16 %v9353_v31, %v9358_v7  ;;  %v4234_v21 = vsub.f32 %v9289_v48, %v4217_v9 }
 0xe02   : > { %6382 = vmatprep.mubr.bf16.mxu0 %v4318_v35 }
 0xe03   : > { %6383 = vmatmul.mubr.bf16.gmra.mrb[84].mxu0 %v4319_v13  ;;  %v4565_v13 = vsel %vm1752_vm0, %v4520_v56, 0 }
 0xe04   : > { %v4213_v36 = vpop.xlane.xlu1 %4212 }
 0xe05   : > { %v4232_v8 = vsub.f32 %v9295_v59, %v4213_v36 }
 0xe07   : > { %6399 = vmatpush3.bf16.xpose.msra.mxu0 %v4556_v5  ;;  %v9370_v43 = vpop.eup %6823  ;;  %v4260_v35 = vmul.f32 1.442695, %v4232_v8 }
 0xe08   : > { %6581 = vmatprep.subr.msk.bf16.mxu0 %vm1752_vm0, %v9329_v18  ;;  %10788 = vst [vmem:[#allocation178_spill] sm:$0xff] %v9370_v43  ;;  %v4215_v32 = vpop.xlane.xlu1 %4214  ;;  %v4256_v18 = vmul.f32 1.442695, %v4230_v4 }
 0xe09   : > { %v4233_v26 = vsub.f32 %v9299_v41, %v4215_v32 }
 0xe0a   : > { %6827 = vpow2.f32 %v4256_v18 }
 0xe0b   : > { %v9372_v10 = vpop.eup %6825  ;;  %v4262_v61 = vmul.f32 1.442695, %v4233_v26 }
 0xe0c   : > { %10789 = vst [vmem:[#allocation179_spill] sm:$0xff] %v9372_v10  ;;  %v4320_v22 = vpack.c.bf16 %v9372_v10, %v9370_v43 }
 0xe0d   : > { %6829 = vpow2.f32 %v4262_v61 }
 0xe0e   : > { %6386 = vmatprep.mubr.bf16.mxu0 %v4320_v22  ;;  %v4264_v22 = vmul.f32 1.442695, %v4234_v21 }
 0xe0f   : > { %6401 = vmatpush3.bf16.xpose.msra.mxu0 %v4559_v3  ;;  %v4524_v3 = vpop.permute.xlu1 %4523 }
 0xe10   : > { %6582 = vmatprep.subr.msk.bf16.mxu0 %vm1752_vm0, %v9325_v60 }
 0xe14   : > { %v9393_v36 = vpop.eup %6827 }
 0xe15   : > { %10790 = vst [vmem:[#allocation180_spill] sm:$0xff] %v9393_v36 }
 0xe17   : > { %6403 = vmatpush3.bf16.xpose.msra.mxu0 %v4562_v55  ;;  %v9395_v48 = vpop.eup %6829  ;;  %v4571_v55 = vsel %vm1752_vm0, %v4524_v3, 0 }
 0xe18   : > { %6583 = vmatprep.subr.msk.bf16.mxu0 %vm1752_vm0, %v4520_v56  ;;  %10791 = vst [vmem:[#allocation181_spill] sm:$0xff] %v9395_v48 }
 0xe1c   : > { %v4211_v15 = vpop.xlane.xlu0 %4210 }
 0xe1d   : > { %v4231_v20 = vsub.f32 %v9305_v34, %v4211_v15 }
 0xe1f   : > { %v4258_v60 = vmul.f32 1.442695, %v4231_v20  ;;  %6405 = vmatpush3.bf16.xpose.msra.mxu0 %v4565_v13 }
 0xe20   : > { %v4219_v0 = vpop.xlane.xlu0 %4218 }
 0xe21   : > { %6831 = vpow2.f32 %v4258_v60  ;;  %v4235_v41 = vsub.f32 %v9310_v12, %v4219_v0 }
 0xe22   : > { %6833 = vpow2.f32 %v4260_v35  ;;  %v4502_v35 = vpop.permute.xlu1 %4501 }
 0xe23   : > { %v4266_v59 = vmul.f32 1.442695, %v4235_v41 }
 0xe24   : > { %v4522_v5 = vpop.permute.xlu0 %4521 }
 0xe25   : > { %6584 = vmatprep.subr.msk.bf16.mxu0 %vm1752_vm0, %v4522_v5  ;;  %v4568_v34 = vsel %vm1752_vm0, %v4522_v5, 0  ;;  %6835 = vpow2.f32 %v4266_v59 }
 0xe26   : > { %6837 = vpow2.f32 %v4264_v22  ;;  %v4506_v60 = vpop.permute.xlu1 %4505  ;;  %v9435_v22 = vld [vmem:[%s7870_s16 + $0x20] sm:$0xff] }
 0xe27   : > { %6407 = vmatpush3.bf16.xpose.msra.mxu0 %v4568_v34  ;;  %6426 = vmatprep.subr.bf16.mxu1 %v9435_v22 }
 0xe28   : > { %6585 = vmatprep.subr.msk.bf16.mxu0 %vm1752_vm0, %v4524_v3  ;;  %v4494_v8 = vpop.permute.xlu0 %4493  ;;  %6427 = vmatpush3.bf16.msra.mxu1 %v9435_v22  ;;  %v9442_v3 = vld [vmem:[%s7870_s16 + $0x48] sm:$0xff] }
 0xe29   : > { %6428 = vmatprep.subr.bf16.mxu1 %v9442_v3 }
 0xe2b   : > { %v9397_v9 = vpop.eup %6831 }
 0xe2c   : > { %10792 = vst [vmem:[#allocation182_spill] sm:$0xff] %v9397_v9  ;;  %v9399_v12 = vpop.eup %6833  ;;  %v4321_v32 = vpack.c.bf16 %v9397_v9, %v9393_v36  ;;  %v4496_v61 = vpop.permute.xlu0 %4495  ;;  %6429 = vmatpush3.bf16.msra.mxu1 %v9442_v3 }
 0xe2d   : > { %10793 = vst [vmem:[#allocation183_spill] sm:$0xff] %v9399_v12  ;;  %v4322_v56 = vpack.c.bf16 %v9395_v48, %v9399_v12 }
 0xe2e   : > { %6387 = vmatmul.mubr.bf16.gmra.mrb[88].mxu0 %v4321_v32 }
 0xe2f   : > { %6390 = vmatprep.mubr.bf16.mxu0 %v4322_v56  ;;  %6409 = vmatpush3.bf16.xpose.msra.mxu0 %v4571_v55  ;;  %v9406_v4 = vpop.eup %6835 }
 0xe30   : > { %10794 = vst [vmem:[#allocation184_spill] sm:$0xff] %v9406_v4  ;;  %v9408_v26 = vpop.eup %6837  ;;  %v4498_v15 = vpop.permute.xlu0 %4497 }
 0xe31   : > { %10795 = vst [vmem:[#allocation185_spill] sm:$0xff] %v9408_v26  ;;  %v4323_v18 = vpack.c.bf16 %v9406_v4, %v9408_v26 }
 0xe34   : > { %v4500_v20 = vpop.permute.xlu0 %4499 }
 0xe36   : > { %6391 = vmatmul.mubr.bf16.gmra.mrb[92].mxu0 %v4323_v18  ;;  %v9458_v18 = vld [vmem:[%s7870_s16 + $0x98] sm:$0xff] }
 0xe37   : > { %6410 = vmatprep.mubr.msk.bf16.mxu0 %vm1752_vm0, %v4494_v8  ;;  %v9453_v8 = vld [vmem:[%s7870_s16 + $0x70] sm:$0xff] }
 0xe38   : > { %v4504_v13 = vpop.permute.xlu0 %4503  ;;  %6430 = vmatprep.subr.bf16.mxu1 %v9453_v8 }
 0xe39   : > { %6431 = vmatpush3.bf16.msra.mxu1 %v9453_v8 }
 0xe3a   : > { %6432 = vmatprep.subr.bf16.mxu1 %v9458_v18 }
 0xe3c   : > { %v4508_v0 = vpop.permute.xlu0 %4507 }
 0xe3d   : > { %6433 = vmatpush3.bf16.msra.mxu1 %v9458_v18 }
 0xe3e   : > { %6411 = vmatmul.mubr.msk.bf16.vlgmr.msra.gmra.mrb[96].mxu0 %vm1752_vm0, %v4496_v61  ;;  %v9463_v61 = vld [vmem:[%s7870_s16 + $0xc0] sm:$0xff] }
 0xe3f   : > { %6414 = vmatprep.mubr.msk.bf16.mxu0 %vm1752_vm0, %v4498_v15  ;;  %6434 = vmatprep.subr.bf16.mxu1 %v9463_v61  ;;  %v9468_v15 = vld [vmem:[%s7870_s16 + $0xe8] sm:$0xff] }
 0xe41   : > { %6435 = vmatpush3.bf16.msra.mxu1 %v9463_v61 }
 0xe42   : > { %6436 = vmatprep.subr.bf16.mxu1 %v9468_v15 }
 0xe45   : > { %6437 = vmatpush3.bf16.msra.mxu1 %v9468_v15 }
 0xe46   : > { %6415 = vmatmul.mubr.msk.bf16.gmra.mrb[100].mxu0 %vm1752_vm0, %v4500_v20  ;;  %v9473_v20 = vld [vmem:[%s7870_s16 + $0x110] sm:$0xff] }
 0xe47   : > { %6418 = vmatprep.mubr.msk.bf16.mxu0 %vm1752_vm0, %v4502_v35  ;;  %6438 = vmatprep.subr.bf16.mxu1 %v9473_v20  ;;  %v9478_v35 = vld [vmem:[%s7870_s16 + $0x138] sm:$0xff] }
 0xe49   : > { %6439 = vmatpush3.bf16.msra.mxu1 %v9473_v20 }
 0xe4a   : > { %6440 = vmatprep.subr.bf16.mxu1 %v9478_v35 }
 0xe4d   : > { %6441 = vmatpush3.bf16.msra.mxu1 %v9478_v35 }
 0xe4e   : > { %6419 = vmatmul.mubr.msk.bf16.gmra.mrb[104].mxu0 %vm1752_vm0, %v4504_v13  ;;  %v9480_v13 = vpop.permute.xlu0 %4951 }
 0xe4f   : > { %6422 = vmatprep.mubr.msk.bf16.mxu0 %vm1752_vm0, %v4506_v60  ;;  %6586 = vmatprep.subr.msk.bf16.mxu1 %vm1752_vm0, %v9480_v13 }
 0xe56   : > { %6423 = vmatmul.mubr.msk.bf16.gmra.mrb[108].mxu0 %vm1752_vm0, %v4508_v0 }
 0xec9   : > { %v9426_v21 = vpop.f32.mrb[80].mxu0 }
 0xeca   : > { %10796 = vst [vmem:[#allocation186_spill] sm:$0xff] %v9426_v21  ;;  %v9428_v41 = vpop.f32.mrb[81].mxu0 }
 0xecb   : > { %10797 = vst [vmem:[#allocation187_spill] sm:$0xff] %v9428_v41  ;;  %v9430_v59 = vpop.f32.mrb[82].mxu0 }
 0xecc   : > { %10798 = vst [vmem:[#allocation188_spill] sm:$0xff] %v9430_v59  ;;  %v9432_v5 = vpop.f32.mrb[83].mxu0 }
 0xecd   : > { %10799 = vst [vmem:[#allocation189_spill] sm:$0xff] %v9432_v5 }
 0xed6   : > { %v9439_v34 = vpop.f32.mrb[84].mxu0 }
 0xed7   : > { %10800 = vst [vmem:[#allocation190_spill] sm:$0xff] %v9439_v34  ;;  %v9444_v32 = vpop.f32.mrb[85].mxu0 }
 0xed8   : > { %10801 = vst [vmem:[#allocation191_spill] sm:$0xff] %v9444_v32  ;;  %v9447_v55 = vpop.f32.mrb[86].mxu0 }
 0xed9   : > { %10802 = vst [vmem:[#allocation192_spill] sm:$0xff] %v9447_v55  ;;  %v9450_v56 = vpop.f32.mrb[87].mxu0 }
 0xeda   : > { %10803 = vst [vmem:[#allocation193_spill] sm:$0xff] %v9450_v56 }
 0xf01   : > { %v9486_v60 = vpop.f32.mrb[88].mxu0 }
 0xf02   : > { %10804 = vst [vmem:[#allocation194_spill] sm:$0xff] %v9486_v60  ;;  %v9488_v0 = vpop.f32.mrb[89].mxu0 }
 0xf03   : > { %10805 = vst [vmem:[#allocation195_spill] sm:$0xff] %v9488_v0  ;;  %v9490_v55 = vpop.f32.mrb[90].mxu0 }
 0xf04   : > { %10806 = vst [vmem:[#allocation196_spill] sm:$0xff] %v9490_v55  ;;  %v9492_v56 = vpop.f32.mrb[91].mxu0 }
 0xf05   : > { %10807 = vst [vmem:[#allocation197_spill] sm:$0xff] %v9492_v56 }
 0xf09   : > { %v9494_v59 = vpop.f32.mrb[92].mxu0 }
 0xf0a   : > { %10808 = vst [vmem:[#allocation198_spill] sm:$0xff] %v9494_v59  ;;  %v9496_v34 = vpop.f32.mrb[93].mxu0 }
 0xf0b   : > { %10809 = vst [vmem:[#allocation199_spill] sm:$0xff] %v9496_v34  ;;  %v9498_v5 = vpop.f32.mrb[94].mxu0 }
 0xf0c   : > { %10810 = vst [vmem:[#allocation200_spill] sm:$0xff] %v9498_v5  ;;  %v9500_v32 = vpop.f32.mrb[95].mxu0 }
 0xf0d   : > { %10811 = vst [vmem:[#allocation201_spill] sm:$0xff] %v9500_v32 }
 0xf11   : > { %v6412_v21 = vpop.f32.mrb[96].mxu0 }
 0xf12   : > { %v9503_v41 = vadd.f32 %v6412_v21, %v10629_v39  ;;  %v4607_v4 = vpop.f32.mrb[97].mxu0 }
 0xf13   : > { %v9506_v60 = vadd.f32 %v4607_v4, %v10628_v33  ;;  %v6413_v0 = vpop.f32.mrb[98].mxu0 }
 0xf14   : > { %4674 = vmax.xlane.f32.xlu0 %v9503_v41  ;;  %v4610_v55 = vpop.f32.mrb[99].mxu0  ;;  %v9514_v5 = vadd.f32 %v6413_v0, %v10626_v40 }
 0xf15   : > { %v9510_v59 = vadd.f32 %v4610_v55, %v10627_v38  ;;  %4670 = vmax.xlane.f32.xlu1 %v9506_v60 }
 0xf18   : > { %4672 = vmax.xlane.f32.xlu0 %v9510_v59 }
 0xf19   : > { %4676 = vmax.xlane.f32.xlu1 %v9514_v5  ;;  %v6416_v21 = vpop.f32.mrb[100].mxu0 }
 0xf1a   : > { %v4623_v32 = vpop.f32.mrb[101].mxu0  ;;  %v9523_v31 = vadd.f32 %v6416_v21, %v10624_v42 }
 0xf1b   : > { %v6417_v4 = vpop.f32.mrb[102].mxu0  ;;  %v9526_v36 = vadd.f32 %v4623_v32, %v10625_v27 }
 0xf1c   : > { %v4626_v56 = vpop.f32.mrb[103].mxu0  ;;  %v9534_v43 = vadd.f32 %v6417_v4, %v10619_v45  ;;  %v10813_v4 = vld [vmem:[#allocation24_spill] sm:$0xff] }
 0xf1d   : > { %v9542_v32 = vadd.f32 %v4626_v56, %v10620_v37 }
 0xf21   : > { %v6420_v34 = vpop.f32.mrb[104].mxu0 }
 0xf22   : > { %v4639_v48 = vpop.f32.mrb[105].mxu0  ;;  %v9549_v21 = vadd.f32 %v6420_v34, %v10614_v57 }
 0xf23   : > { %v6421_v9 = vpop.f32.mrb[106].mxu0  ;;  %v9530_v47 = vadd.f32 %v4639_v48, %v10623_v52 }
 0xf24   : > { %v4642_v26 = vpop.f32.mrb[107].mxu0 }
 0xf25   : > { %v9538_v19 = vadd.f32 %v4642_v26, %v10615_v53  ;;  %v9555_v26 = vadd.f32 %v6421_v9, %v10622_v58 }
 0xf29   : > { %v6424_v10 = vpop.f32.mrb[108].mxu0 }
 0xf2a   : > { %4957 = vrot.lane.b32.xlu1 %v9081_v2, %s7198_s1  ;;  %v4655_v55 = vpop.f32.mrb[109].mxu0  ;;  %v9546_v48 = vadd.f32 %v6424_v10, %v10617_v11 }
 0xf2b   : > { %v6425_v12 = vpop.f32.mrb[110].mxu0  ;;  %v9558_v56 = vadd.f32 %v4655_v55, %v10616_v44  ;;  %v10815_v55 = vld [vmem:[#allocation26_spill] sm:$0xff] }
 0xf2c   : > { %v4658_v0 = vpop.f32.mrb[111].mxu0  ;;  %v9563_v10 = vadd.f32 %v6425_v12, %v10621_v14 }
 0xf2d   : > { %v9567_v34 = vadd.f32 %v4658_v0, %v10618_v50  ;;  %v10818_v0 = vld [vmem:[#allocation22_spill] sm:$0xff] }
 0xf2e   : > { %4959 = vrot.lane.b32.xlu0 %v9085_v51, %s7198_s1 }
 0xf4d   : > { %4682 = vmax.xlane.f32.xlu0 %v9523_v31 }
 0xf4e   : > { %4678 = vmax.xlane.f32.xlu1 %v9526_v36 }
 0xf51   : > { %4686 = vmax.xlane.f32.xlu0 %v9530_v47 }
 0xf52   : > { %4684 = vmax.xlane.f32.xlu1 %v9534_v43 }
 0xf55   : > { %4688 = vmax.xlane.f32.xlu0 %v9538_v19 }
 0xf56   : > { %4680 = vmax.xlane.f32.xlu1 %v9542_v32 }
 0xf59   : > { %4698 = vmax.xlane.f32.xlu0 %v9546_v48 }
 0xf5a   : > { %4690 = vmax.xlane.f32.xlu1 %v9549_v21 }
 0xf5e   : > { %4692 = vmax.xlane.f32.xlu1 %v9555_v26 }
 0xf62   : > { %4694 = vmax.xlane.f32.xlu1 %v9558_v56 }
 0xf66   : > { %4700 = vmax.xlane.f32.xlu1 %v9563_v10 }
 0xf6a   : > { %4696 = vmax.xlane.f32.xlu1 %v9567_v34 }
 0xf6f   : > { %4963 = vrot.lane.b32.xlu0 %v9093_v62, %s7198_s1 }
 0xf73   : > { %4965 = vrot.lane.b32.xlu0 %v9097_v28, %s7198_s1 }
 0xf77   : > { %4935 = vrot.lane.b32.xlu0 %v9067_v54, %s7199_s30  ;;  %v4956_v54 = vpop.permute.xlu0 %4955 }
 0xf7b   : > { %4937 = vrot.lane.b32.xlu0 %v9073_v25, %s7199_s30  ;;  %4961 = vrot.lane.b32.xlu1 %v9089_v6, %s7198_s1  ;;  %v4954_v25 = vpop.permute.xlu1 %4953 }
 0xf7f   : > { %4941 = vrot.lane.b32.xlu0 %v9081_v2, %s7199_s30  ;;  %4939 = vrot.lane.b32.xlu1 %v9077_v24, %s7199_s30 }
 0xf83   : > { %4945 = vrot.lane.b32.xlu0 %v9089_v6, %s7199_s30  ;;  %4943 = vrot.lane.b32.xlu1 %v9085_v51, %s7199_s30 }
 0xf87   : > { %4949 = vrot.lane.b32.xlu0 %v9097_v28, %s7199_s30  ;;  %4947 = vrot.lane.b32.xlu1 %v9093_v62, %s7199_s30 }
 0xf8b   : > { %5256 = vrot.lane.b32.xlu0 %v9435_v22, %s7185_s17  ;;  %5258 = vrot.lane.b32.xlu1 %v9442_v3, %s7185_s17 }
 0xf8f   : > { %5260 = vrot.lane.b32.xlu0 %v9453_v8, %s7185_s17  ;;  %5262 = vrot.lane.b32.xlu1 %v9458_v18, %s7185_s17 }
 0xf93   : > { %5264 = vrot.lane.b32.xlu0 %v9463_v61, %s7185_s17  ;;  %5266 = vrot.lane.b32.xlu1 %v9468_v15, %s7185_s17 }
 0xf97   : > { %5268 = vrot.lane.b32.xlu0 %v9473_v20, %s7185_s17  ;;  %5270 = vrot.lane.b32.xlu1 %v9478_v35, %s7185_s17  ;;  %v4992_v35 = vsel %vm1752_vm0, %v9480_v13, 0  ;;  %v10814_v13 = vld [vmem:[#allocation23_spill] sm:$0xff] }
 0xfa1   : > { %v4675_v24 = vpop.xlane.xlu0 %4674 }
 0xfa2   : > { %v4704_v2 = vsub.f32 %v9503_v41, %v4675_v24  ;;  %v4671_v51 = vpop.xlane.xlu1 %4670 }
 0xfa3   : > { %v4702_v6 = vsub.f32 %v9506_v60, %v4671_v51  ;;  %v10812_v60 = vld [vmem:[#allocation21_spill] sm:$0xff]  ;;  %v10820_v51 = vld [vmem:[#allocation27_spill] sm:$0xff] }
 0xfa4   : > { %v4722_v62 = vmul.f32 1.442695, %v4704_v2  ;;  %v10819_v2 = vld [vmem:[#allocation25_spill] sm:$0xff] }
 0xfa5   : > { %v4718_v28 = vmul.f32 1.442695, %v4702_v6  ;;  %v4673_v9 = vpop.xlane.xlu0 %4672 }
 0xfa6   : > { %v4703_v12 = vsub.f32 %v9510_v59, %v4673_v9  ;;  %v4677_v22 = vpop.xlane.xlu1 %4676  ;;  %6839 = vpow2.f32 %v4722_v62 }
 0xfa7   : > { %v4705_v3 = vsub.f32 %v9514_v5, %v4677_v22  ;;  %6841 = vpow2.f32 %v4718_v28 }
 0xfa8   : > { %v4720_v8 = vmul.f32 1.442695, %v4703_v12 }
 0xfa9   : > { %v4724_v18 = vmul.f32 1.442695, %v4705_v3  ;;  %v4960_v24 = vpop.permute.xlu0 %4959 }
 0xfaa   : > { %6843 = vpow2.f32 %v4720_v8 }
 0xfab   : > { %6845 = vpow2.f32 %v4724_v18 }
 0xfb0   : > { %v9604_v61 = vpop.eup %6839 }
 0xfb1   : > { %v9606_v41 = vpop.eup %6841 }
 0xfb4   : > { %v9608_v15 = vpop.eup %6843 }
 0xfb5   : > { %v9610_v20 = vpop.eup %6845  ;;  %v4798_v59 = vpack.c.bf16 %v9608_v15, %v9606_v41 }
 0xfb6   : > { %1980 = vadd.xlane.f32.xlu0 %v8101_v1  ;;  %v4799_v5 = vpack.c.bf16 %v9610_v20, %v9604_v61  ;;  %v4995_v1 = vsel %vm1752_vm0, %v4954_v25, 0 }
 0xfb7   : > { %6442 = vmatprep.mubr.bf16.mxu1 %v4798_v59 }
 0xfb8   : > { %6443 = vmatmul.mubr.bf16.vlgmr.msra.gmra.mrb[96].mxu1 %v4799_v5 }
 0xfb9   : > { %6459 = vmatpush3.bf16.xpose.msra.mxu1 %v4992_v35 }
 0xfba   : > { %6587 = vmatprep.subr.msk.bf16.mxu1 %vm1752_vm0, %v4954_v25  ;;  %1982 = vadd.xlane.f32.xlu0 %v8112_v46  ;;  %v4998_v46 = vsel %vm1752_vm0, %v4956_v54, 0 }
 0xfbb   : > { %1978 = vadd.xlane.f32.xlu1 %v8106_v30  ;;  %v4958_v30 = vpop.permute.xlu1 %4957 }
 0xfbc   : > { %v5001_v25 = vsel %vm1752_vm0, %v4958_v30, 0 }
 0xfbe   : > { %1984 = vadd.xlane.f32.xlu0 %v8114_v23  ;;  %v10816_v23 = vld [vmem:[#allocation20_spill] sm:$0xff] }
 0xfbf   : > { %1992 = vadd.xlane.f32.xlu1 %v8128_v17  ;;  %v10817_v17 = vld [vmem:[#allocation29_spill] sm:$0xff] }
 0xfc1   : > { %6461 = vmatpush3.bf16.xpose.msra.mxu1 %v4995_v1 }
 0xfc2   : > { %6588 = vmatprep.subr.msk.bf16.mxu1 %vm1752_vm0, %v4956_v54  ;;  %1986 = vadd.xlane.f32.xlu0 %v10812_v60  ;;  %v5004_v54 = vsel %vm1752_vm0, %v4960_v24, 0 }
 0xfc3   : > { %1996 = vadd.xlane.f32.xlu1 %v10813_v4 }
 0xfc6   : > { %1988 = vadd.xlane.f32.xlu0 %v10814_v13 }
 0xfc7   : > { %2000 = vadd.xlane.f32.xlu1 %v10815_v55 }
 0xfc9   : > { %6463 = vmatpush3.bf16.xpose.msra.mxu1 %v4998_v46 }
 0xfca   : > { %6589 = vmatprep.subr.msk.bf16.mxu1 %vm1752_vm0, %v4958_v30  ;;  %1990 = vadd.xlane.f32.xlu0 %v10816_v23 }
 0xfcb   : > { %2004 = vadd.xlane.f32.xlu1 %v10817_v17 }
 0xfce   : > { %1994 = vadd.xlane.f32.xlu0 %v10818_v0 }
 0xfd1   : > { %6465 = vmatpush3.bf16.xpose.msra.mxu1 %v5001_v25 }
 0xfd2   : > { %6590 = vmatprep.subr.msk.bf16.mxu1 %vm1752_vm0, %v4960_v24  ;;  %1998 = vadd.xlane.f32.xlu0 %v10819_v2 }
 0xfd6   : > { %2002 = vadd.xlane.f32.xlu0 %v10820_v51 }
 0xfd9   : > { %6467 = vmatpush3.bf16.xpose.msra.mxu1 %v5004_v54 }
 0xfda   : > { %v4683_v6 = vpop.xlane.xlu0 %4682 }
 0xfdb   : > { %v4679_v62 = vpop.xlane.xlu1 %4678  ;;  %v4708_v3 = vsub.f32 %v9523_v31, %v4683_v6 }
 0xfdc   : > { %v4706_v28 = vsub.f32 %v9526_v36, %v4679_v62 }
 0xfdd   : > { %v4730_v4 = vmul.f32 1.442695, %v4708_v3 }
 0xfde   : > { %v4687_v9 = vpop.xlane.xlu0 %4686  ;;  %v4726_v8 = vmul.f32 1.442695, %v4706_v28 }
 0xfdf   : > { %v4685_v12 = vpop.xlane.xlu1 %4684  ;;  %v4710_v18 = vsub.f32 %v9530_v47, %v4687_v9 }
 0xfe0   : > { %v4709_v22 = vsub.f32 %v9534_v43, %v4685_v12  ;;  %6847 = vpow2.f32 %v4726_v8 }
 0xfe1   : > { %v4734_v36 = vmul.f32 1.442695, %v4710_v18 }
 0xfe2   : > { %v4732_v59 = vmul.f32 1.442695, %v4709_v22  ;;  %v4689_v5 = vpop.xlane.xlu0 %4688 }
 0xfe3   : > { %v4711_v35 = vsub.f32 %v9538_v19, %v4689_v5  ;;  %v4681_v1 = vpop.xlane.xlu1 %4680 }
 0xfe4   : > { %v4707_v60 = vsub.f32 %v9542_v32, %v4681_v1  ;;  %6849 = vpow2.f32 %v4732_v59 }
 0xfe5   : > { %v4736_v13 = vmul.f32 1.442695, %v4711_v35 }
 0xfe6   : > { %v4728_v55 = vmul.f32 1.442695, %v4707_v60  ;;  %v4699_v46 = vpop.xlane.xlu0 %4698 }
 0xfe7   : > { %6851 = vpow2.f32 %v4736_v13  ;;  %v4691_v43 = vpop.xlane.xlu1 %4690  ;;  %v4716_v22 = vsub.f32 %v9546_v48, %v4699_v46 }
 0xfe8   : > { %6853 = vpow2.f32 %v4728_v55  ;;  %v4712_v31 = vsub.f32 %v9549_v21, %v4691_v43 }
 0xfe9   : > { %6855 = vpow2.f32 %v4730_v4 }
 0xfea   : > { %6857 = vpow2.f32 %v4734_v36  ;;  %v4964_v47 = vpop.permute.xlu0 %4963  ;;  %v4738_v30 = vmul.f32 1.442695, %v4712_v31  ;;  %v9648_v0 = vpop.eup %6847 }
 0xfeb   : > { %v4693_v19 = vpop.xlane.xlu1 %4692  ;;  %v5010_v46 = vsel %vm1752_vm0, %v4964_v47, 0 }
 0xfec   : > { %v4713_v23 = vsub.f32 %v9555_v26, %v4693_v19  ;;  %6859 = vpow2.f32 %v4738_v30 }
 0xfee   : > { %v4740_v32 = vmul.f32 1.442695, %v4713_v23  ;;  %v4966_v17 = vpop.permute.xlu0 %4965  ;;  %v9650_v24 = vpop.eup %6849 }
 0xfef   : > { %v4695_v25 = vpop.xlane.xlu1 %4694 }
 0xff0   : > { %6861 = vpow2.f32 %v4740_v32  ;;  %v4714_v21 = vsub.f32 %v9558_v56, %v4695_v25 }
 0xff1   : > { %v9652_v2 = vpop.eup %6851 }
 0xff2   : > { %v9654_v51 = vpop.eup %6853  ;;  %v4936_v54 = vpop.permute.xlu0 %4935  ;;  %v4742_v3 = vmul.f32 1.442695, %v4714_v21 }
 0xff3   : > { %v9657_v6 = vpop.eup %6855  ;;  %v4701_v62 = vpop.xlane.xlu1 %4700  ;;  %v4800_v26 = vpack.c.bf16 %v9654_v51, %v9648_v0 }
 0xff4   : > { %v9661_v28 = vpop.eup %6857  ;;  %v4717_v9 = vsub.f32 %v9563_v10, %v4701_v62  ;;  %v4801_v12 = vpack.c.bf16 %v9650_v24, %v9657_v6  ;;  %v4746_v10 = vmul.f32 1.442695, %v4716_v22  ;;  %6863 = vpow2.f32 %v4742_v3 }
 0xff5   : > { %6446 = vmatprep.mubr.bf16.mxu1 %v4800_v26  ;;  %v4802_v56 = vpack.c.bf16 %v9652_v2, %v9661_v28  ;;  %v5013_v26 = vsel %vm1752_vm0, %v4966_v17, 0 }
 0xff6   : > { %6447 = vmatmul.mubr.bf16.gmra.mrb[100].mxu1 %v4801_v12  ;;  %v4938_v8 = vpop.permute.xlu0 %4937  ;;  %v4748_v18 = vmul.f32 1.442695, %v4717_v9  ;;  %v9670_v35 = vpop.eup %6859 }
 0xff7   : > { %v4697_v59 = vpop.xlane.xlu1 %4696  ;;  %6450 = vmatprep.mubr.bf16.mxu1 %v4802_v56 }
 0xff8   : > { %v4715_v5 = vsub.f32 %v9567_v34, %v4697_v59  ;;  %6865 = vpow2.f32 %v4748_v18 }
 0xffa   : > { %v9672_v1 = vpop.eup %6861  ;;  %v4744_v60 = vmul.f32 1.442695, %v4715_v5  ;;  %v4942_v48 = vpop.permute.xlu0 %4941 }
 0xffb   : > { %v4962_v4 = vpop.permute.xlu1 %4961  ;;  %v4803_v13 = vpack.c.bf16 %v9672_v1, %v9670_v35 }
 0xffc   : > { %6867 = vpow2.f32 %v4744_v60  ;;  %6591 = vmatprep.subr.msk.bf16.mxu1 %vm1752_vm0, %v4962_v4  ;;  %v5007_v36 = vsel %vm1752_vm0, %v4962_v4, 0 }
 0xffd   : > { %6869 = vpow2.f32 %v4746_v10  ;;  %6469 = vmatpush3.bf16.xpose.msra.mxu1 %v5007_v36 }
 0xffe   : > { %6451 = vmatmul.mubr.bf16.gmra.mrb[104].mxu1 %v4803_v13  ;;  %6592 = vmatprep.subr.msk.bf16.mxu1 %vm1752_vm0, %v4964_v47  ;;  %v4946_v34 = vpop.permute.xlu0 %4945  ;;  %v9680_v30 = vpop.eup %6863 }
 0xfff   : > { %v4940_v55 = vpop.permute.xlu1 %4939 }
0x1002   : > { %v4950_v43 = vpop.permute.xlu0 %4949  ;;  %v9682_v19 = vpop.eup %6865 }
0x1003   : > { %v4944_v31 = vpop.permute.xlu1 %4943  ;;  %10821 = vst [vmem:[#allocation21_spill] sm:$0xff] %v9682_v19 }
0x1005   : > { %6471 = vmatpush3.bf16.xpose.msra.mxu1 %v5010_v46 }
0x1006   : > { %v9684_v23 = vpop.eup %6867  ;;  %6593 = vmatprep.subr.msk.bf16.mxu1 %vm1752_vm0, %v4966_v17  ;;  %v5257_v32 = vpop.permute.xlu0 %5256 }
0x1007   : > { %10822 = vst [vmem:[#allocation24_spill] sm:$0xff] %v9684_v23  ;;  %v9687_v25 = vpop.eup %6869  ;;  %v4804_v21 = vpack.c.bf16 %v9684_v23, %v9680_v30  ;;  %v4948_v62 = vpop.permute.xlu1 %4947  ;;  %6490 = vmatprep.subr.bf16.mxu0 %v5257_v32  ;;  %v10897_v23 = vld [vmem:[#allocation153_spill] sm:$0xff] }
0x1008   : > { %v4805_v47 = vpack.c.bf16 %v9682_v19, %v9687_v25  ;;  %6491 = vmatpush3.bf16.msra.mxu0 %v5257_v32 }
0x1009   : > { %6454 = vmatprep.mubr.bf16.mxu1 %v4804_v21 }
0x100a   : > { %6455 = vmatmul.mubr.bf16.gmra.mrb[108].mxu1 %v4805_v47  ;;  %v5261_v12 = vpop.permute.xlu0 %5260 }
0x100b   : > { %6474 = vmatprep.mubr.msk.bf16.mxu1 %vm1752_vm0, %v4936_v54  ;;  %v5259_v9 = vpop.permute.xlu1 %5258 }
0x100c   : > { %6492 = vmatprep.subr.bf16.mxu0 %v5259_v9 }
0x100d   : > { %6473 = vmatpush3.bf16.xpose.msra.mxu1 %v5013_v26  ;;  %6493 = vmatpush3.bf16.msra.mxu0 %v5259_v9 }
0x100e   : > { %6494 = vmatprep.subr.bf16.mxu0 %v5261_v12  ;;  %v5265_v56 = vpop.permute.xlu0 %5264 }
0x100f   : > { %v5263_v22 = vpop.permute.xlu1 %5262 }
0x1011   : > { %6495 = vmatpush3.bf16.msra.mxu0 %v5261_v12 }
0x1012   : > { %6496 = vmatprep.subr.bf16.mxu0 %v5263_v22  ;;  %v5269_v17 = vpop.permute.xlu0 %5268 }
0x1013   : > { %v5267_v3 = vpop.permute.xlu1 %5266 }
0x1014   : > { %6475 = vmatmul.mubr.msk.bf16.vlgmr.msra.gmra.mrb[112].mxu1 %vm1752_vm0, %v4938_v8 }
0x1015   : > { %6478 = vmatprep.mubr.msk.bf16.mxu1 %vm1752_vm0, %v4940_v55  ;;  %6497 = vmatpush3.bf16.msra.mxu0 %v5263_v22 }
0x1016   : > { %6498 = vmatprep.subr.bf16.mxu0 %v5265_v56 }
0x1017   : > { %v5271_v54 = vpop.permute.xlu1 %5270 }
0x1019   : > { %6499 = vmatpush3.bf16.msra.mxu0 %v5265_v56 }
0x101a   : > { %6500 = vmatprep.subr.bf16.mxu0 %v5267_v3 }
0x101c   : > { %6479 = vmatmul.mubr.msk.bf16.gmra.mrb[116].mxu1 %vm1752_vm0, %v4942_v48 }
0x101d   : > { %6482 = vmatprep.mubr.msk.bf16.mxu1 %vm1752_vm0, %v4944_v31  ;;  %6501 = vmatpush3.bf16.msra.mxu0 %v5267_v3 }
0x101e   : > { %6502 = vmatprep.subr.bf16.mxu0 %v5269_v17 }
0x1021   : > { %6503 = vmatpush3.bf16.msra.mxu0 %v5269_v17 }
0x1022   : > { %6504 = vmatprep.subr.bf16.mxu0 %v5271_v54 }
0x1024   : > { %6483 = vmatmul.mubr.msk.bf16.gmra.mrb[120].mxu1 %vm1752_vm0, %v4946_v34 }
0x1025   : > { %6486 = vmatprep.mubr.msk.bf16.mxu1 %vm1752_vm0, %v4948_v62  ;;  %6505 = vmatpush3.bf16.msra.mxu0 %v5271_v54  ;;  %v10839_v54 = vld [vmem:[#allocation30_spill] sm:$0xff] }
0x102c   : > { %6487 = vmatmul.mubr.msk.bf16.gmra.mrb[124].mxu1 %vm1752_vm0, %v4950_v43  ;;  %vm11046_vm0 = vmmov %vm11030_vm1 }
0x108b   : > { %v9702_v8 = vpop.f32.mrb[96].mxu1 }
0x108c   : > { %10823 = vst [vmem:[#allocation23_spill] sm:$0xff] %v9702_v8  ;;  %v9704_v18 = vpop.f32.mrb[97].mxu1 }
0x108d   : > { %10824 = vst [vmem:[#allocation26_spill] sm:$0xff] %v9704_v18  ;;  %v9706_v59 = vpop.f32.mrb[98].mxu1  ;;  %v10896_v18 = vld [vmem:[#allocation150_spill] sm:$0xff] }
0x108e   : > { %10825 = vst [vmem:[#allocation20_spill] sm:$0xff] %v9706_v59  ;;  %v9708_v5 = vpop.f32.mrb[99].mxu1  ;;  %v10894_v59 = vld [vmem:[#allocation146_spill] sm:$0xff] }
0x108f   : > { %10826 = vst [vmem:[#allocation29_spill] sm:$0xff] %v9708_v5 }
0x10c9   : > { %v9710_v10 = vpop.f32.mrb[100].mxu1 }
0x10ca   : > { %10827 = vst [vmem:[#allocation22_spill] sm:$0xff] %v9710_v10  ;;  %v9712_v60 = vpop.f32.mrb[101].mxu1 }
0x10cb   : > { %10828 = vst [vmem:[#allocation25_spill] sm:$0xff] %v9712_v60  ;;  %v9714_v48 = vpop.f32.mrb[102].mxu1  ;;  %v10895_v60 = vld [vmem:[#allocation152_spill] sm:$0xff] }
0x10cc   : > { %10829 = vst [vmem:[#allocation27_spill] sm:$0xff] %v9714_v48  ;;  %v9716_v4 = vpop.f32.mrb[103].mxu1  ;;  %v10888_v48 = vld [vmem:[#allocation122_spill] sm:$0xff] }
0x10cd   : > { %10830 = vst [vmem:[#allocation202_spill] sm:$0xff] %v9716_v4  ;;  %v10891_v4 = vld [vmem:[#allocation147_spill] sm:$0xff] }
0x10d1   : > { %v9718_v13 = vpop.f32.mrb[104].mxu1 }
0x10d2   : > { %10831 = vst [vmem:[#allocation203_spill] sm:$0xff] %v9718_v13  ;;  %v9720_v36 = vpop.f32.mrb[105].mxu1  ;;  %v10889_v13 = vld [vmem:[#allocation143_spill] sm:$0xff] }
0x10d3   : > { %10832 = vst [vmem:[#allocation204_spill] sm:$0xff] %v9720_v36  ;;  %v9722_v34 = vpop.f32.mrb[106].mxu1  ;;  %v10892_v36 = vld [vmem:[#allocation145_spill] sm:$0xff] }
0x10d4   : > { %10833 = vst [vmem:[#allocation205_spill] sm:$0xff] %v9722_v34  ;;  %v9724_v55 = vpop.f32.mrb[107].mxu1  ;;  %v10881_v34 = vld [vmem:[#allocation121_spill] sm:$0xff] }
0x10d5   : > { %10834 = vst [vmem:[#allocation206_spill] sm:$0xff] %v9724_v55  ;;  %v10885_v55 = vld [vmem:[#allocation126_spill] sm:$0xff] }
0x10dd   : > { %v9726_v46 = vpop.f32.mrb[108].mxu1 }
0x10de   : > { %10835 = vst [vmem:[#allocation207_spill] sm:$0xff] %v9726_v46  ;;  %v9728_v43 = vpop.f32.mrb[109].mxu1  ;;  %v10883_v46 = vld [vmem:[#allocation124_spill] sm:$0xff] }
0x10df   : > { %10836 = vst [vmem:[#allocation208_spill] sm:$0xff] %v9728_v43  ;;  %v9730_v31 = vpop.f32.mrb[110].mxu1  ;;  %v10886_v43 = vld [vmem:[#allocation123_spill] sm:$0xff] }
0x10e0   : > { %10837 = vst [vmem:[#allocation209_spill] sm:$0xff] %v9730_v31  ;;  %v9732_v32 = vpop.f32.mrb[111].mxu1 }
0x10e1   : > { %10838 = vst [vmem:[#allocation210_spill] sm:$0xff] %v9732_v32  ;;  %v9846_v32 = vpop.xlane.xlu1 %1978 }
0x10e7   : > { %v6476_v21 = vpop.f32.mrb[112].mxu1 }
0x10e8   : > { %v9735_v62 = vadd.f32 %v6476_v21, %v10629_v39  ;;  %v5049_v47 = vpop.f32.mrb[113].mxu1 }
0x10e9   : > { %v6477_v26 = vpop.f32.mrb[114].mxu1  ;;  %v9742_v22 = vadd.f32 %v5049_v47, %v10628_v33  ;;  %v10840_v33 = vld [vmem:[#allocation28_spill] sm:$0xff] }
0x10ea   : > { %5116 = vmax.xlane.f32.xlu1 %v9735_v62  ;;  %v5052_v9 = vpop.f32.mrb[115].mxu1  ;;  %v9747_v3 = vadd.f32 %v6477_v26, %v10626_v40 }
0x10eb   : > { %v9739_v12 = vadd.f32 %v5052_v9, %v10627_v38 }
0x10ed   : > { %5114 = vmax.xlane.f32.xlu0 %v9739_v12 }
0x10ee   : > { %5112 = vmax.xlane.f32.xlu1 %v9742_v22 }
0x10ef   : > { %v6480_v56 = vpop.f32.mrb[116].mxu1 }
0x10f0   : > { %v5065_v17 = vpop.f32.mrb[117].mxu1  ;;  %v9756_v47 = vadd.f32 %v6480_v56, %v10624_v42 }
0x10f1   : > { %2006 = vadd.xlane.f32.xlu0 %v10839_v54  ;;  %v9751_v21 = vadd.f32 %v5065_v17, %v10625_v27  ;;  %v6481_v39 = vpop.f32.mrb[118].mxu1 }
0x10f2   : > { %5118 = vmax.xlane.f32.xlu1 %v9747_v3  ;;  %v5068_v9 = vpop.f32.mrb[119].mxu1  ;;  %v9768_v31 = vadd.f32 %v6481_v39, %v10619_v45  ;;  %v10845_v45 = vld [vmem:[#allocation54_spill] sm:$0xff] }
0x10f3   : > { %v9773_v56 = vadd.f32 %v5068_v9, %v10620_v37  ;;  %v10844_v37 = vld [vmem:[#allocation49_spill] sm:$0xff] }
0x10f5   : > { %5120 = vmax.xlane.f32.xlu0 %v9751_v21 }
0x10f6   : > { %2008 = vadd.xlane.f32.xlu1 %v10840_v33 }
0x10f7   : > { %v6484_v38 = vpop.f32.mrb[120].mxu1 }
0x10f8   : > { %v5081_v26 = vpop.f32.mrb[121].mxu1 }
0x10f9   : > { %v9760_v40 = vadd.f32 %v5081_v26, %v10623_v52  ;;  %v6485_v54 = vpop.f32.mrb[122].mxu1 }
0x10fa   : > { %5124 = vmax.xlane.f32.xlu1 %v9756_v47  ;;  %v5084_v17 = vpop.f32.mrb[123].mxu1  ;;  %v9765_v27 = vadd.f32 %v6485_v54, %v10622_v58  ;;  %v9780_v58 = vadd.f32 %v6484_v38, %v10614_v57  ;;  %v10876_v57 = vld [vmem:[#allocation113_spill] sm:$0xff] }
0x10fb   : > { %5128 = vmax.xlane.f32.xlu0 %v9760_v40  ;;  %v9788_v9 = vadd.f32 %v5084_v17, %v10615_v53  ;;  %v10843_v17 = vld [vmem:[#allocation51_spill] sm:$0xff]  ;;  %v10853_v53 = vld [vmem:[#allocation62_spill] sm:$0xff] }
0x10fe   : > { %5126 = vmax.xlane.f32.xlu1 %v9768_v31 }
0x10ff   : > { %5134 = vmax.xlane.f32.xlu0 %v9765_v27  ;;  %v6488_v33 = vpop.f32.mrb[124].mxu1 }
0x1100   : > { %v5097_v26 = vpop.f32.mrb[125].mxu1 }
0x1101   : > { %v6489_v42 = vpop.f32.mrb[126].mxu1  ;;  %v9798_v38 = vadd.f32 %v5097_v26, %v10616_v44  ;;  %v10850_v26 = vld [vmem:[#allocation52_spill] sm:$0xff] }
0x1102   : > { %v9776_v52 = vadd.f32 %v6489_v42, %v10621_v14  ;;  %5122 = vmax.xlane.f32.xlu1 %v9773_v56  ;;  %v5100_v54 = vpop.f32.mrb[127].mxu1  ;;  %v9793_v42 = vadd.f32 %v6488_v33, %v10617_v11  ;;  %v10841_v14 = vld [vmem:[#allocation47_spill] sm:$0xff]  ;;  %v10849_v11 = vld [vmem:[#allocation57_spill] sm:$0xff]  ;;  %v10851_v44 = vld [vmem:[#allocation60_spill] sm:$0xff] }
0x1103   : > { %v9784_v39 = vadd.f32 %v5100_v54, %v10618_v50  ;;  %v10842_v54 = vld [vmem:[#allocation50_spill] sm:$0xff]  ;;  %v10846_v50 = vld [vmem:[#allocation48_spill] sm:$0xff]  ;;  %v10847_v33 = vld [vmem:[#allocation55_spill] sm:$0xff] }
0x1104   : > { %5142 = vmax.xlane.f32.xlu0 %v9776_v52 }
0x1106   : > { %5132 = vmax.xlane.f32.xlu1 %v9780_v58 }
0x1108   : > { %5138 = vmax.xlane.f32.xlu0 %v9784_v39 }
0x110a   : > { %5130 = vmax.xlane.f32.xlu1 %v9788_v9 }
0x110c   : > { %2420 = vadd.xlane.f32.xlu0 %v10841_v14  ;;  %v10848_v14 = vld [vmem:[#allocation53_spill] sm:$0xff] }
0x110e   : > { %5140 = vmax.xlane.f32.xlu1 %v9793_v42 }
0x1110   : > { %2424 = vadd.xlane.f32.xlu0 %v10842_v54  ;;  %v10852_v54 = vld [vmem:[#allocation56_spill] sm:$0xff] }
0x1112   : > { %5136 = vmax.xlane.f32.xlu1 %v9798_v38 }
0x1114   : > { %2428 = vadd.xlane.f32.xlu0 %v10843_v17  ;;  %v10854_v17 = vld [vmem:[#allocation59_spill] sm:$0xff] }
0x1116   : > { %2422 = vadd.xlane.f32.xlu1 %v10844_v37  ;;  %v10855_v37 = vld [vmem:[#allocation80_spill] sm:$0xff] }
0x1118   : > { %2432 = vadd.xlane.f32.xlu0 %v10845_v45  ;;  %v10856_v45 = vld [vmem:[#allocation58_spill] sm:$0xff] }
0x111a   : > { %2426 = vadd.xlane.f32.xlu1 %v10846_v50  ;;  %v10857_v50 = vld [vmem:[#allocation79_spill] sm:$0xff] }
0x111c   : > { %2436 = vadd.xlane.f32.xlu0 %v10847_v33  ;;  %v10858_v33 = vld [vmem:[#allocation61_spill] sm:$0xff] }
0x111e   : > { %2430 = vadd.xlane.f32.xlu1 %v10848_v14  ;;  %v10859_v14 = vld [vmem:[#allocation83_spill] sm:$0xff] }
0x1120   : > { %2440 = vadd.xlane.f32.xlu0 %v10849_v11  ;;  %v10860_v11 = vld [vmem:[#allocation81_spill] sm:$0xff] }
0x1122   : > { %2434 = vadd.xlane.f32.xlu1 %v10850_v26  ;;  %v10861_v26 = vld [vmem:[#allocation87_spill] sm:$0xff] }
0x1124   : > { %2444 = vadd.xlane.f32.xlu0 %v10851_v44  ;;  %v10862_v44 = vld [vmem:[#allocation82_spill] sm:$0xff] }
0x1126   : > { %2438 = vadd.xlane.f32.xlu1 %v10852_v54  ;;  %v10863_v54 = vld [vmem:[#allocation88_spill] sm:$0xff] }
0x1128   : > { %2448 = vadd.xlane.f32.xlu0 %v10853_v53  ;;  %v10864_v53 = vld [vmem:[#allocation86_spill] sm:$0xff] }
0x112a   : > { %2442 = vadd.xlane.f32.xlu1 %v10854_v17  ;;  %v10865_v17 = vld [vmem:[#allocation89_spill] sm:$0xff] }
0x112c   : > { %2902 = vadd.xlane.f32.xlu0 %v10855_v37  ;;  %v10866_v37 = vld [vmem:[#allocation84_spill] sm:$0xff] }
0x112e   : > { %2446 = vadd.xlane.f32.xlu1 %v10856_v45  ;;  %v10867_v45 = vld [vmem:[#allocation91_spill] sm:$0xff] }
0x1130   : > { %2906 = vadd.xlane.f32.xlu0 %v10857_v50  ;;  %v9827_v50 = vpop.xlane.xlu0 %1980 }
0x1132   : > { %2450 = vadd.xlane.f32.xlu1 %v10858_v33  ;;  %v10868_v33 = vld [vmem:[#allocation85_spill] sm:$0xff] }
0x1134   : > { %2910 = vadd.xlane.f32.xlu0 %v10859_v14  ;;  %v10869_v14 = vld [vmem:[#allocation94_spill] sm:$0xff] }
0x1136   : > { %2904 = vadd.xlane.f32.xlu1 %v10860_v11  ;;  %v10870_v11 = vld [vmem:[#allocation90_spill] sm:$0xff] }
0x1138   : > { %2914 = vadd.xlane.f32.xlu0 %v10861_v26  ;;  %v9832_v26 = vpop.xlane.xlu0 %1982 }
0x113a   : > { %2908 = vadd.xlane.f32.xlu1 %v10862_v44  ;;  %v10871_v44 = vld [vmem:[#allocation111_spill] sm:$0xff] }
0x113c   : > { %2918 = vadd.xlane.f32.xlu0 %v10863_v54  ;;  %v10872_v54 = vld [vmem:[#allocation93_spill] sm:$0xff] }
0x113e   : > { %2912 = vadd.xlane.f32.xlu1 %v10864_v53  ;;  %v10873_v53 = vld [vmem:[#allocation114_spill] sm:$0xff] }
0x1140   : > { %2922 = vadd.xlane.f32.xlu0 %v10865_v17  ;;  %v9837_v17 = vpop.xlane.xlu0 %1984 }
0x1142   : > { %2916 = vadd.xlane.f32.xlu1 %v10866_v37  ;;  %v10874_v37 = vld [vmem:[#allocation92_spill] sm:$0xff] }
0x1144   : > { %2926 = vadd.xlane.f32.xlu0 %v10867_v45  ;;  %v10875_v45 = vld [vmem:[#allocation115_spill] sm:$0xff] }
0x1146   : > { %2920 = vadd.xlane.f32.xlu1 %v10868_v33  ;;  %v9842_v33 = vpop.xlane.xlu0 %1986 }
0x1148   : > { %2930 = vadd.xlane.f32.xlu0 %v10869_v14  ;;  %v10877_v14 = vld [vmem:[#allocation118_spill] sm:$0xff] }
0x114a   : > { %2924 = vadd.xlane.f32.xlu1 %v10870_v11  ;;  %v10878_v11 = vld [vmem:[#allocation112_spill] sm:$0xff] }
0x114c   : > { %3344 = vadd.xlane.f32.xlu0 %v10871_v44  ;;  %v10879_v44 = vld [vmem:[#allocation119_spill] sm:$0xff] }
0x114e   : > { %2928 = vadd.xlane.f32.xlu1 %v10872_v54  ;;  %v9849_v54 = vpop.xlane.xlu0 %1988 }
0x1150   : > { %3348 = vadd.xlane.f32.xlu0 %v10873_v53  ;;  %v10880_v53 = vld [vmem:[#allocation117_spill] sm:$0xff] }
0x1152   : > { %2932 = vadd.xlane.f32.xlu1 %v10874_v37  ;;  %v9853_v37 = vpop.xlane.xlu1 %1992 }
0x1154   : > { %3352 = vadd.xlane.f32.xlu0 %v10875_v45  ;;  %v10882_v45 = vld [vmem:[#allocation116_spill] sm:$0xff] }
0x1156   : > { %3346 = vadd.xlane.f32.xlu1 %v10876_v57  ;;  %v9856_v57 = vpop.xlane.xlu0 %1990 }
0x1158   : > { %3356 = vadd.xlane.f32.xlu0 %v10877_v14  ;;  %v10884_v14 = vld [vmem:[#allocation120_spill] sm:$0xff] }
0x115a   : > { %3350 = vadd.xlane.f32.xlu1 %v10878_v11  ;;  %v9860_v11 = vpop.xlane.xlu1 %1996 }
0x115c   : > { %3360 = vadd.xlane.f32.xlu0 %v10879_v44  ;;  %v9863_v44 = vpop.xlane.xlu0 %1994 }
0x115e   : > { %3354 = vadd.xlane.f32.xlu1 %v10880_v53  ;;  %v10887_v53 = vld [vmem:[#allocation144_spill] sm:$0xff] }
0x1160   : > { %3364 = vadd.xlane.f32.xlu0 %v10881_v34  ;;  %v9867_v34 = vpop.xlane.xlu1 %2000 }
0x1162   : > { %3358 = vadd.xlane.f32.xlu1 %v10882_v45  ;;  %v9870_v45 = vpop.xlane.xlu0 %1998 }
0x1164   : > { %3368 = vadd.xlane.f32.xlu0 %v10883_v46  ;;  %v10890_v46 = vld [vmem:[#allocation125_spill] sm:$0xff] }
0x1166   : > { %3362 = vadd.xlane.f32.xlu1 %v10884_v14  ;;  %v9874_v14 = vpop.xlane.xlu1 %2004 }
0x1168   : > { %3372 = vadd.xlane.f32.xlu0 %v10885_v55  ;;  %v9877_v55 = vpop.xlane.xlu0 %2002 }
0x116a   : > { %3366 = vadd.xlane.f32.xlu1 %v10886_v43 }
0x116c   : > { %3826 = vadd.xlane.f32.xlu0 %v10887_v53  ;;  %v10893_v53 = vld [vmem:[#allocation151_spill] sm:$0xff] }
0x116e   : > { %3370 = vadd.xlane.f32.xlu1 %v10888_v48 }
0x1170   : > { %3830 = vadd.xlane.f32.xlu0 %v10889_v13 }
0x1172   : > { %3374 = vadd.xlane.f32.xlu1 %v10890_v46 }
0x1174   : > { %3834 = vadd.xlane.f32.xlu0 %v10891_v4 }
0x1176   : > { %3828 = vadd.xlane.f32.xlu1 %v10892_v36 }
0x1177   : > { %v5117_v43 = vpop.xlane.xlu1 %5116 }
0x1178   : > { %3838 = vadd.xlane.f32.xlu0 %v10893_v53  ;;  %v5146_v10 = vsub.f32 %v9735_v62, %v5117_v43  ;;  %v10901_v43 = vld [vmem:[#allocation158_spill] sm:$0xff] }
0x117a   : > { %3832 = vadd.xlane.f32.xlu1 %v10894_v59  ;;  %v5115_v48 = vpop.xlane.xlu0 %5114  ;;  %v5164_v19 = vmul.f32 1.442695, %v5146_v10 }
0x117b   : > { %v5145_v13 = vsub.f32 %v9739_v12, %v5115_v48  ;;  %v5113_v5 = vpop.xlane.xlu1 %5112  ;;  %v10898_v12 = vld [vmem:[#allocation148_spill] sm:$0xff] }
0x117c   : > { %v5144_v46 = vsub.f32 %v9742_v22, %v5113_v5  ;;  %3842 = vadd.xlane.f32.xlu0 %v10895_v60  ;;  %v10899_v22 = vld [vmem:[#allocation155_spill] sm:$0xff] }
0x117d   : > { %v5162_v4 = vmul.f32 1.442695, %v5145_v13  ;;  %v10902_v13 = vld [vmem:[#allocation154_spill] sm:$0xff] }
0x117e   : > { %v5160_v8 = vmul.f32 1.442695, %v5144_v46  ;;  %3836 = vadd.xlane.f32.xlu1 %v10896_v18  ;;  %v2007_v36 = vpop.xlane.xlu0 %2006  ;;  %v10900_v18 = vld [vmem:[#allocation149_spill] sm:$0xff] }
0x117f   : > { %6871 = vpow2.f32 %v5162_v4  ;;  %v5119_v53 = vpop.xlane.xlu1 %5118 }
0x1180   : > { %6873 = vpow2.f32 %v5160_v8  ;;  %v5147_v59 = vsub.f32 %v9747_v3, %v5119_v53  ;;  %3846 = vadd.xlane.f32.xlu0 %v10897_v23 }
0x1181   : > { %6875 = vrcp.f32 %v2007_v36  ;;  %v10903_v36 = vld [vmem:[#allocation43_spill] sm:$0xff] }
0x1182   : > { %v5166_v62 = vmul.f32 1.442695, %v5147_v59  ;;  %3840 = vadd.xlane.f32.xlu1 %v10898_v12  ;;  %6877 = vpow2.f32 %v5164_v19  ;;  %v5121_v60 = vpop.xlane.xlu0 %5120 }
0x1183   : > { %v2009_v5 = vpop.xlane.xlu1 %2008  ;;  %v5148_v48 = vsub.f32 %v9751_v21, %v5121_v60 }
0x1184   : > { %6879 = vpow2.f32 %v5166_v62  ;;  %3850 = vadd.xlane.f32.xlu0 %v10899_v22  ;;  %v10904_v22 = vld [vmem:[#allocation157_spill] sm:$0xff] }
0x1185   : > { %6881 = vrcp.f32 %v2009_v5  ;;  %v5168_v60 = vmul.f32 1.442695, %v5148_v48 }
0x1186   : > { %3844 = vadd.xlane.f32.xlu1 %v10900_v18  ;;  %6883 = vrcp.f32 %v9827_v50 }
0x1187   : > { %v5125_v10 = vpop.xlane.xlu1 %5124  ;;  %6885 = vrcp.f32 %v9832_v26 }
0x1188   : > { %3854 = vadd.xlane.f32.xlu0 %v10901_v43  ;;  %v5129_v8 = vpop.xlane.xlu0 %5128  ;;  %v5150_v5 = vsub.f32 %v9756_v47, %v5125_v10  ;;  %6887 = vpow2.f32 %v5168_v60  ;;  %v10907_v60 = vld [vmem:[#allocation175_spill] sm:$0xff] }
0x1189   : > { %v9893_v3 = vpop.eup %6871  ;;  %v5152_v10 = vsub.f32 %v9760_v40, %v5129_v8 }
0x118a   : > { %v9895_v23 = vpop.eup %6873  ;;  %3848 = vadd.xlane.f32.xlu1 %v10902_v13  ;;  %v5172_v47 = vmul.f32 1.442695, %v5150_v5 }
0x118b   : > { %v6876_v19 = vpop.eup %6875  ;;  %v5127_v46 = vpop.xlane.xlu1 %5126  ;;  %v5240_v4 = vpack.c.bf16 %v9893_v3, %v9895_v23 }
0x118c   : > { %v9902_v53 = vmul.f32 %v6876_v19, %v10903_v36  ;;  %v5151_v59 = vsub.f32 %v9768_v31, %v5127_v46  ;;  %4268 = vadd.xlane.f32.xlu0 %v9333_v49  ;;  %v5135_v62 = vpop.xlane.xlu0 %5134  ;;  %v9906_v12 = vpop.eup %6877  ;;  %v10905_v49 = vld [vmem:[#allocation45_spill] sm:$0xff]  ;;  %v10906_v36 = vld [vmem:[#allocation156_spill] sm:$0xff] }
0x118d   : > { %6506 = vmatprep.mubr.bf16.mxu0 %v5240_v4 }
0x118e   : > { %v9909_v21 = vpop.eup %6879  ;;  %3852 = vadd.xlane.f32.xlu1 %v10904_v22  ;;  %v5174_v43 = vmul.f32 1.442695, %v5151_v59 }
0x118f   : > { %v6882_v18 = vpop.eup %6881  ;;  %v5123_v13 = vpop.xlane.xlu1 %5122  ;;  %v5241_v19 = vpack.c.bf16 %v9909_v21, %v9906_v12 }
0x1190   : > { %v9916_v31 = vmul.f32 %v6882_v18, %v10905_v49  ;;  %v5149_v46 = vsub.f32 %v9773_v56, %v5123_v13  ;;  %4272 = vadd.xlane.f32.xlu0 %v9340_v16  ;;  %6889 = vpow2.f32 %v5174_v43  ;;  %v5176_v16 = vmul.f32 1.442695, %v5152_v10 }
0x1191   : > { %6507 = vmatmul.mubr.bf16.vlgmr.msra.gmra.mrb[112].mxu0 %v5241_v19  ;;  %v5143_v48 = vpop.xlane.xlu0 %5142  ;;  %v5155_v56 = vsub.f32 %v9765_v27, %v5135_v62  ;;  %v10909_v19 = vld [vmem:[#allocation177_spill] sm:$0xff] }
0x1192   : > { %v5170_v4 = vmul.f32 1.442695, %v5149_v46  ;;  %3856 = vadd.xlane.f32.xlu1 %v10906_v36  ;;  %v5159_v5 = vsub.f32 %v9776_v52, %v5143_v48 }
0x1193   : > { %v5133_v50 = vpop.xlane.xlu1 %5132 }
0x1194   : > { %6891 = vpow2.f32 %v5170_v4  ;;  %v5154_v59 = vsub.f32 %v9780_v58, %v5133_v50  ;;  %4276 = vadd.xlane.f32.xlu0 %v9350_v63  ;;  %v5182_v63 = vmul.f32 1.442695, %v5155_v56  ;;  %v5190_v52 = vmul.f32 1.442695, %v5159_v5  ;;  %v10910_v4 = vld [vmem:[#allocation180_spill] sm:$0xff] }
0x1195   : > { %6893 = vpow2.f32 %v5172_v47  ;;  %v5139_v26 = vpop.xlane.xlu0 %5138  ;;  %v10911_v56 = vld [vmem:[#allocation176_spill] sm:$0xff] }
0x1196   : > { %6895 = vrcp.f32 %v9846_v32  ;;  %v5180_v40 = vmul.f32 1.442695, %v5154_v59  ;;  %4270 = vadd.xlane.f32.xlu1 %v9338_v29  ;;  %v5157_v27 = vsub.f32 %v9784_v39, %v5139_v26  ;;  %v9934_v32 = vpop.eup %6883 }
0x1197   : > { %6897 = vrcp.f32 %v9837_v17  ;;  %v5131_v8 = vpop.xlane.xlu1 %5130  ;;  %v6886_v17 = vpop.eup %6885 }
0x1198   : > { %6899 = vrcp.f32 %v9842_v33  ;;  %v5153_v58 = vsub.f32 %v9788_v9, %v5131_v8  ;;  %4280 = vadd.xlane.f32.xlu0 %v9358_v7  ;;  %v9937_v22 = vpop.eup %6887  ;;  %v10908_v9 = vld [vmem:[#allocation178_spill] sm:$0xff]  ;;  %v5186_v39 = vmul.f32 1.442695, %v5157_v27  ;;  %v10912_v8 = vld [vmem:[#allocation183_spill] sm:$0xff]  ;;  %v10913_v27 = vld [vmem:[#allocation32_spill] sm:$0xff] }
0x1199   : > { %6901 = vpow2.f32 %v5176_v16  ;;  %v2421_v62 = vpop.xlane.xlu0 %2420 }
0x119a   : > { %6903 = vpow2.f32 %v5180_v40  ;;  %v5178_v29 = vmul.f32 1.442695, %v5153_v58  ;;  %4274 = vadd.xlane.f32.xlu1 %v10907_v60  ;;  %v9941_v18 = vpop.eup %6889 }
0x119b   : > { %6905 = vrcp.f32 %v2421_v62  ;;  %v5141_v33 = vpop.xlane.xlu1 %5140 }
0x119c   : > { %6907 = vpow2.f32 %v5178_v29  ;;  %v5158_v7 = vsub.f32 %v9793_v42, %v5141_v33  ;;  %4284 = vadd.xlane.f32.xlu0 %v10908_v9  ;;  %v10914_v29 = vld [vmem:[#allocation64_spill] sm:$0xff]  ;;  %v10915_v33 = vld [vmem:[#allocation179_spill] sm:$0xff] }
0x119d   : > { %6909 = vpow2.f32 %v5182_v63  ;;  %v2425_v43 = vpop.xlane.xlu0 %2424 }
0x119e   : > { %v9943_v13 = vpop.eup %6891  ;;  %6911 = vrcp.f32 %v2425_v43  ;;  %4278 = vadd.xlane.f32.xlu1 %v10909_v19  ;;  %v5188_v46 = vmul.f32 1.442695, %v5158_v7  ;;  %v10916_v43 = vld [vmem:[#allocation185_spill] sm:$0xff] }
0x119f   : > { %v9946_v49 = vpop.eup %6893  ;;  %6913 = vrcp.f32 %v9856_v57  ;;  %v5137_v47 = vpop.xlane.xlu1 %5136  ;;  %v5242_v42 = vpack.c.bf16 %v9943_v13, %v9937_v22 }
0x11a0   : > { %v6896_v10 = vpop.eup %6895  ;;  %6915 = vpow2.f32 %v5190_v52  ;;  %v5156_v48 = vsub.f32 %v9798_v38, %v5137_v47  ;;  %4288 = vadd.xlane.f32.xlu0 %v10910_v4  ;;  %v5243_v36 = vpack.c.bf16 %v9941_v18, %v9946_v49 }
0x11a1   : > { %v9955_v50 = vpop.eup %6897  ;;  %6917 = vpow2.f32 %v5186_v39  ;;  %6510 = vmatprep.mubr.bf16.mxu0 %v5242_v42  ;;  %v2429_v59 = vpop.xlane.xlu0 %2428  ;;  %v2131_v62 = vmul.f32 %v6896_v10, %v10913_v27  ;;  %v10917_v42 = vld [vmem:[#allocation31_spill] sm:$0xff] }
0x11a2   : > { %v6900_v57 = vpop.eup %6899  ;;  %v5184_v16 = vmul.f32 1.442695, %v5156_v48  ;;  %6919 = vrcp.f32 %v2429_v59  ;;  %4282 = vadd.xlane.f32.xlu1 %v10911_v56  ;;  %6511 = vmatmul.mubr.bf16.gmra.mrb[116].mxu0 %v5243_v36  ;;  %v2133_v10 = vmul.f32 %v6886_v17, %v10917_v42  ;;  %v10918_v48 = vld [vmem:[#allocation63_spill] sm:$0xff]  ;;  %v10919_v59 = vld [vmem:[#allocation182_spill] sm:$0xff] }
0x11a3   : > { %v9958_v26 = vpop.eup %6901  ;;  %6921 = vpow2.f32 %v5188_v46  ;;  %v2423_v38 = vpop.xlane.xlu1 %2422 }
0x11a4   : > { %v9960_v40 = vpop.eup %6903  ;;  %6923 = vpow2.f32 %v5184_v16  ;;  %4292 = vadd.xlane.f32.xlu0 %v10912_v8  ;;  %v10920_v8 = vld [vmem:[#allocation36_spill] sm:$0xff] }
0x11a5   : > { %v6906_v5 = vpop.eup %6905  ;;  %6925 = vrcp.f32 %v2423_v38  ;;  %v2433_v58 = vpop.xlane.xlu0 %2432 }
0x11a6   : > { %v9963_v63 = vpop.eup %6907  ;;  %v2605_v60 = vmul.f32 %v6906_v5, %v10914_v29  ;;  %6927 = vrcp.f32 %v2433_v58  ;;  %4286 = vadd.xlane.f32.xlu1 %v10915_v33  ;;  %v2135_v5 = vmul.f32 %v6900_v57, %v10920_v8  ;;  %v10921_v58 = vld [vmem:[#allocation68_spill] sm:$0xff] }
0x11a7   : > { %v9968_v52 = vpop.eup %6909  ;;  %6929 = vrcp.f32 %v9863_v44  ;;  %v2427_v7 = vpop.xlane.xlu1 %2426  ;;  %v5244_v9 = vpack.c.bf16 %v9963_v63, %v9958_v26 }
0x11a8   : > { %v6912_v39 = vpop.eup %6911  ;;  %6931 = vrcp.f32 %v2427_v7  ;;  %4296 = vadd.xlane.f32.xlu0 %v10916_v43  ;;  %v5245_v19 = vpack.c.bf16 %v9968_v52, %v9960_v40  ;;  %v9976_v46 = vadd.f32 %v2605_v60, %v2131_v62 }
0x11a9   : > { %v6914_v47 = vpop.eup %6913  ;;  %6933 = vrcp.f32 %v9849_v54  ;;  %v2607_v44 = vmul.f32 %v6912_v39, %v10918_v48  ;;  %6514 = vmatprep.mubr.bf16.mxu0 %v5244_v9  ;;  %v2437_v4 = vpop.xlane.xlu0 %2436  ;;  %v10923_v9 = vld [vmem:[#allocation34_spill] sm:$0xff]  ;;  %v10926_v48 = vld [vmem:[#allocation67_spill] sm:$0xff] }
0x11aa   : > { %v9981_v36 = vpop.eup %6915  ;;  %6935 = vrcp.f32 %v2437_v4  ;;  %4290 = vadd.xlane.f32.xlu1 %v10919_v59  ;;  %6515 = vmatmul.mubr.bf16.gmra.mrb[120].mxu0 %v5245_v19  ;;  %v2132_v57 = vmul.f32 %v9934_v32, %v10923_v9  ;;  %v10924_v39 = vld [vmem:[#allocation66_spill] sm:$0xff]  ;;  %v10927_v32 = vld [vmem:[#allocation184_spill] sm:$0xff] }
0x11ab   : > { %v9984_v16 = vpop.eup %6917  ;;  %6937 = vrcp.f32 %v9870_v45  ;;  %v2431_v56 = vpop.xlane.xlu1 %2430  ;;  %v9987_v38 = vadd.f32 %v2607_v44, %v2133_v10  ;;  %v10922_v45 = vld [vmem:[#allocation181_spill] sm:$0xff] }
0x11ac   : > { %v6920_v17 = vpop.eup %6919  ;;  %6939 = vrcp.f32 %v2431_v56  ;;  %4750 = vadd.xlane.f32.xlu0 %v9606_v41 }
0x11ad   : > { %v9990_v54 = vpop.eup %6921  ;;  %6941 = vrcp.f32 %v9853_v37  ;;  %v2609_v27 = vmul.f32 %v6920_v17, %v10921_v58  ;;  %v2441_v62 = vpop.xlane.xlu0 %2440  ;;  %v10928_v17 = vld [vmem:[#allocation33_spill] sm:$0xff] }
0x11ae   : > { %v9995_v29 = vpop.eup %6923  ;;  %6943 = vrcp.f32 %v2441_v62  ;;  %4294 = vadd.xlane.f32.xlu1 %v10922_v45  ;;  %v5247_v19 = vpack.c.bf16 %v9981_v36, %v9990_v54  ;;  %v2134_v8 = vmul.f32 %v9955_v50, %v10928_v17  ;;  %v10930_v45 = vld [vmem:[#allocation40_spill] sm:$0xff] }
0x11af   : > { %v6926_v60 = vpop.eup %6925  ;;  %6945 = vrcp.f32 %v9877_v55  ;;  %v2435_v33 = vpop.xlane.xlu1 %2434  ;;  %v5246_v41 = vpack.c.bf16 %v9984_v16, %v9995_v29  ;;  %v10001_v7 = vadd.f32 %v2609_v27, %v2135_v5  ;;  %v10925_v55 = vld [vmem:[#allocation35_spill] sm:$0xff]  ;;  %v10929_v5 = vld [vmem:[#allocation65_spill] sm:$0xff] }
0x11b0   : > { %v6928_v37 = vpop.eup %6927  ;;  %v2606_v43 = vmul.f32 %v6926_v60, %v10924_v39  ;;  %6947 = vrcp.f32 %v2435_v33  ;;  %4754 = vadd.xlane.f32.xlu0 %v9604_v61  ;;  %v2137_v10 = vmul.f32 %v6914_v47, %v10925_v55  ;;  %v10931_v33 = vld [vmem:[#allocation72_spill] sm:$0xff]  ;;  %v10932_v39 = vld [vmem:[#allocation38_spill] sm:$0xff] }
0x11b1   : > { %v6930_v42 = vpop.eup %6929  ;;  %6949 = vrcp.f32 %v9860_v11  ;;  %v2611_v44 = vmul.f32 %v6928_v37, %v10926_v48  ;;  %6518 = vmatprep.mubr.bf16.mxu0 %v5246_v41  ;;  %v2445_v4 = vpop.xlane.xlu0 %2444  ;;  %v10934_v48 = vld [vmem:[#allocation39_spill] sm:$0xff] }
0x11b2   : > { %v6932_v59 = vpop.eup %6931  ;;  %6951 = vrcp.f32 %v2445_v4  ;;  %4298 = vadd.xlane.f32.xlu1 %v10927_v32  ;;  %6519 = vmatmul.mubr.bf16.gmra.mrb[124].mxu0 %v5247_v19  ;;  %v10013_v56 = vadd.f32 %v2606_v43, %v2132_v57  ;;  %v2139_v60 = vmul.f32 %v6930_v42, %v10930_v45  ;;  %v10933_v19 = vld [vmem:[#allocation70_spill] sm:$0xff]  ;;  %v10935_v4 = vld [vmem:[#allocation71_spill] sm:$0xff] }
0x11b3   : > { %v6934_v61 = vpop.eup %6933  ;;  %v2608_v58 = vmul.f32 %v6932_v59, %v10929_v5  ;;  %v2439_v11 = vpop.xlane.xlu1 %2438  ;;  %v10018_v27 = vadd.f32 %v2611_v44, %v2137_v10 }
0x11b4   : > { %v6936_v47 = vpop.eup %6935  ;;  %6953 = vrcp.f32 %v2439_v11  ;;  %4758 = vadd.xlane.f32.xlu0 %v9648_v0  ;;  %v2136_v43 = vmul.f32 %v6934_v61, %v10932_v39 }
0x11b5   : > { %v6938_v62 = vpop.eup %6937  ;;  %6955 = vrcp.f32 %v9867_v34  ;;  %v2613_v41 = vmul.f32 %v6936_v47, %v10931_v33  ;;  %v2449_v37 = vpop.xlane.xlu0 %2448  ;;  %v10024_v9 = vadd.f32 %v2608_v58, %v2134_v8  ;;  %v10936_v8 = vld [vmem:[#allocation37_spill] sm:$0xff] }
0x11b6   : > { %v6940_v50 = vpop.eup %6939  ;;  %6957 = vrcp.f32 %v2449_v37  ;;  %4752 = vadd.xlane.f32.xlu1 %v9608_v15  ;;  %v2141_v44 = vmul.f32 %v6938_v62, %v10934_v48  ;;  %v10937_v58 = vld [vmem:[#allocation69_spill] sm:$0xff]  ;;  %v10938_v62 = vld [vmem:[#allocation44_spill] sm:$0xff] }
0x11b7   : > { %v6942_v57 = vpop.eup %6941  ;;  %v2610_v55 = vmul.f32 %v6940_v50, %v10933_v19  ;;  %v2443_v0 = vpop.xlane.xlu1 %2442  ;;  %v10029_v10 = vadd.f32 %v2613_v41, %v2139_v60  ;;  %v10939_v60 = vld [vmem:[#allocation76_spill] sm:$0xff] }
0x11b8   : > { %v6944_v34 = vpop.eup %6943  ;;  %6959 = vrcp.f32 %v2443_v0  ;;  %4762 = vadd.xlane.f32.xlu0 %v9657_v6  ;;  %v2138_v5 = vmul.f32 %v6942_v57, %v10936_v8  ;;  %v10940_v57 = vld [vmem:[#allocation42_spill] sm:$0xff] }
0x11b9   : > { %v6946_v42 = vpop.eup %6945  ;;  %6961 = vrcp.f32 %v9874_v14  ;;  %v2615_v59 = vmul.f32 %v6944_v34, %v10935_v4  ;;  %v2903_v15 = vpop.xlane.xlu0 %2902  ;;  %v10035_v32 = vadd.f32 %v2610_v55, %v2136_v43  ;;  %v10941_v43 = vld [vmem:[#allocation74_spill] sm:$0xff]  ;;  %v10942_v34 = vld [vmem:[#allocation75_spill] sm:$0xff] }
0x11ba   : > { %v6948_v61 = vpop.eup %6947  ;;  %6963 = vrcp.f32 %v2903_v15  ;;  %4756 = vadd.xlane.f32.xlu1 %v9610_v20  ;;  %v2143_v45 = vmul.f32 %v6946_v42, %v10938_v62 }
0x11bb   : > { %v6950_v17 = vpop.eup %6949  ;;  %v2612_v11 = vmul.f32 %v6948_v61, %v10937_v58  ;;  %v2447_v6 = vpop.xlane.xlu1 %2446  ;;  %v10040_v47 = vadd.f32 %v2615_v59, %v2141_v44  ;;  %v10943_v59 = vld [vmem:[#allocation41_spill] sm:$0xff] }
0x11bc   : > { %v6952_v14 = vpop.eup %6951  ;;  %6965 = vrcp.f32 %v2447_v6  ;;  %4766 = vadd.xlane.f32.xlu0 %v9661_v28  ;;  %v2140_v39 = vmul.f32 %v6950_v17, %v10940_v57  ;;  %v10944_v17 = vld [vmem:[#allocation73_spill] sm:$0xff] }
0x11bd   : > { %v2617_v33 = vmul.f32 %v6952_v14, %v10939_v60  ;;  %v2907_v41 = vpop.xlane.xlu0 %2906  ;;  %v10045_v37 = vadd.f32 %v2612_v11, %v2138_v5 }
0x11be   : > { %v6954_v20 = vpop.eup %6953  ;;  %6967 = vrcp.f32 %v2907_v41  ;;  %4760 = vadd.xlane.f32.xlu1 %v9654_v51 }
0x11bf   : > { %v6956_v50 = vpop.eup %6955  ;;  %v2614_v19 = vmul.f32 %v6954_v20, %v10941_v43  ;;  %v2451_v55 = vpop.xlane.xlu1 %2450  ;;  %v10050_v0 = vadd.f32 %v2617_v33, %v2143_v45 }
0x11c0   : > { %v6958_v28 = vpop.eup %6957  ;;  %6969 = vrcp.f32 %v2451_v55  ;;  %4770 = vadd.xlane.f32.xlu0 %v9670_v35  ;;  %v2142_v15 = vmul.f32 %v6956_v50, %v10943_v59  ;;  %v10945_v35 = vld [vmem:[#allocation96_spill] sm:$0xff] }
0x11c1   : > { %v2619_v42 = vmul.f32 %v6958_v28, %v10942_v34  ;;  %v2911_v48 = vpop.xlane.xlu0 %2910  ;;  %v10054_v44 = vadd.f32 %v2614_v19, %v2140_v39  ;;  %v10950_v34 = vld [vmem:[#allocation100_spill] sm:$0xff] }
0x11c2   : > { %v6960_v4 = vpop.eup %6959  ;;  %6971 = vrcp.f32 %v2911_v48  ;;  %4764 = vadd.xlane.f32.xlu1 %v9650_v24  ;;  %v10946_v24 = vld [vmem:[#allocation46_spill] sm:$0xff] }
0x11c3   : > { %v6962_v51 = vpop.eup %6961  ;;  %v10059_v61 = vadd.f32 %v2619_v42, %v9902_v53  ;;  %v2616_v8 = vmul.f32 %v6960_v4, %v10944_v17  ;;  %v2905_v5 = vpop.xlane.xlu1 %2904  ;;  %v10947_v53 = vld [vmem:[#allocation78_spill] sm:$0xff] }
0x11c4   : > { %v6964_v58 = vpop.eup %6963  ;;  %6973 = vrcp.f32 %v2905_v5  ;;  %4774 = vadd.xlane.f32.xlu0 %v9680_v30  ;;  %v2144_v45 = vmul.f32 %v6962_v51, %v10946_v24  ;;  %v10948_v30 = vld [vmem:[#allocation95_spill] sm:$0xff]  ;;  %v10951_v51 = vld [vmem:[#allocation24_spill] sm:$0xff] }
0x11c5   : > { %v3055_v11 = vmul.f32 %v6964_v58, %v10945_v35  ;;  %v2915_v6 = vpop.xlane.xlu0 %2914  ;;  %v10064_v14 = vadd.f32 %v2616_v8, %v2142_v15  ;;  %v10954_v35 = vld [vmem:[#allocation21_spill] sm:$0xff] }
0x11c6   : > { %v6966_v62 = vpop.eup %6965  ;;  %6975 = vrcp.f32 %v2915_v6  ;;  %4768 = vadd.xlane.f32.xlu1 %v9652_v2  ;;  %v10949_v2 = vld [vmem:[#allocation77_spill] sm:$0xff] }
0x11c7   : > { %v2618_v60 = vmul.f32 %v6966_v62, %v10947_v53  ;;  %v2909_v33 = vpop.xlane.xlu1 %2908  ;;  %v10070_v41 = vadd.f32 %v3055_v11, %v9976_v46  ;;  %v10955_v11 = vld [vmem:[#allocation97_spill] sm:$0xff] }
0x11c8   : > { %v6968_v20 = vpop.eup %6967  ;;  %6977 = vrcp.f32 %v2909_v33  ;;  %4778 = vadd.xlane.f32.xlu0 %v9687_v25  ;;  %v10957_v33 = vld [vmem:[#allocation102_spill] sm:$0xff] }
0x11c9   : > { %v3057_v50 = vmul.f32 %v6968_v20, %v10948_v30  ;;  %v2919_v57 = vpop.xlane.xlu0 %2918  ;;  %v10074_v39 = vadd.f32 %v2618_v60, %v2144_v45 }
0x11ca   : > { %v6970_v43 = vpop.eup %6969  ;;  %6979 = vrcp.f32 %v2919_v57  ;;  %4772 = vadd.xlane.f32.xlu1 %v9672_v1  ;;  %v10952_v1 = vld [vmem:[#allocation98_spill] sm:$0xff] }
0x11cb   : > { %v2620_v19 = vmul.f32 %v6970_v43, %v10949_v2  ;;  %v2913_v55 = vpop.xlane.xlu1 %2912  ;;  %v10079_v28 = vadd.f32 %v3057_v50, %v9987_v38 }
0x11cc   : > { %v6972_v46 = vpop.eup %6971  ;;  %6981 = vrcp.f32 %v2913_v55  ;;  %5196 = vadd.xlane.f32.xlu0 %v9906_v12  ;;  %v10953_v12 = vld [vmem:[#allocation99_spill] sm:$0xff] }
0x11cd   : > { %v10083_v25 = vadd.f32 %v2620_v19, %v9916_v31  ;;  %v3059_v42 = vmul.f32 %v6972_v46, %v10950_v34  ;;  %v2923_v48 = vpop.xlane.xlu0 %2922 }
0x11ce   : > { %v6974_v4 = vpop.eup %6973  ;;  %6983 = vrcp.f32 %v2923_v48  ;;  %4776 = vadd.xlane.f32.xlu1 %v10951_v51 }
0x11cf   : > { %v3056_v59 = vmul.f32 %v6974_v4, %v10952_v1  ;;  %v2917_v15 = vpop.xlane.xlu1 %2916  ;;  %v10089_v38 = vadd.f32 %v3059_v42, %v10001_v7 }
0x11d0   : > { %v6976_v17 = vpop.eup %6975  ;;  %6985 = vrcp.f32 %v2917_v15  ;;  %5192 = vadd.xlane.f32.xlu0 %v9895_v23  ;;  %v10956_v23 = vld [vmem:[#allocation104_spill] sm:$0xff] }
0x11d1   : > { %v3061_v31 = vmul.f32 %v6976_v17, %v10953_v12  ;;  %v2927_v8 = vpop.xlane.xlu0 %2926  ;;  %v10094_v5 = vadd.f32 %v3056_v59, %v10013_v56 }
0x11d2   : > { %v6978_v58 = vpop.eup %6977  ;;  %6987 = vrcp.f32 %v2927_v8  ;;  %4780 = vadd.xlane.f32.xlu1 %v10954_v35 }
0x11d3   : > { %v3058_v6 = vmul.f32 %v6978_v58, %v10955_v11  ;;  %v2921_v62 = vpop.xlane.xlu1 %2920  ;;  %v10099_v7 = vadd.f32 %v3061_v31, %v10018_v27 }
0x11d4   : > { %v6980_v24 = vpop.eup %6979  ;;  %6989 = vrcp.f32 %v2921_v62  ;;  %5204 = vadd.xlane.f32.xlu0 %v9946_v49  ;;  %v10958_v49 = vld [vmem:[#allocation103_spill] sm:$0xff] }
0x11d5   : > { %v3063_v45 = vmul.f32 %v6980_v24, %v10956_v23  ;;  %v2931_v53 = vpop.xlane.xlu0 %2930  ;;  %v10104_v56 = vadd.f32 %v3058_v6, %v10024_v9 }
0x11d6   : > { %v6982_v60 = vpop.eup %6981  ;;  %6991 = vrcp.f32 %v2931_v53  ;;  %5198 = vadd.xlane.f32.xlu1 %v9909_v21  ;;  %v10959_v21 = vld [vmem:[#allocation101_spill] sm:$0xff] }
0x11d7   : > { %v3060_v20 = vmul.f32 %v6982_v60, %v10957_v33  ;;  %v2925_v30 = vpop.xlane.xlu1 %2924  ;;  %v10109_v27 = vadd.f32 %v3063_v45, %v10029_v10 }
0x11d8   : > { %v6984_v50 = vpop.eup %6983  ;;  %6993 = vrcp.f32 %v2925_v30  ;;  %5200 = vadd.xlane.f32.xlu0 %v9937_v22  ;;  %v10960_v22 = vld [vmem:[#allocation108_spill] sm:$0xff] }
0x11d9   : > { %v3065_v57 = vmul.f32 %v6984_v50, %v10958_v49  ;;  %v3345_v43 = vpop.xlane.xlu0 %3344  ;;  %v10114_v9 = vadd.f32 %v3060_v20, %v10035_v32  ;;  %v10968_v30 = vld [vmem:[#allocation132_spill] sm:$0xff] }
0x11da   : > { %v6986_v2 = vpop.eup %6985  ;;  %6995 = vrcp.f32 %v3345_v43  ;;  %5194 = vadd.xlane.f32.xlu1 %v9893_v3  ;;  %v10961_v3 = vld [vmem:[#allocation106_spill] sm:$0xff] }
0x11db   : > { %v3062_v19 = vmul.f32 %v6986_v2, %v10959_v21  ;;  %v2929_v55 = vpop.xlane.xlu1 %2928  ;;  %v10119_v10 = vadd.f32 %v3065_v57, %v10040_v47  ;;  %v10969_v57 = vld [vmem:[#allocation130_spill] sm:$0xff]  ;;  %v10970_v21 = vld [vmem:[#allocation131_spill] sm:$0xff] }
0x11dc   : > { %v6988_v46 = vpop.eup %6987  ;;  %6997 = vrcp.f32 %v2929_v55  ;;  %5212 = vadd.xlane.f32.xlu0 %v9960_v40  ;;  %v10962_v40 = vld [vmem:[#allocation107_spill] sm:$0xff] }
0x11dd   : > { %v3067_v34 = vmul.f32 %v6988_v46, %v10960_v22  ;;  %v3349_v42 = vpop.xlane.xlu0 %3348  ;;  %v10124_v32 = vadd.f32 %v3062_v19, %v10045_v37  ;;  %v10971_v22 = vld [vmem:[#allocation129_spill] sm:$0xff] }
0x11de   : > { %v6990_v48 = vpop.eup %6989  ;;  %6999 = vrcp.f32 %v3349_v42  ;;  %5206 = vadd.xlane.f32.xlu1 %v9941_v18  ;;  %v10963_v18 = vld [vmem:[#allocation105_spill] sm:$0xff] }
0x11df   : > { %v3064_v4 = vmul.f32 %v6990_v48, %v10961_v3  ;;  %v2933_v51 = vpop.xlane.xlu1 %2932  ;;  %v10129_v47 = vadd.f32 %v3067_v34, %v10050_v0  ;;  %v10972_v48 = vld [vmem:[#allocation136_spill] sm:$0xff] }
0x11e0   : > { %v6992_v1 = vpop.eup %6991  ;;  %7001 = vrcp.f32 %v2933_v51  ;;  %5208 = vadd.xlane.f32.xlu0 %v9958_v26  ;;  %v10964_v26 = vld [vmem:[#allocation128_spill] sm:$0xff] }
0x11e1   : > { %v3069_v59 = vmul.f32 %v6992_v1, %v10962_v40  ;;  %v3353_v15 = vpop.xlane.xlu0 %3352  ;;  %v10134_v37 = vadd.f32 %v3064_v4, %v10054_v44  ;;  %v10973_v1 = vld [vmem:[#allocation134_spill] sm:$0xff] }
0x11e2   : > { %v6994_v17 = vpop.eup %6993  ;;  %7003 = vrcp.f32 %v3353_v15  ;;  %5202 = vadd.xlane.f32.xlu1 %v9943_v13  ;;  %v10965_v13 = vld [vmem:[#allocation110_spill] sm:$0xff] }
0x11e3   : > { %v3066_v12 = vmul.f32 %v6994_v17, %v10963_v18  ;;  %v3347_v31 = vpop.xlane.xlu1 %3346  ;;  %v10139_v0 = vadd.f32 %v3069_v59, %v10059_v61 }
0x11e4   : > { %v6996_v8 = vpop.eup %6995  ;;  %7005 = vrcp.f32 %v3347_v31  ;;  %5216 = vadd.xlane.f32.xlu0 %v9995_v29  ;;  %v10966_v29 = vld [vmem:[#allocation127_spill] sm:$0xff] }
0x11e5   : > { %v3529_v58 = vmul.f32 %v6996_v8, %v10964_v26  ;;  %v3357_v35 = vpop.xlane.xlu0 %3356  ;;  %v10144_v44 = vadd.f32 %v3066_v12, %v10064_v14 }
0x11e6   : > { %v6998_v11 = vpop.eup %6997  ;;  %7007 = vrcp.f32 %v3357_v35  ;;  %5214 = vadd.xlane.f32.xlu1 %v9968_v52  ;;  %v10967_v52 = vld [vmem:[#allocation109_spill] sm:$0xff] }
0x11e7   : > { %v3068_v6 = vmul.f32 %v6998_v11, %v10965_v13  ;;  %v3351_v62 = vpop.xlane.xlu1 %3350  ;;  %v10149_v61 = vadd.f32 %v3529_v58, %v10070_v41 }
0x11e8   : > { %v7000_v24 = vpop.eup %6999  ;;  %7009 = vrcp.f32 %v3351_v62  ;;  %5220 = vadd.xlane.f32.xlu0 %v9990_v54 }
0x11e9   : > { %v3531_v23 = vmul.f32 %v7000_v24, %v10966_v29  ;;  %v3361_v45 = vpop.xlane.xlu0 %3360  ;;  %v10154_v14 = vadd.f32 %v3068_v6, %v10074_v39 }
0x11ea   : > { %v7002_v53 = vpop.eup %7001  ;;  %7011 = vrcp.f32 %v3361_v45  ;;  %5210 = vadd.xlane.f32.xlu1 %v9963_v63 }
0x11eb   : > { %v3070_v60 = vmul.f32 %v7002_v53, %v10967_v52  ;;  %v3355_v33 = vpop.xlane.xlu1 %3354  ;;  %v10159_v41 = vadd.f32 %v3531_v23, %v10079_v28 }
0x11ec   : > { %v7004_v20 = vpop.eup %7003  ;;  %7013 = vrcp.f32 %v3355_v33 }
0x11ed   : > { %v3533_v54 = vmul.f32 %v7004_v20, %v10968_v30  ;;  %v3365_v50 = vpop.xlane.xlu0 %3364  ;;  %v10163_v49 = vadd.f32 %v3070_v60, %v10083_v25 }
0x11ee   : > { %v7006_v39 = vpop.eup %7005  ;;  %7015 = vrcp.f32 %v3365_v50  ;;  %5218 = vadd.xlane.f32.xlu1 %v9984_v16 }
0x11ef   : > { %v3530_v63 = vmul.f32 %v7006_v39, %v10969_v57  ;;  %v3359_v43 = vpop.xlane.xlu1 %3358  ;;  %v10168_v2 = vadd.f32 %v3533_v54, %v10089_v38  ;;  %v10980_v39 = vld [vmem:[#allocation160_spill] sm:$0xff] }
0x11f0   : > { %v7008_v28 = vpop.eup %7007  ;;  %7017 = vrcp.f32 %v3359_v43 }
0x11f1   : > { %v3535_v19 = vmul.f32 %v7008_v28, %v10970_v21  ;;  %v3369_v55 = vpop.xlane.xlu0 %3368  ;;  %v10172_v46 = vadd.f32 %v3530_v63, %v10094_v5 }
0x11f2   : > { %v7010_v25 = vpop.eup %7009  ;;  %7019 = vrcp.f32 %v3369_v55  ;;  %5222 = vadd.xlane.f32.xlu1 %v9981_v36 }
0x11f3   : > { %v3532_v16 = vmul.f32 %v7010_v25, %v10971_v22  ;;  %v3363_v34 = vpop.xlane.xlu1 %3362  ;;  %v10177_v42 = vadd.f32 %v3535_v19, %v10099_v7  ;;  %v10974_v7 = vld [vmem:[#allocation135_spill] sm:$0xff] }
0x11f4   : > { %v7012_v38 = vpop.eup %7011  ;;  %7021 = vrcp.f32 %v3363_v34  ;;  %v10982_v25 = vld [vmem:[#allocation159_spill] sm:$0xff] }
0x11f5   : > { %v3537_v3 = vmul.f32 %v7012_v38, %v10972_v48  ;;  %v3373_v4 = vpop.xlane.xlu0 %3372  ;;  %v10181_v51 = vadd.f32 %v3532_v16, %v10104_v56  ;;  %v10975_v56 = vld [vmem:[#allocation133_spill] sm:$0xff] }
0x11f6   : > { %v7014_v5 = vpop.eup %7013  ;;  %7023 = vrcp.f32 %v3373_v4 }
0x11f7   : > { %v3534_v40 = vmul.f32 %v7014_v5, %v10973_v1  ;;  %v3367_v59 = vpop.xlane.xlu1 %3366  ;;  %v10185_v36 = vadd.f32 %v3537_v3, %v10109_v27  ;;  %v10976_v27 = vld [vmem:[#allocation140_spill] sm:$0xff] }
0x11f8   : > { %v7016_v15 = vpop.eup %7015  ;;  %7025 = vrcp.f32 %v3367_v59  ;;  %v10984_v5 = vld [vmem:[#allocation164_spill] sm:$0xff] }
0x11f9   : > { %v3539_v17 = vmul.f32 %v7016_v15, %v10974_v7  ;;  %v3827_v18 = vpop.xlane.xlu0 %3826  ;;  %v10189_v12 = vadd.f32 %v3534_v40, %v10114_v9  ;;  %v10977_v9 = vld [vmem:[#allocation138_spill] sm:$0xff] }
0x11fa   : > { %v7018_v31 = vpop.eup %7017  ;;  %7027 = vrcp.f32 %v3827_v18  ;;  %v10985_v15 = vld [vmem:[#allocation162_spill] sm:$0xff] }
0x11fb   : > { %v3536_v8 = vmul.f32 %v7018_v31, %v10975_v56  ;;  %v3371_v26 = vpop.xlane.xlu1 %3370  ;;  %v10193_v58 = vadd.f32 %v3539_v17, %v10119_v10  ;;  %v10978_v10 = vld [vmem:[#allocation139_spill] sm:$0xff] }
0x11fc   : > { %v7020_v35 = vpop.eup %7019  ;;  %7029 = vrcp.f32 %v3371_v26  ;;  %v10986_v56 = vld [vmem:[#allocation163_spill] sm:$0xff] }
0x11fd   : > { %v3541_v11 = vmul.f32 %v7020_v35, %v10976_v27  ;;  %v3831_v13 = vpop.xlane.xlu0 %3830  ;;  %v10197_v6 = vadd.f32 %v3536_v8, %v10124_v32  ;;  %v10979_v32 = vld [vmem:[#allocation137_spill] sm:$0xff] }
0x11fe   : > { %v7022_v62 = vpop.eup %7021  ;;  %7031 = vrcp.f32 %v3831_v13  ;;  %v10987_v35 = vld [vmem:[#allocation161_spill] sm:$0xff] }
0x11ff   : > { %v3538_v24 = vmul.f32 %v7022_v62, %v10977_v9  ;;  %v3375_v29 = vpop.xlane.xlu1 %3374  ;;  %v10201_v23 = vadd.f32 %v3541_v11, %v10129_v47  ;;  %v10988_v9 = vld [vmem:[#allocation168_spill] sm:$0xff] }
0x1200   : > { %v7024_v45 = vpop.eup %7023  ;;  %7033 = vrcp.f32 %v3375_v29 }
0x1201   : > { %v3543_v53 = vmul.f32 %v7024_v45, %v10978_v10  ;;  %v3835_v52 = vpop.xlane.xlu0 %3834  ;;  %v10205_v60 = vadd.f32 %v3538_v24, %v10134_v37  ;;  %v10981_v37 = vld [vmem:[#allocation142_spill] sm:$0xff] }
0x1202   : > { %v7026_v33 = vpop.eup %7025  ;;  %7035 = vrcp.f32 %v3835_v52  ;;  %v10989_v45 = vld [vmem:[#allocation166_spill] sm:$0xff] }
0x1203   : > { %v3540_v20 = vmul.f32 %v7026_v33, %v10979_v32  ;;  %v3829_v30 = vpop.xlane.xlu1 %3828  ;;  %v10209_v54 = vadd.f32 %v3543_v53, %v10139_v0  ;;  %v10990_v32 = vld [vmem:[#allocation167_spill] sm:$0xff] }
0x1204   : > { %v7028_v50 = vpop.eup %7027  ;;  %7037 = vrcp.f32 %v3829_v30 }
0x1205   : > { %v3839_v47 = vpop.xlane.xlu0 %3838  ;;  %v3979_v57 = vmul.f32 %v7028_v50, %v10980_v39  ;;  %v10213_v63 = vadd.f32 %v3540_v20, %v10144_v44  ;;  %v10983_v44 = vld [vmem:[#allocation141_spill] sm:$0xff] }
0x1206   : > { %v7030_v43 = vpop.eup %7029  ;;  %7039 = vrcp.f32 %v3839_v47  ;;  %v10991_v50 = vld [vmem:[#allocation165_spill] sm:$0xff] }
0x1207   : > { %v3542_v28 = vmul.f32 %v7030_v43, %v10981_v37  ;;  %v3833_v21 = vpop.xlane.xlu1 %3832  ;;  %v10217_v19 = vadd.f32 %v3979_v57, %v10149_v61  ;;  %v10992_v37 = vld [vmem:[#allocation172_spill] sm:$0xff] }
0x1208   : > { %v7032_v55 = vpop.eup %7031  ;;  %7041 = vrcp.f32 %v3833_v21 }
0x1209   : > { %v3843_v0 = vpop.xlane.xlu0 %3842  ;;  %v3981_v22 = vmul.f32 %v7032_v55, %v10982_v25  ;;  %v10221_v16 = vadd.f32 %v3542_v28, %v10154_v14  ;;  %v10993_v55 = vld [vmem:[#allocation170_spill] sm:$0xff] }
0x120a   : > { %v7034_v34 = vpop.eup %7033  ;;  %7043 = vrcp.f32 %v3843_v0 }
0x120b   : > { %v3544_v38 = vmul.f32 %v7034_v34, %v10983_v44  ;;  %v3837_v48 = vpop.xlane.xlu1 %3836  ;;  %v10225_v3 = vadd.f32 %v3981_v22, %v10159_v41  ;;  %v10994_v44 = vld [vmem:[#allocation171_spill] sm:$0xff] }
0x120c   : > { %v7036_v4 = vpop.eup %7035  ;;  %7045 = vrcp.f32 %v3837_v48 }
0x120d   : > { %v3847_v61 = vpop.xlane.xlu0 %3846  ;;  %v3983_v1 = vmul.f32 %v7036_v4, %v10984_v5  ;;  %v10229_v40 = vadd.f32 %v3544_v38, %v10163_v49  ;;  %v10995_v4 = vld [vmem:[#allocation169_spill] sm:$0xff] }
0x120e   : > { %v7038_v59 = vpop.eup %7037  ;;  %7047 = vrcp.f32 %v3847_v61 }
0x120f   : > { %v3841_v14 = vpop.xlane.xlu1 %3840  ;;  %v3980_v7 = vmul.f32 %v7038_v59, %v10985_v15  ;;  %v10233_v17 = vadd.f32 %v3983_v1, %v10168_v2  ;;  %v10996_v59 = vld [vmem:[#allocation187_spill] sm:$0xff] }
0x1210   : > { %v7040_v18 = vpop.eup %7039  ;;  %7049 = vrcp.f32 %v3841_v14 }
0x1211   : > { %v3851_v41 = vpop.xlane.xlu0 %3850  ;;  %v10236_v31 = vadd.f32 %v3980_v7, %v10172_v46  ;;  %v3985_v8 = vmul.f32 %v7040_v18, %v10986_v56 }
0x1212   : > { %v7042_v26 = vpop.eup %7041  ;;  %7051 = vrcp.f32 %v3851_v41  ;;  %v10997_v41 = vld [vmem:[#allocation174_spill] sm:$0xff] }
0x1213   : > { %v3845_v49 = vpop.xlane.xlu1 %3844  ;;  %v3982_v27 = vmul.f32 %v7042_v26, %v10987_v35  ;;  %v10241_v11 = vadd.f32 %v3985_v8, %v10177_v42  ;;  %v10998_v26 = vld [vmem:[#allocation186_spill] sm:$0xff] }
0x1214   : > { %v7044_v13 = vpop.eup %7043  ;;  %7053 = vrcp.f32 %v3845_v49 }
0x1215   : > { %v3855_v2 = vpop.xlane.xlu0 %3854  ;;  %v10244_v62 = vadd.f32 %v3982_v27, %v10181_v51  ;;  %v3987_v24 = vmul.f32 %v7044_v13, %v10988_v9 }
0x1216   : > { %v7046_v46 = vpop.eup %7045  ;;  %7055 = vrcp.f32 %v3855_v2  ;;  %v10999_v2 = vld [vmem:[#allocation173_spill] sm:$0xff] }
0x1217   : > { %v3849_v29 = vpop.xlane.xlu1 %3848  ;;  %v3984_v10 = vmul.f32 %v7046_v46, %v10989_v45  ;;  %v10249_v53 = vadd.f32 %v3987_v24, %v10185_v36  ;;  %v11000_v46 = vld [vmem:[#allocation191_spill] sm:$0xff] }
0x1218   : > { %v7048_v52 = vpop.eup %7047  ;;  %7057 = vrcp.f32 %v3849_v29 }
0x1219   : > { %v4269_v42 = vpop.xlane.xlu0 %4268  ;;  %v10252_v33 = vadd.f32 %v3984_v10, %v10189_v12  ;;  %v3989_v20 = vmul.f32 %v7048_v52, %v10990_v32  ;;  %v11001_v52 = vld [vmem:[#allocation189_spill] sm:$0xff] }
0x121a   : > { %v7050_v51 = vpop.eup %7049  ;;  %7059 = vrcp.f32 %v4269_v42 }
0x121b   : > { %v3853_v30 = vpop.xlane.xlu1 %3852  ;;  %v3986_v47 = vmul.f32 %v7050_v51, %v10991_v50  ;;  %v10257_v39 = vadd.f32 %v3989_v20, %v10193_v58 }
0x121c   : > { %v7052_v57 = vpop.eup %7051  ;;  %7061 = vrcp.f32 %v3853_v30  ;;  %v11002_v30 = vld [vmem:[#allocation190_spill] sm:$0xff] }
0x121d   : > { %v4273_v36 = vpop.xlane.xlu0 %4272  ;;  %v10260_v43 = vadd.f32 %v3986_v47, %v10197_v6  ;;  %v3991_v28 = vmul.f32 %v7052_v57, %v10992_v37  ;;  %v11003_v57 = vld [vmem:[#allocation188_spill] sm:$0xff] }
0x121e   : > { %v7054_v12 = vpop.eup %7053  ;;  %7063 = vrcp.f32 %v4273_v36 }
0x121f   : > { %v3857_v21 = vpop.xlane.xlu1 %3856  ;;  %v3988_v0 = vmul.f32 %v7054_v12, %v10993_v55  ;;  %v10265_v25 = vadd.f32 %v3991_v28, %v10201_v23 }
0x1220   : > { %v7056_v22 = vpop.eup %7055  ;;  %7065 = vrcp.f32 %v3857_v21  ;;  %v11004_v21 = vld [vmem:[#allocation195_spill] sm:$0xff] }
0x1221   : > { %v4277_v58 = vpop.xlane.xlu0 %4276  ;;  %v10268_v34 = vadd.f32 %v3988_v0, %v10205_v60  ;;  %v3993_v38 = vmul.f32 %v7056_v22, %v10994_v44  ;;  %v11005_v22 = vld [vmem:[#allocation193_spill] sm:$0xff] }
0x1222   : > { %v7058_v6 = vpop.eup %7057  ;;  %7067 = vrcp.f32 %v4277_v58 }
0x1223   : > { %v4271_v48 = vpop.xlane.xlu1 %4270  ;;  %v3990_v61 = vmul.f32 %v7058_v6, %v10995_v4  ;;  %v10273_v5 = vadd.f32 %v3993_v38, %v10209_v54 }
0x1224   : > { %v7060_v1 = vpop.eup %7059  ;;  %7069 = vrcp.f32 %v4271_v48  ;;  %v11006_v48 = vld [vmem:[#allocation194_spill] sm:$0xff] }
0x1225   : > { %v4281_v23 = vpop.xlane.xlu0 %4280  ;;  %v4453_v14 = vmul.f32 %v7060_v1, %v10996_v59  ;;  %v10277_v15 = vadd.f32 %v3990_v61, %v10213_v63  ;;  %v11007_v1 = vld [vmem:[#allocation192_spill] sm:$0xff] }
0x1226   : > { %v7062_v60 = vpop.eup %7061  ;;  %7071 = vrcp.f32 %v4281_v23 }
0x1227   : > { %v4275_v7 = vpop.xlane.xlu1 %4274  ;;  %v10280_v18 = vadd.f32 %v4453_v14, %v10217_v19  ;;  %v3992_v56 = vmul.f32 %v7062_v60, %v10997_v41 }
0x1228   : > { %v7064_v8 = vpop.eup %7063  ;;  %7073 = vrcp.f32 %v4275_v7  ;;  %v11008_v7 = vld [vmem:[#allocation199_spill] sm:$0xff] }
0x1229   : > { %v4285_v54 = vpop.xlane.xlu0 %4284  ;;  %v4455_v49 = vmul.f32 %v7064_v8, %v10998_v26  ;;  %v10285_v35 = vadd.f32 %v3992_v56, %v10221_v16  ;;  %v11009_v8 = vld [vmem:[#allocation197_spill] sm:$0xff] }
0x122a   : > { %v7066_v27 = vpop.eup %7065  ;;  %7075 = vrcp.f32 %v4285_v54 }
0x122b   : > { %v4279_v63 = vpop.xlane.xlu1 %4278  ;;  %v10288_v13 = vadd.f32 %v4455_v49, %v10225_v3  ;;  %v3994_v9 = vmul.f32 %v7066_v27, %v10999_v2 }
0x122c   : > { %v7068_v19 = vpop.eup %7067  ;;  %7077 = vrcp.f32 %v4279_v63  ;;  %v11010_v63 = vld [vmem:[#allocation198_spill] sm:$0xff] }
0x122d   : > { %v4289_v24 = vpop.xlane.xlu0 %4288  ;;  %v4457_v29 = vmul.f32 %v7068_v19, %v11000_v46  ;;  %v10293_v45 = vadd.f32 %v3994_v9, %v10229_v40  ;;  %v11011_v19 = vld [vmem:[#allocation196_spill] sm:$0xff] }
0x122e   : > { %v7070_v10 = vpop.eup %7069  ;;  %7079 = vrcp.f32 %v4289_v24 }
0x122f   : > { %v4283_v16 = vpop.xlane.xlu1 %4282  ;;  %v4454_v42 = vmul.f32 %v7070_v10, %v11001_v52  ;;  %v10297_v32 = vadd.f32 %v4457_v29, %v10233_v17  ;;  %v11012_v10 = vld [vmem:[#allocation26_spill] sm:$0xff] }
0x1230   : > { %v7072_v3 = vpop.eup %7071  ;;  %7081 = vrcp.f32 %v4283_v16 }
0x1231   : > { %v4293_v20 = vpop.xlane.xlu0 %4292  ;;  %v10300_v51 = vadd.f32 %v4454_v42, %v10236_v31  ;;  %v4459_v50 = vmul.f32 %v7072_v3, %v11002_v30 }
0x1232   : > { %v7074_v47 = vpop.eup %7073  ;;  %7083 = vrcp.f32 %v4293_v20  ;;  %v11013_v20 = vld [vmem:[#allocation201_spill] sm:$0xff] }
0x1233   : > { %v4287_v40 = vpop.xlane.xlu1 %4286  ;;  %v4456_v36 = vmul.f32 %v7074_v47, %v11003_v57  ;;  %v10305_v37 = vadd.f32 %v4459_v50, %v10241_v11  ;;  %v11014_v47 = vld [vmem:[#allocation23_spill] sm:$0xff] }
0x1234   : > { %v7076_v28 = vpop.eup %7075  ;;  %7085 = vrcp.f32 %v4287_v40 }
0x1235   : > { %v4297_v17 = vpop.xlane.xlu0 %4296  ;;  %v10308_v12 = vadd.f32 %v4456_v36, %v10244_v62  ;;  %v4461_v55 = vmul.f32 %v7076_v28, %v11004_v21 }
0x1236   : > { %v7078_v31 = vpop.eup %7077  ;;  %7087 = vrcp.f32 %v4297_v17  ;;  %v11015_v17 = vld [vmem:[#allocation200_spill] sm:$0xff] }
0x1237   : > { %v4291_v0 = vpop.xlane.xlu1 %4290  ;;  %v4458_v58 = vmul.f32 %v7078_v31, %v11005_v22  ;;  %v10313_v44 = vadd.f32 %v4461_v55, %v10249_v53  ;;  %v11016_v31 = vld [vmem:[#allocation25_spill] sm:$0xff] }
0x1238   : > { %v7080_v38 = vpop.eup %7079  ;;  %7089 = vrcp.f32 %v4291_v0 }
0x1239   : > { %v4751_v11 = vpop.xlane.xlu0 %4750  ;;  %v10316_v6 = vadd.f32 %v4458_v58, %v10252_v33  ;;  %v4463_v4 = vmul.f32 %v7080_v38, %v11006_v48  ;;  %v11017_v38 = vld [vmem:[#allocation29_spill] sm:$0xff] }
0x123a   : > { %v7082_v62 = vpop.eup %7081  ;;  %7091 = vrcp.f32 %v4751_v11 }
0x123b   : > { %v4295_v61 = vpop.xlane.xlu1 %4294  ;;  %v4460_v23 = vmul.f32 %v7082_v62, %v11007_v1  ;;  %v10321_v59 = vadd.f32 %v4463_v4, %v10257_v39 }
0x123c   : > { %v7084_v14 = vpop.eup %7083  ;;  %7093 = vrcp.f32 %v4295_v61  ;;  %v11018_v61 = vld [vmem:[#allocation22_spill] sm:$0xff] }
0x123d   : > { %v4755_v53 = vpop.xlane.xlu0 %4754  ;;  %v10324_v60 = vadd.f32 %v4460_v23, %v10260_v43  ;;  %v4465_v41 = vmul.f32 %v7084_v14, %v11008_v7  ;;  %v11019_v14 = vld [vmem:[#allocation20_spill] sm:$0xff] }
0x123e   : > { %v7086_v33 = vpop.eup %7085  ;;  %7095 = vrcp.f32 %v4755_v53 }
0x123f   : > { %v4299_v56 = vpop.xlane.xlu1 %4298  ;;  %v4462_v54 = vmul.f32 %v7086_v33, %v11009_v8  ;;  %v10329_v26 = vadd.f32 %v4465_v41, %v10265_v25 }
0x1240   : > { %v7088_v49 = vpop.eup %7087  ;;  %7097 = vrcp.f32 %v4299_v56  ;;  %v11020_v56 = vld [vmem:[#allocation204_spill] sm:$0xff] }
0x1241   : > { %v4759_v39 = vpop.xlane.xlu0 %4758  ;;  %v10332_v27 = vadd.f32 %v4462_v54, %v10268_v34  ;;  %v4467_v2 = vmul.f32 %v7088_v49, %v11010_v63  ;;  %v11021_v49 = vld [vmem:[#allocation202_spill] sm:$0xff] }
0x1242   : > { %v7090_v43 = vpop.eup %7089  ;;  %7099 = vrcp.f32 %v4759_v39 }
0x1243   : > { %v4753_v9 = vpop.xlane.xlu1 %4752  ;;  %v4464_v24 = vmul.f32 %v7090_v43, %v11011_v19  ;;  %v10337_v46 = vadd.f32 %v4467_v2, %v10273_v5 }
0x1244   : > { %v7092_v29 = vpop.eup %7091  ;;  %7101 = vrcp.f32 %v4753_v9  ;;  %v11022_v9 = vld [vmem:[#allocation203_spill] sm:$0xff] }
0x1245   : > { %v4763_v25 = vpop.xlane.xlu0 %4762  ;;  %v4903_v16 = vmul.f32 %v7092_v29, %v11012_v10  ;;  %v10341_v52 = vadd.f32 %v4464_v24, %v10277_v15  ;;  %v11023_v29 = vld [vmem:[#allocation27_spill] sm:$0xff] }
0x1246   : > { %v7094_v34 = vpop.eup %7093  ;;  %7103 = vrcp.f32 %v4763_v25 }
0x1247   : > { %v4757_v42 = vpop.xlane.xlu1 %4756  ;;  %v10344_v3 = vadd.f32 %v4903_v16, %v10280_v18  ;;  %v4466_v30 = vmul.f32 %v7094_v34, %v11013_v20 }
0x1248   : > { %v7096_v50 = vpop.eup %7095  ;;  %7105 = vrcp.f32 %v4757_v42  ;;  %v11024_v42 = vld [vmem:[#allocation208_spill] sm:$0xff] }
0x1249   : > { %v4767_v5 = vpop.xlane.xlu0 %4766  ;;  %v4905_v40 = vmul.f32 %v7096_v50, %v11014_v47  ;;  %v10349_v57 = vadd.f32 %v4466_v30, %v10285_v35  ;;  %v11025_v50 = vld [vmem:[#allocation206_spill] sm:$0xff] }
0x124a   : > { %v7098_v36 = vpop.eup %7097  ;;  %7107 = vrcp.f32 %v4767_v5 }
0x124b   : > { %v4761_v15 = vpop.xlane.xlu1 %4760  ;;  %v10352_v28 = vadd.f32 %v4905_v40, %v10288_v13  ;;  %v4468_v21 = vmul.f32 %v7098_v36, %v11015_v17 }
0x124c   : > { %v7100_v18 = vpop.eup %7099  ;;  %7109 = vrcp.f32 %v4761_v15  ;;  %v11026_v15 = vld [vmem:[#allocation207_spill] sm:$0xff] }
0x124d   : > { %v4771_v55 = vpop.xlane.xlu0 %4770  ;;  %v4907_v0 = vmul.f32 %v7100_v18, %v11016_v31  ;;  %v10357_v22 = vadd.f32 %v4468_v21, %v10293_v45  ;;  %v11027_v18 = vld [vmem:[#allocation205_spill] sm:$0xff] }
0x124e   : > { %v7102_v58 = vpop.eup %7101  ;;  %7111 = vrcp.f32 %v4771_v55 }
0x124f   : > { %v4765_v35 = vpop.xlane.xlu1 %4764  ;;  %v4904_v11 = vmul.f32 %v7102_v58, %v11017_v38  ;;  %v10361_v48 = vadd.f32 %v4907_v0, %v10297_v32 }
0x1250   : > { %v7104_v13 = vpop.eup %7103  ;;  %7113 = vrcp.f32 %v4765_v35 }
0x1251   : > { %v4775_v4 = vpop.xlane.xlu0 %4774  ;;  %v10364_v62 = vadd.f32 %v4904_v11, %v10300_v51  ;;  %v4909_v1 = vmul.f32 %v7104_v13, %v11018_v61 }
0x1252   : > { %v7106_v23 = vpop.eup %7105  ;;  %7115 = vrcp.f32 %v4775_v4 }
0x1253   : > { %v4769_v45 = vpop.xlane.xlu1 %4768  ;;  %v4906_v53 = vmul.f32 %v7106_v23, %v11019_v14  ;;  %v10369_v7 = vadd.f32 %v4909_v1, %v10305_v37  ;;  %v11028_v23 = vld [vmem:[#allocation210_spill] sm:$0xff]  ;;  %v11029_v14 = vld [vmem:[#allocation3_spill] sm:$0xff] }
0x1254   : > { %v7108_v41 = vpop.eup %7107  ;;  %7117 = vrcp.f32 %v4769_v45 }
0x1255   : > { %v4779_v32 = vpop.xlane.xlu0 %4778  ;;  %v10372_v33 = vadd.f32 %v4906_v53, %v10308_v12  ;;  %v4911_v8 = vmul.f32 %v7108_v41, %v11020_v56 }
0x1256   : > { %v7110_v51 = vpop.eup %7109  ;;  %7119 = vrcp.f32 %v4779_v32 }
0x1257   : > { %v4773_v54 = vpop.xlane.xlu1 %4772  ;;  %v4908_v39 = vmul.f32 %v7110_v51, %v11021_v49  ;;  %v10377_v63 = vadd.f32 %v4911_v8, %v10313_v44  ;;  %v11031_v51 = vld [vmem:[#allocation209_spill] sm:$0xff] }
0x1258   : > { %v7112_v2 = vpop.eup %7111  ;;  %7121 = vrcp.f32 %v4773_v54 }
0x1259   : > { %v5197_v37 = vpop.xlane.xlu0 %5196  ;;  %v10380_v43 = vadd.f32 %v4908_v39, %v10316_v6  ;;  %v4913_v19 = vmul.f32 %v7112_v2, %v11022_v9 }
0x125a   : > { %v7114_v12 = vpop.eup %7113  ;;  %7123 = vrcp.f32 %v5197_v37 }
0x125b   : > { %v4777_v24 = vpop.xlane.xlu1 %4776  ;;  %v4910_v25 = vmul.f32 %v7114_v12, %v11023_v29  ;;  %v10385_v10 = vadd.f32 %v4913_v19, %v10321_v59 }
0x125c   : > { %v7116_v16 = vpop.eup %7115  ;;  %7125 = vrcp.f32 %v4777_v24 }
0x125d   : > { %v5193_v44 = vpop.xlane.xlu0 %5192  ;;  %v10388_v34 = vadd.f32 %v4910_v25, %v10324_v60  ;;  %v4915_v20 = vmul.f32 %v7116_v16, %v11024_v42 }
0x125e   : > { %v7118_v6 = vpop.eup %7117  ;;  %7127 = vrcp.f32 %v5193_v44 }
0x125f   : > { %v4781_v30 = vpop.xlane.xlu1 %4780  ;;  %v4912_v5 = vmul.f32 %v7118_v6, %v11025_v50  ;;  %v10393_v47 = vadd.f32 %v4915_v20, %v10329_v26 }
0x1260   : > { %v7120_v40 = vpop.eup %7119  ;;  %7129 = vrcp.f32 %v4781_v30 }
0x1261   : > { %v5205_v59 = vpop.xlane.xlu0 %5204  ;;  %v10396_v36 = vadd.f32 %v4912_v5, %v10332_v27  ;;  %v4917_v60 = vmul.f32 %v7120_v40, %v11026_v15 }
0x1262   : > { %v7122_v17 = vpop.eup %7121 }
0x1263   : > { %v5199_v21 = vpop.xlane.xlu1 %5198  ;;  %v4914_v55 = vmul.f32 %v7122_v17, %v11027_v18  ;;  %v10401_v31 = vadd.f32 %v4917_v60, %v10337_v46 }
0x1264   : > { %v7124_v0 = vpop.eup %7123  ;;  %7131 = vrcp.f32 %v5199_v21  ;;  %v6508_v58 = vpop.f32.mrb[112].mxu0 }
0x1265   : > { %v5379_v26 = vmul.f32 %v7124_v0, %v6508_v58  ;;  %v5314_v35 = vpop.f32.mrb[113].mxu0  ;;  %v5201_v38 = vpop.xlane.xlu0 %5200  ;;  %v10405_v11 = vadd.f32 %v4914_v55, %v10341_v52 }
0x1266   : > { %v7126_v27 = vpop.eup %7125  ;;  %v6509_v13 = vpop.f32.mrb[114].mxu0 }
0x1267   : > { %v5395_v4 = vadd.f32 %v5379_v26, %v10352_v28  ;;  %v5195_v61 = vpop.xlane.xlu1 %5194  ;;  %v5317_v1 = vpop.f32.mrb[115].mxu0  ;;  %v4916_v45 = vmul.f32 %v7126_v27, %v11028_v23 }
0x1268   : > { %v7128_v46 = vpop.eup %7127  ;;  %7133 = vrcp.f32 %v5195_v61 }
0x1269   : > { %v5417_v53 = vadd.f32 %v11029_v14, %v5395_v4  ;;  %v5377_v52 = vmul.f32 %v7128_v46, %v5314_v35  ;;  %v5213_v41 = vpop.xlane.xlu0 %5212  ;;  %v10416_v32 = vadd.f32 %v4916_v45, %v10349_v57  ;;  %7135 = vrcp.f32 %v5205_v59 }
0x126a   : > { %v7130_v28 = vpop.eup %7129  ;;  %7137 = vrcp.f32 %v5201_v38 }
0x126b   : > { %5435 = vst.msk [vmem:[%s10412_s7 + $0x10] sm:$0xff] %vm11030_vm1, %v5417_v53  ;;  %v5393_v56 = vadd.f32 %v5377_v52, %v10344_v3  ;;  %v5207_v8 = vpop.xlane.xlu1 %5206  ;;  %v4918_v54 = vmul.f32 %v7130_v28, %v11031_v51 }
0x126c   : > { %7139 = vrcp.f32 %v5207_v8 }
0x126d   : > { %v5415_v49 = vadd.f32 %v11029_v14, %v5393_v56  ;;  %v5209_v39 = vpop.xlane.xlu0 %5208  ;;  %v10424_v2 = vadd.f32 %v4918_v54, %v10357_v22 }
0x126e   : > { %v7132_v37 = vpop.eup %7131 }
0x126f   : > { %5433 = vst.msk [vmem:[%s10412_s7] sm:$0xff] %vm11032_vm2, %v5415_v49  ;;  %v5380_v57 = vmul.f32 %v7132_v37, %v6509_v13  ;;  %v5203_v9 = vpop.xlane.xlu1 %5202 }
0x1270   : > { %7141 = vrcp.f32 %v5203_v9 }
0x1271   : > { %v5396_v3 = vadd.f32 %v5380_v57, %v10372_v33  ;;  %7143 = vrcp.f32 %v5213_v41  ;;  %v5217_v12 = vpop.xlane.xlu0 %5216 }
0x1272   : > { %v7134_v19 = vpop.eup %7133  ;;  %7145 = vrcp.f32 %v5209_v39 }
0x1273   : > { %v5418_v24 = vadd.f32 %v11029_v14, %v5396_v3  ;;  %v5378_v29 = vmul.f32 %v7134_v19, %v5317_v1  ;;  %v5215_v25 = vpop.xlane.xlu1 %5214  ;;  %v7136_v16 = vpop.eup %7135 }
0x1274   : > { %7147 = vrcp.f32 %v5215_v25  ;;  %v7138_v22 = vpop.eup %7137 }
0x1275   : > { %5436 = vst.msk [vmem:[%s10412_s7 + $0x18] sm:$0xff] %vm11033_vm3, %v5418_v24  ;;  %v5394_v44 = vadd.f32 %v5378_v29, %v10364_v62  ;;  %v6512_v42 = vpop.f32.mrb[116].mxu0  ;;  %v5221_v15 = vpop.xlane.xlu0 %5220 }
0x1276   : > { %v7140_v20 = vpop.eup %7139  ;;  %v5383_v6 = vmul.f32 %v7136_v16, %v6512_v42  ;;  %v5330_v33 = vpop.f32.mrb[117].mxu0 }
0x1277   : > { %v5416_v30 = vadd.f32 %v11029_v14, %v5394_v44  ;;  %v5381_v50 = vmul.f32 %v7138_v22, %v5330_v33  ;;  %v6513_v5 = vpop.f32.mrb[118].mxu0  ;;  %v5211_v40 = vpop.xlane.xlu1 %5210 }
0x1278   : > { %v5399_v59 = vadd.f32 %v5383_v6, %v10369_v7  ;;  %v5384_v60 = vmul.f32 %v7140_v20, %v6513_v5  ;;  %7149 = vrcp.f32 %v5211_v40  ;;  %v5333_v17 = vpop.f32.mrb[119].mxu0 }
0x1279   : > { %5434 = vst.msk [vmem:[%s10412_s7 + $0x8] sm:$0xff] %vm11034_vm4, %v5416_v30  ;;  %v5397_v62 = vadd.f32 %v5381_v50, %v10361_v48  ;;  %7151 = vrcp.f32 %v5221_v15 }
0x127a   : > { %v7142_v21 = vpop.eup %7141  ;;  %v5421_v18 = vadd.f32 %v11029_v14, %v5399_v59  ;;  %v5400_v55 = vadd.f32 %v5384_v60, %v10388_v34  ;;  %7153 = vrcp.f32 %v5217_v12 }
0x127b   : > { %v5419_v0 = vadd.f32 %v11029_v14, %v5397_v62  ;;  %v5382_v7 = vmul.f32 %v7142_v21, %v5333_v17  ;;  %v5219_v58 = vpop.xlane.xlu1 %5218  ;;  %v7144_v26 = vpop.eup %7143 }
0x127c   : > { %5439 = vst.msk [vmem:[%s10412_s7 + $0x30] sm:$0xff] %vm11035_vm5, %v5421_v18  ;;  %v5422_v35 = vadd.f32 %v11029_v14, %v5400_v55  ;;  %v7146_v38 = vpop.eup %7145  ;;  %7155 = vrcp.f32 %v5219_v58 }
0x127d   : > { %5437 = vst.msk [vmem:[%s10412_s7 + $0x20] sm:$0xff] %vm11036_vm6, %v5419_v0  ;;  %v5398_v48 = vadd.f32 %v5382_v7, %v10380_v43  ;;  %v6516_v27 = vpop.f32.mrb[120].mxu0 }
0x127e   : > { %v7148_v13 = vpop.eup %7147  ;;  %5440 = vst.msk [vmem:[%s10412_s7 + $0x38] sm:$0xff] %vm11037_vm7, %v5422_v35  ;;  %v5387_v34 = vmul.f32 %v7144_v26, %v6516_v27  ;;  %v5346_v4 = vpop.f32.mrb[121].mxu0 }
0x127f   : > { %v5420_v61 = vadd.f32 %v11029_v14, %v5398_v48  ;;  %v5385_v1 = vmul.f32 %v7146_v38, %v5346_v4  ;;  %v6517_v23 = vpop.f32.mrb[122].mxu0  ;;  %v5223_v45 = vpop.xlane.xlu1 %5222 }
0x1280   : > { %v5403_v46 = vadd.f32 %v5387_v34, %v10385_v10  ;;  %v5388_v53 = vmul.f32 %v7148_v13, %v6517_v23  ;;  %7157 = vrcp.f32 %v5223_v45  ;;  %v5349_v43 = vpop.f32.mrb[123].mxu0 }
0x1281   : > { %5438 = vst.msk [vmem:[%s10412_s7 + $0x28] sm:$0xff] %vm11038_vm8, %v5420_v61  ;;  %v5401_v52 = vadd.f32 %v5385_v1, %v10377_v63 }
0x1282   : > { %v7150_v41 = vpop.eup %7149  ;;  %v5425_v28 = vadd.f32 %v11029_v14, %v5403_v46  ;;  %v5404_v56 = vadd.f32 %v5388_v53, %v10405_v11 }
0x1283   : > { %v5423_v8 = vadd.f32 %v11029_v14, %v5401_v52  ;;  %v5386_v51 = vmul.f32 %v7150_v41, %v5349_v43  ;;  %v7152_v54 = vpop.eup %7151 }
0x1284   : > { %5443 = vst.msk [vmem:[%s10412_s7 + $0x50] sm:$0xff] %vm11039_vm9, %v5425_v28  ;;  %v5426_v10 = vadd.f32 %v11029_v14, %v5404_v56  ;;  %v7154_v63 = vpop.eup %7153 }
0x1285   : > { %5441 = vst.msk [vmem:[%s10412_s7 + $0x40] sm:$0xff] %vm11040_vm10, %v5423_v8  ;;  %v5402_v49 = vadd.f32 %v5386_v51, %v10396_v36  ;;  %v6520_v39 = vpop.f32.mrb[124].mxu0 }
0x1286   : > { %5444 = vst.msk [vmem:[%s10412_s7 + $0x58] sm:$0xff] %vm11041_vm11, %v5426_v10  ;;  %v5391_v37 = vmul.f32 %v7152_v54, %v6520_v39  ;;  %v5362_v11 = vpop.f32.mrb[125].mxu0  ;;  %v7156_v19 = vpop.eup %7155 }
0x1287   : > { %v5424_v57 = vadd.f32 %v11029_v14, %v5402_v49  ;;  %v5389_v9 = vmul.f32 %v7154_v63, %v5362_v11  ;;  %v6521_v3 = vpop.f32.mrb[126].mxu0 }
0x1288   : > { %v5407_v12 = vadd.f32 %v5391_v37, %v10401_v31  ;;  %v5365_v24 = vpop.f32.mrb[127].mxu0 }
0x1289   : > { %5442 = vst.msk [vmem:[%s10412_s7 + $0x48] sm:$0xff] %vm11042_vm12, %v5424_v57  ;;  %v5405_v36 = vadd.f32 %v5389_v9, %v10393_v47  ;;  %v5390_v29 = vmul.f32 %v7156_v19, %v5365_v24 }
0x128a   : > { %v7158_v25 = vpop.eup %7157  ;;  %v5429_v16 = vadd.f32 %v11029_v14, %v5407_v12 }
0x128b   : > { %v5427_v22 = vadd.f32 %v11029_v14, %v5405_v36  ;;  %v5392_v44 = vmul.f32 %v7158_v25, %v6521_v3  ;;  %v5406_v42 = vadd.f32 %v5390_v29, %v10416_v32  ;;  %1707 = sbr.rel (!%p1705_p0) target bundleno = 548 (0x224), region = 41 }
0x128c   : > { %5447 = vst.msk [vmem:[%s10412_s7 + $0x70] sm:$0xff] %vm11043_vm13, %v5429_v16 }
0x128d   : > { %5445 = vst.msk [vmem:[%s10412_s7 + $0x60] sm:$0xff] %vm11044_vm14, %v5427_v22  ;;  %v5408_v31 = vadd.f32 %v5392_v44, %v10424_v2  ;;  %v5428_v20 = vadd.f32 %v11029_v14, %v5406_v42 }
0x128f   : > { %v5430_v6 = vadd.f32 %v11029_v14, %v5408_v31  ;;  %5446 = vst.msk [vmem:[%s10412_s7 + $0x68] sm:$0xff] %vm11045_vm15, %v5428_v20 }
0x1291   : > { %5448 = vst.msk [vmem:[%s10412_s7 + $0x78] sm:$0xff] %vm11046_vm0, %v5430_v6 }

</bundles_post_ra>
